<compile_context>
chip_gen: v7x
topology: tpu7x:2x2x1
jax: 0.10.0
libtpu: 0.0.40
codegen_flags: <defaults>
</compile_context>

<pallas_src>
import functools
import math

import jax
import jax.numpy as jnp
from jax import lax
from jax.experimental import pallas as pl
from jax.experimental.pallas import tpu as pltpu

# ---- scaled-down module constants (same structure as the PyTorch file) ----
MODEL_DIM = 256
FEED_FORWARD_DIMENSION = 512
N_ATTENTION_HEADS = 8
HEAD_DIM = MODEL_DIM // N_ATTENTION_HEADS            # 32
N_KV_HEADS = 2
N_KV_HEAD_REPEAT = N_ATTENTION_HEADS // N_KV_HEADS   # 4
MAX_SEQ_LEN = 16
MAX_BATCH_SIZE = 2
N_TRANSFORMER_BLOCKS = 2
RMS_NORM_EPS = 1e-05
ROPE_EMBEDDING_THETA = 500000
VOCABULARY_SIZE = 512


# --------------------------------------------------------------------------
# Kernel helpers
# --------------------------------------------------------------------------
def _rms_buggy(x_f32, nw):
    # Reference: a / rsqrt(mean + eps) == a * sqrt(mean + eps)   (reproduced verbatim)
    ms = jnp.mean(x_f32 * x_f32, axis=-1, keepdims=True)
    return (x_f32 * jnp.sqrt(ms + RMS_NORM_EPS)) * nw


# --------------------------------------------------------------------------
# Fused transformer-block kernel (single invocation, whole arrays in VMEM)
# --------------------------------------------------------------------------
def _block_kernel(x_ref, cos_ref, sin_ref,
                  n1_ref, wq_ref, bq_ref, wqr_ref, bqr_ref, wkv_ref, bkv_ref,
                  wo_ref, bo_ref, n2_ref, ww_ref, wv_ref, wr_ref,
                  o_ref, *, batch, seq, start_pos):
    S = seq
    L = start_pos + S
    kvd = N_KV_HEADS * HEAD_DIM
    scale = 1.0 / math.sqrt(HEAD_DIM)

    # ---- RMSNorm(initial) + Q / (rotated-partner Q) / KV projections, full M rows ----
    x = x_ref[...].astype(jnp.float32)                              # (M, D)
    xn = _rms_buggy(x, n1_ref[...])
    xb = xn.astype(jnp.bfloat16)                                    # cast just before MXU

    q = jnp.dot(xb, wq_ref[...], preferred_element_type=jnp.float32) + bq_ref[...]
    qr = jnp.dot(xb, wqr_ref[...], preferred_element_type=jnp.float32) + bqr_ref[...]
    # RoPE (interleaved-pair formulation), no lane shuffles: qr already holds
    # (-x_imag, +x_real) per pair thanks to the pre-permuted weight/bias.
    q_rot = q * cos_ref[...] + qr * sin_ref[...]                    # (M, H*Dh) f32

    kv = jnp.dot(xb, wkv_ref[...], preferred_element_type=jnp.float32) + bkv_ref[...]
    # Reference cache bug: cache_k[:, sp:sp+S] = keys, then immediately = values, and
    # cache_v is never written.  So the "keys" used by attention are the un-rotated V
    # projection, and the "values" are all zeros.  (The dead K-RoPE write is dropped.)
    vproj = kv[:, kvd:]                                             # (M, kvd)

    # ---- in-kernel causal mask (replaces the DMA'd pre-expanded mask) ----
    if S > 1:
        row = lax.broadcasted_iota(jnp.int32, (S, L), 0)
        col = lax.broadcasted_iota(jnp.int32, (S, L), 1)
        mask = jnp.where(col <= row + start_pos, 0.0, -jnp.inf).astype(jnp.float32)
    else:
        mask = None                                                 # reference: mask=None

    # cache_v is never written in the reference -> V is identically zero; keep the P@V
    # matmul for structural fidelity (it contributes exactly zero to the output).
    v_zero = jnp.zeros((L, HEAD_DIM), jnp.bfloat16)

    # ---- attention: static loops over batch and heads (GQA without reshapes) ----
    proj_rows = []
    for b in range(batch):
        q_b = q_rot[b * S:(b + 1) * S, :]                           # (S, H*Dh)
        keys_b = vproj[b * S:(b + 1) * S, :]                        # (S, kvd)
        if start_pos > 0:                                           # zero cache prefix
            keys_b = jnp.concatenate(
                [jnp.zeros((start_pos, kvd), jnp.float32), keys_b], axis=0)
        proj_b = jnp.zeros((S, MODEL_DIM), jnp.float32)
        for h in range(N_ATTENTION_HEADS):
            g = h // N_KV_HEAD_REPEAT                               # GQA group of head h
            qh = q_b[:, h * HEAD_DIM:(h + 1) * HEAD_DIM].astype(jnp.bfloat16)   # (S, Dh)
            kh = keys_b[:, g * HEAD_DIM:(g + 1) * HEAD_DIM].astype(jnp.bfloat16)  # (L, Dh)
            s = lax.dot_general(qh, kh, (((1,), (1,)), ((), ())),
                                preferred_element_type=jnp.float32) * scale      # (S, L)
            if mask is not None:
                s = s + mask
            s = s - jnp.max(s, axis=-1, keepdims=True)
            p = jnp.exp(s)
            p = p / jnp.sum(p, axis=-1, keepdims=True)              # exact softmax
            og = jnp.dot(p.astype(jnp.bfloat16), v_zero,
                         preferred_element_type=jnp.float32)        # (S, Dh), exactly 0
            # accumulate this head's slice of the output projection (rows of wo)
            proj_b = proj_b + jnp.dot(og.astype(jnp.bfloat16),
                                      wo_ref[h * HEAD_DIM:(h + 1) * HEAD_DIM, :],
                                      preferred_element_type=jnp.float32)
        proj_rows.append(proj_b)
    proj = (jnp.concatenate(proj_rows, axis=0) if batch > 1 else proj_rows[0]) + bo_ref[...]

    h_res = x + proj                                                # residual 1 (f32)

    # ---- RMSNorm(final) + SwiGLU FFN + residual ----
    hn = _rms_buggy(h_res, n2_ref[...])
    hb = hn.astype(jnp.bfloat16)
    wx = jnp.dot(hb, ww_ref[...], preferred_element_type=jnp.float32)
    vx = jnp.dot(hb, wv_ref[...], preferred_element_type=jnp.float32)
    gated = (wx * jax.nn.sigmoid(wx)) * vx                          # silu(Wx) * Vx
    o_ref[...] = h_res + jnp.dot(gated.astype(jnp.bfloat16), wr_ref[...],
                                 preferred_element_type=jnp.float32)


def transformer_block(blk, x2, cos_full, sin_full, batch, seq, start_pos):
    kernel = functools.partial(_block_kernel, batch=batch, seq=seq, start_pos=start_pos)
    # Single invocation, whole operands resident in VMEM (everything < ~1.5 MiB here).
    # TODO(synk): at real LLaMA dims, grid over batch/heads and tile F / K with a VMEM
    # accumulator instead of whole-array operands.
    return pl.pallas_call(
        kernel,
        out_shape=jax.ShapeDtypeStruct(x2.shape, jnp.float32),
    )(x2, cos_full, sin_full,
      blk["norm1_w"], blk["wq"], blk["bq"], blk["wq_rot"], blk["bq_rot"],
      blk["wkv"], blk["bkv"], blk["wo"], blk["bo"], blk["norm2_w"],
      blk["ffn_w"], blk["ffn_v"], blk["ffn_r"])


# --------------------------------------------------------------------------
# LM head: fused pre_linear_norm + linear_proj (full-M token tile -> 1 grid step)
# --------------------------------------------------------------------------
def _norm_proj_kernel(x_ref, nw_ref, w_ref, o_ref):
    x = x_ref[...].astype(jnp.float32)
    xn = _rms_buggy(x, nw_ref[...])
    # reference casts logits to float -> keep a f32 (lane-dense, V % 128 == 0) output.
    o_ref[...] = jnp.dot(xn.astype(jnp.bfloat16), w_ref[...],
                         preferred_element_type=jnp.float32)


def norm_proj(x2, nw, w):
    M, D = x2.shape
    V = w.shape[1]
    TM = M                                               # full-M tile (single grid step)
    return pl.pallas_call(
        _norm_proj_kernel,
        out_shape=jax.ShapeDtypeStruct((M, V), jnp.float32),
        grid=(M // TM,),
        in_specs=[pl.BlockSpec((TM, D), lambda i: (i, 0)),
                  pl.BlockSpec((1, D), lambda i: (0, 0)),
                  pl.BlockSpec((D, V), lambda i: (0, 0))],
        out_specs=pl.BlockSpec((TM, V), lambda i: (i, 0)),
        compiler_params=pltpu.CompilerParams(dimension_semantics=("parallel",)),
    )(x2, nw, w)


# --------------------------------------------------------------------------
# RoPE tables in the interleaved-pair, head-merged lane layout (built once per forward)
# --------------------------------------------------------------------------
def make_rope_tables(seq, start_pos, batch):
    half = HEAD_DIM // 2
    freqs = 1.0 / (ROPE_EMBEDDING_THETA **
                   (jnp.arange(0, HEAD_DIM, 2, dtype=jnp.float32)[:half] / HEAD_DIM))
    pos = jnp.arange(start_pos, start_pos + seq, dtype=jnp.float32)
    ang = jnp.outer(pos, freqs)                                    # (S, Dh/2)
    cos = jnp.tile(jnp.repeat(jnp.cos(ang), 2, axis=-1), (1, N_ATTENTION_HEADS))  # (S, H*Dh)
    sin = jnp.tile(jnp.repeat(jnp.sin(ang), 2, axis=-1), (1, N_ATTENTION_HEADS))
    return jnp.tile(cos, (batch, 1)), jnp.tile(sin, (batch, 1))    # (M, H*Dh)


# --------------------------------------------------------------------------
# Transformer forward
# --------------------------------------------------------------------------
def transformer_forward(prep, tokens, start_pos):
    B, S = tokens.shape
    assert B <= MAX_BATCH_SIZE and start_pos + S <= MAX_SEQ_LEN
    M = B * S

    # nn.Embedding gather kept as a plain-JAX take (irregular row gather).
    x = prep["emb"][tokens].reshape(M, MODEL_DIM)                  # (M, D) f32

    cos_full, sin_full = make_rope_tables(S, start_pos, B)

    for blk in prep["blocks"]:
        x = transformer_block(blk, x, cos_full, sin_full, B, S, start_pos)

    # NOTE: the reference forward computes `logits` but has no return statement;
    # we return them so the demo can verify the output.
    logits = norm_proj(x, prep["final_norm_w"], prep["proj_w"])
    return logits.reshape(B, S, VOCABULARY_SIZE)


# --------------------------------------------------------------------------
# Parameters: torch-layout init, then one-time prepare (transpose + bf16 + RoPE weights)
# --------------------------------------------------------------------------
def init_params(key):
    def n(k, shape, s=0.02):
        return (s * jax.random.normal(k, shape)).astype(jnp.float32)

    key, ek, pk = jax.random.split(key, 3)
    blocks = []
    for _ in range(N_TRANSFORMER_BLOCKS):
        key, *ks = jax.random.split(key, 12)
        blocks.append({
            "wq_w": n(ks[0], (N_ATTENTION_HEADS * HEAD_DIM, MODEL_DIM)),
            "wq_b": n(ks[1], (N_ATTENTION_HEADS * HEAD_DIM,)),
            "wk_w": n(ks[2], (N_KV_HEADS * HEAD_DIM, MODEL_DIM)),
            "wk_b": n(ks[3], (N_KV_HEADS * HEAD_DIM,)),
            "wv_w": n(ks[4], (N_KV_HEADS * HEAD_DIM, MODEL_DIM)),
            "wv_b": n(ks[5], (N_KV_HEADS * HEAD_DIM,)),
            "wo_w": n(ks[6], (MODEL_DIM, N_ATTENTION_HEADS * HEAD_DIM)),
            "wo_b": n(ks[7], (MODEL_DIM,)),
            "ffn_v": n(ks[8], (FEED_FORWARD_DIMENSION, MODEL_DIM)),
            "ffn_w": n(ks[9], (FEED_FORWARD_DIMENSION, MODEL_DIM)),
            "ffn_r": n(ks[10], (MODEL_DIM, FEED_FORWARD_DIMENSION)),
            "norm1_w": jnp.ones((MODEL_DIM,), jnp.float32),
            "norm2_w": jnp.ones((MODEL_DIM,), jnp.float32),
        })
    return {
        "emb": n(ek, (VOCABULARY_SIZE, MODEL_DIM)),
        "blocks": blocks,
        "final_norm_w": jnp.ones((MODEL_DIM,), jnp.float32),
        "proj_w": n(pk, (VOCABULARY_SIZE, MODEL_DIM)),
    }


def prepare_params(params):
    bf16 = jnp.bfloat16

    def rope_pair_swap_cols(w_t):
        # new col 2j = -old col (2j+1), new col 2j+1 = +old col 2j  (per RoPE pair)
        return jnp.stack([-w_t[:, 1::2], w_t[:, 0::2]], axis=-1).reshape(w_t.shape)

    def rope_pair_swap_vec(b):
        return jnp.stack([-b[1::2], b[0::2]], axis=-1).reshape(b.shape)

    blocks = []
    for b in params["blocks"]:
        wq_t = b["wq_w"].T                                          # (D, H*Dh)
        blocks.append({
            "norm1_w": b["norm1_w"].reshape(1, MODEL_DIM),
            "norm2_w": b["norm2_w"].reshape(1, MODEL_DIM),
            "wq": wq_t.astype(bf16),
            "bq": b["wq_b"].reshape(1, -1),
            "wq_rot": rope_pair_swap_cols(wq_t).astype(bf16),       # rotated-partner Q weight
            "bq_rot": rope_pair_swap_vec(b["wq_b"]).reshape(1, -1),
            "wkv": jnp.concatenate([b["wk_w"].T, b["wv_w"].T], axis=1).astype(bf16),
            "bkv": jnp.concatenate([b["wk_b"], b["wv_b"]]).reshape(1, -1),
            "wo": b["wo_w"].T.astype(bf16),                         # (H*Dh, D)
            "bo": b["wo_b"].reshape(1, -1),
            "ffn_w": b["ffn_w"].T.astype(bf16),                     # (D, F)
            "ffn_v": b["ffn_v"].T.astype(bf16),                     # (D, F)
            "ffn_r": b["ffn_r"].T.astype(bf16),                     # (F, D)
        })
    return {
        "emb": params["emb"],
        "blocks": blocks,
        "final_norm_w": params["final_norm_w"].reshape(1, MODEL_DIM),
        "proj_w": params["proj_w"].T.astype(bf16),                  # (D, V)
    }


if __name__ == "__main__":
    key = jax.random.PRNGKey(0)
    pkey, tkey = jax.random.split(key)
    params = init_params(pkey)
    prep = prepare_params(params)

    B, S = 2, 8
    start_pos = 0
    tokens = jax.random.randint(tkey, (B, S), 0, VOCABULARY_SIZE, dtype=jnp.int32)

    fwd = jax.jit(transformer_forward, static_argnums=(2,))
    logits = fwd(prep, tokens, start_pos)
    logits = jax.block_until_ready(logits)

    assert logits.shape == (B, S, VOCABULARY_SIZE)
    assert bool(jnp.all(jnp.isfinite(logits)))
    print("KERNEL_OK")
</pallas_src>

<mosaic_0001>
module attributes {stable_mosaic.version = 11 : i64} {
  func.func @_norm_proj_kernel(%arg0: i32, %arg1: memref<16x256xf32, #tpu.memory_space<vmem>>, %arg2: memref<1x256xf32, #tpu.memory_space<vmem>>, %arg3: memref<256x512xbf16, #tpu.memory_space<vmem>>, %arg4: memref<16x512xf32, #tpu.memory_space<vmem>>) attributes {dimension_semantics = [#tpu.dimension_semantics<parallel>], iteration_bounds = array<i64: 1>, scalar_prefetch = 0 : i64, scratch_operands = 0 : i64, tpu.core_type = #tpu.core_type<tc>, window_params = [{transform_indices = @transform_0, window_bounds = array<i64: 16, 256>}, {pipeline_mode = #tpu.pipeline_mode<synchronous>, transform_indices = @transform_1, window_bounds = array<i64: 1, 256>}, {pipeline_mode = #tpu.pipeline_mode<synchronous>, transform_indices = @transform_2, window_bounds = array<i64: 256, 512>}, {transform_indices = @transform_3, window_bounds = array<i64: 16, 512>}]} {
    %c0 = arith.constant 0 : index
    %c0_0 = arith.constant 0 : index
    %0 = vector.load %arg1[%c0, %c0_0] : memref<16x256xf32, #tpu.memory_space<vmem>>, vector<16x256xf32>
    %c0_1 = arith.constant 0 : index
    %c0_2 = arith.constant 0 : index
    %1 = vector.load %arg2[%c0_1, %c0_2] : memref<1x256xf32, #tpu.memory_space<vmem>>, vector<1x256xf32>
    %2 = arith.mulf %0, %0 : vector<16x256xf32>
    %cst = arith.constant dense<0.000000e+00> : vector<16xf32>
    %3 = vector.multi_reduction <add>, %2, %cst [1] : vector<16x256xf32> to vector<16xf32>
    %4 = vector.shape_cast %3 : vector<16xf32> to vector<16x1xf32>
    %cst_3 = arith.constant 2.560000e+02 : f32
    %5 = vector.broadcast %cst_3 : f32 to vector<16x1xf32>
    %6 = arith.divf %4, %5 : vector<16x1xf32>
    %cst_4 = arith.constant 9.99999974E-6 : f32
    %7 = vector.broadcast %cst_4 : f32 to vector<16x1xf32>
    %8 = arith.addf %6, %7 : vector<16x1xf32>
    %9 = math.sqrt %8 : vector<16x1xf32>
    %10 = vector.broadcast %9 : vector<16x1xf32> to vector<16x256xf32>
    %11 = arith.mulf %0, %10 : vector<16x256xf32>
    %12 = vector.broadcast %1 : vector<1x256xf32> to vector<16x256xf32>
    %13 = arith.mulf %11, %12 : vector<16x256xf32>
    %14 = arith.truncf %13 : vector<16x256xf32> to vector<16x256xbf16>
    %c0_5 = arith.constant 0 : index
    %c0_6 = arith.constant 0 : index
    %15 = vector.load %arg3[%c0_5, %c0_6] : memref<256x512xbf16, #tpu.memory_space<vmem>>, vector<256x512xbf16>
    %cst_7 = arith.constant dense<0.000000e+00> : vector<16x512xf32>
    %16 = tpu.matmul %14, %15, %cst_7 {dimension_numbers = #tpu.dot_dimension_numbers<[1], [0], [0], [1], [0, 0, 1, 1], [], []>} : vector<16x256xbf16>, vector<256x512xbf16>, vector<16x512xf32> -> vector<16x512xf32>
    %c0_8 = arith.constant 0 : index
    %c0_9 = arith.constant 0 : index
    %17 = vector.load %arg4[%c0_8, %c0_9] : memref<16x512xf32, #tpu.memory_space<vmem>>, vector<16x512xf32>
    tpu.vector_store %arg4[%c0_8, %c0_9], %16 {strides = array<i32>} : memref<16x512xf32, #tpu.memory_space<vmem>>, vector<16x512xf32>,
    return
  }
  func.func @transform_0(%arg0: i32) -> (i32, i32) {
    %c0_i32 = arith.constant 0 : i32
    %c0_i32_0 = arith.constant 0 : i32
    return %arg0, %c0_i32 : i32, i32
  }
  func.func @transform_1(%arg0: i32) -> (i32, i32) {
    %c0_i32 = arith.constant 0 : i32
    %c0_i32_0 = arith.constant 0 : i32
    %c0_i32_1 = arith.constant 0 : i32
    return %c0_i32, %c0_i32_0 : i32, i32
  }
  func.func @transform_2(%arg0: i32) -> (i32, i32) {
    %c0_i32 = arith.constant 0 : i32
    %c0_i32_0 = arith.constant 0 : i32
    %c0_i32_1 = arith.constant 0 : i32
    return %c0_i32, %c0_i32_0 : i32, i32
  }
  func.func @transform_3(%arg0: i32) -> (i32, i32) {
    %c0_i32 = arith.constant 0 : i32
    %c0_i32_0 = arith.constant 0 : i32
    return %arg0, %c0_i32 : i32, i32
  }
}

module attributes {stable_mosaic.version = 11 : i64} {
  func.func @_block_kernel(%arg0: memref<16x256xf32, #tpu.memory_space<vmem>>, %arg1: memref<16x256xf32, #tpu.memory_space<vmem>>, %arg2: memref<16x256xf32, #tpu.memory_space<vmem>>, %arg3: memref<1x256xf32, #tpu.memory_space<vmem>>, %arg4: memref<256x256xbf16, #tpu.memory_space<vmem>>, %arg5: memref<1x256xf32, #tpu.memory_space<vmem>>, %arg6: memref<256x256xbf16, #tpu.memory_space<vmem>>, %arg7: memref<1x256xf32, #tpu.memory_space<vmem>>, %arg8: memref<256x128xbf16, #tpu.memory_space<vmem>>, %arg9: memref<1x128xf32, #tpu.memory_space<vmem>>, %arg10: memref<256x256xbf16, #tpu.memory_space<vmem>>, %arg11: memref<1x256xf32, #tpu.memory_space<vmem>>, %arg12: memref<1x256xf32, #tpu.memory_space<vmem>>, %arg13: memref<256x512xbf16, #tpu.memory_space<vmem>>, %arg14: memref<256x512xbf16, #tpu.memory_space<vmem>>, %arg15: memref<512x256xbf16, #tpu.memory_space<vmem>>, %arg16: memref<16x256xf32, #tpu.memory_space<vmem>>) attributes {dimension_semantics = [], scalar_prefetch = 0 : i64, scratch_operands = 0 : i64, tpu.core_type = #tpu.core_type<tc>} {
    %c0 = arith.constant 0 : index
    %c0_0 = arith.constant 0 : index
    %0 = vector.load %arg0[%c0, %c0_0] : memref<16x256xf32, #tpu.memory_space<vmem>>, vector<16x256xf32>
    %c0_1 = arith.constant 0 : index
    %c0_2 = arith.constant 0 : index
    %1 = vector.load %arg3[%c0_1, %c0_2] : memref<1x256xf32, #tpu.memory_space<vmem>>, vector<1x256xf32>
    %2 = arith.mulf %0, %0 : vector<16x256xf32>
    %cst = arith.constant dense<0.000000e+00> : vector<16xf32>
    %3 = vector.multi_reduction <add>, %2, %cst [1] : vector<16x256xf32> to vector<16xf32>
    %4 = vector.shape_cast %3 : vector<16xf32> to vector<16x1xf32>
    %cst_3 = arith.constant 2.560000e+02 : f32
    %5 = vector.broadcast %cst_3 : f32 to vector<16x1xf32>
    %6 = arith.divf %4, %5 : vector<16x1xf32>
    %cst_4 = arith.constant 9.99999974E-6 : f32
    %7 = vector.broadcast %cst_4 : f32 to vector<16x1xf32>
    %8 = arith.addf %6, %7 : vector<16x1xf32>
    %9 = math.sqrt %8 : vector<16x1xf32>
    %10 = vector.broadcast %9 : vector<16x1xf32> to vector<16x256xf32>
    %11 = arith.mulf %0, %10 : vector<16x256xf32>
    %12 = vector.broadcast %1 : vector<1x256xf32> to vector<16x256xf32>
    %13 = arith.mulf %11, %12 : vector<16x256xf32>
    %14 = arith.truncf %13 : vector<16x256xf32> to vector<16x256xbf16>
    %c0_5 = arith.constant 0 : index
    %c0_6 = arith.constant 0 : index
    %15 = vector.load %arg4[%c0_5, %c0_6] : memref<256x256xbf16, #tpu.memory_space<vmem>>, vector<256x256xbf16>
    %cst_7 = arith.constant dense<0.000000e+00> : vector<16x256xf32>
    %16 = tpu.matmul %14, %15, %cst_7 {dimension_numbers = #tpu.dot_dimension_numbers<[1], [0], [0], [1], [0, 0, 1, 1], [], []>} : vector<16x256xbf16>, vector<256x256xbf16>, vector<16x256xf32> -> vector<16x256xf32>
    %c0_8 = arith.constant 0 : index
    %c0_9 = arith.constant 0 : index
    %17 = vector.load %arg5[%c0_8, %c0_9] : memref<1x256xf32, #tpu.memory_space<vmem>>, vector<1x256xf32>
    %18 = vector.broadcast %17 : vector<1x256xf32> to vector<16x256xf32>
    %19 = arith.addf %16, %18 : vector<16x256xf32>
    %c0_10 = arith.constant 0 : index
    %c0_11 = arith.constant 0 : index
    %20 = vector.load %arg6[%c0_10, %c0_11] : memref<256x256xbf16, #tpu.memory_space<vmem>>, vector<256x256xbf16>
    %cst_12 = arith.constant dense<0.000000e+00> : vector<16x256xf32>
    %21 = tpu.matmul %14, %20, %cst_12 {dimension_numbers = #tpu.dot_dimension_numbers<[1], [0], [0], [1], [0, 0, 1, 1], [], []>} : vector<16x256xbf16>, vector<256x256xbf16>, vector<16x256xf32> -> vector<16x256xf32>
    %c0_13 = arith.constant 0 : index
    %c0_14 = arith.constant 0 : index
    %22 = vector.load %arg7[%c0_13, %c0_14] : memref<1x256xf32, #tpu.memory_space<vmem>>, vector<1x256xf32>
    %23 = vector.broadcast %22 : vector<1x256xf32> to vector<16x256xf32>
    %24 = arith.addf %21, %23 : vector<16x256xf32>
    %c0_15 = arith.constant 0 : index
    %c0_16 = arith.constant 0 : index
    %25 = vector.load %arg1[%c0_15, %c0_16] : memref<16x256xf32, #tpu.memory_space<vmem>>, vector<16x256xf32>
    %26 = arith.mulf %19, %25 : vector<16x256xf32>
    %c0_17 = arith.constant 0 : index
    %c0_18 = arith.constant 0 : index
    %27 = vector.load %arg2[%c0_17, %c0_18] : memref<16x256xf32, #tpu.memory_space<vmem>>, vector<16x256xf32>
    %28 = arith.mulf %24, %27 : vector<16x256xf32>
    %29 = arith.addf %26, %28 : vector<16x256xf32>
    %c0_19 = arith.constant 0 : index
    %c0_20 = arith.constant 0 : index
    %30 = vector.load %arg8[%c0_19, %c0_20] : memref<256x128xbf16, #tpu.memory_space<vmem>>, vector<256x128xbf16>
    %cst_21 = arith.constant dense<0.000000e+00> : vector<16x128xf32>
    %31 = tpu.matmul %14, %30, %cst_21 {dimension_numbers = #tpu.dot_dimension_numbers<[1], [0], [0], [1], [0, 0, 1, 1], [], []>} : vector<16x256xbf16>, vector<256x128xbf16>, vector<16x128xf32> -> vector<16x128xf32>
    %c0_22 = arith.constant 0 : index
    %c0_23 = arith.constant 0 : index
    %32 = vector.load %arg9[%c0_22, %c0_23] : memref<1x128xf32, #tpu.memory_space<vmem>>, vector<1x128xf32>
    %33 = vector.broadcast %32 : vector<1x128xf32> to vector<16x128xf32>
    %34 = arith.addf %31, %33 : vector<16x128xf32>
    %35 = vector.extract_strided_slice %34 {offsets = [0, 64], sizes = [16, 64], strides = [1, 1]} : vector<16x128xf32> to vector<16x64xf32>
    %36 = tpu.iota {dimensions = array<i32: 0>} : vector<8x8xi32>
    %37 = tpu.iota {dimensions = array<i32: 1>} : vector<8x8xi32>
    %c0_i32 = arith.constant 0 : i32
    %38 = vector.broadcast %c0_i32 : i32 to vector<8x8xi32>
    %39 = arith.addi %36, %38 : vector<8x8xi32>
    %40 = arith.cmpi sle, %37, %39 : vector<8x8xi32>
    %cst_24 = arith.constant 0.000000e+00 : f32
    %cst_25 = arith.constant 0xFF800000 : f32
    %41 = vector.broadcast %cst_24 : f32 to vector<8x8xf32>
    %42 = vector.broadcast %cst_25 : f32 to vector<8x8xf32>
    %43 = arith.select %40, %41, %42 : vector<8x8xi1>, vector<8x8xf32>
    %cst_26 = arith.constant 0.000000e+00 : bf16
    %44 = vector.broadcast %cst_26 : bf16 to vector<8x32xbf16>
    %45 = vector.extract_strided_slice %29 {offsets = [0, 0], sizes = [8, 256], strides = [1, 1]} : vector<16x256xf32> to vector<8x256xf32>
    %46 = vector.extract_strided_slice %35 {offsets = [0, 0], sizes = [8, 64], strides = [1, 1]} : vector<16x64xf32> to vector<8x64xf32>
    %cst_27 = arith.constant 0.000000e+00 : f32
    %47 = vector.broadcast %cst_27 : f32 to vector<8x256xf32>
    %48 = vector.extract_strided_slice %45 {offsets = [0, 0], sizes = [8, 32], strides = [1, 1]} : vector<8x256xf32> to vector<8x32xf32>
    %49 = arith.truncf %48 : vector<8x32xf32> to vector<8x32xbf16>
    %50 = vector.extract_strided_slice %46 {offsets = [0, 0], sizes = [8, 32], strides = [1, 1]} : vector<8x64xf32> to vector<8x32xf32>
    %51 = arith.truncf %50 : vector<8x32xf32> to vector<8x32xbf16>
    %cst_28 = arith.constant dense<0.000000e+00> : vector<8x8xf32>
    %52 = tpu.matmul %49, %51, %cst_28 {dimension_numbers = #tpu.dot_dimension_numbers<[1], [1], [0], [0], [0, 0, 1, 0], [], []>} : vector<8x32xbf16>, vector<8x32xbf16>, vector<8x8xf32> -> vector<8x8xf32>
    %cst_29 = arith.constant 0.176776692 : f32
    %53 = vector.broadcast %cst_29 : f32 to vector<8x8xf32>
    %54 = arith.mulf %52, %53 : vector<8x8xf32>
    %55 = arith.addf %54, %43 : vector<8x8xf32>
    %cst_30 = arith.constant dense<0xFF800000> : vector<8xf32>
    %56 = vector.multi_reduction <maximumf>, %55, %cst_30 [1] : vector<8x8xf32> to vector<8xf32>
    %57 = vector.shape_cast %56 : vector<8xf32> to vector<8x1xf32>
    %58 = vector.broadcast %57 : vector<8x1xf32> to vector<8x8xf32>
    %59 = arith.subf %55, %58 : vector<8x8xf32>
    %60 = math.exp %59 : vector<8x8xf32>
    %cst_31 = arith.constant dense<0.000000e+00> : vector<8xf32>
    %61 = vector.multi_reduction <add>, %60, %cst_31 [1] : vector<8x8xf32> to vector<8xf32>
    %62 = vector.shape_cast %61 : vector<8xf32> to vector<8x1xf32>
    %63 = vector.broadcast %62 : vector<8x1xf32> to vector<8x8xf32>
    %64 = arith.divf %60, %63 : vector<8x8xf32>
    %65 = arith.truncf %64 : vector<8x8xf32> to vector<8x8xbf16>
    %cst_32 = arith.constant dense<0.000000e+00> : vector<8x32xf32>
    %66 = tpu.matmul %65, %44, %cst_32 {dimension_numbers = #tpu.dot_dimension_numbers<[1], [0], [0], [1], [0, 0, 1, 1], [], []>} : vector<8x8xbf16>, vector<8x32xbf16>, vector<8x32xf32> -> vector<8x32xf32>
    %67 = arith.truncf %66 : vector<8x32xf32> to vector<8x32xbf16>
    %c0_33 = arith.constant 0 : index
    %c0_34 = arith.constant 0 : index
    %68 = vector.load %arg10[%c0_33, %c0_34] : memref<256x256xbf16, #tpu.memory_space<vmem>>, vector<32x256xbf16>
    %cst_35 = arith.constant dense<0.000000e+00> : vector<8x256xf32>
    %69 = tpu.matmul %67, %68, %cst_35 {dimension_numbers = #tpu.dot_dimension_numbers<[1], [0], [0], [1], [0, 0, 1, 1], [], []>} : vector<8x32xbf16>, vector<32x256xbf16>, vector<8x256xf32> -> vector<8x256xf32>
    %70 = arith.addf %47, %69 : vector<8x256xf32>
    %71 = vector.extract_strided_slice %45 {offsets = [0, 32], sizes = [8, 32], strides = [1, 1]} : vector<8x256xf32> to vector<8x32xf32>
    %72 = arith.truncf %71 : vector<8x32xf32> to vector<8x32xbf16>
    %73 = vector.extract_strided_slice %46 {offsets = [0, 0], sizes = [8, 32], strides = [1, 1]} : vector<8x64xf32> to vector<8x32xf32>
    %74 = arith.truncf %73 : vector<8x32xf32> to vector<8x32xbf16>
    %cst_36 = arith.constant dense<0.000000e+00> : vector<8x8xf32>
    %75 = tpu.matmul %72, %74, %cst_36 {dimension_numbers = #tpu.dot_dimension_numbers<[1], [1], [0], [0], [0, 0, 1, 0], [], []>} : vector<8x32xbf16>, vector<8x32xbf16>, vector<8x8xf32> -> vector<8x8xf32>
    %cst_37 = arith.constant 0.176776692 : f32
    %76 = vector.broadcast %cst_37 : f32 to vector<8x8xf32>
    %77 = arith.mulf %75, %76 : vector<8x8xf32>
    %78 = arith.addf %77, %43 : vector<8x8xf32>
    %cst_38 = arith.constant dense<0xFF800000> : vector<8xf32>
    %79 = vector.multi_reduction <maximumf>, %78, %cst_38 [1] : vector<8x8xf32> to vector<8xf32>
    %80 = vector.shape_cast %79 : vector<8xf32> to vector<8x1xf32>
    %81 = vector.broadcast %80 : vector<8x1xf32> to vector<8x8xf32>
    %82 = arith.subf %78, %81 : vector<8x8xf32>
    %83 = math.exp %82 : vector<8x8xf32>
    %cst_39 = arith.constant dense<0.000000e+00> : vector<8xf32>
    %84 = vector.multi_reduction <add>, %83, %cst_39 [1] : vector<8x8xf32> to vector<8xf32>
    %85 = vector.shape_cast %84 : vector<8xf32> to vector<8x1xf32>
    %86 = vector.broadcast %85 : vector<8x1xf32> to vector<8x8xf32>
    %87 = arith.divf %83, %86 : vector<8x8xf32>
    %88 = arith.truncf %87 : vector<8x8xf32> to vector<8x8xbf16>
    %cst_40 = arith.constant dense<0.000000e+00> : vector<8x32xf32>
    %89 = tpu.matmul %88, %44, %cst_40 {dimension_numbers = #tpu.dot_dimension_numbers<[1], [0], [0], [1], [0, 0, 1, 1], [], []>} : vector<8x8xbf16>, vector<8x32xbf16>, vector<8x32xf32> -> vector<8x32xf32>
    %90 = arith.truncf %89 : vector<8x32xf32> to vector<8x32xbf16>
    %c32 = arith.constant 32 : index
    %c0_41 = arith.constant 0 : index
    %91 = vector.load %arg10[%c32, %c0_41] : memref<256x256xbf16, #tpu.memory_space<vmem>>, vector<32x256xbf16>
    %cst_42 = arith.constant dense<0.000000e+00> : vector<8x256xf32>
    %92 = tpu.matmul %90, %91, %cst_42 {dimension_numbers = #tpu.dot_dimension_numbers<[1], [0], [0], [1], [0, 0, 1, 1], [], []>} : vector<8x32xbf16>, vector<32x256xbf16>, vector<8x256xf32> -> vector<8x256xf32>
    %93 = arith.addf %70, %92 : vector<8x256xf32>
    %94 = vector.extract_strided_slice %45 {offsets = [0, 64], sizes = [8, 32], strides = [1, 1]} : vector<8x256xf32> to vector<8x32xf32>
    %95 = arith.truncf %94 : vector<8x32xf32> to vector<8x32xbf16>
    %96 = vector.extract_strided_slice %46 {offsets = [0, 0], sizes = [8, 32], strides = [1, 1]} : vector<8x64xf32> to vector<8x32xf32>
    %97 = arith.truncf %96 : vector<8x32xf32> to vector<8x32xbf16>
    %cst_43 = arith.constant dense<0.000000e+00> : vector<8x8xf32>
    %98 = tpu.matmul %95, %97, %cst_43 {dimension_numbers = #tpu.dot_dimension_numbers<[1], [1], [0], [0], [0, 0, 1, 0], [], []>} : vector<8x32xbf16>, vector<8x32xbf16>, vector<8x8xf32> -> vector<8x8xf32>
    %cst_44 = arith.constant 0.176776692 : f32
    %99 = vector.broadcast %cst_44 : f32 to vector<8x8xf32>
    %100 = arith.mulf %98, %99 : vector<8x8xf32>
    %101 = arith.addf %100, %43 : vector<8x8xf32>
    %cst_45 = arith.constant dense<0xFF800000> : vector<8xf32>
    %102 = vector.multi_reduction <maximumf>, %101, %cst_45 [1] : vector<8x8xf32> to vector<8xf32>
    %103 = vector.shape_cast %102 : vector<8xf32> to vector<8x1xf32>
    %104 = vector.broadcast %103 : vector<8x1xf32> to vector<8x8xf32>
    %105 = arith.subf %101, %104 : vector<8x8xf32>
    %106 = math.exp %105 : vector<8x8xf32>
    %cst_46 = arith.constant dense<0.000000e+00> : vector<8xf32>
    %107 = vector.multi_reduction <add>, %106, %cst_46 [1] : vector<8x8xf32> to vector<8xf32>
    %108 = vector.shape_cast %107 : vector<8xf32> to vector<8x1xf32>
    %109 = vector.broadcast %108 : vector<8x1xf32> to vector<8x8xf32>
    %110 = arith.divf %106, %109 : vector<8x8xf32>
    %111 = arith.truncf %110 : vector<8x8xf32> to vector<8x8xbf16>
    %cst_47 = arith.constant dense<0.000000e+00> : vector<8x32xf32>
    %112 = tpu.matmul %111, %44, %cst_47 {dimension_numbers = #tpu.dot_dimension_numbers<[1], [0], [0], [1], [0, 0, 1, 1], [], []>} : vector<8x8xbf16>, vector<8x32xbf16>, vector<8x32xf32> -> vector<8x32xf32>
    %113 = arith.truncf %112 : vector<8x32xf32> to vector<8x32xbf16>
    %c64 = arith.constant 64 : index
    %c0_48 = arith.constant 0 : index
    %114 = vector.load %arg10[%c64, %c0_48] : memref<256x256xbf16, #tpu.memory_space<vmem>>, vector<32x256xbf16>
    %cst_49 = arith.constant dense<0.000000e+00> : vector<8x256xf32>
    %115 = tpu.matmul %113, %114, %cst_49 {dimension_numbers = #tpu.dot_dimension_numbers<[1], [0], [0], [1], [0, 0, 1, 1], [], []>} : vector<8x32xbf16>, vector<32x256xbf16>, vector<8x256xf32> -> vector<8x256xf32>
    %116 = arith.addf %93, %115 : vector<8x256xf32>
    %117 = vector.extract_strided_slice %45 {offsets = [0, 96], sizes = [8, 32], strides = [1, 1]} : vector<8x256xf32> to vector<8x32xf32>
    %118 = arith.truncf %117 : vector<8x32xf32> to vector<8x32xbf16>
    %119 = vector.extract_strided_slice %46 {offsets = [0, 0], sizes = [8, 32], strides = [1, 1]} : vector<8x64xf32> to vector<8x32xf32>
    %120 = arith.truncf %119 : vector<8x32xf32> to vector<8x32xbf16>
    %cst_50 = arith.constant dense<0.000000e+00> : vector<8x8xf32>
    %121 = tpu.matmul %118, %120, %cst_50 {dimension_numbers = #tpu.dot_dimension_numbers<[1], [1], [0], [0], [0, 0, 1, 0], [], []>} : vector<8x32xbf16>, vector<8x32xbf16>, vector<8x8xf32> -> vector<8x8xf32>
    %cst_51 = arith.constant 0.176776692 : f32
    %122 = vector.broadcast %cst_51 : f32 to vector<8x8xf32>
    %123 = arith.mulf %121, %122 : vector<8x8xf32>
    %124 = arith.addf %123, %43 : vector<8x8xf32>
    %cst_52 = arith.constant dense<0xFF800000> : vector<8xf32>
    %125 = vector.multi_reduction <maximumf>, %124, %cst_52 [1] : vector<8x8xf32> to vector<8xf32>
    %126 = vector.shape_cast %125 : vector<8xf32> to vector<8x1xf32>
    %127 = vector.broadcast %126 : vector<8x1xf32> to vector<8x8xf32>
    %128 = arith.subf %124, %127 : vector<8x8xf32>
    %129 = math.exp %128 : vector<8x8xf32>
    %cst_53 = arith.constant dense<0.000000e+00> : vector<8xf32>
    %130 = vector.multi_reduction <add>, %129, %cst_53 [1] : vector<8x8xf32> to vector<8xf32>
    %131 = vector.shape_cast %130 : vector<8xf32> to vector<8x1xf32>
    %132 = vector.broadcast %131 : vector<8x1xf32> to vector<8x8xf32>
    %133 = arith.divf %129, %132 : vector<8x8xf32>
    %134 = arith.truncf %133 : vector<8x8xf32> to vector<8x8xbf16>
    %cst_54 = arith.constant dense<0.000000e+00> : vector<8x32xf32>
    %135 = tpu.matmul %134, %44, %cst_54 {dimension_numbers = #tpu.dot_dimension_numbers<[1], [0], [0], [1], [0, 0, 1, 1], [], []>} : vector<8x8xbf16>, vector<8x32xbf16>, vector<8x32xf32> -> vector<8x32xf32>
    %136 = arith.truncf %135 : vector<8x32xf32> to vector<8x32xbf16>
    %c96 = arith.constant 96 : index
    %c0_55 = arith.constant 0 : index
    %137 = vector.load %arg10[%c96, %c0_55] : memref<256x256xbf16, #tpu.memory_space<vmem>>, vector<32x256xbf16>
    %cst_56 = arith.constant dense<0.000000e+00> : vector<8x256xf32>
    %138 = tpu.matmul %136, %137, %cst_56 {dimension_numbers = #tpu.dot_dimension_numbers<[1], [0], [0], [1], [0, 0, 1, 1], [], []>} : vector<8x32xbf16>, vector<32x256xbf16>, vector<8x256xf32> -> vector<8x256xf32>
    %139 = arith.addf %116, %138 : vector<8x256xf32>
    %140 = vector.extract_strided_slice %45 {offsets = [0, 128], sizes = [8, 32], strides = [1, 1]} : vector<8x256xf32> to vector<8x32xf32>
    %141 = arith.truncf %140 : vector<8x32xf32> to vector<8x32xbf16>
    %142 = vector.extract_strided_slice %46 {offsets = [0, 32], sizes = [8, 32], strides = [1, 1]} : vector<8x64xf32> to vector<8x32xf32>
    %143 = arith.truncf %142 : vector<8x32xf32> to vector<8x32xbf16>
    %cst_57 = arith.constant dense<0.000000e+00> : vector<8x8xf32>
    %144 = tpu.matmul %141, %143, %cst_57 {dimension_numbers = #tpu.dot_dimension_numbers<[1], [1], [0], [0], [0, 0, 1, 0], [], []>} : vector<8x32xbf16>, vector<8x32xbf16>, vector<8x8xf32> -> vector<8x8xf32>
    %cst_58 = arith.constant 0.176776692 : f32
    %145 = vector.broadcast %cst_58 : f32 to vector<8x8xf32>
    %146 = arith.mulf %144, %145 : vector<8x8xf32>
    %147 = arith.addf %146, %43 : vector<8x8xf32>
    %cst_59 = arith.constant dense<0xFF800000> : vector<8xf32>
    %148 = vector.multi_reduction <maximumf>, %147, %cst_59 [1] : vector<8x8xf32> to vector<8xf32>
    %149 = vector.shape_cast %148 : vector<8xf32> to vector<8x1xf32>
    %150 = vector.broadcast %149 : vector<8x1xf32> to vector<8x8xf32>
    %151 = arith.subf %147, %150 : vector<8x8xf32>
    %152 = math.exp %151 : vector<8x8xf32>
    %cst_60 = arith.constant dense<0.000000e+00> : vector<8xf32>
    %153 = vector.multi_reduction <add>, %152, %cst_60 [1] : vector<8x8xf32> to vector<8xf32>
    %154 = vector.shape_cast %153 : vector<8xf32> to vector<8x1xf32>
    %155 = vector.broadcast %154 : vector<8x1xf32> to vector<8x8xf32>
    %156 = arith.divf %152, %155 : vector<8x8xf32>
    %157 = arith.truncf %156 : vector<8x8xf32> to vector<8x8xbf16>
    %cst_61 = arith.constant dense<0.000000e+00> : vector<8x32xf32>
    %158 = tpu.matmul %157, %44, %cst_61 {dimension_numbers = #tpu.dot_dimension_numbers<[1], [0], [0], [1], [0, 0, 1, 1], [], []>} : vector<8x8xbf16>, vector<8x32xbf16>, vector<8x32xf32> -> vector<8x32xf32>
    %159 = arith.truncf %158 : vector<8x32xf32> to vector<8x32xbf16>
    %c128 = arith.constant 128 : index
    %c0_62 = arith.constant 0 : index
    %160 = vector.load %arg10[%c128, %c0_62] : memref<256x256xbf16, #tpu.memory_space<vmem>>, vector<32x256xbf16>
    %cst_63 = arith.constant dense<0.000000e+00> : vector<8x256xf32>
    %161 = tpu.matmul %159, %160, %cst_63 {dimension_numbers = #tpu.dot_dimension_numbers<[1], [0], [0], [1], [0, 0, 1, 1], [], []>} : vector<8x32xbf16>, vector<32x256xbf16>, vector<8x256xf32> -> vector<8x256xf32>
    %162 = arith.addf %139, %161 : vector<8x256xf32>
    %163 = vector.extract_strided_slice %45 {offsets = [0, 160], sizes = [8, 32], strides = [1, 1]} : vector<8x256xf32> to vector<8x32xf32>
    %164 = arith.truncf %163 : vector<8x32xf32> to vector<8x32xbf16>
    %165 = vector.extract_strided_slice %46 {offsets = [0, 32], sizes = [8, 32], strides = [1, 1]} : vector<8x64xf32> to vector<8x32xf32>
    %166 = arith.truncf %165 : vector<8x32xf32> to vector<8x32xbf16>
    %cst_64 = arith.constant dense<0.000000e+00> : vector<8x8xf32>
    %167 = tpu.matmul %164, %166, %cst_64 {dimension_numbers = #tpu.dot_dimension_numbers<[1], [1], [0], [0], [0, 0, 1, 0], [], []>} : vector<8x32xbf16>, vector<8x32xbf16>, vector<8x8xf32> -> vector<8x8xf32>
    %cst_65 = arith.constant 0.176776692 : f32
    %168 = vector.broadcast %cst_65 : f32 to vector<8x8xf32>
    %169 = arith.mulf %167, %168 : vector<8x8xf32>
    %170 = arith.addf %169, %43 : vector<8x8xf32>
    %cst_66 = arith.constant dense<0xFF800000> : vector<8xf32>
    %171 = vector.multi_reduction <maximumf>, %170, %cst_66 [1] : vector<8x8xf32> to vector<8xf32>
    %172 = vector.shape_cast %171 : vector<8xf32> to vector<8x1xf32>
    %173 = vector.broadcast %172 : vector<8x1xf32> to vector<8x8xf32>
    %174 = arith.subf %170, %173 : vector<8x8xf32>
    %175 = math.exp %174 : vector<8x8xf32>
    %cst_67 = arith.constant dense<0.000000e+00> : vector<8xf32>
    %176 = vector.multi_reduction <add>, %175, %cst_67 [1] : vector<8x8xf32> to vector<8xf32>
    %177 = vector.shape_cast %176 : vector<8xf32> to vector<8x1xf32>
    %178 = vector.broadcast %177 : vector<8x1xf32> to vector<8x8xf32>
    %179 = arith.divf %175, %178 : vector<8x8xf32>
    %180 = arith.truncf %179 : vector<8x8xf32> to vector<8x8xbf16>
    %cst_68 = arith.constant dense<0.000000e+00> : vector<8x32xf32>
    %181 = tpu.matmul %180, %44, %cst_68 {dimension_numbers = #tpu.dot_dimension_numbers<[1], [0], [0], [1], [0, 0, 1, 1], [], []>} : vector<8x8xbf16>, vector<8x32xbf16>, vector<8x32xf32> -> vector<8x32xf32>
    %182 = arith.truncf %181 : vector<8x32xf32> to vector<8x32xbf16>
    %c160 = arith.constant 160 : index
    %c0_69 = arith.constant 0 : index
    %183 = vector.load %arg10[%c160, %c0_69] : memref<256x256xbf16, #tpu.memory_space<vmem>>, vector<32x256xbf16>
    %cst_70 = arith.constant dense<0.000000e+00> : vector<8x256xf32>
    %184 = tpu.matmul %182, %183, %cst_70 {dimension_numbers = #tpu.dot_dimension_numbers<[1], [0], [0], [1], [0, 0, 1, 1], [], []>} : vector<8x32xbf16>, vector<32x256xbf16>, vector<8x256xf32> -> vector<8x256xf32>
    %185 = arith.addf %162, %184 : vector<8x256xf32>
    %186 = vector.extract_strided_slice %45 {offsets = [0, 192], sizes = [8, 32], strides = [1, 1]} : vector<8x256xf32> to vector<8x32xf32>
    %187 = arith.truncf %186 : vector<8x32xf32> to vector<8x32xbf16>
    %188 = vector.extract_strided_slice %46 {offsets = [0, 32], sizes = [8, 32], strides = [1, 1]} : vector<8x64xf32> to vector<8x32xf32>
    %189 = arith.truncf %188 : vector<8x32xf32> to vector<8x32xbf16>
    %cst_71 = arith.constant dense<0.000000e+00> : vector<8x8xf32>
    %190 = tpu.matmul %187, %189, %cst_71 {dimension_numbers = #tpu.dot_dimension_numbers<[1], [1], [0], [0], [0, 0, 1, 0], [], []>} : vector<8x32xbf16>, vector<8x32xbf16>, vector<8x8xf32> -> vector<8x8xf32>
    %cst_72 = arith.constant 0.176776692 : f32
    %191 = vector.broadcast %cst_72 : f32 to vector<8x8xf32>
    %192 = arith.mulf %190, %191 : vector<8x8xf32>
    %193 = arith.addf %192, %43 : vector<8x8xf32>
    %cst_73 = arith.constant dense<0xFF800000> : vector<8xf32>
    %194 = vector.multi_reduction <maximumf>, %193, %cst_73 [1] : vector<8x8xf32> to vector<8xf32>
    %195 = vector.shape_cast %194 : vector<8xf32> to vector<8x1xf32>
    %196 = vector.broadcast %195 : vector<8x1xf32> to vector<8x8xf32>
    %197 = arith.subf %193, %196 : vector<8x8xf32>
    %198 = math.exp %197 : vector<8x8xf32>
    %cst_74 = arith.constant dense<0.000000e+00> : vector<8xf32>
    %199 = vector.multi_reduction <add>, %198, %cst_74 [1] : vector<8x8xf32> to vector<8xf32>
    %200 = vector.shape_cast %199 : vector<8xf32> to vector<8x1xf32>
    %201 = vector.broadcast %200 : vector<8x1xf32> to vector<8x8xf32>
    %202 = arith.divf %198, %201 : vector<8x8xf32>
    %203 = arith.truncf %202 : vector<8x8xf32> to vector<8x8xbf16>
    %cst_75 = arith.constant dense<0.000000e+00> : vector<8x32xf32>
    %204 = tpu.matmul %203, %44, %cst_75 {dimension_numbers = #tpu.dot_dimension_numbers<[1], [0], [0], [1], [0, 0, 1, 1], [], []>} : vector<8x8xbf16>, vector<8x32xbf16>, vector<8x32xf32> -> vector<8x32xf32>
    %205 = arith.truncf %204 : vector<8x32xf32> to vector<8x32xbf16>
    %c192 = arith.constant 192 : index
    %c0_76 = arith.constant 0 : index
    %206 = vector.load %arg10[%c192, %c0_76] : memref<256x256xbf16, #tpu.memory_space<vmem>>, vector<32x256xbf16>
    %cst_77 = arith.constant dense<0.000000e+00> : vector<8x256xf32>
    %207 = tpu.matmul %205, %206, %cst_77 {dimension_numbers = #tpu.dot_dimension_numbers<[1], [0], [0], [1], [0, 0, 1, 1], [], []>} : vector<8x32xbf16>, vector<32x256xbf16>, vector<8x256xf32> -> vector<8x256xf32>
    %208 = arith.addf %185, %207 : vector<8x256xf32>
    %209 = vector.extract_strided_slice %45 {offsets = [0, 224], sizes = [8, 32], strides = [1, 1]} : vector<8x256xf32> to vector<8x32xf32>
    %210 = arith.truncf %209 : vector<8x32xf32> to vector<8x32xbf16>
    %211 = vector.extract_strided_slice %46 {offsets = [0, 32], sizes = [8, 32], strides = [1, 1]} : vector<8x64xf32> to vector<8x32xf32>
    %212 = arith.truncf %211 : vector<8x32xf32> to vector<8x32xbf16>
    %cst_78 = arith.constant dense<0.000000e+00> : vector<8x8xf32>
    %213 = tpu.matmul %210, %212, %cst_78 {dimension_numbers = #tpu.dot_dimension_numbers<[1], [1], [0], [0], [0, 0, 1, 0], [], []>} : vector<8x32xbf16>, vector<8x32xbf16>, vector<8x8xf32> -> vector<8x8xf32>
    %cst_79 = arith.constant 0.176776692 : f32
    %214 = vector.broadcast %cst_79 : f32 to vector<8x8xf32>
    %215 = arith.mulf %213, %214 : vector<8x8xf32>
    %216 = arith.addf %215, %43 : vector<8x8xf32>
    %cst_80 = arith.constant dense<0xFF800000> : vector<8xf32>
    %217 = vector.multi_reduction <maximumf>, %216, %cst_80 [1] : vector<8x8xf32> to vector<8xf32>
    %218 = vector.shape_cast %217 : vector<8xf32> to vector<8x1xf32>
    %219 = vector.broadcast %218 : vector<8x1xf32> to vector<8x8xf32>
    %220 = arith.subf %216, %219 : vector<8x8xf32>
    %221 = math.exp %220 : vector<8x8xf32>
    %cst_81 = arith.constant dense<0.000000e+00> : vector<8xf32>
    %222 = vector.multi_reduction <add>, %221, %cst_81 [1] : vector<8x8xf32> to vector<8xf32>
    %223 = vector.shape_cast %222 : vector<8xf32> to vector<8x1xf32>
    %224 = vector.broadcast %223 : vector<8x1xf32> to vector<8x8xf32>
    %225 = arith.divf %221, %224 : vector<8x8xf32>
    %226 = arith.truncf %225 : vector<8x8xf32> to vector<8x8xbf16>
    %cst_82 = arith.constant dense<0.000000e+00> : vector<8x32xf32>
    %227 = tpu.matmul %226, %44, %cst_82 {dimension_numbers = #tpu.dot_dimension_numbers<[1], [0], [0], [1], [0, 0, 1, 1], [], []>} : vector<8x8xbf16>, vector<8x32xbf16>, vector<8x32xf32> -> vector<8x32xf32>
    %228 = arith.truncf %227 : vector<8x32xf32> to vector<8x32xbf16>
    %c224 = arith.constant 224 : index
    %c0_83 = arith.constant 0 : index
    %229 = vector.load %arg10[%c224, %c0_83] : memref<256x256xbf16, #tpu.memory_space<vmem>>, vector<32x256xbf16>
    %cst_84 = arith.constant dense<0.000000e+00> : vector<8x256xf32>
    %230 = tpu.matmul %228, %229, %cst_84 {dimension_numbers = #tpu.dot_dimension_numbers<[1], [0], [0], [1], [0, 0, 1, 1], [], []>} : vector<8x32xbf16>, vector<32x256xbf16>, vector<8x256xf32> -> vector<8x256xf32>
    %231 = arith.addf %208, %230 : vector<8x256xf32>
    %232 = vector.extract_strided_slice %29 {offsets = [8, 0], sizes = [8, 256], strides = [1, 1]} : vector<16x256xf32> to vector<8x256xf32>
    %233 = vector.extract_strided_slice %35 {offsets = [8, 0], sizes = [8, 64], strides = [1, 1]} : vector<16x64xf32> to vector<8x64xf32>
    %cst_85 = arith.constant 0.000000e+00 : f32
    %234 = vector.broadcast %cst_85 : f32 to vector<8x256xf32>
    %235 = vector.extract_strided_slice %232 {offsets = [0, 0], sizes = [8, 32], strides = [1, 1]} : vector<8x256xf32> to vector<8x32xf32>
    %236 = arith.truncf %235 : vector<8x32xf32> to vector<8x32xbf16>
    %237 = vector.extract_strided_slice %233 {offsets = [0, 0], sizes = [8, 32], strides = [1, 1]} : vector<8x64xf32> to vector<8x32xf32>
    %238 = arith.truncf %237 : vector<8x32xf32> to vector<8x32xbf16>
    %cst_86 = arith.constant dense<0.000000e+00> : vector<8x8xf32>
    %239 = tpu.matmul %236, %238, %cst_86 {dimension_numbers = #tpu.dot_dimension_numbers<[1], [1], [0], [0], [0, 0, 1, 0], [], []>} : vector<8x32xbf16>, vector<8x32xbf16>, vector<8x8xf32> -> vector<8x8xf32>
    %cst_87 = arith.constant 0.176776692 : f32
    %240 = vector.broadcast %cst_87 : f32 to vector<8x8xf32>
    %241 = arith.mulf %239, %240 : vector<8x8xf32>
    %242 = arith.addf %241, %43 : vector<8x8xf32>
    %cst_88 = arith.constant dense<0xFF800000> : vector<8xf32>
    %243 = vector.multi_reduction <maximumf>, %242, %cst_88 [1] : vector<8x8xf32> to vector<8xf32>
    %244 = vector.shape_cast %243 : vector<8xf32> to vector<8x1xf32>
    %245 = vector.broadcast %244 : vector<8x1xf32> to vector<8x8xf32>
    %246 = arith.subf %242, %245 : vector<8x8xf32>
    %247 = math.exp %246 : vector<8x8xf32>
    %cst_89 = arith.constant dense<0.000000e+00> : vector<8xf32>
    %248 = vector.multi_reduction <add>, %247, %cst_89 [1] : vector<8x8xf32> to vector<8xf32>
    %249 = vector.shape_cast %248 : vector<8xf32> to vector<8x1xf32>
    %250 = vector.broadcast %249 : vector<8x1xf32> to vector<8x8xf32>
    %251 = arith.divf %247, %250 : vector<8x8xf32>
    %252 = arith.truncf %251 : vector<8x8xf32> to vector<8x8xbf16>
    %cst_90 = arith.constant dense<0.000000e+00> : vector<8x32xf32>
    %253 = tpu.matmul %252, %44, %cst_90 {dimension_numbers = #tpu.dot_dimension_numbers<[1], [0], [0], [1], [0, 0, 1, 1], [], []>} : vector<8x8xbf16>, vector<8x32xbf16>, vector<8x32xf32> -> vector<8x32xf32>
    %254 = arith.truncf %253 : vector<8x32xf32> to vector<8x32xbf16>
    %c0_91 = arith.constant 0 : index
    %c0_92 = arith.constant 0 : index
    %255 = vector.load %arg10[%c0_91, %c0_92] : memref<256x256xbf16, #tpu.memory_space<vmem>>, vector<32x256xbf16>
    %cst_93 = arith.constant dense<0.000000e+00> : vector<8x256xf32>
    %256 = tpu.matmul %254, %255, %cst_93 {dimension_numbers = #tpu.dot_dimension_numbers<[1], [0], [0], [1], [0, 0, 1, 1], [], []>} : vector<8x32xbf16>, vector<32x256xbf16>, vector<8x256xf32> -> vector<8x256xf32>
    %257 = arith.addf %234, %256 : vector<8x256xf32>
    %258 = vector.extract_strided_slice %232 {offsets = [0, 32], sizes = [8, 32], strides = [1, 1]} : vector<8x256xf32> to vector<8x32xf32>
    %259 = arith.truncf %258 : vector<8x32xf32> to vector<8x32xbf16>
    %260 = vector.extract_strided_slice %233 {offsets = [0, 0], sizes = [8, 32], strides = [1, 1]} : vector<8x64xf32> to vector<8x32xf32>
    %261 = arith.truncf %260 : vector<8x32xf32> to vector<8x32xbf16>
    %cst_94 = arith.constant dense<0.000000e+00> : vector<8x8xf32>
    %262 = tpu.matmul %259, %261, %cst_94 {dimension_numbers = #tpu.dot_dimension_numbers<[1], [1], [0], [0], [0, 0, 1, 0], [], []>} : vector<8x32xbf16>, vector<8x32xbf16>, vector<8x8xf32> -> vector<8x8xf32>
    %cst_95 = arith.constant 0.176776692 : f32
    %263 = vector.broadcast %cst_95 : f32 to vector<8x8xf32>
    %264 = arith.mulf %262, %263 : vector<8x8xf32>
    %265 = arith.addf %264, %43 : vector<8x8xf32>
    %cst_96 = arith.constant dense<0xFF800000> : vector<8xf32>
    %266 = vector.multi_reduction <maximumf>, %265, %cst_96 [1] : vector<8x8xf32> to vector<8xf32>
    %267 = vector.shape_cast %266 : vector<8xf32> to vector<8x1xf32>
    %268 = vector.broadcast %267 : vector<8x1xf32> to vector<8x8xf32>
    %269 = arith.subf %265, %268 : vector<8x8xf32>
    %270 = math.exp %269 : vector<8x8xf32>
    %cst_97 = arith.constant dense<0.000000e+00> : vector<8xf32>
    %271 = vector.multi_reduction <add>, %270, %cst_97 [1] : vector<8x8xf32> to vector<8xf32>
    %272 = vector.shape_cast %271 : vector<8xf32> to vector<8x1xf32>
    %273 = vector.broadcast %272 : vector<8x1xf32> to vector<8x8xf32>
    %274 = arith.divf %270, %273 : vector<8x8xf32>
    %275 = arith.truncf %274 : vector<8x8xf32> to vector<8x8xbf16>
    %cst_98 = arith.constant dense<0.000000e+00> : vector<8x32xf32>
    %276 = tpu.matmul %275, %44, %cst_98 {dimension_numbers = #tpu.dot_dimension_numbers<[1], [0], [0], [1], [0, 0, 1, 1], [], []>} : vector<8x8xbf16>, vector<8x32xbf16>, vector<8x32xf32> -> vector<8x32xf32>
    %277 = arith.truncf %276 : vector<8x32xf32> to vector<8x32xbf16>
    %c32_99 = arith.constant 32 : index
    %c0_100 = arith.constant 0 : index
    %278 = vector.load %arg10[%c32_99, %c0_100] : memref<256x256xbf16, #tpu.memory_space<vmem>>, vector<32x256xbf16>
    %cst_101 = arith.constant dense<0.000000e+00> : vector<8x256xf32>
    %279 = tpu.matmul %277, %278, %cst_101 {dimension_numbers = #tpu.dot_dimension_numbers<[1], [0], [0], [1], [0, 0, 1, 1], [], []>} : vector<8x32xbf16>, vector<32x256xbf16>, vector<8x256xf32> -> vector<8x256xf32>
    %280 = arith.addf %257, %279 : vector<8x256xf32>
    %281 = vector.extract_strided_slice %232 {offsets = [0, 64], sizes = [8, 32], strides = [1, 1]} : vector<8x256xf32> to vector<8x32xf32>
    %282 = arith.truncf %281 : vector<8x32xf32> to vector<8x32xbf16>
    %283 = vector.extract_strided_slice %233 {offsets = [0, 0], sizes = [8, 32], strides = [1, 1]} : vector<8x64xf32> to vector<8x32xf32>
    %284 = arith.truncf %283 : vector<8x32xf32> to vector<8x32xbf16>
    %cst_102 = arith.constant dense<0.000000e+00> : vector<8x8xf32>
    %285 = tpu.matmul %282, %284, %cst_102 {dimension_numbers = #tpu.dot_dimension_numbers<[1], [1], [0], [0], [0, 0, 1, 0], [], []>} : vector<8x32xbf16>, vector<8x32xbf16>, vector<8x8xf32> -> vector<8x8xf32>
    %cst_103 = arith.constant 0.176776692 : f32
    %286 = vector.broadcast %cst_103 : f32 to vector<8x8xf32>
    %287 = arith.mulf %285, %286 : vector<8x8xf32>
    %288 = arith.addf %287, %43 : vector<8x8xf32>
    %cst_104 = arith.constant dense<0xFF800000> : vector<8xf32>
    %289 = vector.multi_reduction <maximumf>, %288, %cst_104 [1] : vector<8x8xf32> to vector<8xf32>
    %290 = vector.shape_cast %289 : vector<8xf32> to vector<8x1xf32>
    %291 = vector.broadcast %290 : vector<8x1xf32> to vector<8x8xf32>
    %292 = arith.subf %288, %291 : vector<8x8xf32>
    %293 = math.exp %292 : vector<8x8xf32>
    %cst_105 = arith.constant dense<0.000000e+00> : vector<8xf32>
    %294 = vector.multi_reduction <add>, %293, %cst_105 [1] : vector<8x8xf32> to vector<8xf32>
    %295 = vector.shape_cast %294 : vector<8xf32> to vector<8x1xf32>
    %296 = vector.broadcast %295 : vector<8x1xf32> to vector<8x8xf32>
    %297 = arith.divf %293, %296 : vector<8x8xf32>
    %298 = arith.truncf %297 : vector<8x8xf32> to vector<8x8xbf16>
    %cst_106 = arith.constant dense<0.000000e+00> : vector<8x32xf32>
    %299 = tpu.matmul %298, %44, %cst_106 {dimension_numbers = #tpu.dot_dimension_numbers<[1], [0], [0], [1], [0, 0, 1, 1], [], []>} : vector<8x8xbf16>, vector<8x32xbf16>, vector<8x32xf32> -> vector<8x32xf32>
    %300 = arith.truncf %299 : vector<8x32xf32> to vector<8x32xbf16>
    %c64_107 = arith.constant 64 : index
    %c0_108 = arith.constant 0 : index
    %301 = vector.load %arg10[%c64_107, %c0_108] : memref<256x256xbf16, #tpu.memory_space<vmem>>, vector<32x256xbf16>
    %cst_109 = arith.constant dense<0.000000e+00> : vector<8x256xf32>
    %302 = tpu.matmul %300, %301, %cst_109 {dimension_numbers = #tpu.dot_dimension_numbers<[1], [0], [0], [1], [0, 0, 1, 1], [], []>} : vector<8x32xbf16>, vector<32x256xbf16>, vector<8x256xf32> -> vector<8x256xf32>
    %303 = arith.addf %280, %302 : vector<8x256xf32>
    %304 = vector.extract_strided_slice %232 {offsets = [0, 96], sizes = [8, 32], strides = [1, 1]} : vector<8x256xf32> to vector<8x32xf32>
    %305 = arith.truncf %304 : vector<8x32xf32> to vector<8x32xbf16>
    %306 = vector.extract_strided_slice %233 {offsets = [0, 0], sizes = [8, 32], strides = [1, 1]} : vector<8x64xf32> to vector<8x32xf32>
    %307 = arith.truncf %306 : vector<8x32xf32> to vector<8x32xbf16>
    %cst_110 = arith.constant dense<0.000000e+00> : vector<8x8xf32>
    %308 = tpu.matmul %305, %307, %cst_110 {dimension_numbers = #tpu.dot_dimension_numbers<[1], [1], [0], [0], [0, 0, 1, 0], [], []>} : vector<8x32xbf16>, vector<8x32xbf16>, vector<8x8xf32> -> vector<8x8xf32>
    %cst_111 = arith.constant 0.176776692 : f32
    %309 = vector.broadcast %cst_111 : f32 to vector<8x8xf32>
    %310 = arith.mulf %308, %309 : vector<8x8xf32>
    %311 = arith.addf %310, %43 : vector<8x8xf32>
    %cst_112 = arith.constant dense<0xFF800000> : vector<8xf32>
    %312 = vector.multi_reduction <maximumf>, %311, %cst_112 [1] : vector<8x8xf32> to vector<8xf32>
    %313 = vector.shape_cast %312 : vector<8xf32> to vector<8x1xf32>
    %314 = vector.broadcast %313 : vector<8x1xf32> to vector<8x8xf32>
    %315 = arith.subf %311, %314 : vector<8x8xf32>
    %316 = math.exp %315 : vector<8x8xf32>
    %cst_113 = arith.constant dense<0.000000e+00> : vector<8xf32>
    %317 = vector.multi_reduction <add>, %316, %cst_113 [1] : vector<8x8xf32> to vector<8xf32>
    %318 = vector.shape_cast %317 : vector<8xf32> to vector<8x1xf32>
    %319 = vector.broadcast %318 : vector<8x1xf32> to vector<8x8xf32>
    %320 = arith.divf %316, %319 : vector<8x8xf32>
    %321 = arith.truncf %320 : vector<8x8xf32> to vector<8x8xbf16>
    %cst_114 = arith.constant dense<0.000000e+00> : vector<8x32xf32>
    %322 = tpu.matmul %321, %44, %cst_114 {dimension_numbers = #tpu.dot_dimension_numbers<[1], [0], [0], [1], [0, 0, 1, 1], [], []>} : vector<8x8xbf16>, vector<8x32xbf16>, vector<8x32xf32> -> vector<8x32xf32>
    %323 = arith.truncf %322 : vector<8x32xf32> to vector<8x32xbf16>
    %c96_115 = arith.constant 96 : index
    %c0_116 = arith.constant 0 : index
    %324 = vector.load %arg10[%c96_115, %c0_116] : memref<256x256xbf16, #tpu.memory_space<vmem>>, vector<32x256xbf16>
    %cst_117 = arith.constant dense<0.000000e+00> : vector<8x256xf32>
    %325 = tpu.matmul %323, %324, %cst_117 {dimension_numbers = #tpu.dot_dimension_numbers<[1], [0], [0], [1], [0, 0, 1, 1], [], []>} : vector<8x32xbf16>, vector<32x256xbf16>, vector<8x256xf32> -> vector<8x256xf32>
    %326 = arith.addf %303, %325 : vector<8x256xf32>
    %327 = vector.extract_strided_slice %232 {offsets = [0, 128], sizes = [8, 32], strides = [1, 1]} : vector<8x256xf32> to vector<8x32xf32>
    %328 = arith.truncf %327 : vector<8x32xf32> to vector<8x32xbf16>
    %329 = vector.extract_strided_slice %233 {offsets = [0, 32], sizes = [8, 32], strides = [1, 1]} : vector<8x64xf32> to vector<8x32xf32>
    %330 = arith.truncf %329 : vector<8x32xf32> to vector<8x32xbf16>
    %cst_118 = arith.constant dense<0.000000e+00> : vector<8x8xf32>
    %331 = tpu.matmul %328, %330, %cst_118 {dimension_numbers = #tpu.dot_dimension_numbers<[1], [1], [0], [0], [0, 0, 1, 0], [], []>} : vector<8x32xbf16>, vector<8x32xbf16>, vector<8x8xf32> -> vector<8x8xf32>
    %cst_119 = arith.constant 0.176776692 : f32
    %332 = vector.broadcast %cst_119 : f32 to vector<8x8xf32>
    %333 = arith.mulf %331, %332 : vector<8x8xf32>
    %334 = arith.addf %333, %43 : vector<8x8xf32>
    %cst_120 = arith.constant dense<0xFF800000> : vector<8xf32>
    %335 = vector.multi_reduction <maximumf>, %334, %cst_120 [1] : vector<8x8xf32> to vector<8xf32>
    %336 = vector.shape_cast %335 : vector<8xf32> to vector<8x1xf32>
    %337 = vector.broadcast %336 : vector<8x1xf32> to vector<8x8xf32>
    %338 = arith.subf %334, %337 : vector<8x8xf32>
    %339 = math.exp %338 : vector<8x8xf32>
    %cst_121 = arith.constant dense<0.000000e+00> : vector<8xf32>
    %340 = vector.multi_reduction <add>, %339, %cst_121 [1] : vector<8x8xf32> to vector<8xf32>
    %341 = vector.shape_cast %340 : vector<8xf32> to vector<8x1xf32>
    %342 = vector.broadcast %341 : vector<8x1xf32> to vector<8x8xf32>
    %343 = arith.divf %339, %342 : vector<8x8xf32>
    %344 = arith.truncf %343 : vector<8x8xf32> to vector<8x8xbf16>
    %cst_122 = arith.constant dense<0.000000e+00> : vector<8x32xf32>
    %345 = tpu.matmul %344, %44, %cst_122 {dimension_numbers = #tpu.dot_dimension_numbers<[1], [0], [0], [1], [0, 0, 1, 1], [], []>} : vector<8x8xbf16>, vector<8x32xbf16>, vector<8x32xf32> -> vector<8x32xf32>
    %346 = arith.truncf %345 : vector<8x32xf32> to vector<8x32xbf16>
    %c128_123 = arith.constant 128 : index
    %c0_124 = arith.constant 0 : index
    %347 = vector.load %arg10[%c128_123, %c0_124] : memref<256x256xbf16, #tpu.memory_space<vmem>>, vector<32x256xbf16>
    %cst_125 = arith.constant dense<0.000000e+00> : vector<8x256xf32>
    %348 = tpu.matmul %346, %347, %cst_125 {dimension_numbers = #tpu.dot_dimension_numbers<[1], [0], [0], [1], [0, 0, 1, 1], [], []>} : vector<8x32xbf16>, vector<32x256xbf16>, vector<8x256xf32> -> vector<8x256xf32>
    %349 = arith.addf %326, %348 : vector<8x256xf32>
    %350 = vector.extract_strided_slice %232 {offsets = [0, 160], sizes = [8, 32], strides = [1, 1]} : vector<8x256xf32> to vector<8x32xf32>
    %351 = arith.truncf %350 : vector<8x32xf32> to vector<8x32xbf16>
    %352 = vector.extract_strided_slice %233 {offsets = [0, 32], sizes = [8, 32], strides = [1, 1]} : vector<8x64xf32> to vector<8x32xf32>
    %353 = arith.truncf %352 : vector<8x32xf32> to vector<8x32xbf16>
    %cst_126 = arith.constant dense<0.000000e+00> : vector<8x8xf32>
    %354 = tpu.matmul %351, %353, %cst_126 {dimension_numbers = #tpu.dot_dimension_numbers<[1], [1], [0], [0], [0, 0, 1, 0], [], []>} : vector<8x32xbf16>, vector<8x32xbf16>, vector<8x8xf32> -> vector<8x8xf32>
    %cst_127 = arith.constant 0.176776692 : f32
    %355 = vector.broadcast %cst_127 : f32 to vector<8x8xf32>
    %356 = arith.mulf %354, %355 : vector<8x8xf32>
    %357 = arith.addf %356, %43 : vector<8x8xf32>
    %cst_128 = arith.constant dense<0xFF800000> : vector<8xf32>
    %358 = vector.multi_reduction <maximumf>, %357, %cst_128 [1] : vector<8x8xf32> to vector<8xf32>
    %359 = vector.shape_cast %358 : vector<8xf32> to vector<8x1xf32>
    %360 = vector.broadcast %359 : vector<8x1xf32> to vector<8x8xf32>
    %361 = arith.subf %357, %360 : vector<8x8xf32>
    %362 = math.exp %361 : vector<8x8xf32>
    %cst_129 = arith.constant dense<0.000000e+00> : vector<8xf32>
    %363 = vector.multi_reduction <add>, %362, %cst_129 [1] : vector<8x8xf32> to vector<8xf32>
    %364 = vector.shape_cast %363 : vector<8xf32> to vector<8x1xf32>
    %365 = vector.broadcast %364 : vector<8x1xf32> to vector<8x8xf32>
    %366 = arith.divf %362, %365 : vector<8x8xf32>
    %367 = arith.truncf %366 : vector<8x8xf32> to vector<8x8xbf16>
    %cst_130 = arith.constant dense<0.000000e+00> : vector<8x32xf32>
    %368 = tpu.matmul %367, %44, %cst_130 {dimension_numbers = #tpu.dot_dimension_numbers<[1], [0], [0], [1], [0, 0, 1, 1], [], []>} : vector<8x8xbf16>, vector<8x32xbf16>, vector<8x32xf32> -> vector<8x32xf32>
    %369 = arith.truncf %368 : vector<8x32xf32> to vector<8x32xbf16>
    %c160_131 = arith.constant 160 : index
    %c0_132 = arith.constant 0 : index
    %370 = vector.load %arg10[%c160_131, %c0_132] : memref<256x256xbf16, #tpu.memory_space<vmem>>, vector<32x256xbf16>
    %cst_133 = arith.constant dense<0.000000e+00> : vector<8x256xf32>
    %371 = tpu.matmul %369, %370, %cst_133 {dimension_numbers = #tpu.dot_dimension_numbers<[1], [0], [0], [1], [0, 0, 1, 1], [], []>} : vector<8x32xbf16>, vector<32x256xbf16>, vector<8x256xf32> -> vector<8x256xf32>
    %372 = arith.addf %349, %371 : vector<8x256xf32>
    %373 = vector.extract_strided_slice %232 {offsets = [0, 192], sizes = [8, 32], strides = [1, 1]} : vector<8x256xf32> to vector<8x32xf32>
    %374 = arith.truncf %373 : vector<8x32xf32> to vector<8x32xbf16>
    %375 = vector.extract_strided_slice %233 {offsets = [0, 32], sizes = [8, 32], strides = [1, 1]} : vector<8x64xf32> to vector<8x32xf32>
    %376 = arith.truncf %375 : vector<8x32xf32> to vector<8x32xbf16>
    %cst_134 = arith.constant dense<0.000000e+00> : vector<8x8xf32>
    %377 = tpu.matmul %374, %376, %cst_134 {dimension_numbers = #tpu.dot_dimension_numbers<[1], [1], [0], [0], [0, 0, 1, 0], [], []>} : vector<8x32xbf16>, vector<8x32xbf16>, vector<8x8xf32> -> vector<8x8xf32>
    %cst_135 = arith.constant 0.176776692 : f32
    %378 = vector.broadcast %cst_135 : f32 to vector<8x8xf32>
    %379 = arith.mulf %377, %378 : vector<8x8xf32>
    %380 = arith.addf %379, %43 : vector<8x8xf32>
    %cst_136 = arith.constant dense<0xFF800000> : vector<8xf32>
    %381 = vector.multi_reduction <maximumf>, %380, %cst_136 [1] : vector<8x8xf32> to vector<8xf32>
    %382 = vector.shape_cast %381 : vector<8xf32> to vector<8x1xf32>
    %383 = vector.broadcast %382 : vector<8x1xf32> to vector<8x8xf32>
    %384 = arith.subf %380, %383 : vector<8x8xf32>
    %385 = math.exp %384 : vector<8x8xf32>
    %cst_137 = arith.constant dense<0.000000e+00> : vector<8xf32>
    %386 = vector.multi_reduction <add>, %385, %cst_137 [1] : vector<8x8xf32> to vector<8xf32>
    %387 = vector.shape_cast %386 : vector<8xf32> to vector<8x1xf32>
    %388 = vector.broadcast %387 : vector<8x1xf32> to vector<8x8xf32>
    %389 = arith.divf %385, %388 : vector<8x8xf32>
    %390 = arith.truncf %389 : vector<8x8xf32> to vector<8x8xbf16>
    %cst_138 = arith.constant dense<0.000000e+00> : vector<8x32xf32>
    %391 = tpu.matmul %390, %44, %cst_138 {dimension_numbers = #tpu.dot_dimension_numbers<[1], [0], [0], [1], [0, 0, 1, 1], [], []>} : vector<8x8xbf16>, vector<8x32xbf16>, vector<8x32xf32> -> vector<8x32xf32>
    %392 = arith.truncf %391 : vector<8x32xf32> to vector<8x32xbf16>
    %c192_139 = arith.constant 192 : index
    %c0_140 = arith.constant 0 : index
    %393 = vector.load %arg10[%c192_139, %c0_140] : memref<256x256xbf16, #tpu.memory_space<vmem>>, vector<32x256xbf16>
    %cst_141 = arith.constant dense<0.000000e+00> : vector<8x256xf32>
    %394 = tpu.matmul %392, %393, %cst_141 {dimension_numbers = #tpu.dot_dimension_numbers<[1], [0], [0], [1], [0, 0, 1, 1], [], []>} : vector<8x32xbf16>, vector<32x256xbf16>, vector<8x256xf32> -> vector<8x256xf32>
    %395 = arith.addf %372, %394 : vector<8x256xf32>
    %396 = vector.extract_strided_slice %232 {offsets = [0, 224], sizes = [8, 32], strides = [1, 1]} : vector<8x256xf32> to vector<8x32xf32>
    %397 = arith.truncf %396 : vector<8x32xf32> to vector<8x32xbf16>
    %398 = vector.extract_strided_slice %233 {offsets = [0, 32], sizes = [8, 32], strides = [1, 1]} : vector<8x64xf32> to vector<8x32xf32>
    %399 = arith.truncf %398 : vector<8x32xf32> to vector<8x32xbf16>
    %cst_142 = arith.constant dense<0.000000e+00> : vector<8x8xf32>
    %400 = tpu.matmul %397, %399, %cst_142 {dimension_numbers = #tpu.dot_dimension_numbers<[1], [1], [0], [0], [0, 0, 1, 0], [], []>} : vector<8x32xbf16>, vector<8x32xbf16>, vector<8x8xf32> -> vector<8x8xf32>
    %cst_143 = arith.constant 0.176776692 : f32
    %401 = vector.broadcast %cst_143 : f32 to vector<8x8xf32>
    %402 = arith.mulf %400, %401 : vector<8x8xf32>
    %403 = arith.addf %402, %43 : vector<8x8xf32>
    %cst_144 = arith.constant dense<0xFF800000> : vector<8xf32>
    %404 = vector.multi_reduction <maximumf>, %403, %cst_144 [1] : vector<8x8xf32> to vector<8xf32>
    %405 = vector.shape_cast %404 : vector<8xf32> to vector<8x1xf32>
    %406 = vector.broadcast %405 : vector<8x1xf32> to vector<8x8xf32>
    %407 = arith.subf %403, %406 : vector<8x8xf32>
    %408 = math.exp %407 : vector<8x8xf32>
    %cst_145 = arith.constant dense<0.000000e+00> : vector<8xf32>
    %409 = vector.multi_reduction <add>, %408, %cst_145 [1] : vector<8x8xf32> to vector<8xf32>
    %410 = vector.shape_cast %409 : vector<8xf32> to vector<8x1xf32>
    %411 = vector.broadcast %410 : vector<8x1xf32> to vector<8x8xf32>
    %412 = arith.divf %408, %411 : vector<8x8xf32>
    %413 = arith.truncf %412 : vector<8x8xf32> to vector<8x8xbf16>
    %cst_146 = arith.constant dense<0.000000e+00> : vector<8x32xf32>
    %414 = tpu.matmul %413, %44, %cst_146 {dimension_numbers = #tpu.dot_dimension_numbers<[1], [0], [0], [1], [0, 0, 1, 1], [], []>} : vector<8x8xbf16>, vector<8x32xbf16>, vector<8x32xf32> -> vector<8x32xf32>
    %415 = arith.truncf %414 : vector<8x32xf32> to vector<8x32xbf16>
    %c224_147 = arith.constant 224 : index
    %c0_148 = arith.constant 0 : index
    %416 = vector.load %arg10[%c224_147, %c0_148] : memref<256x256xbf16, #tpu.memory_space<vmem>>, vector<32x256xbf16>
    %cst_149 = arith.constant dense<0.000000e+00> : vector<8x256xf32>
    %417 = tpu.matmul %415, %416, %cst_149 {dimension_numbers = #tpu.dot_dimension_numbers<[1], [0], [0], [1], [0, 0, 1, 1], [], []>} : vector<8x32xbf16>, vector<32x256xbf16>, vector<8x256xf32> -> vector<8x256xf32>
    %418 = arith.addf %395, %417 : vector<8x256xf32>
    %419 = tpu.concatenate %231, %418 in 0 : vector<8x256xf32>, vector<8x256xf32> -> vector<16x256xf32>
    %c0_150 = arith.constant 0 : index
    %c0_151 = arith.constant 0 : index
    %420 = vector.load %arg11[%c0_150, %c0_151] : memref<1x256xf32, #tpu.memory_space<vmem>>, vector<1x256xf32>
    %421 = vector.broadcast %420 : vector<1x256xf32> to vector<16x256xf32>
    %422 = arith.addf %419, %421 : vector<16x256xf32>
    %423 = arith.addf %0, %422 : vector<16x256xf32>
    %c0_152 = arith.constant 0 : index
    %c0_153 = arith.constant 0 : index
    %424 = vector.load %arg12[%c0_152, %c0_153] : memref<1x256xf32, #tpu.memory_space<vmem>>, vector<1x256xf32>
    %425 = arith.mulf %423, %423 : vector<16x256xf32>
    %cst_154 = arith.constant dense<0.000000e+00> : vector<16xf32>
    %426 = vector.multi_reduction <add>, %425, %cst_154 [1] : vector<16x256xf32> to vector<16xf32>
    %427 = vector.shape_cast %426 : vector<16xf32> to vector<16x1xf32>
    %cst_155 = arith.constant 2.560000e+02 : f32
    %428 = vector.broadcast %cst_155 : f32 to vector<16x1xf32>
    %429 = arith.divf %427, %428 : vector<16x1xf32>
    %cst_156 = arith.constant 9.99999974E-6 : f32
    %430 = vector.broadcast %cst_156 : f32 to vector<16x1xf32>
    %431 = arith.addf %429, %430 : vector<16x1xf32>
    %432 = math.sqrt %431 : vector<16x1xf32>
    %433 = vector.broadcast %432 : vector<16x1xf32> to vector<16x256xf32>
    %434 = arith.mulf %423, %433 : vector<16x256xf32>
    %435 = vector.broadcast %424 : vector<1x256xf32> to vector<16x256xf32>
    %436 = arith.mulf %434, %435 : vector<16x256xf32>
    %437 = arith.truncf %436 : vector<16x256xf32> to vector<16x256xbf16>
    %c0_157 = arith.constant 0 : index
    %c0_158 = arith.constant 0 : index
    %438 = vector.load %arg13[%c0_157, %c0_158] : memref<256x512xbf16, #tpu.memory_space<vmem>>, vector<256x512xbf16>
    %cst_159 = arith.constant dense<0.000000e+00> : vector<16x512xf32>
    %439 = tpu.matmul %437, %438, %cst_159 {dimension_numbers = #tpu.dot_dimension_numbers<[1], [0], [0], [1], [0, 0, 1, 1], [], []>} : vector<16x256xbf16>, vector<256x512xbf16>, vector<16x512xf32> -> vector<16x512xf32>
    %c0_160 = arith.constant 0 : index
    %c0_161 = arith.constant 0 : index
    %440 = vector.load %arg14[%c0_160, %c0_161] : memref<256x512xbf16, #tpu.memory_space<vmem>>, vector<256x512xbf16>
    %cst_162 = arith.constant dense<0.000000e+00> : vector<16x512xf32>
    %441 = tpu.matmul %437, %440, %cst_162 {dimension_numbers = #tpu.dot_dimension_numbers<[1], [0], [0], [1], [0, 0, 1, 1], [], []>} : vector<16x256xbf16>, vector<256x512xbf16>, vector<16x512xf32> -> vector<16x512xf32>
    %442 = arith.negf %439 : vector<16x512xf32>
    %443 = math.exp %442 : vector<16x512xf32>
    %cst_163 = arith.constant 1.000000e+00 : f32
    %444 = vector.broadcast %cst_163 : f32 to vector<16x512xf32>
    %445 = arith.addf %444, %443 : vector<16x512xf32>
    %446 = arith.divf %444, %445 : vector<16x512xf32>
    %447 = arith.mulf %439, %446 : vector<16x512xf32>
    %448 = arith.mulf %447, %441 : vector<16x512xf32>
    %449 = arith.truncf %448 : vector<16x512xf32> to vector<16x512xbf16>
    %c0_164 = arith.constant 0 : index
    %c0_165 = arith.constant 0 : index
    %450 = vector.load %arg15[%c0_164, %c0_165] : memref<512x256xbf16, #tpu.memory_space<vmem>>, vector<512x256xbf16>
    %cst_166 = arith.constant dense<0.000000e+00> : vector<16x256xf32>
    %451 = tpu.matmul %449, %450, %cst_166 {dimension_numbers = #tpu.dot_dimension_numbers<[1], [0], [0], [1], [0, 0, 1, 1], [], []>} : vector<16x512xbf16>, vector<512x256xbf16>, vector<16x256xf32> -> vector<16x256xf32>
    %452 = arith.addf %423, %451 : vector<16x256xf32>
    %c0_167 = arith.constant 0 : index
    %c0_168 = arith.constant 0 : index
    %453 = vector.load %arg16[%c0_167, %c0_168] : memref<16x256xf32, #tpu.memory_space<vmem>>, vector<16x256xf32>
    tpu.vector_store %arg16[%c0_167, %c0_168], %452 {strides = array<i32>} : memref<16x256xf32, #tpu.memory_space<vmem>>, vector<16x256xf32>,
    return
  }
}

module attributes {stable_mosaic.version = 11 : i64} {
  func.func @_block_kernel(%arg0: memref<16x256xf32, #tpu.memory_space<vmem>>, %arg1: memref<16x256xf32, #tpu.memory_space<vmem>>, %arg2: memref<16x256xf32, #tpu.memory_space<vmem>>, %arg3: memref<1x256xf32, #tpu.memory_space<vmem>>, %arg4: memref<256x256xbf16, #tpu.memory_space<vmem>>, %arg5: memref<1x256xf32, #tpu.memory_space<vmem>>, %arg6: memref<256x256xbf16, #tpu.memory_space<vmem>>, %arg7: memref<1x256xf32, #tpu.memory_space<vmem>>, %arg8: memref<256x128xbf16, #tpu.memory_space<vmem>>, %arg9: memref<1x128xf32, #tpu.memory_space<vmem>>, %arg10: memref<256x256xbf16, #tpu.memory_space<vmem>>, %arg11: memref<1x256xf32, #tpu.memory_space<vmem>>, %arg12: memref<1x256xf32, #tpu.memory_space<vmem>>, %arg13: memref<256x512xbf16, #tpu.memory_space<vmem>>, %arg14: memref<256x512xbf16, #tpu.memory_space<vmem>>, %arg15: memref<512x256xbf16, #tpu.memory_space<vmem>>, %arg16: memref<16x256xf32, #tpu.memory_space<vmem>>) attributes {dimension_semantics = [], scalar_prefetch = 0 : i64, scratch_operands = 0 : i64, tpu.core_type = #tpu.core_type<tc>} {
    %c0 = arith.constant 0 : index
    %c0_0 = arith.constant 0 : index
    %0 = vector.load %arg0[%c0, %c0_0] : memref<16x256xf32, #tpu.memory_space<vmem>>, vector<16x256xf32>
    %c0_1 = arith.constant 0 : index
    %c0_2 = arith.constant 0 : index
    %1 = vector.load %arg3[%c0_1, %c0_2] : memref<1x256xf32, #tpu.memory_space<vmem>>, vector<1x256xf32>
    %2 = arith.mulf %0, %0 : vector<16x256xf32>
    %cst = arith.constant dense<0.000000e+00> : vector<16xf32>
    %3 = vector.multi_reduction <add>, %2, %cst [1] : vector<16x256xf32> to vector<16xf32>
    %4 = vector.shape_cast %3 : vector<16xf32> to vector<16x1xf32>
    %cst_3 = arith.constant 2.560000e+02 : f32
    %5 = vector.broadcast %cst_3 : f32 to vector<16x1xf32>
    %6 = arith.divf %4, %5 : vector<16x1xf32>
    %cst_4 = arith.constant 9.99999974E-6 : f32
    %7 = vector.broadcast %cst_4 : f32 to vector<16x1xf32>
    %8 = arith.addf %6, %7 : vector<16x1xf32>
    %9 = math.sqrt %8 : vector<16x1xf32>
    %10 = vector.broadcast %9 : vector<16x1xf32> to vector<16x256xf32>
    %11 = arith.mulf %0, %10 : vector<16x256xf32>
    %12 = vector.broadcast %1 : vector<1x256xf32> to vector<16x256xf32>
    %13 = arith.mulf %11, %12 : vector<16x256xf32>
    %14 = arith.truncf %13 : vector<16x256xf32> to vector<16x256xbf16>
    %c0_5 = arith.constant 0 : index
    %c0_6 = arith.constant 0 : index
    %15 = vector.load %arg4[%c0_5, %c0_6] : memref<256x256xbf16, #tpu.memory_space<vmem>>, vector<256x256xbf16>
    %cst_7 = arith.constant dense<0.000000e+00> : vector<16x256xf32>
    %16 = tpu.matmul %14, %15, %cst_7 {dimension_numbers = #tpu.dot_dimension_numbers<[1], [0], [0], [1], [0, 0, 1, 1], [], []>} : vector<16x256xbf16>, vector<256x256xbf16>, vector<16x256xf32> -> vector<16x256xf32>
    %c0_8 = arith.constant 0 : index
    %c0_9 = arith.constant 0 : index
    %17 = vector.load %arg5[%c0_8, %c0_9] : memref<1x256xf32, #tpu.memory_space<vmem>>, vector<1x256xf32>
    %18 = vector.broadcast %17 : vector<1x256xf32> to vector<16x256xf32>
    %19 = arith.addf %16, %18 : vector<16x256xf32>
    %c0_10 = arith.constant 0 : index
    %c0_11 = arith.constant 0 : index
    %20 = vector.load %arg6[%c0_10, %c0_11] : memref<256x256xbf16, #tpu.memory_space<vmem>>, vector<256x256xbf16>
    %cst_12 = arith.constant dense<0.000000e+00> : vector<16x256xf32>
    %21 = tpu.matmul %14, %20, %cst_12 {dimension_numbers = #tpu.dot_dimension_numbers<[1], [0], [0], [1], [0, 0, 1, 1], [], []>} : vector<16x256xbf16>, vector<256x256xbf16>, vector<16x256xf32> -> vector<16x256xf32>
    %c0_13 = arith.constant 0 : index
    %c0_14 = arith.constant 0 : index
    %22 = vector.load %arg7[%c0_13, %c0_14] : memref<1x256xf32, #tpu.memory_space<vmem>>, vector<1x256xf32>
    %23 = vector.broadcast %22 : vector<1x256xf32> to vector<16x256xf32>
    %24 = arith.addf %21, %23 : vector<16x256xf32>
    %c0_15 = arith.constant 0 : index
    %c0_16 = arith.constant 0 : index
    %25 = vector.load %arg1[%c0_15, %c0_16] : memref<16x256xf32, #tpu.memory_space<vmem>>, vector<16x256xf32>
    %26 = arith.mulf %19, %25 : vector<16x256xf32>
    %c0_17 = arith.constant 0 : index
    %c0_18 = arith.constant 0 : index
    %27 = vector.load %arg2[%c0_17, %c0_18] : memref<16x256xf32, #tpu.memory_space<vmem>>, vector<16x256xf32>
    %28 = arith.mulf %24, %27 : vector<16x256xf32>
    %29 = arith.addf %26, %28 : vector<16x256xf32>
    %c0_19 = arith.constant 0 : index
    %c0_20 = arith.constant 0 : index
    %30 = vector.load %arg8[%c0_19, %c0_20] : memref<256x128xbf16, #tpu.memory_space<vmem>>, vector<256x128xbf16>
    %cst_21 = arith.constant dense<0.000000e+00> : vector<16x128xf32>
    %31 = tpu.matmul %14, %30, %cst_21 {dimension_numbers = #tpu.dot_dimension_numbers<[1], [0], [0], [1], [0, 0, 1, 1], [], []>} : vector<16x256xbf16>, vector<256x128xbf16>, vector<16x128xf32> -> vector<16x128xf32>
    %c0_22 = arith.constant 0 : index
    %c0_23 = arith.constant 0 : index
    %32 = vector.load %arg9[%c0_22, %c0_23] : memref<1x128xf32, #tpu.memory_space<vmem>>, vector<1x128xf32>
    %33 = vector.broadcast %32 : vector<1x128xf32> to vector<16x128xf32>
    %34 = arith.addf %31, %33 : vector<16x128xf32>
    %35 = vector.extract_strided_slice %34 {offsets = [0, 64], sizes = [16, 64], strides = [1, 1]} : vector<16x128xf32> to vector<16x64xf32>
    %36 = tpu.iota {dimensions = array<i32: 0>} : vector<8x8xi32>
    %37 = tpu.iota {dimensions = array<i32: 1>} : vector<8x8xi32>
    %c0_i32 = arith.constant 0 : i32
    %38 = vector.broadcast %c0_i32 : i32 to vector<8x8xi32>
    %39 = arith.addi %36, %38 : vector<8x8xi32>
    %40 = arith.cmpi sle, %37, %39 : vector<8x8xi32>
    %cst_24 = arith.constant 0.000000e+00 : f32
    %cst_25 = arith.constant 0xFF800000 : f32
    %41 = vector.broadcast %cst_24 : f32 to vector<8x8xf32>
    %42 = vector.broadcast %cst_25 : f32 to vector<8x8xf32>
    %43 = arith.select %40, %41, %42 : vector<8x8xi1>, vector<8x8xf32>
    %cst_26 = arith.constant 0.000000e+00 : bf16
    %44 = vector.broadcast %cst_26 : bf16 to vector<8x32xbf16>
    %45 = vector.extract_strided_slice %29 {offsets = [0, 0], sizes = [8, 256], strides = [1, 1]} : vector<16x256xf32> to vector<8x256xf32>
    %46 = vector.extract_strided_slice %35 {offsets = [0, 0], sizes = [8, 64], strides = [1, 1]} : vector<16x64xf32> to vector<8x64xf32>
    %cst_27 = arith.constant 0.000000e+00 : f32
    %47 = vector.broadcast %cst_27 : f32 to vector<8x256xf32>
    %48 = vector.extract_strided_slice %45 {offsets = [0, 0], sizes = [8, 32], strides = [1, 1]} : vector<8x256xf32> to vector<8x32xf32>
    %49 = arith.truncf %48 : vector<8x32xf32> to vector<8x32xbf16>
    %50 = vector.extract_strided_slice %46 {offsets = [0, 0], sizes = [8, 32], strides = [1, 1]} : vector<8x64xf32> to vector<8x32xf32>
    %51 = arith.truncf %50 : vector<8x32xf32> to vector<8x32xbf16>
    %cst_28 = arith.constant dense<0.000000e+00> : vector<8x8xf32>
    %52 = tpu.matmul %49, %51, %cst_28 {dimension_numbers = #tpu.dot_dimension_numbers<[1], [1], [0], [0], [0, 0, 1, 0], [], []>} : vector<8x32xbf16>, vector<8x32xbf16>, vector<8x8xf32> -> vector<8x8xf32>
    %cst_29 = arith.constant 0.176776692 : f32
    %53 = vector.broadcast %cst_29 : f32 to vector<8x8xf32>
    %54 = arith.mulf %52, %53 : vector<8x8xf32>
    %55 = arith.addf %54, %43 : vector<8x8xf32>
    %cst_30 = arith.constant dense<0xFF800000> : vector<8xf32>
    %56 = vector.multi_reduction <maximumf>, %55, %cst_30 [1] : vector<8x8xf32> to vector<8xf32>
    %57 = vector.shape_cast %56 : vector<8xf32> to vector<8x1xf32>
    %58 = vector.broadcast %57 : vector<8x1xf32> to vector<8x8xf32>
    %59 = arith.subf %55, %58 : vector<8x8xf32>
    %60 = math.exp %59 : vector<8x8xf32>
    %cst_31 = arith.constant dense<0.000000e+00> : vector<8xf32>
    %61 = vector.multi_reduction <add>, %60, %cst_31 [1] : vector<8x8xf32> to vector<8xf32>
    %62 = vector.shape_cast %61 : vector<8xf32> to vector<8x1xf32>
    %63 = vector.broadcast %62 : vector<8x1xf32> to vector<8x8xf32>
    %64 = arith.divf %60, %63 : vector<8x8xf32>
    %65 = arith.truncf %64 : vector<8x8xf32> to vector<8x8xbf16>
    %cst_32 = arith.constant dense<0.000000e+00> : vector<8x32xf32>
    %66 = tpu.matmul %65, %44, %cst_32 {dimension_numbers = #tpu.dot_dimension_numbers<[1], [0], [0], [1], [0, 0, 1, 1], [], []>} : vector<8x8xbf16>, vector<8x32xbf16>, vector<8x32xf32> -> vector<8x32xf32>
    %67 = arith.truncf %66 : vector<8x32xf32> to vector<8x32xbf16>
    %c0_33 = arith.constant 0 : index
    %c0_34 = arith.constant 0 : index
    %68 = vector.load %arg10[%c0_33, %c0_34] : memref<256x256xbf16, #tpu.memory_space<vmem>>, vector<32x256xbf16>
    %cst_35 = arith.constant dense<0.000000e+00> : vector<8x256xf32>
    %69 = tpu.matmul %67, %68, %cst_35 {dimension_numbers = #tpu.dot_dimension_numbers<[1], [0], [0], [1], [0, 0, 1, 1], [], []>} : vector<8x32xbf16>, vector<32x256xbf16>, vector<8x256xf32> -> vector<8x256xf32>
    %70 = arith.addf %47, %69 : vector<8x256xf32>
    %71 = vector.extract_strided_slice %45 {offsets = [0, 32], sizes = [8, 32], strides = [1, 1]} : vector<8x256xf32> to vector<8x32xf32>
    %72 = arith.truncf %71 : vector<8x32xf32> to vector<8x32xbf16>
    %73 = vector.extract_strided_slice %46 {offsets = [0, 0], sizes = [8, 32], strides = [1, 1]} : vector<8x64xf32> to vector<8x32xf32>
    %74 = arith.truncf %73 : vector<8x32xf32> to vector<8x32xbf16>
    %cst_36 = arith.constant dense<0.000000e+00> : vector<8x8xf32>
    %75 = tpu.matmul %72, %74, %cst_36 {dimension_numbers = #tpu.dot_dimension_numbers<[1], [1], [0], [0], [0, 0, 1, 0], [], []>} : vector<8x32xbf16>, vector<8x32xbf16>, vector<8x8xf32> -> vector<8x8xf32>
    %cst_37 = arith.constant 0.176776692 : f32
    %76 = vector.broadcast %cst_37 : f32 to vector<8x8xf32>
    %77 = arith.mulf %75, %76 : vector<8x8xf32>
    %78 = arith.addf %77, %43 : vector<8x8xf32>
    %cst_38 = arith.constant dense<0xFF800000> : vector<8xf32>
    %79 = vector.multi_reduction <maximumf>, %78, %cst_38 [1] : vector<8x8xf32> to vector<8xf32>
    %80 = vector.shape_cast %79 : vector<8xf32> to vector<8x1xf32>
    %81 = vector.broadcast %80 : vector<8x1xf32> to vector<8x8xf32>
    %82 = arith.subf %78, %81 : vector<8x8xf32>
    %83 = math.exp %82 : vector<8x8xf32>
    %cst_39 = arith.constant dense<0.000000e+00> : vector<8xf32>
    %84 = vector.multi_reduction <add>, %83, %cst_39 [1] : vector<8x8xf32> to vector<8xf32>
    %85 = vector.shape_cast %84 : vector<8xf32> to vector<8x1xf32>
    %86 = vector.broadcast %85 : vector<8x1xf32> to vector<8x8xf32>
    %87 = arith.divf %83, %86 : vector<8x8xf32>
    %88 = arith.truncf %87 : vector<8x8xf32> to vector<8x8xbf16>
    %cst_40 = arith.constant dense<0.000000e+00> : vector<8x32xf32>
    %89 = tpu.matmul %88, %44, %cst_40 {dimension_numbers = #tpu.dot_dimension_numbers<[1], [0], [0], [1], [0, 0, 1, 1], [], []>} : vector<8x8xbf16>, vector<8x32xbf16>, vector<8x32xf32> -> vector<8x32xf32>
    %90 = arith.truncf %89 : vector<8x32xf32> to vector<8x32xbf16>
    %c32 = arith.constant 32 : index
    %c0_41 = arith.constant 0 : index
    %91 = vector.load %arg10[%c32, %c0_41] : memref<256x256xbf16, #tpu.memory_space<vmem>>, vector<32x256xbf16>
    %cst_42 = arith.constant dense<0.000000e+00> : vector<8x256xf32>
    %92 = tpu.matmul %90, %91, %cst_42 {dimension_numbers = #tpu.dot_dimension_numbers<[1], [0], [0], [1], [0, 0, 1, 1], [], []>} : vector<8x32xbf16>, vector<32x256xbf16>, vector<8x256xf32> -> vector<8x256xf32>
    %93 = arith.addf %70, %92 : vector<8x256xf32>
    %94 = vector.extract_strided_slice %45 {offsets = [0, 64], sizes = [8, 32], strides = [1, 1]} : vector<8x256xf32> to vector<8x32xf32>
    %95 = arith.truncf %94 : vector<8x32xf32> to vector<8x32xbf16>
    %96 = vector.extract_strided_slice %46 {offsets = [0, 0], sizes = [8, 32], strides = [1, 1]} : vector<8x64xf32> to vector<8x32xf32>
    %97 = arith.truncf %96 : vector<8x32xf32> to vector<8x32xbf16>
    %cst_43 = arith.constant dense<0.000000e+00> : vector<8x8xf32>
    %98 = tpu.matmul %95, %97, %cst_43 {dimension_numbers = #tpu.dot_dimension_numbers<[1], [1], [0], [0], [0, 0, 1, 0], [], []>} : vector<8x32xbf16>, vector<8x32xbf16>, vector<8x8xf32> -> vector<8x8xf32>
    %cst_44 = arith.constant 0.176776692 : f32
    %99 = vector.broadcast %cst_44 : f32 to vector<8x8xf32>
    %100 = arith.mulf %98, %99 : vector<8x8xf32>
    %101 = arith.addf %100, %43 : vector<8x8xf32>
    %cst_45 = arith.constant dense<0xFF800000> : vector<8xf32>
    %102 = vector.multi_reduction <maximumf>, %101, %cst_45 [1] : vector<8x8xf32> to vector<8xf32>
    %103 = vector.shape_cast %102 : vector<8xf32> to vector<8x1xf32>
    %104 = vector.broadcast %103 : vector<8x1xf32> to vector<8x8xf32>
    %105 = arith.subf %101, %104 : vector<8x8xf32>
    %106 = math.exp %105 : vector<8x8xf32>
    %cst_46 = arith.constant dense<0.000000e+00> : vector<8xf32>
    %107 = vector.multi_reduction <add>, %106, %cst_46 [1] : vector<8x8xf32> to vector<8xf32>
    %108 = vector.shape_cast %107 : vector<8xf32> to vector<8x1xf32>
    %109 = vector.broadcast %108 : vector<8x1xf32> to vector<8x8xf32>
    %110 = arith.divf %106, %109 : vector<8x8xf32>
    %111 = arith.truncf %110 : vector<8x8xf32> to vector<8x8xbf16>
    %cst_47 = arith.constant dense<0.000000e+00> : vector<8x32xf32>
    %112 = tpu.matmul %111, %44, %cst_47 {dimension_numbers = #tpu.dot_dimension_numbers<[1], [0], [0], [1], [0, 0, 1, 1], [], []>} : vector<8x8xbf16>, vector<8x32xbf16>, vector<8x32xf32> -> vector<8x32xf32>
    %113 = arith.truncf %112 : vector<8x32xf32> to vector<8x32xbf16>
    %c64 = arith.constant 64 : index
    %c0_48 = arith.constant 0 : index
    %114 = vector.load %arg10[%c64, %c0_48] : memref<256x256xbf16, #tpu.memory_space<vmem>>, vector<32x256xbf16>
    %cst_49 = arith.constant dense<0.000000e+00> : vector<8x256xf32>
    %115 = tpu.matmul %113, %114, %cst_49 {dimension_numbers = #tpu.dot_dimension_numbers<[1], [0], [0], [1], [0, 0, 1, 1], [], []>} : vector<8x32xbf16>, vector<32x256xbf16>, vector<8x256xf32> -> vector<8x256xf32>
    %116 = arith.addf %93, %115 : vector<8x256xf32>
    %117 = vector.extract_strided_slice %45 {offsets = [0, 96], sizes = [8, 32], strides = [1, 1]} : vector<8x256xf32> to vector<8x32xf32>
    %118 = arith.truncf %117 : vector<8x32xf32> to vector<8x32xbf16>
    %119 = vector.extract_strided_slice %46 {offsets = [0, 0], sizes = [8, 32], strides = [1, 1]} : vector<8x64xf32> to vector<8x32xf32>
    %120 = arith.truncf %119 : vector<8x32xf32> to vector<8x32xbf16>
    %cst_50 = arith.constant dense<0.000000e+00> : vector<8x8xf32>
    %121 = tpu.matmul %118, %120, %cst_50 {dimension_numbers = #tpu.dot_dimension_numbers<[1], [1], [0], [0], [0, 0, 1, 0], [], []>} : vector<8x32xbf16>, vector<8x32xbf16>, vector<8x8xf32> -> vector<8x8xf32>
    %cst_51 = arith.constant 0.176776692 : f32
    %122 = vector.broadcast %cst_51 : f32 to vector<8x8xf32>
    %123 = arith.mulf %121, %122 : vector<8x8xf32>
    %124 = arith.addf %123, %43 : vector<8x8xf32>
    %cst_52 = arith.constant dense<0xFF800000> : vector<8xf32>
    %125 = vector.multi_reduction <maximumf>, %124, %cst_52 [1] : vector<8x8xf32> to vector<8xf32>
    %126 = vector.shape_cast %125 : vector<8xf32> to vector<8x1xf32>
    %127 = vector.broadcast %126 : vector<8x1xf32> to vector<8x8xf32>
    %128 = arith.subf %124, %127 : vector<8x8xf32>
    %129 = math.exp %128 : vector<8x8xf32>
    %cst_53 = arith.constant dense<0.000000e+00> : vector<8xf32>
    %130 = vector.multi_reduction <add>, %129, %cst_53 [1] : vector<8x8xf32> to vector<8xf32>
    %131 = vector.shape_cast %130 : vector<8xf32> to vector<8x1xf32>
    %132 = vector.broadcast %131 : vector<8x1xf32> to vector<8x8xf32>
    %133 = arith.divf %129, %132 : vector<8x8xf32>
    %134 = arith.truncf %133 : vector<8x8xf32> to vector<8x8xbf16>
    %cst_54 = arith.constant dense<0.000000e+00> : vector<8x32xf32>
    %135 = tpu.matmul %134, %44, %cst_54 {dimension_numbers = #tpu.dot_dimension_numbers<[1], [0], [0], [1], [0, 0, 1, 1], [], []>} : vector<8x8xbf16>, vector<8x32xbf16>, vector<8x32xf32> -> vector<8x32xf32>
    %136 = arith.truncf %135 : vector<8x32xf32> to vector<8x32xbf16>
    %c96 = arith.constant 96 : index
    %c0_55 = arith.constant 0 : index
    %137 = vector.load %arg10[%c96, %c0_55] : memref<256x256xbf16, #tpu.memory_space<vmem>>, vector<32x256xbf16>
    %cst_56 = arith.constant dense<0.000000e+00> : vector<8x256xf32>
    %138 = tpu.matmul %136, %137, %cst_56 {dimension_numbers = #tpu.dot_dimension_numbers<[1], [0], [0], [1], [0, 0, 1, 1], [], []>} : vector<8x32xbf16>, vector<32x256xbf16>, vector<8x256xf32> -> vector<8x256xf32>
    %139 = arith.addf %116, %138 : vector<8x256xf32>
    %140 = vector.extract_strided_slice %45 {offsets = [0, 128], sizes = [8, 32], strides = [1, 1]} : vector<8x256xf32> to vector<8x32xf32>
    %141 = arith.truncf %140 : vector<8x32xf32> to vector<8x32xbf16>
    %142 = vector.extract_strided_slice %46 {offsets = [0, 32], sizes = [8, 32], strides = [1, 1]} : vector<8x64xf32> to vector<8x32xf32>
    %143 = arith.truncf %142 : vector<8x32xf32> to vector<8x32xbf16>
    %cst_57 = arith.constant dense<0.000000e+00> : vector<8x8xf32>
    %144 = tpu.matmul %141, %143, %cst_57 {dimension_numbers = #tpu.dot_dimension_numbers<[1], [1], [0], [0], [0, 0, 1, 0], [], []>} : vector<8x32xbf16>, vector<8x32xbf16>, vector<8x8xf32> -> vector<8x8xf32>
    %cst_58 = arith.constant 0.176776692 : f32
    %145 = vector.broadcast %cst_58 : f32 to vector<8x8xf32>
    %146 = arith.mulf %144, %145 : vector<8x8xf32>
    %147 = arith.addf %146, %43 : vector<8x8xf32>
    %cst_59 = arith.constant dense<0xFF800000> : vector<8xf32>
    %148 = vector.multi_reduction <maximumf>, %147, %cst_59 [1] : vector<8x8xf32> to vector<8xf32>
    %149 = vector.shape_cast %148 : vector<8xf32> to vector<8x1xf32>
    %150 = vector.broadcast %149 : vector<8x1xf32> to vector<8x8xf32>
    %151 = arith.subf %147, %150 : vector<8x8xf32>
    %152 = math.exp %151 : vector<8x8xf32>
    %cst_60 = arith.constant dense<0.000000e+00> : vector<8xf32>
    %153 = vector.multi_reduction <add>, %152, %cst_60 [1] : vector<8x8xf32> to vector<8xf32>
    %154 = vector.shape_cast %153 : vector<8xf32> to vector<8x1xf32>
    %155 = vector.broadcast %154 : vector<8x1xf32> to vector<8x8xf32>
    %156 = arith.divf %152, %155 : vector<8x8xf32>
    %157 = arith.truncf %156 : vector<8x8xf32> to vector<8x8xbf16>
    %cst_61 = arith.constant dense<0.000000e+00> : vector<8x32xf32>
    %158 = tpu.matmul %157, %44, %cst_61 {dimension_numbers = #tpu.dot_dimension_numbers<[1], [0], [0], [1], [0, 0, 1, 1], [], []>} : vector<8x8xbf16>, vector<8x32xbf16>, vector<8x32xf32> -> vector<8x32xf32>
    %159 = arith.truncf %158 : vector<8x32xf32> to vector<8x32xbf16>
    %c128 = arith.constant 128 : index
    %c0_62 = arith.constant 0 : index
    %160 = vector.load %arg10[%c128, %c0_62] : memref<256x256xbf16, #tpu.memory_space<vmem>>, vector<32x256xbf16>
    %cst_63 = arith.constant dense<0.000000e+00> : vector<8x256xf32>
    %161 = tpu.matmul %159, %160, %cst_63 {dimension_numbers = #tpu.dot_dimension_numbers<[1], [0], [0], [1], [0, 0, 1, 1], [], []>} : vector<8x32xbf16>, vector<32x256xbf16>, vector<8x256xf32> -> vector<8x256xf32>
    %162 = arith.addf %139, %161 : vector<8x256xf32>
    %163 = vector.extract_strided_slice %45 {offsets = [0, 160], sizes = [8, 32], strides = [1, 1]} : vector<8x256xf32> to vector<8x32xf32>
    %164 = arith.truncf %163 : vector<8x32xf32> to vector<8x32xbf16>
    %165 = vector.extract_strided_slice %46 {offsets = [0, 32], sizes = [8, 32], strides = [1, 1]} : vector<8x64xf32> to vector<8x32xf32>
    %166 = arith.truncf %165 : vector<8x32xf32> to vector<8x32xbf16>
    %cst_64 = arith.constant dense<0.000000e+00> : vector<8x8xf32>
    %167 = tpu.matmul %164, %166, %cst_64 {dimension_numbers = #tpu.dot_dimension_numbers<[1], [1], [0], [0], [0, 0, 1, 0], [], []>} : vector<8x32xbf16>, vector<8x32xbf16>, vector<8x8xf32> -> vector<8x8xf32>
    %cst_65 = arith.constant 0.176776692 : f32
    %168 = vector.broadcast %cst_65 : f32 to vector<8x8xf32>
    %169 = arith.mulf %167, %168 : vector<8x8xf32>
    %170 = arith.addf %169, %43 : vector<8x8xf32>
    %cst_66 = arith.constant dense<0xFF800000> : vector<8xf32>
    %171 = vector.multi_reduction <maximumf>, %170, %cst_66 [1] : vector<8x8xf32> to vector<8xf32>
    %172 = vector.shape_cast %171 : vector<8xf32> to vector<8x1xf32>
    %173 = vector.broadcast %172 : vector<8x1xf32> to vector<8x8xf32>
    %174 = arith.subf %170, %173 : vector<8x8xf32>
    %175 = math.exp %174 : vector<8x8xf32>
    %cst_67 = arith.constant dense<0.000000e+00> : vector<8xf32>
    %176 = vector.multi_reduction <add>, %175, %cst_67 [1] : vector<8x8xf32> to vector<8xf32>
    %177 = vector.shape_cast %176 : vector<8xf32> to vector<8x1xf32>
    %178 = vector.broadcast %177 : vector<8x1xf32> to vector<8x8xf32>
    %179 = arith.divf %175, %178 : vector<8x8xf32>
    %180 = arith.truncf %179 : vector<8x8xf32> to vector<8x8xbf16>
    %cst_68 = arith.constant dense<0.000000e+00> : vector<8x32xf32>
    %181 = tpu.matmul %180, %44, %cst_68 {dimension_numbers = #tpu.dot_dimension_numbers<[1], [0], [0], [1], [0, 0, 1, 1], [], []>} : vector<8x8xbf16>, vector<8x32xbf16>, vector<8x32xf32> -> vector<8x32xf32>
    %182 = arith.truncf %181 : vector<8x32xf32> to vector<8x32xbf16>
    %c160 = arith.constant 160 : index
    %c0_69 = arith.constant 0 : index
    %183 = vector.load %arg10[%c160, %c0_69] : memref<256x256xbf16, #tpu.memory_space<vmem>>, vector<32x256xbf16>
    %cst_70 = arith.constant dense<0.000000e+00> : vector<8x256xf32>
    %184 = tpu.matmul %182, %183, %cst_70 {dimension_numbers = #tpu.dot_dimension_numbers<[1], [0], [0], [1], [0, 0, 1, 1], [], []>} : vector<8x32xbf16>, vector<32x256xbf16>, vector<8x256xf32> -> vector<8x256xf32>
    %185 = arith.addf %162, %184 : vector<8x256xf32>
    %186 = vector.extract_strided_slice %45 {offsets = [0, 192], sizes = [8, 32], strides = [1, 1]} : vector<8x256xf32> to vector<8x32xf32>
    %187 = arith.truncf %186 : vector<8x32xf32> to vector<8x32xbf16>
    %188 = vector.extract_strided_slice %46 {offsets = [0, 32], sizes = [8, 32], strides = [1, 1]} : vector<8x64xf32> to vector<8x32xf32>
    %189 = arith.truncf %188 : vector<8x32xf32> to vector<8x32xbf16>
    %cst_71 = arith.constant dense<0.000000e+00> : vector<8x8xf32>
    %190 = tpu.matmul %187, %189, %cst_71 {dimension_numbers = #tpu.dot_dimension_numbers<[1], [1], [0], [0], [0, 0, 1, 0], [], []>} : vector<8x32xbf16>, vector<8x32xbf16>, vector<8x8xf32> -> vector<8x8xf32>
    %cst_72 = arith.constant 0.176776692 : f32
    %191 = vector.broadcast %cst_72 : f32 to vector<8x8xf32>
    %192 = arith.mulf %190, %191 : vector<8x8xf32>
    %193 = arith.addf %192, %43 : vector<8x8xf32>
    %cst_73 = arith.constant dense<0xFF800000> : vector<8xf32>
    %194 = vector.multi_reduction <maximumf>, %193, %cst_73 [1] : vector<8x8xf32> to vector<8xf32>
    %195 = vector.shape_cast %194 : vector<8xf32> to vector<8x1xf32>
    %196 = vector.broadcast %195 : vector<8x1xf32> to vector<8x8xf32>
    %197 = arith.subf %193, %196 : vector<8x8xf32>
    %198 = math.exp %197 : vector<8x8xf32>
    %cst_74 = arith.constant dense<0.000000e+00> : vector<8xf32>
    %199 = vector.multi_reduction <add>, %198, %cst_74 [1] : vector<8x8xf32> to vector<8xf32>
    %200 = vector.shape_cast %199 : vector<8xf32> to vector<8x1xf32>
    %201 = vector.broadcast %200 : vector<8x1xf32> to vector<8x8xf32>
    %202 = arith.divf %198, %201 : vector<8x8xf32>
    %203 = arith.truncf %202 : vector<8x8xf32> to vector<8x8xbf16>
    %cst_75 = arith.constant dense<0.000000e+00> : vector<8x32xf32>
    %204 = tpu.matmul %203, %44, %cst_75 {dimension_numbers = #tpu.dot_dimension_numbers<[1], [0], [0], [1], [0, 0, 1, 1], [], []>} : vector<8x8xbf16>, vector<8x32xbf16>, vector<8x32xf32> -> vector<8x32xf32>
    %205 = arith.truncf %204 : vector<8x32xf32> to vector<8x32xbf16>
    %c192 = arith.constant 192 : index
    %c0_76 = arith.constant 0 : index
    %206 = vector.load %arg10[%c192, %c0_76] : memref<256x256xbf16, #tpu.memory_space<vmem>>, vector<32x256xbf16>
    %cst_77 = arith.constant dense<0.000000e+00> : vector<8x256xf32>
    %207 = tpu.matmul %205, %206, %cst_77 {dimension_numbers = #tpu.dot_dimension_numbers<[1], [0], [0], [1], [0, 0, 1, 1], [], []>} : vector<8x32xbf16>, vector<32x256xbf16>, vector<8x256xf32> -> vector<8x256xf32>
    %208 = arith.addf %185, %207 : vector<8x256xf32>
    %209 = vector.extract_strided_slice %45 {offsets = [0, 224], sizes = [8, 32], strides = [1, 1]} : vector<8x256xf32> to vector<8x32xf32>
    %210 = arith.truncf %209 : vector<8x32xf32> to vector<8x32xbf16>
    %211 = vector.extract_strided_slice %46 {offsets = [0, 32], sizes = [8, 32], strides = [1, 1]} : vector<8x64xf32> to vector<8x32xf32>
    %212 = arith.truncf %211 : vector<8x32xf32> to vector<8x32xbf16>
    %cst_78 = arith.constant dense<0.000000e+00> : vector<8x8xf32>
    %213 = tpu.matmul %210, %212, %cst_78 {dimension_numbers = #tpu.dot_dimension_numbers<[1], [1], [0], [0], [0, 0, 1, 0], [], []>} : vector<8x32xbf16>, vector<8x32xbf16>, vector<8x8xf32> -> vector<8x8xf32>
    %cst_79 = arith.constant 0.176776692 : f32
    %214 = vector.broadcast %cst_79 : f32 to vector<8x8xf32>
    %215 = arith.mulf %213, %214 : vector<8x8xf32>
    %216 = arith.addf %215, %43 : vector<8x8xf32>
    %cst_80 = arith.constant dense<0xFF800000> : vector<8xf32>
    %217 = vector.multi_reduction <maximumf>, %216, %cst_80 [1] : vector<8x8xf32> to vector<8xf32>
    %218 = vector.shape_cast %217 : vector<8xf32> to vector<8x1xf32>
    %219 = vector.broadcast %218 : vector<8x1xf32> to vector<8x8xf32>
    %220 = arith.subf %216, %219 : vector<8x8xf32>
    %221 = math.exp %220 : vector<8x8xf32>
    %cst_81 = arith.constant dense<0.000000e+00> : vector<8xf32>
    %222 = vector.multi_reduction <add>, %221, %cst_81 [1] : vector<8x8xf32> to vector<8xf32>
    %223 = vector.shape_cast %222 : vector<8xf32> to vector<8x1xf32>
    %224 = vector.broadcast %223 : vector<8x1xf32> to vector<8x8xf32>
    %225 = arith.divf %221, %224 : vector<8x8xf32>
    %226 = arith.truncf %225 : vector<8x8xf32> to vector<8x8xbf16>
    %cst_82 = arith.constant dense<0.000000e+00> : vector<8x32xf32>
    %227 = tpu.matmul %226, %44, %cst_82 {dimension_numbers = #tpu.dot_dimension_numbers<[1], [0], [0], [1], [0, 0, 1, 1], [], []>} : vector<8x8xbf16>, vector<8x32xbf16>, vector<8x32xf32> -> vector<8x32xf32>
    %228 = arith.truncf %227 : vector<8x32xf32> to vector<8x32xbf16>
    %c224 = arith.constant 224 : index
    %c0_83 = arith.constant 0 : index
    %229 = vector.load %arg10[%c224, %c0_83] : memref<256x256xbf16, #tpu.memory_space<vmem>>, vector<32x256xbf16>
    %cst_84 = arith.constant dense<0.000000e+00> : vector<8x256xf32>
    %230 = tpu.matmul %228, %229, %cst_84 {dimension_numbers = #tpu.dot_dimension_numbers<[1], [0], [0], [1], [0, 0, 1, 1], [], []>} : vector<8x32xbf16>, vector<32x256xbf16>, vector<8x256xf32> -> vector<8x256xf32>
    %231 = arith.addf %208, %230 : vector<8x256xf32>
    %232 = vector.extract_strided_slice %29 {offsets = [8, 0], sizes = [8, 256], strides = [1, 1]} : vector<16x256xf32> to vector<8x256xf32>
    %233 = vector.extract_strided_slice %35 {offsets = [8, 0], sizes = [8, 64], strides = [1, 1]} : vector<16x64xf32> to vector<8x64xf32>
    %cst_85 = arith.constant 0.000000e+00 : f32
    %234 = vector.broadcast %cst_85 : f32 to vector<8x256xf32>
    %235 = vector.extract_strided_slice %232 {offsets = [0, 0], sizes = [8, 32], strides = [1, 1]} : vector<8x256xf32> to vector<8x32xf32>
    %236 = arith.truncf %235 : vector<8x32xf32> to vector<8x32xbf16>
    %237 = vector.extract_strided_slice %233 {offsets = [0, 0], sizes = [8, 32], strides = [1, 1]} : vector<8x64xf32> to vector<8x32xf32>
    %238 = arith.truncf %237 : vector<8x32xf32> to vector<8x32xbf16>
    %cst_86 = arith.constant dense<0.000000e+00> : vector<8x8xf32>
    %239 = tpu.matmul %236, %238, %cst_86 {dimension_numbers = #tpu.dot_dimension_numbers<[1], [1], [0], [0], [0, 0, 1, 0], [], []>} : vector<8x32xbf16>, vector<8x32xbf16>, vector<8x8xf32> -> vector<8x8xf32>
    %cst_87 = arith.constant 0.176776692 : f32
    %240 = vector.broadcast %cst_87 : f32 to vector<8x8xf32>
    %241 = arith.mulf %239, %240 : vector<8x8xf32>
    %242 = arith.addf %241, %43 : vector<8x8xf32>
    %cst_88 = arith.constant dense<0xFF800000> : vector<8xf32>
    %243 = vector.multi_reduction <maximumf>, %242, %cst_88 [1] : vector<8x8xf32> to vector<8xf32>
    %244 = vector.shape_cast %243 : vector<8xf32> to vector<8x1xf32>
    %245 = vector.broadcast %244 : vector<8x1xf32> to vector<8x8xf32>
    %246 = arith.subf %242, %245 : vector<8x8xf32>
    %247 = math.exp %246 : vector<8x8xf32>
    %cst_89 = arith.constant dense<0.000000e+00> : vector<8xf32>
    %248 = vector.multi_reduction <add>, %247, %cst_89 [1] : vector<8x8xf32> to vector<8xf32>
    %249 = vector.shape_cast %248 : vector<8xf32> to vector<8x1xf32>
    %250 = vector.broadcast %249 : vector<8x1xf32> to vector<8x8xf32>
    %251 = arith.divf %247, %250 : vector<8x8xf32>
    %252 = arith.truncf %251 : vector<8x8xf32> to vector<8x8xbf16>
    %cst_90 = arith.constant dense<0.000000e+00> : vector<8x32xf32>
    %253 = tpu.matmul %252, %44, %cst_90 {dimension_numbers = #tpu.dot_dimension_numbers<[1], [0], [0], [1], [0, 0, 1, 1], [], []>} : vector<8x8xbf16>, vector<8x32xbf16>, vector<8x32xf32> -> vector<8x32xf32>
    %254 = arith.truncf %253 : vector<8x32xf32> to vector<8x32xbf16>
    %c0_91 = arith.constant 0 : index
    %c0_92 = arith.constant 0 : index
    %255 = vector.load %arg10[%c0_91, %c0_92] : memref<256x256xbf16, #tpu.memory_space<vmem>>, vector<32x256xbf16>
    %cst_93 = arith.constant dense<0.000000e+00> : vector<8x256xf32>
    %256 = tpu.matmul %254, %255, %cst_93 {dimension_numbers = #tpu.dot_dimension_numbers<[1], [0], [0], [1], [0, 0, 1, 1], [], []>} : vector<8x32xbf16>, vector<32x256xbf16>, vector<8x256xf32> -> vector<8x256xf32>
    %257 = arith.addf %234, %256 : vector<8x256xf32>
    %258 = vector.extract_strided_slice %232 {offsets = [0, 32], sizes = [8, 32], strides = [1, 1]} : vector<8x256xf32> to vector<8x32xf32>
    %259 = arith.truncf %258 : vector<8x32xf32> to vector<8x32xbf16>
    %260 = vector.extract_strided_slice %233 {offsets = [0, 0], sizes = [8, 32], strides = [1, 1]} : vector<8x64xf32> to vector<8x32xf32>
    %261 = arith.truncf %260 : vector<8x32xf32> to vector<8x32xbf16>
    %cst_94 = arith.constant dense<0.000000e+00> : vector<8x8xf32>
    %262 = tpu.matmul %259, %261, %cst_94 {dimension_numbers = #tpu.dot_dimension_numbers<[1], [1], [0], [0], [0, 0, 1, 0], [], []>} : vector<8x32xbf16>, vector<8x32xbf16>, vector<8x8xf32> -> vector<8x8xf32>
    %cst_95 = arith.constant 0.176776692 : f32
    %263 = vector.broadcast %cst_95 : f32 to vector<8x8xf32>
    %264 = arith.mulf %262, %263 : vector<8x8xf32>
    %265 = arith.addf %264, %43 : vector<8x8xf32>
    %cst_96 = arith.constant dense<0xFF800000> : vector<8xf32>
    %266 = vector.multi_reduction <maximumf>, %265, %cst_96 [1] : vector<8x8xf32> to vector<8xf32>
    %267 = vector.shape_cast %266 : vector<8xf32> to vector<8x1xf32>
    %268 = vector.broadcast %267 : vector<8x1xf32> to vector<8x8xf32>
    %269 = arith.subf %265, %268 : vector<8x8xf32>
    %270 = math.exp %269 : vector<8x8xf32>
    %cst_97 = arith.constant dense<0.000000e+00> : vector<8xf32>
    %271 = vector.multi_reduction <add>, %270, %cst_97 [1] : vector<8x8xf32> to vector<8xf32>
    %272 = vector.shape_cast %271 : vector<8xf32> to vector<8x1xf32>
    %273 = vector.broadcast %272 : vector<8x1xf32> to vector<8x8xf32>
    %274 = arith.divf %270, %273 : vector<8x8xf32>
    %275 = arith.truncf %274 : vector<8x8xf32> to vector<8x8xbf16>
    %cst_98 = arith.constant dense<0.000000e+00> : vector<8x32xf32>
    %276 = tpu.matmul %275, %44, %cst_98 {dimension_numbers = #tpu.dot_dimension_numbers<[1], [0], [0], [1], [0, 0, 1, 1], [], []>} : vector<8x8xbf16>, vector<8x32xbf16>, vector<8x32xf32> -> vector<8x32xf32>
    %277 = arith.truncf %276 : vector<8x32xf32> to vector<8x32xbf16>
    %c32_99 = arith.constant 32 : index
    %c0_100 = arith.constant 0 : index
    %278 = vector.load %arg10[%c32_99, %c0_100] : memref<256x256xbf16, #tpu.memory_space<vmem>>, vector<32x256xbf16>
    %cst_101 = arith.constant dense<0.000000e+00> : vector<8x256xf32>
    %279 = tpu.matmul %277, %278, %cst_101 {dimension_numbers = #tpu.dot_dimension_numbers<[1], [0], [0], [1], [0, 0, 1, 1], [], []>} : vector<8x32xbf16>, vector<32x256xbf16>, vector<8x256xf32> -> vector<8x256xf32>
    %280 = arith.addf %257, %279 : vector<8x256xf32>
    %281 = vector.extract_strided_slice %232 {offsets = [0, 64], sizes = [8, 32], strides = [1, 1]} : vector<8x256xf32> to vector<8x32xf32>
    %282 = arith.truncf %281 : vector<8x32xf32> to vector<8x32xbf16>
    %283 = vector.extract_strided_slice %233 {offsets = [0, 0], sizes = [8, 32], strides = [1, 1]} : vector<8x64xf32> to vector<8x32xf32>
    %284 = arith.truncf %283 : vector<8x32xf32> to vector<8x32xbf16>
    %cst_102 = arith.constant dense<0.000000e+00> : vector<8x8xf32>
    %285 = tpu.matmul %282, %284, %cst_102 {dimension_numbers = #tpu.dot_dimension_numbers<[1], [1], [0], [0], [0, 0, 1, 0], [], []>} : vector<8x32xbf16>, vector<8x32xbf16>, vector<8x8xf32> -> vector<8x8xf32>
    %cst_103 = arith.constant 0.176776692 : f32
    %286 = vector.broadcast %cst_103 : f32 to vector<8x8xf32>
    %287 = arith.mulf %285, %286 : vector<8x8xf32>
    %288 = arith.addf %287, %43 : vector<8x8xf32>
    %cst_104 = arith.constant dense<0xFF800000> : vector<8xf32>
    %289 = vector.multi_reduction <maximumf>, %288, %cst_104 [1] : vector<8x8xf32> to vector<8xf32>
    %290 = vector.shape_cast %289 : vector<8xf32> to vector<8x1xf32>
    %291 = vector.broadcast %290 : vector<8x1xf32> to vector<8x8xf32>
    %292 = arith.subf %288, %291 : vector<8x8xf32>
    %293 = math.exp %292 : vector<8x8xf32>
    %cst_105 = arith.constant dense<0.000000e+00> : vector<8xf32>
    %294 = vector.multi_reduction <add>, %293, %cst_105 [1] : vector<8x8xf32> to vector<8xf32>
    %295 = vector.shape_cast %294 : vector<8xf32> to vector<8x1xf32>
    %296 = vector.broadcast %295 : vector<8x1xf32> to vector<8x8xf32>
    %297 = arith.divf %293, %296 : vector<8x8xf32>
    %298 = arith.truncf %297 : vector<8x8xf32> to vector<8x8xbf16>
    %cst_106 = arith.constant dense<0.000000e+00> : vector<8x32xf32>
    %299 = tpu.matmul %298, %44, %cst_106 {dimension_numbers = #tpu.dot_dimension_numbers<[1], [0], [0], [1], [0, 0, 1, 1], [], []>} : vector<8x8xbf16>, vector<8x32xbf16>, vector<8x32xf32> -> vector<8x32xf32>
    %300 = arith.truncf %299 : vector<8x32xf32> to vector<8x32xbf16>
    %c64_107 = arith.constant 64 : index
    %c0_108 = arith.constant 0 : index
    %301 = vector.load %arg10[%c64_107, %c0_108] : memref<256x256xbf16, #tpu.memory_space<vmem>>, vector<32x256xbf16>
    %cst_109 = arith.constant dense<0.000000e+00> : vector<8x256xf32>
    %302 = tpu.matmul %300, %301, %cst_109 {dimension_numbers = #tpu.dot_dimension_numbers<[1], [0], [0], [1], [0, 0, 1, 1], [], []>} : vector<8x32xbf16>, vector<32x256xbf16>, vector<8x256xf32> -> vector<8x256xf32>
    %303 = arith.addf %280, %302 : vector<8x256xf32>
    %304 = vector.extract_strided_slice %232 {offsets = [0, 96], sizes = [8, 32], strides = [1, 1]} : vector<8x256xf32> to vector<8x32xf32>
    %305 = arith.truncf %304 : vector<8x32xf32> to vector<8x32xbf16>
    %306 = vector.extract_strided_slice %233 {offsets = [0, 0], sizes = [8, 32], strides = [1, 1]} : vector<8x64xf32> to vector<8x32xf32>
    %307 = arith.truncf %306 : vector<8x32xf32> to vector<8x32xbf16>
    %cst_110 = arith.constant dense<0.000000e+00> : vector<8x8xf32>
    %308 = tpu.matmul %305, %307, %cst_110 {dimension_numbers = #tpu.dot_dimension_numbers<[1], [1], [0], [0], [0, 0, 1, 0], [], []>} : vector<8x32xbf16>, vector<8x32xbf16>, vector<8x8xf32> -> vector<8x8xf32>
    %cst_111 = arith.constant 0.176776692 : f32
    %309 = vector.broadcast %cst_111 : f32 to vector<8x8xf32>
    %310 = arith.mulf %308, %309 : vector<8x8xf32>
    %311 = arith.addf %310, %43 : vector<8x8xf32>
    %cst_112 = arith.constant dense<0xFF800000> : vector<8xf32>
    %312 = vector.multi_reduction <maximumf>, %311, %cst_112 [1] : vector<8x8xf32> to vector<8xf32>
    %313 = vector.shape_cast %312 : vector<8xf32> to vector<8x1xf32>
    %314 = vector.broadcast %313 : vector<8x1xf32> to vector<8x8xf32>
    %315 = arith.subf %311, %314 : vector<8x8xf32>
    %316 = math.exp %315 : vector<8x8xf32>
    %cst_113 = arith.constant dense<0.000000e+00> : vector<8xf32>
    %317 = vector.multi_reduction <add>, %316, %cst_113 [1] : vector<8x8xf32> to vector<8xf32>
    %318 = vector.shape_cast %317 : vector<8xf32> to vector<8x1xf32>
    %319 = vector.broadcast %318 : vector<8x1xf32> to vector<8x8xf32>
    %320 = arith.divf %316, %319 : vector<8x8xf32>
    %321 = arith.truncf %320 : vector<8x8xf32> to vector<8x8xbf16>
    %cst_114 = arith.constant dense<0.000000e+00> : vector<8x32xf32>
    %322 = tpu.matmul %321, %44, %cst_114 {dimension_numbers = #tpu.dot_dimension_numbers<[1], [0], [0], [1], [0, 0, 1, 1], [], []>} : vector<8x8xbf16>, vector<8x32xbf16>, vector<8x32xf32> -> vector<8x32xf32>
    %323 = arith.truncf %322 : vector<8x32xf32> to vector<8x32xbf16>
    %c96_115 = arith.constant 96 : index
    %c0_116 = arith.constant 0 : index
    %324 = vector.load %arg10[%c96_115, %c0_116] : memref<256x256xbf16, #tpu.memory_space<vmem>>, vector<32x256xbf16>
    %cst_117 = arith.constant dense<0.000000e+00> : vector<8x256xf32>
    %325 = tpu.matmul %323, %324, %cst_117 {dimension_numbers = #tpu.dot_dimension_numbers<[1], [0], [0], [1], [0, 0, 1, 1], [], []>} : vector<8x32xbf16>, vector<32x256xbf16>, vector<8x256xf32> -> vector<8x256xf32>
    %326 = arith.addf %303, %325 : vector<8x256xf32>
    %327 = vector.extract_strided_slice %232 {offsets = [0, 128], sizes = [8, 32], strides = [1, 1]} : vector<8x256xf32> to vector<8x32xf32>
    %328 = arith.truncf %327 : vector<8x32xf32> to vector<8x32xbf16>
    %329 = vector.extract_strided_slice %233 {offsets = [0, 32], sizes = [8, 32], strides = [1, 1]} : vector<8x64xf32> to vector<8x32xf32>
    %330 = arith.truncf %329 : vector<8x32xf32> to vector<8x32xbf16>
    %cst_118 = arith.constant dense<0.000000e+00> : vector<8x8xf32>
    %331 = tpu.matmul %328, %330, %cst_118 {dimension_numbers = #tpu.dot_dimension_numbers<[1], [1], [0], [0], [0, 0, 1, 0], [], []>} : vector<8x32xbf16>, vector<8x32xbf16>, vector<8x8xf32> -> vector<8x8xf32>
    %cst_119 = arith.constant 0.176776692 : f32
    %332 = vector.broadcast %cst_119 : f32 to vector<8x8xf32>
    %333 = arith.mulf %331, %332 : vector<8x8xf32>
    %334 = arith.addf %333, %43 : vector<8x8xf32>
    %cst_120 = arith.constant dense<0xFF800000> : vector<8xf32>
    %335 = vector.multi_reduction <maximumf>, %334, %cst_120 [1] : vector<8x8xf32> to vector<8xf32>
    %336 = vector.shape_cast %335 : vector<8xf32> to vector<8x1xf32>
    %337 = vector.broadcast %336 : vector<8x1xf32> to vector<8x8xf32>
    %338 = arith.subf %334, %337 : vector<8x8xf32>
    %339 = math.exp %338 : vector<8x8xf32>
    %cst_121 = arith.constant dense<0.000000e+00> : vector<8xf32>
    %340 = vector.multi_reduction <add>, %339, %cst_121 [1] : vector<8x8xf32> to vector<8xf32>
    %341 = vector.shape_cast %340 : vector<8xf32> to vector<8x1xf32>
    %342 = vector.broadcast %341 : vector<8x1xf32> to vector<8x8xf32>
    %343 = arith.divf %339, %342 : vector<8x8xf32>
    %344 = arith.truncf %343 : vector<8x8xf32> to vector<8x8xbf16>
    %cst_122 = arith.constant dense<0.000000e+00> : vector<8x32xf32>
    %345 = tpu.matmul %344, %44, %cst_122 {dimension_numbers = #tpu.dot_dimension_numbers<[1], [0], [0], [1], [0, 0, 1, 1], [], []>} : vector<8x8xbf16>, vector<8x32xbf16>, vector<8x32xf32> -> vector<8x32xf32>
    %346 = arith.truncf %345 : vector<8x32xf32> to vector<8x32xbf16>
    %c128_123 = arith.constant 128 : index
    %c0_124 = arith.constant 0 : index
    %347 = vector.load %arg10[%c128_123, %c0_124] : memref<256x256xbf16, #tpu.memory_space<vmem>>, vector<32x256xbf16>
    %cst_125 = arith.constant dense<0.000000e+00> : vector<8x256xf32>
    %348 = tpu.matmul %346, %347, %cst_125 {dimension_numbers = #tpu.dot_dimension_numbers<[1], [0], [0], [1], [0, 0, 1, 1], [], []>} : vector<8x32xbf16>, vector<32x256xbf16>, vector<8x256xf32> -> vector<8x256xf32>
    %349 = arith.addf %326, %348 : vector<8x256xf32>
    %350 = vector.extract_strided_slice %232 {offsets = [0, 160], sizes = [8, 32], strides = [1, 1]} : vector<8x256xf32> to vector<8x32xf32>
    %351 = arith.truncf %350 : vector<8x32xf32> to vector<8x32xbf16>
    %352 = vector.extract_strided_slice %233 {offsets = [0, 32], sizes = [8, 32], strides = [1, 1]} : vector<8x64xf32> to vector<8x32xf32>
    %353 = arith.truncf %352 : vector<8x32xf32> to vector<8x32xbf16>
    %cst_126 = arith.constant dense<0.000000e+00> : vector<8x8xf32>
    %354 = tpu.matmul %351, %353, %cst_126 {dimension_numbers = #tpu.dot_dimension_numbers<[1], [1], [0], [0], [0, 0, 1, 0], [], []>} : vector<8x32xbf16>, vector<8x32xbf16>, vector<8x8xf32> -> vector<8x8xf32>
    %cst_127 = arith.constant 0.176776692 : f32
    %355 = vector.broadcast %cst_127 : f32 to vector<8x8xf32>
    %356 = arith.mulf %354, %355 : vector<8x8xf32>
    %357 = arith.addf %356, %43 : vector<8x8xf32>
    %cst_128 = arith.constant dense<0xFF800000> : vector<8xf32>
    %358 = vector.multi_reduction <maximumf>, %357, %cst_128 [1] : vector<8x8xf32> to vector<8xf32>
    %359 = vector.shape_cast %358 : vector<8xf32> to vector<8x1xf32>
    %360 = vector.broadcast %359 : vector<8x1xf32> to vector<8x8xf32>
    %361 = arith.subf %357, %360 : vector<8x8xf32>
    %362 = math.exp %361 : vector<8x8xf32>
    %cst_129 = arith.constant dense<0.000000e+00> : vector<8xf32>
    %363 = vector.multi_reduction <add>, %362, %cst_129 [1] : vector<8x8xf32> to vector<8xf32>
    %364 = vector.shape_cast %363 : vector<8xf32> to vector<8x1xf32>
    %365 = vector.broadcast %364 : vector<8x1xf32> to vector<8x8xf32>
    %366 = arith.divf %362, %365 : vector<8x8xf32>
    %367 = arith.truncf %366 : vector<8x8xf32> to vector<8x8xbf16>
    %cst_130 = arith.constant dense<0.000000e+00> : vector<8x32xf32>
    %368 = tpu.matmul %367, %44, %cst_130 {dimension_numbers = #tpu.dot_dimension_numbers<[1], [0], [0], [1], [0, 0, 1, 1], [], []>} : vector<8x8xbf16>, vector<8x32xbf16>, vector<8x32xf32> -> vector<8x32xf32>
    %369 = arith.truncf %368 : vector<8x32xf32> to vector<8x32xbf16>
    %c160_131 = arith.constant 160 : index
    %c0_132 = arith.constant 0 : index
    %370 = vector.load %arg10[%c160_131, %c0_132] : memref<256x256xbf16, #tpu.memory_space<vmem>>, vector<32x256xbf16>
    %cst_133 = arith.constant dense<0.000000e+00> : vector<8x256xf32>
    %371 = tpu.matmul %369, %370, %cst_133 {dimension_numbers = #tpu.dot_dimension_numbers<[1], [0], [0], [1], [0, 0, 1, 1], [], []>} : vector<8x32xbf16>, vector<32x256xbf16>, vector<8x256xf32> -> vector<8x256xf32>
    %372 = arith.addf %349, %371 : vector<8x256xf32>
    %373 = vector.extract_strided_slice %232 {offsets = [0, 192], sizes = [8, 32], strides = [1, 1]} : vector<8x256xf32> to vector<8x32xf32>
    %374 = arith.truncf %373 : vector<8x32xf32> to vector<8x32xbf16>
    %375 = vector.extract_strided_slice %233 {offsets = [0, 32], sizes = [8, 32], strides = [1, 1]} : vector<8x64xf32> to vector<8x32xf32>
    %376 = arith.truncf %375 : vector<8x32xf32> to vector<8x32xbf16>
    %cst_134 = arith.constant dense<0.000000e+00> : vector<8x8xf32>
    %377 = tpu.matmul %374, %376, %cst_134 {dimension_numbers = #tpu.dot_dimension_numbers<[1], [1], [0], [0], [0, 0, 1, 0], [], []>} : vector<8x32xbf16>, vector<8x32xbf16>, vector<8x8xf32> -> vector<8x8xf32>
    %cst_135 = arith.constant 0.176776692 : f32
    %378 = vector.broadcast %cst_135 : f32 to vector<8x8xf32>
    %379 = arith.mulf %377, %378 : vector<8x8xf32>
    %380 = arith.addf %379, %43 : vector<8x8xf32>
    %cst_136 = arith.constant dense<0xFF800000> : vector<8xf32>
    %381 = vector.multi_reduction <maximumf>, %380, %cst_136 [1] : vector<8x8xf32> to vector<8xf32>
    %382 = vector.shape_cast %381 : vector<8xf32> to vector<8x1xf32>
    %383 = vector.broadcast %382 : vector<8x1xf32> to vector<8x8xf32>
    %384 = arith.subf %380, %383 : vector<8x8xf32>
    %385 = math.exp %384 : vector<8x8xf32>
    %cst_137 = arith.constant dense<0.000000e+00> : vector<8xf32>
    %386 = vector.multi_reduction <add>, %385, %cst_137 [1] : vector<8x8xf32> to vector<8xf32>
    %387 = vector.shape_cast %386 : vector<8xf32> to vector<8x1xf32>
    %388 = vector.broadcast %387 : vector<8x1xf32> to vector<8x8xf32>
    %389 = arith.divf %385, %388 : vector<8x8xf32>
    %390 = arith.truncf %389 : vector<8x8xf32> to vector<8x8xbf16>
    %cst_138 = arith.constant dense<0.000000e+00> : vector<8x32xf32>
    %391 = tpu.matmul %390, %44, %cst_138 {dimension_numbers = #tpu.dot_dimension_numbers<[1], [0], [0], [1], [0, 0, 1, 1], [], []>} : vector<8x8xbf16>, vector<8x32xbf16>, vector<8x32xf32> -> vector<8x32xf32>
    %392 = arith.truncf %391 : vector<8x32xf32> to vector<8x32xbf16>
    %c192_139 = arith.constant 192 : index
    %c0_140 = arith.constant 0 : index
    %393 = vector.load %arg10[%c192_139, %c0_140] : memref<256x256xbf16, #tpu.memory_space<vmem>>, vector<32x256xbf16>
    %cst_141 = arith.constant dense<0.000000e+00> : vector<8x256xf32>
    %394 = tpu.matmul %392, %393, %cst_141 {dimension_numbers = #tpu.dot_dimension_numbers<[1], [0], [0], [1], [0, 0, 1, 1], [], []>} : vector<8x32xbf16>, vector<32x256xbf16>, vector<8x256xf32> -> vector<8x256xf32>
    %395 = arith.addf %372, %394 : vector<8x256xf32>
    %396 = vector.extract_strided_slice %232 {offsets = [0, 224], sizes = [8, 32], strides = [1, 1]} : vector<8x256xf32> to vector<8x32xf32>
    %397 = arith.truncf %396 : vector<8x32xf32> to vector<8x32xbf16>
    %398 = vector.extract_strided_slice %233 {offsets = [0, 32], sizes = [8, 32], strides = [1, 1]} : vector<8x64xf32> to vector<8x32xf32>
    %399 = arith.truncf %398 : vector<8x32xf32> to vector<8x32xbf16>
    %cst_142 = arith.constant dense<0.000000e+00> : vector<8x8xf32>
    %400 = tpu.matmul %397, %399, %cst_142 {dimension_numbers = #tpu.dot_dimension_numbers<[1], [1], [0], [0], [0, 0, 1, 0], [], []>} : vector<8x32xbf16>, vector<8x32xbf16>, vector<8x8xf32> -> vector<8x8xf32>
    %cst_143 = arith.constant 0.176776692 : f32
    %401 = vector.broadcast %cst_143 : f32 to vector<8x8xf32>
    %402 = arith.mulf %400, %401 : vector<8x8xf32>
    %403 = arith.addf %402, %43 : vector<8x8xf32>
    %cst_144 = arith.constant dense<0xFF800000> : vector<8xf32>
    %404 = vector.multi_reduction <maximumf>, %403, %cst_144 [1] : vector<8x8xf32> to vector<8xf32>
    %405 = vector.shape_cast %404 : vector<8xf32> to vector<8x1xf32>
    %406 = vector.broadcast %405 : vector<8x1xf32> to vector<8x8xf32>
    %407 = arith.subf %403, %406 : vector<8x8xf32>
    %408 = math.exp %407 : vector<8x8xf32>
    %cst_145 = arith.constant dense<0.000000e+00> : vector<8xf32>
    %409 = vector.multi_reduction <add>, %408, %cst_145 [1] : vector<8x8xf32> to vector<8xf32>
    %410 = vector.shape_cast %409 : vector<8xf32> to vector<8x1xf32>
    %411 = vector.broadcast %410 : vector<8x1xf32> to vector<8x8xf32>
    %412 = arith.divf %408, %411 : vector<8x8xf32>
    %413 = arith.truncf %412 : vector<8x8xf32> to vector<8x8xbf16>
    %cst_146 = arith.constant dense<0.000000e+00> : vector<8x32xf32>
    %414 = tpu.matmul %413, %44, %cst_146 {dimension_numbers = #tpu.dot_dimension_numbers<[1], [0], [0], [1], [0, 0, 1, 1], [], []>} : vector<8x8xbf16>, vector<8x32xbf16>, vector<8x32xf32> -> vector<8x32xf32>
    %415 = arith.truncf %414 : vector<8x32xf32> to vector<8x32xbf16>
    %c224_147 = arith.constant 224 : index
    %c0_148 = arith.constant 0 : index
    %416 = vector.load %arg10[%c224_147, %c0_148] : memref<256x256xbf16, #tpu.memory_space<vmem>>, vector<32x256xbf16>
    %cst_149 = arith.constant dense<0.000000e+00> : vector<8x256xf32>
    %417 = tpu.matmul %415, %416, %cst_149 {dimension_numbers = #tpu.dot_dimension_numbers<[1], [0], [0], [1], [0, 0, 1, 1], [], []>} : vector<8x32xbf16>, vector<32x256xbf16>, vector<8x256xf32> -> vector<8x256xf32>
    %418 = arith.addf %395, %417 : vector<8x256xf32>
    %419 = tpu.concatenate %231, %418 in 0 : vector<8x256xf32>, vector<8x256xf32> -> vector<16x256xf32>
    %c0_150 = arith.constant 0 : index
    %c0_151 = arith.constant 0 : index
    %420 = vector.load %arg11[%c0_150, %c0_151] : memref<1x256xf32, #tpu.memory_space<vmem>>, vector<1x256xf32>
    %421 = vector.broadcast %420 : vector<1x256xf32> to vector<16x256xf32>
    %422 = arith.addf %419, %421 : vector<16x256xf32>
    %423 = arith.addf %0, %422 : vector<16x256xf32>
    %c0_152 = arith.constant 0 : index
    %c0_153 = arith.constant 0 : index
    %424 = vector.load %arg12[%c0_152, %c0_153] : memref<1x256xf32, #tpu.memory_space<vmem>>, vector<1x256xf32>
    %425 = arith.mulf %423, %423 : vector<16x256xf32>
    %cst_154 = arith.constant dense<0.000000e+00> : vector<16xf32>
    %426 = vector.multi_reduction <add>, %425, %cst_154 [1] : vector<16x256xf32> to vector<16xf32>
    %427 = vector.shape_cast %426 : vector<16xf32> to vector<16x1xf32>
    %cst_155 = arith.constant 2.560000e+02 : f32
    %428 = vector.broadcast %cst_155 : f32 to vector<16x1xf32>
    %429 = arith.divf %427, %428 : vector<16x1xf32>
    %cst_156 = arith.constant 9.99999974E-6 : f32
    %430 = vector.broadcast %cst_156 : f32 to vector<16x1xf32>
    %431 = arith.addf %429, %430 : vector<16x1xf32>
    %432 = math.sqrt %431 : vector<16x1xf32>
    %433 = vector.broadcast %432 : vector<16x1xf32> to vector<16x256xf32>
    %434 = arith.mulf %423, %433 : vector<16x256xf32>
    %435 = vector.broadcast %424 : vector<1x256xf32> to vector<16x256xf32>
    %436 = arith.mulf %434, %435 : vector<16x256xf32>
    %437 = arith.truncf %436 : vector<16x256xf32> to vector<16x256xbf16>
    %c0_157 = arith.constant 0 : index
    %c0_158 = arith.constant 0 : index
    %438 = vector.load %arg13[%c0_157, %c0_158] : memref<256x512xbf16, #tpu.memory_space<vmem>>, vector<256x512xbf16>
    %cst_159 = arith.constant dense<0.000000e+00> : vector<16x512xf32>
    %439 = tpu.matmul %437, %438, %cst_159 {dimension_numbers = #tpu.dot_dimension_numbers<[1], [0], [0], [1], [0, 0, 1, 1], [], []>} : vector<16x256xbf16>, vector<256x512xbf16>, vector<16x512xf32> -> vector<16x512xf32>
    %c0_160 = arith.constant 0 : index
    %c0_161 = arith.constant 0 : index
    %440 = vector.load %arg14[%c0_160, %c0_161] : memref<256x512xbf16, #tpu.memory_space<vmem>>, vector<256x512xbf16>
    %cst_162 = arith.constant dense<0.000000e+00> : vector<16x512xf32>
    %441 = tpu.matmul %437, %440, %cst_162 {dimension_numbers = #tpu.dot_dimension_numbers<[1], [0], [0], [1], [0, 0, 1, 1], [], []>} : vector<16x256xbf16>, vector<256x512xbf16>, vector<16x512xf32> -> vector<16x512xf32>
    %442 = arith.negf %439 : vector<16x512xf32>
    %443 = math.exp %442 : vector<16x512xf32>
    %cst_163 = arith.constant 1.000000e+00 : f32
    %444 = vector.broadcast %cst_163 : f32 to vector<16x512xf32>
    %445 = arith.addf %444, %443 : vector<16x512xf32>
    %446 = arith.divf %444, %445 : vector<16x512xf32>
    %447 = arith.mulf %439, %446 : vector<16x512xf32>
    %448 = arith.mulf %447, %441 : vector<16x512xf32>
    %449 = arith.truncf %448 : vector<16x512xf32> to vector<16x512xbf16>
    %c0_164 = arith.constant 0 : index
    %c0_165 = arith.constant 0 : index
    %450 = vector.load %arg15[%c0_164, %c0_165] : memref<512x256xbf16, #tpu.memory_space<vmem>>, vector<512x256xbf16>
    %cst_166 = arith.constant dense<0.000000e+00> : vector<16x256xf32>
    %451 = tpu.matmul %449, %450, %cst_166 {dimension_numbers = #tpu.dot_dimension_numbers<[1], [0], [0], [1], [0, 0, 1, 1], [], []>} : vector<16x512xbf16>, vector<512x256xbf16>, vector<16x256xf32> -> vector<16x256xf32>
    %452 = arith.addf %423, %451 : vector<16x256xf32>
    %c0_167 = arith.constant 0 : index
    %c0_168 = arith.constant 0 : index
    %453 = vector.load %arg16[%c0_167, %c0_168] : memref<16x256xf32, #tpu.memory_space<vmem>>, vector<16x256xf32>
    tpu.vector_store %arg16[%c0_167, %c0_168], %452 {strides = array<i32>} : memref<16x256xf32, #tpu.memory_space<vmem>>, vector<16x256xf32>,
    return
  }
}

</mosaic_0001>

<bundles_post_ra>
// kernel: transformer_forward.5
= control target key start
LH: loop header
LB: loop body
LE: loop exit
PB: predicated region body
PF: predicated region fallthrough
CT: control target
= control target key end

     0   :  { %s1017_s0 = inlined_call_operand.vmem [shape: f32[16,256], index: 0, kind: input, shape index: {}]   ;;  %s1018_s1 = inlined_call_operand.vmem [shape: f32[1,256], index: 1, kind: input, shape index: {}]   ;;  %s1019_s2 = inlined_call_operand.vmem [shape: bf16[256,512], index: 2, kind: input, shape index: {}]   ;;  %s1020_s3 = inlined_call_operand.hbm [shape: f32[16,512], index: 3, kind: output, shape index: {}]  }
   0x1   :  { %v781_v0 = vld [vmem:[%s1017_s0] sm:$0xff]  ;;  %v786_v1 = vld [vmem:[%s1017_s0 + $0x8] sm:$0xff]  ;;  %v791_v2 = vld [vmem:[%s1017_s0 + $0x10] sm:$0xff] }
   0x2   :  { %v20_v3 = vmul.f32 %v781_v0, %v781_v0  ;;  %v21_v4 = vmul.f32 %v786_v1, %v786_v1  ;;  %v800_v5 = vld [vmem:[%s1017_s0 + $0x18] sm:$0xff]  ;;  %v22_v6 = vmul.f32 %v791_v2, %v791_v2  ;;  %v631_v8 = vld [vmem:[%s1019_s2 + $0x4] ss:$16 sps:$4 sm:$0xff]   ;;  %v635_v11 = vld [vmem:[%s1019_s2] ss:$16 sps:$4 sm:$0xff]  }
   0x3   :  { %v23_v7 = vmul.f32 %v800_v5, %v800_v5  ;;  %v633_v10 = vld [vmem:[%s1019_s2 + $0xc] ss:$16 sps:$4 sm:$0xff]   ;;  %v636_v12 = vld [vmem:[%s1019_s2 + $0x8] ss:$16 sps:$4 sm:$0xff]   ;;  %454 = vmatprep.subr.bf16.mxu0 %v631_v8  ;;  %v637_v13 = vld [vmem:[%s1019_s2 + $0x24] ss:$16 sps:$4 sm:$0xff]  }
   0x4   :  { %v24_v9 = vadd.f32 %v21_v4, %v20_v3  ;;  %497 = vmatprep.subr.bf16.mxu1 %v633_v10  ;;  %v639_v15 = vld [vmem:[%s1019_s2 + $0x2c] ss:$16 sps:$4 sm:$0xff]   ;;  %455 = vmatpush1.bf16.msra.mxu0 %v635_v11  ;;  %v641_v16 = vld [vmem:[%s1019_s2 + $0x20] ss:$16 sps:$4 sm:$0xff]   ;;  %v642_v17 = vld [vmem:[%s1019_s2 + $0x28] ss:$16 sps:$4 sm:$0xff]  }
   0x5   :  { %v27_v14 = vadd.f32 %v23_v7, %v22_v6  ;;  %498 = vmatpush1.bf16.msra.mxu1 %v636_v12  ;;  %456 = vmatprep.subr.bf16.mxu0 %v637_v13  ;;  %v643_v18 = vld [vmem:[%s1019_s2 + $0x44] ss:$16 sps:$4 sm:$0xff]   ;;  %v645_v19 = vld [vmem:[%s1019_s2 + $0x4c] ss:$16 sps:$4 sm:$0xff]   ;;  %v647_v20 = vld [vmem:[%s1019_s2 + $0x40] ss:$16 sps:$4 sm:$0xff]  }
   0x6   :  { %25 = vadd.xlane.f32.xlu0 %v24_v9  ;;  %499 = vmatprep.subr.bf16.mxu1 %v639_v15  ;;  %v648_v21 = vld [vmem:[%s1019_s2 + $0x48] ss:$16 sps:$4 sm:$0xff]   ;;  %v649_v22 = vld [vmem:[%s1019_s2 + $0x64] ss:$16 sps:$4 sm:$0xff]   ;;  %v651_v23 = vld [vmem:[%s1019_s2 + $0x6c] ss:$16 sps:$4 sm:$0xff]  }
   0x7   :  { %v653_v24 = vld [vmem:[%s1019_s2 + $0x60] ss:$16 sps:$4 sm:$0xff]   ;;  %v654_v25 = vld [vmem:[%s1019_s2 + $0x68] ss:$16 sps:$4 sm:$0xff]   ;;  %v655_v26 = vld [vmem:[%s1019_s2 + $0x84] ss:$16 sps:$4 sm:$0xff]  }
   0x8   :  { %457 = vmatpush1.bf16.msra.mxu0 %v641_v16  ;;  %v657_v27 = vld [vmem:[%s1019_s2 + $0x8c] ss:$16 sps:$4 sm:$0xff]   ;;  %v659_v28 = vld [vmem:[%s1019_s2 + $0x80] ss:$16 sps:$4 sm:$0xff]   ;;  %v660_v29 = vld [vmem:[%s1019_s2 + $0x88] ss:$16 sps:$4 sm:$0xff]  }
   0x9   :  { %500 = vmatpush1.bf16.msra.mxu1 %v642_v17  ;;  %458 = vmatprep.subr.bf16.mxu0 %v643_v18  ;;  %v661_v30 = vld [vmem:[%s1019_s2 + $0xa4] ss:$16 sps:$4 sm:$0xff]   ;;  %v663_v31 = vld [vmem:[%s1019_s2 + $0xac] ss:$16 sps:$4 sm:$0xff]   ;;  %v665_v32 = vld [vmem:[%s1019_s2 + $0xa0] ss:$16 sps:$4 sm:$0xff]  }
   0xa   :  { %28 = vadd.xlane.f32.xlu0 %v27_v14  ;;  %501 = vmatprep.subr.bf16.mxu1 %v645_v19  ;;  %v666_v33 = vld [vmem:[%s1019_s2 + $0xa8] ss:$16 sps:$4 sm:$0xff]   ;;  %v667_v34 = vld [vmem:[%s1019_s2 + $0xc4] ss:$16 sps:$4 sm:$0xff]   ;;  %v669_v35 = vld [vmem:[%s1019_s2 + $0xcc] ss:$16 sps:$4 sm:$0xff]  }
   0xb   :  { %v671_v36 = vld [vmem:[%s1019_s2 + $0xc0] ss:$16 sps:$4 sm:$0xff]   ;;  %v672_v37 = vld [vmem:[%s1019_s2 + $0xc8] ss:$16 sps:$4 sm:$0xff]   ;;  %v673_v38 = vld [vmem:[%s1019_s2 + $0xe4] ss:$16 sps:$4 sm:$0xff]  }
   0xc   :  { %459 = vmatpush1.bf16.msra.mxu0 %v647_v20  ;;  %v675_v39 = vld [vmem:[%s1019_s2 + $0xec] ss:$16 sps:$4 sm:$0xff]   ;;  %v677_v40 = vld [vmem:[%s1019_s2 + $0xe0] ss:$16 sps:$4 sm:$0xff]   ;;  %v678_v41 = vld [vmem:[%s1019_s2 + $0xe8] ss:$16 sps:$4 sm:$0xff]  }
   0xd   :  { %502 = vmatpush1.bf16.msra.mxu1 %v648_v21  ;;  %460 = vmatprep.subr.bf16.mxu0 %v649_v22  ;;  %v679_v42 = vld [vmem:[%s1019_s2 + $0x104] ss:$16 sps:$4 sm:$0xff]   ;;  %v681_v43 = vld [vmem:[%s1019_s2 + $0x10c] ss:$16 sps:$4 sm:$0xff]   ;;  %v683_v44 = vld [vmem:[%s1019_s2 + $0x100] ss:$16 sps:$4 sm:$0xff]  }
   0xe   :  { %503 = vmatprep.subr.bf16.mxu1 %v651_v23  ;;  %v684_v45 = vld [vmem:[%s1019_s2 + $0x108] ss:$16 sps:$4 sm:$0xff]   ;;  %v685_v46 = vld [vmem:[%s1019_s2 + $0x124] ss:$16 sps:$4 sm:$0xff]   ;;  %v687_v47 = vld [vmem:[%s1019_s2 + $0x12c] ss:$16 sps:$4 sm:$0xff]  }
   0xf   :  { %v689_v48 = vld [vmem:[%s1019_s2 + $0x120] ss:$16 sps:$4 sm:$0xff]   ;;  %v690_v49 = vld [vmem:[%s1019_s2 + $0x128] ss:$16 sps:$4 sm:$0xff]   ;;  %v691_v50 = vld [vmem:[%s1019_s2 + $0x144] ss:$16 sps:$4 sm:$0xff]  }
  0x10   :  { %461 = vmatpush1.bf16.msra.mxu0 %v653_v24  ;;  %v693_v51 = vld [vmem:[%s1019_s2 + $0x14c] ss:$16 sps:$4 sm:$0xff]   ;;  %v695_v52 = vld [vmem:[%s1019_s2 + $0x140] ss:$16 sps:$4 sm:$0xff]   ;;  %v696_v53 = vld [vmem:[%s1019_s2 + $0x148] ss:$16 sps:$4 sm:$0xff]  }
  0x11   :  { %504 = vmatpush1.bf16.msra.mxu1 %v654_v25  ;;  %462 = vmatprep.subr.bf16.mxu0 %v655_v26  ;;  %v697_v54 = vld [vmem:[%s1019_s2 + $0x164] ss:$16 sps:$4 sm:$0xff]   ;;  %v699_v55 = vld [vmem:[%s1019_s2 + $0x16c] ss:$16 sps:$4 sm:$0xff]  }
  0x12   :  { %505 = vmatprep.subr.bf16.mxu1 %v657_v27 }
  0x14   :  { %463 = vmatpush1.bf16.msra.mxu0 %v659_v28 }
  0x15   :  { %506 = vmatpush1.bf16.msra.mxu1 %v660_v29  ;;  %464 = vmatprep.subr.bf16.mxu0 %v661_v30 }
  0x16   :  { %507 = vmatprep.subr.bf16.mxu1 %v663_v31 }
  0x18   :  { %465 = vmatpush1.bf16.msra.mxu0 %v665_v32 }
  0x19   :  { %508 = vmatpush1.bf16.msra.mxu1 %v666_v33  ;;  %466 = vmatprep.subr.bf16.mxu0 %v667_v34 }
  0x1a   :  { %509 = vmatprep.subr.bf16.mxu1 %v669_v35 }
  0x1c   :  { %467 = vmatpush1.bf16.msra.mxu0 %v671_v36 }
  0x1d   :  { %510 = vmatpush1.bf16.msra.mxu1 %v672_v37  ;;  %468 = vmatprep.subr.bf16.mxu0 %v673_v38 }
  0x1e   :  { %511 = vmatprep.subr.bf16.mxu1 %v675_v39 }
  0x20   :  { %469 = vmatpush1.bf16.msra.mxu0 %v677_v40 }
  0x21   :  { %512 = vmatpush1.bf16.msra.mxu1 %v678_v41  ;;  %470 = vmatprep.subr.bf16.mxu0 %v679_v42 }
  0x22   :  { %513 = vmatprep.subr.bf16.mxu1 %v681_v43 }
  0x24   :  { %471 = vmatpush1.bf16.msra.mxu0 %v683_v44 }
  0x25   :  { %514 = vmatpush1.bf16.msra.mxu1 %v684_v45  ;;  %472 = vmatprep.subr.bf16.mxu0 %v685_v46 }
  0x26   :  { %515 = vmatprep.subr.bf16.mxu1 %v687_v47 }
  0x28   :  { %473 = vmatpush1.bf16.msra.mxu0 %v689_v48 }
  0x29   :  { %516 = vmatpush1.bf16.msra.mxu1 %v690_v49  ;;  %474 = vmatprep.subr.bf16.mxu0 %v691_v50 }
  0x2a   :  { %517 = vmatprep.subr.bf16.mxu1 %v693_v51 }
  0x2b   :  { %8 = vsyncpa [#allocation3], 0  ;;  %v701_v56 = vld [vmem:[%s1019_s2 + $0x160] ss:$16 sps:$4 sm:$0xff]   ;;  %v702_v57 = vld [vmem:[%s1019_s2 + $0x168] ss:$16 sps:$4 sm:$0xff]   ;;  %v54_v20 = vlaneseq }
  0x2c   :  { %475 = vmatpush1.bf16.msra.mxu0 %v695_v52  ;;  %v703_v58 = vld [vmem:[%s1019_s2 + $0x184] ss:$16 sps:$4 sm:$0xff]   ;;  %v705_v59 = vld [vmem:[%s1019_s2 + $0x18c] ss:$16 sps:$4 sm:$0xff]   ;;  %v707_v60 = vld [vmem:[%s1019_s2 + $0x180] ss:$16 sps:$4 sm:$0xff]  }
  0x2d   :  { %518 = vmatpush1.bf16.msra.mxu1 %v696_v53  ;;  %476 = vmatprep.subr.bf16.mxu0 %v697_v54  ;;  %v708_v61 = vld [vmem:[%s1019_s2 + $0x188] ss:$16 sps:$4 sm:$0xff]   ;;  %v709_v62 = vld [vmem:[%s1019_s2 + $0x1a4] ss:$16 sps:$4 sm:$0xff]   ;;  %v711_v63 = vld [vmem:[%s1019_s2 + $0x1ac] ss:$16 sps:$4 sm:$0xff]  }
  0x2e   :  { %519 = vmatprep.subr.bf16.mxu1 %v699_v55  ;;  %v713_v3 = vld [vmem:[%s1019_s2 + $0x1a0] ss:$16 sps:$4 sm:$0xff]   ;;  %v714_v4 = vld [vmem:[%s1019_s2 + $0x1a8] ss:$16 sps:$4 sm:$0xff]   ;;  %v715_v6 = vld [vmem:[%s1019_s2 + $0x1c4] ss:$16 sps:$4 sm:$0xff]  }
  0x2f   :  { %v717_v7 = vld [vmem:[%s1019_s2 + $0x1cc] ss:$16 sps:$4 sm:$0xff]   ;;  %v719_v8 = vld [vmem:[%s1019_s2 + $0x1c0] ss:$16 sps:$4 sm:$0xff]   ;;  %v720_v9 = vld [vmem:[%s1019_s2 + $0x1c8] ss:$16 sps:$4 sm:$0xff]  }
  0x30   :  { %477 = vmatpush1.bf16.msra.mxu0 %v701_v56  ;;  %v721_v10 = vld [vmem:[%s1019_s2 + $0x1e4] ss:$16 sps:$4 sm:$0xff]   ;;  %v723_v11 = vld [vmem:[%s1019_s2 + $0x1ec] ss:$16 sps:$4 sm:$0xff]   ;;  %v725_v12 = vld [vmem:[%s1019_s2 + $0x1e0] ss:$16 sps:$4 sm:$0xff]  }
  0x31   :  { %520 = vmatpush1.bf16.msra.mxu1 %v702_v57  ;;  %478 = vmatprep.subr.bf16.mxu0 %v703_v58  ;;  %v726_v13 = vld [vmem:[%s1019_s2 + $0x1e8] ss:$16 sps:$4 sm:$0xff]   ;;  %v55_v21 = vshrl.u32 %v54_v20, 7  ;;  %v19_v27 = vld [vmem:[%s1018_s1] sm:$0x3]  ;;  %s755_s1 = smov [#allocation2]  }
  0x32   :  { %521 = vmatprep.subr.bf16.mxu1 %v705_v59  ;;  %s553_s9 = sshll.u32 %s755_s1, 4  ;;  %s554_s9 = int_to_ptr.vmem [resolvable:$true] %s553_s9 }
  0x33   :  { %v56_v25 = vsub.s32 0, %v55_v21  ;;  %v60_v26 = vsub.s32 1, %v55_v21  ;;  %s731_s10 = scalar_lea.vmem %s554_s9, 1024  ;;  %p736_p1 = scmp.lt.s32.totalorder %s554_s9, %s554_s9 }
  0x34   :  { %479 = vmatpush1.bf16.msra.mxu0 %v707_v60  ;;  %p732_p0 = scmp.ne.s32.totalorder %s554_s9, %s731_s10  ;;  %p737_p2 = scmp.lt.s32.totalorder %s731_s10, %s731_s10 }
  0x35   :  { %522 = vmatpush1.bf16.msra.mxu1 %v708_v61  ;;  %480 = vmatprep.subr.bf16.mxu0 %v709_v62  ;;  %v57_v33 = vrot.slane %v19_v27, %v56_v25  ;;  %v61_v34 = vrot.slane %v19_v27, %v60_v26 }
  0x36   :  { %523 = vmatprep.subr.bf16.mxu1 %v711_v63  ;;  %p738_p3 = por %p737_p2, %p736_p1 }
  0x38   :  { %481 = vmatpush1.bf16.msra.mxu0 %v713_v3  ;;  %p739_p4 = pnand %p738_p3, %p732_p0 }
  0x39   :  { %524 = vmatpush1.bf16.msra.mxu1 %v714_v4  ;;  %482 = vmatprep.subr.bf16.mxu0 %v715_v6 }
  0x3a   :  { %525 = vmatprep.subr.bf16.mxu1 %v717_v7 }
  0x3c   :  { %483 = vmatpush1.bf16.msra.mxu0 %v719_v8 }
  0x3d   :  { %526 = vmatpush1.bf16.msra.mxu1 %v720_v9  ;;  %484 = vmatprep.subr.bf16.mxu0 %v721_v10 }
  0x3e   :  { %527 = vmatprep.subr.bf16.mxu1 %v723_v11 }
  0x40   :  { %485 = vmatpush1.bf16.msra.mxu0 %v725_v12 }
  0x41   :  { %528 = vmatpush1.bf16.msra.mxu1 %v726_v13 }
  0x93   :  { %v26_v14 = vpop.xlane.xlu0 %25 }
  0x94   :  { %v31_v15 = vmul.f32 0.00390625, %v26_v14 }
  0x96   :  { %v33_v16 = vadd.f32 1e-05, %v31_v15 }
  0x97   :  { %v29_v17 = vpop.xlane.xlu0 %28 }
  0x98   :  { %727 = vrsqrt.f32 %v33_v16  ;;  %v32_v18 = vmul.f32 0.00390625, %v29_v17  ;;  %vm37_vm0 = vcmp.eq.f32.partialorder %v33_v16, inf  ;;  %v40_v24 = vand.u32 2147483648, %v33_v16 }
  0x99   :  { %vm39_vm1 = vcmp.eq.f32.partialorder %v33_v16, 0.0 }
  0x9a   :  { %v34_v19 = vadd.f32 1e-05, %v32_v18 }
  0x9c   :  { %729 = vrsqrt.f32 %v34_v19  ;;  %vm44_vm2 = vcmp.eq.f32.partialorder %v34_v19, inf  ;;  %v47_v32 = vand.u32 2147483648, %v34_v19  ;;  %vm46_vm3 = vcmp.eq.f32.partialorder %v34_v19, 0.0 }
  0xa2   :  { %v728_v22 = vpop.eup %727 }
  0xa3   :  { %v36_v23 = vmul.f32 %v728_v22, %v33_v16 }
  0xa5   :  { %v38_v28 = vsel %vm37_vm0, %v33_v16, %v36_v23 }
  0xa6   :  { %v730_v29 = vpop.eup %729  ;;  %v41_v30 = vsel %vm39_vm1, %v40_v24, %v38_v28 }
  0xa7   :  { %v43_v31 = vmul.f32 %v730_v29, %v34_v19  ;;  %v49_v36 = vmul.f32 %v41_v30, %v781_v0  ;;  %v50_v37 = vmul.f32 %v41_v30, %v786_v1 }
  0xa9   :  { %v45_v35 = vsel %vm44_vm2, %v34_v19, %v43_v31  ;;  %v65_v41 = vmul.f32 %v61_v34, %v50_v37  ;;  %v64_v43 = vmul.f32 %v57_v33, %v49_v36 }
  0xaa   :  { %v48_v38 = vsel %vm46_vm3, %v47_v32, %v45_v35 }
  0xab   :  { %v51_v39 = vmul.f32 %v48_v38, %v791_v2  ;;  %v52_v40 = vmul.f32 %v48_v38, %v800_v5 }
  0xad   :  { %v67_v42 = vmul.f32 %v61_v34, %v52_v40  ;;  %v66_v44 = vmul.f32 %v57_v33, %v51_v39 }
  0xaf   :  { %v69_v45 = vpack.c.bf16 %v67_v42, %v65_v41  ;;  %v68_v46 = vpack.c.bf16 %v66_v44, %v64_v43 }
  0xb1   :  { %486 = vmatprep.mubr.bf16.mxu0 %v69_v45  ;;  %529 = vmatprep.mubr.bf16.mxu1 %v69_v45 }
  0xb2   :  { %487 = vmatmul.mubr.bf16.vlgmr.msra.gmra.mrb[0].mxu0 %v68_v46  ;;  %530 = vmatmul.mubr.bf16.vlgmr.msra.gmra.mrb[0].mxu1 %v68_v46 }
 0x185   :  { %v488_v0 = vpop.f32.mrb[0].mxu0  ;;  %v531_v47 = vpop.f32.mrb[0].mxu1 }
 0x186   :  { %540 = vst [vmem:[#allocation2] sm:$0xff] %v488_v0  ;;  %542 = vst [vmem:[#allocation2 + $0x10] sm:$0xff] %v531_v47  ;;  %v490_v1 = vpop.f32.mrb[1].mxu0  ;;  %v533_v2 = vpop.f32.mrb[1].mxu1 }
 0x187   :  { %541 = vst [vmem:[#allocation2 + $0x8] sm:$0xff] %v490_v1  ;;  %543 = vst [vmem:[#allocation2 + $0x18] sm:$0xff] %v533_v2  ;;  %v492_v5 = vpop.f32.mrb[2].mxu0  ;;  %v535_v48 = vpop.f32.mrb[2].mxu1 }
 0x188   :  { %544 = vst [vmem:[#allocation2 + $0x20] sm:$0xff] %v492_v5  ;;  %546 = vst [vmem:[#allocation2 + $0x30] sm:$0xff] %v535_v48  ;;  %v494_v49 = vpop.f32.mrb[3].mxu0  ;;  %v537_v50 = vpop.f32.mrb[3].mxu1 }
 0x189   :  { %545 = vst [vmem:[#allocation2 + $0x28] sm:$0xff] %v494_v49  ;;  %547 = vst [vmem:[#allocation2 + $0x38] sm:$0xff] %v537_v50 }
 0x18a   :  { %742 = shalt.err (!%p739_p4)
}
 0x18b   :  { %s743_s13 = scalar_lea.hbm %s1020_s3, 1024 }
 0x18c   :  { %p744_p5 = scmp.ne.s32.totalorder %s1020_s3, %s743_s13  ;;  %p747_p6 = scmp.lt.u32.totalorder %s743_s13, %s1020_s3 }
 0x18e   :  { %p749_p7 = pnand %p747_p6, %p744_p5 }
 0x190   :  { %752 = shalt.err (!%p749_p7)
}
 0x191   :  { %s756_s18 = smov 512   ;;  %s757_s19 = smov 32  }
 0x192   :  { %559 = dma.vmem_to_hbm [thread:$0]  %s554_s9, 1024, %s1020_s3, [#allocation3], %s756_s18, %s756_s18, %s757_s19  }
 0x193   :  { %753 = dma.done.wait [#allocation3], 1024  }
 0x194   :  { %754 = vsyncadd [#allocation3], 4294966272 }
 0x195   :  { %563 = vsyncpa [#allocation3], 1 }

// kernel: transformer_forward.4
= control target key start
LH: loop header
LB: loop body
LE: loop exit
PB: predicated region body
PF: predicated region fallthrough
CT: control target
= control target key end

     0   :  { %v93_v49 = vlaneseq  ;;  %vm6170_vm5 = vmmov 0   ;;  %vm810_vm6 = vcmask 261120   ;;  %vm859_vm7 = vcmask 64512   ;;  %s6175_s22 = smov 32   ;;  %s7824_s0 = inlined_call_operand.vmem [shape: f32[16,256], index: 0, kind: input, shape index: {}]   ;;  %s7825_s4 = inlined_call_operand.vmem [shape: bf16[256,256], index: 4, kind: input, shape index: {}]   ;;  %s7826_s8 = inlined_call_operand.vmem [shape: bf16[256,128], index: 8, kind: input, shape index: {}]   ;;  %s7827_s6 = inlined_call_operand.vmem [shape: bf16[256,256], index: 6, kind: input, shape index: {}]   ;;  %s7828_s3 = inlined_call_operand.vmem [shape: f32[1,256], index: 3, kind: input, shape index: {}]   ;;  %s7829_s5 = inlined_call_operand.vmem [shape: f32[1,256], index: 5, kind: input, shape index: {}]   ;;  %s7830_s1 = inlined_call_operand.vmem [shape: f32[16,256], index: 1, kind: input, shape index: {}]   ;;  %s7831_s9 = inlined_call_operand.vmem [shape: f32[1,128], index: 9, kind: input, shape index: {}]   ;;  %s7832_s7 = inlined_call_operand.vmem [shape: f32[1,256], index: 7, kind: input, shape index: {}]   ;;  %s7833_s2 = inlined_call_operand.vmem [shape: f32[16,256], index: 2, kind: input, shape index: {}]   ;;  %s7834_s10 = inlined_call_operand.vmem [shape: bf16[256,256], index: 10, kind: input, shape index: {}]   ;;  %s7835_s11 = inlined_call_operand.vmem [shape: f32[1,256], index: 11, kind: input, shape index: {}]   ;;  %s7836_s13 = inlined_call_operand.vmem [shape: bf16[256,512], index: 13, kind: input, shape index: {}]   ;;  %s7837_s14 = inlined_call_operand.vmem [shape: bf16[256,512], index: 14, kind: input, shape index: {}]   ;;  %s7838_s12 = inlined_call_operand.vmem [shape: f32[1,256], index: 12, kind: input, shape index: {}]   ;;  %s7839_s15 = inlined_call_operand.vmem [shape: bf16[512,256], index: 15, kind: input, shape index: {}]   ;;  %s7840_s16 = inlined_call_operand.vmem [shape: f32[16,256], index: 16, kind: output, shape index: {}]  }
   0x1   :  { %7842 = sst [smem:[#allocation2_spill]] %s7824_s0  ;;  %v5613_v8 = vld [vmem:[%s7825_s4 + $0x4] ss:$8 sps:$4 sm:$0xff]   ;;  %v5615_v9 = vld [vmem:[%s7825_s4] ss:$8 sps:$4 sm:$0xff]   ;;  %v5650_v28 = vld [vmem:[%s7826_s8 + $0x50] sm:$0xff]  }
   0x2   :  { %s7843_s23 = sld [smem:[#allocation2_spill]]  ;;  %v5616_v11 = vld [vmem:[%s7825_s4 + $0x14] ss:$8 sps:$4 sm:$0xff]   ;;  %313 = vmatprep.subr.bf16.mxu1 %v5613_v8  ;;  %v5618_v13 = vld [vmem:[%s7825_s4 + $0x10] ss:$8 sps:$4 sm:$0xff]   ;;  %v5640_v19 = vld [vmem:[%s7826_s8 + $0x40] sm:$0xff]  }
   0x3   :  { %314 = vmatpush1.bf16.msra.mxu1 %v5615_v9  ;;  %v5619_v14 = vld [vmem:[%s7825_s4 + $0x24] ss:$8 sps:$4 sm:$0xff]   ;;  %v5621_v15 = vld [vmem:[%s7825_s4 + $0x20] ss:$8 sps:$4 sm:$0xff]   ;;  %v5622_v16 = vld [vmem:[%s7825_s4 + $0x34] ss:$8 sps:$4 sm:$0xff]   ;;  %5324 = vmatprep.subr.bf16.mxu0 %v5640_v19 }
   0x4   :  { %315 = vmatprep.subr.bf16.mxu1 %v5616_v11  ;;  %v5624_v17 = vld [vmem:[%s7825_s4 + $0x30] ss:$8 sps:$4 sm:$0xff]   ;;  %v5625_v18 = vld [vmem:[%s7825_s4 + $0x44] ss:$8 sps:$4 sm:$0xff]   ;;  %v5627_v20 = vld [vmem:[%s7825_s4 + $0x40] ss:$8 sps:$4 sm:$0xff]  }
   0x5   :  { %v5641_v21 = vld [vmem:[%s7826_s8] sm:$0xff]   ;;  %v5628_v22 = vld [vmem:[%s7825_s4 + $0x54] ss:$8 sps:$4 sm:$0xff]   ;;  %v5630_v23 = vld [vmem:[%s7825_s4 + $0x50] ss:$8 sps:$4 sm:$0xff]   ;;  %v6415_v53 = vshrl.u32 %v93_v49, 7 }
   0x6   :  { %5325 = vmatpush3.bf16.msra.mxu0 %v5641_v21  ;;  %v5645_v24 = vld [vmem:[%s7826_s8 + $0x48] sm:$0xff]   ;;  %v5651_v29 = vld [vmem:[%s7826_s8 + $0x10] sm:$0xff]   ;;  %v5655_v31 = vld [vmem:[%s7826_s8 + $0x58] sm:$0xff]   ;;  %v6417_v54 = vand.u32 127, %v93_v49 }
   0x7   :  { %316 = vmatpush1.bf16.msra.mxu1 %v5618_v13  ;;  %v5646_v25 = vld [vmem:[%s7826_s8 + $0x8] sm:$0xff]   ;;  %5326 = vmatprep.subr.bf16.mxu0 %v5645_v24  ;;  %v5634_v30 = vld [vmem:[%s7825_s4 + $0x74] ss:$8 sps:$4 sm:$0xff]   ;;  %v5660_v33 = vld [vmem:[%s7826_s8 + $0x60] sm:$0xff]   ;;  %v6443_v11 = vsub.s32 1, %v6415_v53 }
   0x8   :  { %v6264_v0 = vld [vmem:[%s7843_s23] sm:$0xff]  ;;  %v6269_v1 = vld [vmem:[%s7843_s23 + $0x8] sm:$0xff]  ;;  %v6274_v2 = vld [vmem:[%s7843_s23 + $0x10] sm:$0xff]  ;;  %317 = vmatprep.subr.bf16.mxu1 %v5619_v14  ;;  %vm803_vm0 = vcmp.le.s32.totalorder %v6417_v54, %v6415_v53  ;;  %v6173_v54 = vmov 0  }
   0x9   :  { %v59_v3 = vmul.f32 %v6264_v0, %v6264_v0  ;;  %v60_v4 = vmul.f32 %v6269_v1, %v6269_v1  ;;  %v6283_v5 = vld [vmem:[%s7843_s23 + $0x18] sm:$0xff]  ;;  %v61_v6 = vmul.f32 %v6274_v2, %v6274_v2  ;;  %v5631_v26 = vld [vmem:[%s7825_s4 + $0x64] ss:$8 sps:$4 sm:$0xff]   ;;  %v5633_v27 = vld [vmem:[%s7825_s4 + $0x60] ss:$8 sps:$4 sm:$0xff]  }
   0xa   :  { %v62_v7 = vmul.f32 %v6283_v5, %v6283_v5  ;;  %5327 = vmatpush3.bf16.msra.mxu0 %v5646_v25  ;;  %v5656_v32 = vld [vmem:[%s7826_s8 + $0x18] sm:$0xff]   ;;  %v5637_v35 = vld [vmem:[%s7825_s4 + $0x84] ss:$8 sps:$4 sm:$0xff]   ;;  %v5639_v38 = vld [vmem:[%s7825_s4 + $0x80] ss:$8 sps:$4 sm:$0xff]  }
   0xb   :  { %v63_v10 = vadd.f32 %v60_v4, %v59_v3  ;;  %318 = vmatpush1.bf16.msra.mxu1 %v5621_v15  ;;  %5328 = vmatprep.subr.bf16.mxu0 %v5650_v28  ;;  %v5636_v34 = vld [vmem:[%s7825_s4 + $0x70] ss:$8 sps:$4 sm:$0xff]   ;;  %v5661_v36 = vld [vmem:[%s7826_s8 + $0x20] sm:$0xff]   ;;  %v5665_v37 = vld [vmem:[%s7826_s8 + $0x68] sm:$0xff]  }
   0xc   :  { %v66_v12 = vadd.f32 %v62_v7, %v61_v6  ;;  %319 = vmatprep.subr.bf16.mxu1 %v5622_v16  ;;  %v5642_v39 = vld [vmem:[%s7825_s4 + $0x94] ss:$8 sps:$4 sm:$0xff]   ;;  %v5666_v40 = vld [vmem:[%s7826_s8 + $0x28] sm:$0xff]   ;;  %v5644_v42 = vld [vmem:[%s7825_s4 + $0x90] ss:$8 sps:$4 sm:$0xff]  }
   0xd   :  { %64 = vadd.xlane.f32.xlu0 %v63_v10  ;;  %v5670_v41 = vld [vmem:[%s7826_s8 + $0x70] sm:$0xff]   ;;  %v5647_v43 = vld [vmem:[%s7825_s4 + $0xa4] ss:$8 sps:$4 sm:$0xff]   ;;  %v5675_v45 = vld [vmem:[%s7826_s8 + $0x78] sm:$0xff]  }
   0xe   :  { %5329 = vmatpush3.bf16.msra.mxu0 %v5651_v29  ;;  %v5671_v44 = vld [vmem:[%s7826_s8 + $0x30] sm:$0xff]   ;;  %v5649_v46 = vld [vmem:[%s7825_s4 + $0xa0] ss:$8 sps:$4 sm:$0xff]   ;;  %v5676_v48 = vld [vmem:[%s7826_s8 + $0x38] sm:$0xff]  }
   0xf   :  { %320 = vmatpush1.bf16.msra.mxu1 %v5624_v17  ;;  %5330 = vmatprep.subr.bf16.mxu0 %v5655_v31  ;;  %v5652_v47 = vld [vmem:[%s7825_s4 + $0xb4] ss:$8 sps:$4 sm:$0xff]   ;;  %v5654_v50 = vld [vmem:[%s7825_s4 + $0xb0] ss:$8 sps:$4 sm:$0xff]   ;;  %v5657_v51 = vld [vmem:[%s7825_s4 + $0xc4] ss:$8 sps:$4 sm:$0xff]  }
  0x10   :  { %321 = vmatprep.subr.bf16.mxu1 %v5625_v18  ;;  %v5659_v52 = vld [vmem:[%s7825_s4 + $0xc0] ss:$8 sps:$4 sm:$0xff]   ;;  %v5662_v55 = vld [vmem:[%s7825_s4 + $0xd4] ss:$8 sps:$4 sm:$0xff]   ;;  %v5664_v56 = vld [vmem:[%s7825_s4 + $0xd0] ss:$8 sps:$4 sm:$0xff]  }
  0x11   :  { %67 = vadd.xlane.f32.xlu0 %v66_v12  ;;  %v5667_v57 = vld [vmem:[%s7825_s4 + $0xe4] ss:$8 sps:$4 sm:$0xff]   ;;  %v5669_v58 = vld [vmem:[%s7825_s4 + $0xe0] ss:$8 sps:$4 sm:$0xff]   ;;  %v5672_v59 = vld [vmem:[%s7825_s4 + $0xf4] ss:$8 sps:$4 sm:$0xff]  }
  0x12   :  { %5331 = vmatpush3.bf16.msra.mxu0 %v5656_v32  ;;  %v5674_v60 = vld [vmem:[%s7825_s4 + $0xf0] ss:$8 sps:$4 sm:$0xff]   ;;  %v5679_v61 = vld [vmem:[%s7827_s6 + $0x4] ss:$8 sps:$4 sm:$0xff]   ;;  %v6446_v12 = vsub.s32 0, %v6415_v53 }
  0x13   :  { %322 = vmatpush1.bf16.msra.mxu1 %v5627_v20  ;;  %5332 = vmatprep.subr.bf16.mxu0 %v5660_v33  ;;  %v58_v13 = vld [vmem:[%s7828_s3] sm:$0x3] }
  0x14   :  { %323 = vmatprep.subr.bf16.mxu1 %v5628_v22  ;;  %v100_v19 = vrot.slane %v58_v13, %v6443_v11  ;;  %v96_v20 = vrot.slane %v58_v13, %v6446_v12  ;;  %v5677_v32 = vld [vmem:[%s7827_s6] ss:$8 sps:$4 sm:$0xff]  }
  0x15   :  { %v5707_v49 = vld [vmem:[%s7827_s6 + $0xa0] ss:$8 sps:$4 sm:$0xff]  }
  0x16   :  { %5333 = vmatpush3.bf16.msra.mxu0 %v5661_v36  ;;  %v5691_v36 = vld [vmem:[%s7827_s6 + $0x44] ss:$8 sps:$4 sm:$0xff]   ;;  %v5027_v13 = vld [vmem:[%s7831_s9] ss:$0 sm:$0xff]  ;;  %s6171_s9 = smov 64  }
  0x17   :  { %324 = vmatpush1.bf16.msra.mxu1 %v5630_v23  ;;  %5334 = vmatprep.subr.bf16.mxu0 %v5665_v37  ;;  %v5689_v37 = vld [vmem:[%s7827_s6 + $0x40] ss:$8 sps:$4 sm:$0xff]  }
  0x18   :  { %325 = vmatprep.subr.bf16.mxu1 %v5631_v26 }
  0x1a   :  { %5335 = vmatpush3.bf16.msra.mxu0 %v5666_v40  ;;  %v5697_v40 = vld [vmem:[%s7827_s6 + $0x64] ss:$8 sps:$4 sm:$0xff]  }
  0x1b   :  { %326 = vmatpush1.bf16.msra.mxu1 %v5633_v27  ;;  %5336 = vmatprep.subr.bf16.mxu0 %v5670_v41  ;;  %v5695_v41 = vld [vmem:[%s7827_s6 + $0x60] ss:$8 sps:$4 sm:$0xff]  }
  0x1c   :  { %327 = vmatprep.subr.bf16.mxu1 %v5634_v30 }
  0x1e   :  { %5337 = vmatpush3.bf16.msra.mxu0 %v5671_v44  ;;  %v5703_v44 = vld [vmem:[%s7827_s6 + $0x84] ss:$8 sps:$4 sm:$0xff]  }
  0x1f   :  { %328 = vmatpush1.bf16.msra.mxu1 %v5636_v34  ;;  %5338 = vmatprep.subr.bf16.mxu0 %v5675_v45  ;;  %v5688_v34 = vld [vmem:[%s7827_s6 + $0x34] ss:$8 sps:$4 sm:$0xff]   ;;  %v5701_v45 = vld [vmem:[%s7827_s6 + $0x80] ss:$8 sps:$4 sm:$0xff]  }
  0x20   :  { %329 = vmatprep.subr.bf16.mxu1 %v5637_v35  ;;  %v5686_v35 = vld [vmem:[%s7827_s6 + $0x30] ss:$8 sps:$4 sm:$0xff]  }
  0x22   :  { %5339 = vmatpush3.bf16.msra.mxu0 %v5676_v48  ;;  %v5709_v48 = vld [vmem:[%s7827_s6 + $0xa4] ss:$8 sps:$4 sm:$0xff]  }
  0x23   :  { %330 = vmatpush1.bf16.msra.mxu1 %v5639_v38  ;;  %v5694_v38 = vld [vmem:[%s7827_s6 + $0x54] ss:$8 sps:$4 sm:$0xff]  }
  0x24   :  { %331 = vmatprep.subr.bf16.mxu1 %v5642_v39  ;;  %v5692_v39 = vld [vmem:[%s7827_s6 + $0x50] ss:$8 sps:$4 sm:$0xff]  }
  0x27   :  { %332 = vmatpush1.bf16.msra.mxu1 %v5644_v42  ;;  %v5700_v42 = vld [vmem:[%s7827_s6 + $0x74] ss:$8 sps:$4 sm:$0xff]  }
  0x28   :  { %333 = vmatprep.subr.bf16.mxu1 %v5647_v43  ;;  %v5698_v43 = vld [vmem:[%s7827_s6 + $0x70] ss:$8 sps:$4 sm:$0xff]  }
  0x2b   :  { %334 = vmatpush1.bf16.msra.mxu1 %v5649_v46  ;;  %v5706_v46 = vld [vmem:[%s7827_s6 + $0x94] ss:$8 sps:$4 sm:$0xff]  }
  0x2c   :  { %335 = vmatprep.subr.bf16.mxu1 %v5652_v47  ;;  %v5704_v47 = vld [vmem:[%s7827_s6 + $0x90] ss:$8 sps:$4 sm:$0xff]  }
  0x2f   :  { %336 = vmatpush1.bf16.msra.mxu1 %v5654_v50  ;;  %v5712_v50 = vld [vmem:[%s7827_s6 + $0xb4] ss:$8 sps:$4 sm:$0xff]  }
  0x30   :  { %337 = vmatprep.subr.bf16.mxu1 %v5657_v51  ;;  %v5710_v51 = vld [vmem:[%s7827_s6 + $0xb0] ss:$8 sps:$4 sm:$0xff]  }
  0x33   :  { %338 = vmatpush1.bf16.msra.mxu1 %v5659_v52  ;;  %v5715_v52 = vld [vmem:[%s7827_s6 + $0xc4] ss:$8 sps:$4 sm:$0xff]  }
  0x34   :  { %339 = vmatprep.subr.bf16.mxu1 %v5662_v55  ;;  %v5713_v55 = vld [vmem:[%s7827_s6 + $0xc0] ss:$8 sps:$4 sm:$0xff]  }
  0x37   :  { %340 = vmatpush1.bf16.msra.mxu1 %v5664_v56  ;;  %v5718_v56 = vld [vmem:[%s7827_s6 + $0xd4] ss:$8 sps:$4 sm:$0xff]  }
  0x38   :  { %341 = vmatprep.subr.bf16.mxu1 %v5667_v57  ;;  %v5716_v57 = vld [vmem:[%s7827_s6 + $0xd0] ss:$8 sps:$4 sm:$0xff]  }
  0x3b   :  { %342 = vmatpush1.bf16.msra.mxu1 %v5669_v58  ;;  %v5721_v58 = vld [vmem:[%s7827_s6 + $0xe4] ss:$8 sps:$4 sm:$0xff]  }
  0x3c   :  { %343 = vmatprep.subr.bf16.mxu1 %v5672_v59  ;;  %v5719_v59 = vld [vmem:[%s7827_s6 + $0xe0] ss:$8 sps:$4 sm:$0xff]  }
  0x3f   :  { %344 = vmatpush1.bf16.msra.mxu1 %v5674_v60  ;;  %v5724_v60 = vld [vmem:[%s7827_s6 + $0xf4] ss:$8 sps:$4 sm:$0xff]  }
  0x40   :  { %560 = vmatprep.subr.bf16.mxu1 %v5679_v61  ;;  %v5722_v61 = vld [vmem:[%s7827_s6 + $0xf0] ss:$8 sps:$4 sm:$0xff]  }
  0x9a   :  { %v65_v62 = vpop.xlane.xlu0 %64 }
  0x9b   :  { %v70_v63 = vmul.f32 0.00390625, %v65_v62  ;;  %v141_v62 = vld [vmem:[%s7829_s5] sm:$0x3] }
  0x9d   :  { %v72_v3 = vadd.f32 1e-05, %v70_v63  ;;  %v6169_v63 = vmov 0.0  }
  0x9e   :  { %v68_v4 = vpop.xlane.xlu0 %67 }
  0x9f   :  { %6061 = vrsqrt.f32 %v72_v3  ;;  %v71_v6 = vmul.f32 0.00390625, %v68_v4  ;;  %vm76_vm1 = vcmp.eq.f32.partialorder %v72_v3, inf  ;;  %v79_v10 = vand.u32 2147483648, %v72_v3 }
  0xa0   :  { %vm78_vm2 = vcmp.eq.f32.partialorder %v72_v3, 0.0 }
  0xa1   :  { %v73_v7 = vadd.f32 1e-05, %v71_v6 }
  0xa3   :  { %6063 = vrsqrt.f32 %v73_v7  ;;  %vm83_vm3 = vcmp.eq.f32.partialorder %v73_v7, inf  ;;  %v86_v18 = vand.u32 2147483648, %v73_v7  ;;  %vm85_vm4 = vcmp.eq.f32.partialorder %v73_v7, 0.0 }
  0xa9   :  { %v6062_v8 = vpop.eup %6061 }
  0xaa   :  { %v75_v9 = vmul.f32 %v6062_v8, %v72_v3 }
  0xac   :  { %v77_v14 = vsel %vm76_vm1, %v72_v3, %v75_v9  ;;  %v150_v3 = vrot.slane %v141_v62, %v6443_v11  ;;  %v604_v9 = vld [vmem:[%s7830_s1 + $0x8] sm:$0xff] }
  0xad   :  { %v6064_v15 = vpop.eup %6063  ;;  %v80_v16 = vsel %vm78_vm2, %v79_v10, %v77_v14 }
  0xae   :  { %v82_v17 = vmul.f32 %v6064_v15, %v73_v7  ;;  %v89_v22 = vmul.f32 %v80_v16, %v6269_v1  ;;  %v88_v23 = vmul.f32 %v80_v16, %v6264_v0  ;;  %v5682_v0 = vld [vmem:[%s7827_s6 + $0x14] ss:$8 sps:$4 sm:$0xff]   ;;  %v5680_v1 = vld [vmem:[%s7827_s6 + $0x10] ss:$8 sps:$4 sm:$0xff]  }
  0xb0   :  { %v84_v21 = vsel %vm83_vm3, %v73_v7, %v82_v17  ;;  %v104_v27 = vmul.f32 %v100_v19, %v89_v22  ;;  %v103_v29 = vmul.f32 %v96_v20, %v88_v23  ;;  %v146_v7 = vrot.slane %v141_v62, %v6446_v12  ;;  %v605_v17 = vld [vmem:[%s7830_s1 + $0x10] sm:$0xff] }
  0xb1   :  { %v87_v24 = vsel %vm85_vm4, %v86_v18, %v84_v21  ;;  %v606_v21 = vld [vmem:[%s7830_s1 + $0x18] sm:$0xff] }
  0xb2   :  { %v91_v25 = vmul.f32 %v87_v24, %v6283_v5  ;;  %v90_v26 = vmul.f32 %v87_v24, %v6274_v2  ;;  %v5685_v2 = vld [vmem:[%s7827_s6 + $0x24] ss:$8 sps:$4 sm:$0xff]   ;;  %v5683_v5 = vld [vmem:[%s7827_s6 + $0x20] ss:$8 sps:$4 sm:$0xff]  }
  0xb4   :  { %v106_v28 = vmul.f32 %v100_v19, %v91_v25  ;;  %v105_v30 = vmul.f32 %v96_v20, %v90_v26 }
  0xb6   :  { %v108_v31 = vpack.c.bf16 %v106_v28, %v104_v27  ;;  %v6460_v33 = vpack.c.bf16 %v105_v30, %v103_v29 }
  0xb8   :  { %345 = vmatprep.mubr.bf16.mxu1 %v108_v31  ;;  %790 = vmatprep.mubr.bf16.mxu0 %v108_v31 }
  0xb9   :  { %346 = vmatmul.mubr.bf16.vlgmr.msra.gmra.mrb[0].mxu1 %v6460_v33  ;;  %791 = vmatmul.mubr.bf16.vlgmr.msra.gmra.mrb[0].mxu0 %v6460_v33 }
  0xba   :  { %561 = vmatpush1.bf16.msra.mxu1 %v5677_v32  ;;  %592 = vmatprep.mubr.bf16.mxu1 %v108_v31  ;;  %v388_v31 = vld [vmem:[%s7832_s7] sm:$0x3] }
  0xbb   :  { %562 = vmatprep.subr.bf16.mxu1 %v5682_v0  ;;  %v393_v32 = vrot.slane %v388_v31, %v6446_v12  ;;  %1087 = vmatprep.mubr.bf16.mxu0 %v6173_v54 }
  0xbe   :  { %563 = vmatpush1.bf16.msra.mxu1 %v5680_v1  ;;  %v603_v1 = vld [vmem:[%s7830_s1] sm:$0xff] }
  0xbf   :  { %564 = vmatprep.subr.bf16.mxu1 %v5685_v2 }
  0xc2   :  { %565 = vmatpush1.bf16.msra.mxu1 %v5683_v5  ;;  %v611_v5 = vld [vmem:[%s7833_s2] sm:$0xff] }
  0xc3   :  { %566 = vmatprep.subr.bf16.mxu1 %v5688_v34 }
  0xc6   :  { %567 = vmatpush1.bf16.msra.mxu1 %v5686_v35 }
  0xc7   :  { %568 = vmatprep.subr.bf16.mxu1 %v5691_v36  ;;  %v612_v36 = vld [vmem:[%s7833_s2 + $0x8] sm:$0xff] }
  0xca   :  { %569 = vmatpush1.bf16.msra.mxu1 %v5689_v37 }
  0xcb   :  { %570 = vmatprep.subr.bf16.mxu1 %v5694_v38 }
  0xce   :  { %571 = vmatpush1.bf16.msra.mxu1 %v5692_v39  ;;  %v613_v39 = vld [vmem:[%s7833_s2 + $0x10] sm:$0xff] }
  0xcf   :  { %572 = vmatprep.subr.bf16.mxu1 %v5697_v40 }
  0xd2   :  { %573 = vmatpush1.bf16.msra.mxu1 %v5695_v41 }
  0xd3   :  { %574 = vmatprep.subr.bf16.mxu1 %v5700_v42 }
  0xd6   :  { %575 = vmatpush1.bf16.msra.mxu1 %v5698_v43 }
  0xd7   :  { %576 = vmatprep.subr.bf16.mxu1 %v5703_v44  ;;  %v614_v44 = vld [vmem:[%s7833_s2 + $0x18] sm:$0xff]  ;;  %s6174_s2 = smov 96  }
  0xda   :  { %577 = vmatpush1.bf16.msra.mxu1 %v5701_v45 }
  0xdb   :  { %578 = vmatprep.subr.bf16.mxu1 %v5706_v46 }
  0xde   :  { %579 = vmatpush1.bf16.msra.mxu1 %v5704_v47 }
  0xdf   :  { %580 = vmatprep.subr.bf16.mxu1 %v5709_v48 }
  0xe2   :  { %581 = vmatpush1.bf16.msra.mxu1 %v5707_v49 }
  0xe3   :  { %582 = vmatprep.subr.bf16.mxu1 %v5712_v50 }
  0xe6   :  { %583 = vmatpush1.bf16.msra.mxu1 %v5710_v51 }
  0xe7   :  { %584 = vmatprep.subr.bf16.mxu1 %v5715_v52 }
  0xea   :  { %585 = vmatpush1.bf16.msra.mxu1 %v5713_v55 }
  0xeb   :  { %586 = vmatprep.subr.bf16.mxu1 %v5718_v56 }
  0xee   :  { %587 = vmatpush1.bf16.msra.mxu1 %v5716_v57 }
  0xef   :  { %588 = vmatprep.subr.bf16.mxu1 %v5721_v58  ;;  %v6172_v58 = vmov -inf  }
  0xf2   :  { %589 = vmatpush1.bf16.msra.mxu1 %v5719_v59  ;;  %v6621_v59 = vsel %vm803_vm0, 0.0, %v6172_v58 }
  0xf3   :  { %590 = vmatprep.subr.bf16.mxu1 %v5724_v60 }
  0xf6   :  { %591 = vmatpush1.bf16.msra.mxu1 %v5722_v61 }
  0xf7   :  { %5410 = vmatprep.subr.bf16.mxu1 %v6169_v63 }
  0xf9   :  { %593 = vmatmul.mubr.bf16.vlgmr.msra.gmra.mrb[4].mxu1 %v6460_v33  ;;  %v397_v33 = vrot.slane %v388_v31, %v6443_v11 }
  0xfa   :  { %5412 = vmatprep.mubr.msk.bf16.mxu1 %vm6170_vm5, %v6169_v63 }
 0x18c   :  { %v347_v4 = vpop.f32.mrb[0].mxu1  ;;  %v5340_v6 = vpop.f32.mrb[0].mxu0 }
 0x18d   :  { %v349_v8 = vpop.f32.mrb[1].mxu1  ;;  %v5341_v10 = vpop.f32.mrb[1].mxu0  ;;  %v348_v0 = vadd.f32 %v347_v4, %v146_v7 }
 0x18e   :  { %v350_v14 = vadd.f32 %v349_v8, %v150_v3  ;;  %v5342_v15 = vadd.f32 %v5341_v10, %v5340_v6  ;;  %v351_v16 = vpop.f32.mrb[2].mxu1  ;;  %v5343_v18 = vpop.f32.mrb[2].mxu0 }
 0x18f   :  { %v352_v19 = vadd.f32 %v351_v16, %v146_v7  ;;  %v353_v20 = vpop.f32.mrb[3].mxu1  ;;  %v5344_v22 = vpop.f32.mrb[3].mxu0  ;;  %v607_v40 = vmul.f32 %v603_v1, %v348_v0 }
 0x190   :  { %v608_v23 = vmul.f32 %v604_v9, %v350_v14  ;;  %v354_v24 = vadd.f32 %v353_v20, %v150_v3  ;;  %v5345_v25 = vadd.f32 %v5344_v22, %v5343_v18  ;;  %v793_v26 = vadd.f32 %v5342_v15, %v5027_v13 }
 0x191   :  { %v609_v27 = vmul.f32 %v605_v17, %v352_v19 }
 0x192   :  { %v610_v28 = vmul.f32 %v606_v21, %v354_v24  ;;  %v6575_v29 = vadd.f32 %v5345_v25, %v5027_v13  ;;  %v6577_v30 = vpack.c.bf16 %v793_v26, %v793_v26 }
 0x194   :  { %808 = vrot.lane.b32.xlu1 %v6577_v30, %s6171_s9 }
 0x1cc   :  { %v594_v2 = vpop.f32.mrb[4].mxu1 }
 0x1cd   :  { %v595_v34 = vadd.f32 %v594_v2, %v393_v32  ;;  %v596_v35 = vpop.f32.mrb[5].mxu1 }
 0x1ce   :  { %v597_v37 = vadd.f32 %v596_v35, %v397_v33  ;;  %v598_v38 = vpop.f32.mrb[6].mxu1  ;;  %v6659_v35 = vld [vmem:[%s7834_s10 + $0x24] ss:$8 sps:$4 sm:$0xff]  }
 0x1cf   :  { %v615_v41 = vmul.f32 %v611_v5, %v595_v34  ;;  %v599_v42 = vadd.f32 %v598_v38, %v393_v32  ;;  %v600_v43 = vpop.f32.mrb[7].mxu1  ;;  %v6648_v5 = vld [vmem:[%s7834_s10 + $0x4] ss:$8 sps:$4 sm:$0xff]   ;;  %v6654_v34 = vld [vmem:[%s7834_s10 + $0x20] ss:$8 sps:$4 sm:$0xff]   ;;  %1055 = vmatprep.subr.bf16.mxu0 %v6659_v35 }
 0x1d0   :  { %v616_v45 = vmul.f32 %v612_v36, %v597_v37  ;;  %v601_v46 = vadd.f32 %v600_v43, %v397_v33  ;;  %v6664_v36 = vld [vmem:[%s7834_s10 + $0x30] ss:$8 sps:$4 sm:$0xff]   ;;  %v6669_v37 = vld [vmem:[%s7834_s10 + $0x34] ss:$8 sps:$4 sm:$0xff]   ;;  %1056 = vmatpush1.bf16.msra.mxu0 %v6654_v34 }
 0x1d1   :  { %v619_v47 = vadd.f32 %v615_v41, %v607_v40  ;;  %v617_v48 = vmul.f32 %v613_v39, %v599_v42  ;;  %1057 = vmatprep.subr.bf16.mxu0 %v6669_v37  ;;  %v6679_v41 = vld [vmem:[%s7834_s10] ss:$8 sps:$4 sm:$0xff]   ;;  %v6684_v43 = vld [vmem:[%s7834_s10 + $0x14] ss:$8 sps:$4 sm:$0xff]  }
 0x1d2   :  { %v6601_v49 = vadd.f32 %v616_v45, %v608_v23  ;;  %v618_v50 = vmul.f32 %v614_v44, %v601_v46  ;;  %v6691_v44 = vld [vmem:[%s7834_s10 + $0x10] ss:$8 sps:$4 sm:$0xff]  }
 0x1d3   :  { %v6603_v51 = vadd.f32 %v617_v48, %v609_v27  ;;  %v6612_v57 = vpack.c.bf16 %v619_v47, %v619_v47 }
 0x1d4   :  { %v6605_v52 = vadd.f32 %v618_v50, %v610_v28  ;;  %1058 = vmatpush1.bf16.msra.mxu0 %v6664_v36 }
 0x1d5   :  { %5434 = vmatprep.subr.bf16.mxu0 %v6169_v63 }
 0x206   :  { %v809_v55 = vpop.permute.xlu1 %808 }
 0x207   :  { %v6608_v56 = vsel %vm810_vm6, %v809_v55, 0 }
 0x208   :  { %5411 = vmatpush3.bf16.xpose.msra.mxu1 %v6608_v56 }
 0x209   :  { %5416 = vmatprep.subr.bf16.mxu1 %v6169_v63 }
 0x20f   :  { %5413 = vmatmul.mubr.msk.bf16.vlgmr.msra.gmra.mrb[8].mxu1 %vm810_vm6, %v6612_v57 }
 0x210   :  { %5418 = vmatprep.mubr.msk.bf16.mxu1 %vm6170_vm5, %v6169_v63  ;;  %5417 = vmatpush3.bf16.msra.mxu1 %v6173_v54 }
 0x211   :  { %5422 = vmatprep.subr.bf16.mxu1 %v6169_v63 }
 0x2e2   :  { %v851_v60 = vpop.f32.mrb[8].mxu1 }
 0x2e3   :  { %v857_v61 = vmul.f32 0.17677669, %v851_v60  ;;  %v5414_v62 = vpop.f32.mrb[9].mxu1 }
 0x2e4   :  { %v854_v3 = vpop.f32.mrb[10].mxu1 }
 0x2e5   :  { %v5415_v4 = vpop.f32.mrb[11].mxu1  ;;  %v858_v6 = vadd.f32 %v857_v61, %v6621_v59 }
 0x2e7   :  { %v860_v7 = vsel %vm859_vm7, %v858_v6, -inf }
 0x2e8   :  { %861 = vmax.xlane.f32.xlu1 %v860_v7 }
 0x375   :  { %v862_v8 = vpop.xlane.xlu1 %861 }
 0x376   :  { %v863_v9 = vsub.f32 %v858_v6, %v862_v8 }
 0x378   :  { %v864_v10 = vmul.f32 1.442695, %v863_v9 }
 0x37a   :  { %6065 = vpow2.f32 %v864_v10 }
 0x384   :  { %v6066_v13 = vpop.eup %6065 }
 0x385   :  { %v866_v53 = vsel %vm859_vm7, %v6066_v13, 0.0 }
 0x386   :  { %867 = vadd.xlane.f32.xlu0 %v866_v53 }
 0x39c   :  { %925 = vrot.lane.b32.xlu0 %v6612_v57, %s6174_s2 }
 0x413   :  { %v868_v14 = vpop.xlane.xlu0 %867 }
 0x414   :  { %6067 = vrcp.f32 %v868_v14 }
 0x417   :  { %v926_v18 = vpop.permute.xlu0 %925 }
 0x41e   :  { %v6068_v15 = vpop.eup %6067 }
 0x41f   :  { %v870_v16 = vmul.f32 %v6068_v15, %v6066_v13 }
 0x421   :  { %v871_v17 = vpack.c.bf16 %v870_v16, %v870_v16 }
 0x423   :  { %5419 = vmatmul.mubr.msk.bf16.vlgmr.msra.gmra.mrb[12].mxu1 %vm859_vm7, %v871_v17 }
 0x424   :  { %5423 = vmatpush3.bf16.xpose.msra.mxu1 %v6608_v56  ;;  %5424 = vmatprep.mubr.msk.bf16.mxu1 %vm6170_vm5, %v6169_v63 }
 0x425   :  { %5428 = vmatprep.subr.bf16.mxu1 %v6169_v63 }
 0x42b   :  { %5425 = vmatmul.mubr.msk.bf16.vlgmr.msra.gmra.mrb[16].mxu1 %vm810_vm6, %v926_v18 }
 0x42c   :  { %5429 = vmatpush3.bf16.msra.mxu1 %v6173_v54  ;;  %5430 = vmatprep.mubr.msk.bf16.mxu1 %vm6170_vm5, %v6169_v63 }
 0x42d   :  { %1119 = vmatprep.subr.bf16.mxu1 %v6648_v5 }
 0x4f6   :  { %v913_v19 = vpop.f32.mrb[12].mxu1 }
 0x4f7   :  { %v5420_v20 = vpop.f32.mrb[13].mxu1  ;;  %v919_v45 = vpack.c.bf16 %v913_v19, %v913_v19 }
 0x4f8   :  { %v916_v21 = vpop.f32.mrb[14].mxu1 }
 0x4f9   :  { %v5421_v22 = vpop.f32.mrb[15].mxu1 }
 0x4fe   :  { %v964_v23 = vpop.f32.mrb[16].mxu1 }
 0x4ff   :  { %v970_v24 = vmul.f32 0.17677669, %v964_v23  ;;  %v5426_v25 = vpop.f32.mrb[17].mxu1 }
 0x500   :  { %v967_v26 = vpop.f32.mrb[18].mxu1  ;;  %v6725_v25 = vld [vmem:[%s7834_s10 + $0x44] ss:$8 sps:$4 sm:$0xff]  }
 0x501   :  { %v5427_v27 = vpop.f32.mrb[19].mxu1  ;;  %v971_v28 = vadd.f32 %v970_v24, %v6621_v59  ;;  %v6720_v24 = vld [vmem:[%s7834_s10 + $0x40] ss:$8 sps:$4 sm:$0xff]   ;;  %v6730_v26 = vld [vmem:[%s7834_s10 + $0x54] ss:$8 sps:$4 sm:$0xff]  }
 0x503   :  { %v972_v31 = vsel %vm859_vm7, %v971_v28, -inf }
 0x504   :  { %973 = vmax.xlane.f32.xlu0 %v972_v31 }
 0x591   :  { %v974_v32 = vpop.xlane.xlu0 %973 }
 0x592   :  { %v975_v33 = vsub.f32 %v971_v28, %v974_v32 }
 0x594   :  { %v976_v0 = vmul.f32 1.442695, %v975_v33 }
 0x596   :  { %6069 = vpow2.f32 %v976_v0 }
 0x5a0   :  { %v6070_v1 = vpop.eup %6069 }
 0x5a1   :  { %v978_v2 = vsel %vm859_vm7, %v6070_v1, 0.0 }
 0x5a2   :  { %979 = vadd.xlane.f32.xlu1 %v978_v2 }
 0x5b3   :  { %1160 = vrot.lane.b32.xlu1 %v6612_v57, %s6171_s9 }
 0x62f   :  { %v980_v38 = vpop.xlane.xlu1 %979 }
 0x630   :  { %6071 = vrcp.f32 %v980_v38 }
 0x633   :  { %v1161_v61 = vpop.permute.xlu1 %1160 }
 0x63a   :  { %v6072_v39 = vpop.eup %6071 }
 0x63b   :  { %v982_v40 = vmul.f32 %v6072_v39, %v6070_v1 }
 0x63d   :  { %v983_v42 = vpack.c.bf16 %v982_v40, %v982_v40 }
 0x63f   :  { %5431 = vmatmul.mubr.msk.bf16.vlgmr.msra.gmra.mrb[20].mxu1 %vm859_vm7, %v983_v42 }
 0x640   :  { %1120 = vmatpush1.bf16.msra.mxu1 %v6679_v41  ;;  %1151 = vmatprep.mubr.bf16.mxu1 %v6173_v54 }
 0x641   :  { %1121 = vmatprep.subr.bf16.mxu1 %v6684_v43 }
 0x644   :  { %1122 = vmatpush1.bf16.msra.mxu1 %v6691_v44 }
 0x645   :  { %5440 = vmatprep.subr.bf16.mxu1 %v6169_v63 }
 0x647   :  { %5057 = vmatmul.mubr.msk.bf16.vlgmr.msra.gmra.mrb[24].mxu1 %vm810_vm6, %v919_v45 }
 0x648   :  { %5441 = vmatpush3.bf16.msra.mxu1 %v6173_v54  ;;  %5442 = vmatprep.mubr.msk.bf16.mxu1 %vm6170_vm5, %v6169_v63 }
 0x649   :  { %5446 = vmatprep.subr.bf16.mxu1 %v6169_v63 }
 0x712   :  { %v1021_v46 = vpop.f32.mrb[20].mxu1 }
 0x713   :  { %v1027_v47 = vpack.c.bf16 %v1021_v46, %v1021_v46  ;;  %v5432_v48 = vpop.f32.mrb[21].mxu1 }
 0x714   :  { %v1024_v50 = vpop.f32.mrb[22].mxu1 }
 0x715   :  { %v5433_v55 = vpop.f32.mrb[23].mxu1  ;;  %5052 = vmatmul.mubr.msk.bf16.vlgmr.msra.gmra.mrb[4].mxu0 %vm810_vm6, %v1027_v47 }
 0x716   :  { %5435 = vmatpush3.bf16.xpose.msra.mxu0 %v6608_v56  ;;  %5436 = vmatprep.mubr.msk.bf16.mxu0 %vm6170_vm5, %v6169_v63 }
 0x717   :  { %1290 = vmatprep.subr.bf16.mxu0 %v6725_v25 }
 0x71a   :  { %v1153_v58 = vpop.f32.mrb[24].mxu1 }
 0x71b   :  { %v1155_v60 = vpop.f32.mrb[25].mxu1 }
 0x71c   :  { %v1157_v62 = vpop.f32.mrb[26].mxu1 }
 0x71d   :  { %v1158_v3 = vpop.f32.mrb[27].mxu1  ;;  %5437 = vmatmul.mubr.msk.bf16.vlgmr.msra.gmra.mrb[8].mxu0 %vm810_vm6, %v1161_v61  ;;  %v6761_v62 = vld [vmem:[%s7834_s10 + $0x60] ss:$8 sps:$4 sm:$0xff]  }
 0x71e   :  { %1322 = vmatprep.mubr.bf16.mxu0 %v6173_v54  ;;  %1291 = vmatpush1.bf16.msra.mxu0 %v6720_v24  ;;  %v6766_v3 = vld [vmem:[%s7834_s10 + $0x64] ss:$8 sps:$4 sm:$0xff]  }
 0x71f   :  { %1292 = vmatprep.subr.bf16.mxu0 %v6730_v26 }
 0x7e8   :  { %v1089_v4 = vpop.f32.mrb[4].mxu0 }
 0x7e9   :  { %v6708_v6 = vadd.f32 %v1153_v58, %v1089_v4  ;;  %v1091_v7 = vpop.f32.mrb[5].mxu0  ;;  %v6771_v4 = vld [vmem:[%s7834_s10 + $0x74] ss:$8 sps:$4 sm:$0xff]  }
 0x7ea   :  { %v6710_v8 = vadd.f32 %v1155_v60, %v1091_v7  ;;  %v1093_v9 = vpop.f32.mrb[6].mxu0 }
 0x7eb   :  { %v1094_v10 = vpop.f32.mrb[7].mxu0 }
 0x7f0   :  { %v1199_v13 = vpop.f32.mrb[8].mxu0 }
 0x7f1   :  { %v1205_v53 = vmul.f32 0.17677669, %v1199_v13  ;;  %v5438_v14 = vpop.f32.mrb[9].mxu0 }
 0x7f2   :  { %v1202_v15 = vpop.f32.mrb[10].mxu0 }
 0x7f3   :  { %v5439_v16 = vpop.f32.mrb[11].mxu0  ;;  %v1206_v17 = vadd.f32 %v1205_v53, %v6621_v59 }
 0x7f5   :  { %v1207_v18 = vsel %vm859_vm7, %v1206_v17, -inf }
 0x7f6   :  { %1208 = vmax.xlane.f32.xlu1 %v1207_v18 }
 0x883   :  { %v1209_v19 = vpop.xlane.xlu1 %1208 }
 0x884   :  { %v1210_v20 = vsub.f32 %v1206_v17, %v1209_v19 }
 0x886   :  { %v1211_v21 = vmul.f32 1.442695, %v1210_v20 }
 0x888   :  { %6073 = vpow2.f32 %v1211_v21 }
 0x892   :  { %v6074_v22 = vpop.eup %6073 }
 0x893   :  { %v1213_v23 = vsel %vm859_vm7, %v6074_v22, 0.0 }
 0x894   :  { %1214 = vadd.xlane.f32.xlu0 %v1213_v23 }
 0x8aa   :  { %1333 = vrot.lane.b32.xlu0 %v6612_v57, %s6175_s22  ;;  %v6737_v57 = vld [vmem:[%s7834_s10 + $0x50] ss:$8 sps:$4 sm:$0xff]  }
 0x8ab   :  { %1293 = vmatpush1.bf16.msra.mxu0 %v6737_v57 }
 0x8ac   :  { %5452 = vmatprep.subr.bf16.mxu0 %v6169_v63 }
 0x921   :  { %v1215_v27 = vpop.xlane.xlu0 %1214 }
 0x922   :  { %6075 = vrcp.f32 %v1215_v27 }
 0x925   :  { %v1334_v33 = vpop.permute.xlu0 %1333 }
 0x92c   :  { %v6076_v28 = vpop.eup %6075 }
 0x92d   :  { %v1217_v31 = vmul.f32 %v6076_v28, %v6074_v22 }
 0x92f   :  { %v1218_v32 = vpack.c.bf16 %v1217_v31, %v1217_v31 }
 0x931   :  { %5443 = vmatmul.mubr.msk.bf16.vlgmr.msra.gmra.mrb[28].mxu1 %vm859_vm7, %v1218_v32 }
 0x932   :  { %5447 = vmatpush3.bf16.xpose.msra.mxu1 %v6608_v56  ;;  %5448 = vmatprep.mubr.msk.bf16.mxu1 %vm6170_vm5, %v6169_v63 }
 0x933   :  { %1463 = vmatprep.subr.bf16.mxu1 %v6766_v3 }
 0x939   :  { %5449 = vmatmul.mubr.msk.bf16.vlgmr.msra.gmra.mrb[32].mxu1 %vm810_vm6, %v1334_v33 }
 0x93a   :  { %1495 = vmatprep.mubr.bf16.mxu1 %v6173_v54  ;;  %1464 = vmatpush1.bf16.msra.mxu1 %v6761_v62 }
 0x93b   :  { %1465 = vmatprep.subr.bf16.mxu1 %v6771_v4 }
 0xa04   :  { %v1256_v0 = vpop.f32.mrb[28].mxu1 }
 0xa05   :  { %v1262_v1 = vpack.c.bf16 %v1256_v0, %v1256_v0  ;;  %v5444_v2 = vpop.f32.mrb[29].mxu1 }
 0xa06   :  { %v1259_v38 = vpop.f32.mrb[30].mxu1 }
 0xa07   :  { %v5445_v39 = vpop.f32.mrb[31].mxu1  ;;  %5064 = vmatmul.mubr.msk.bf16.vlgmr.msra.gmra.mrb[12].mxu0 %vm810_vm6, %v1262_v1 }
 0xa08   :  { %5453 = vmatpush3.bf16.msra.mxu0 %v6173_v54  ;;  %5454 = vmatprep.mubr.msk.bf16.mxu0 %vm6170_vm5, %v6169_v63 }
 0xa09   :  { %5458 = vmatprep.subr.bf16.mxu0 %v6169_v63 }
 0xa0c   :  { %v1372_v56 = vpop.f32.mrb[32].mxu1 }
 0xa0d   :  { %v1378_v40 = vmul.f32 0.17677669, %v1372_v56  ;;  %v5450_v42 = vpop.f32.mrb[33].mxu1 }
 0xa0e   :  { %v1375_v45 = vpop.f32.mrb[34].mxu1  ;;  %v6812_v42 = vld [vmem:[%s7834_s10 + $0x80] ss:$8 sps:$4 sm:$0xff]  }
 0xa0f   :  { %v5451_v46 = vpop.f32.mrb[35].mxu1  ;;  %v1379_v47 = vadd.f32 %v1378_v40, %v6621_v59  ;;  %v6817_v45 = vld [vmem:[%s7834_s10 + $0x84] ss:$8 sps:$4 sm:$0xff]  }
 0xa10   :  { %v6822_v46 = vld [vmem:[%s7834_s10 + $0x94] ss:$8 sps:$4 sm:$0xff]  }
 0xa11   :  { %v1380_v48 = vsel %vm859_vm7, %v1379_v47, -inf }
 0xa12   :  { %1381 = vmax.xlane.f32.xlu0 %v1380_v48 }
 0xa9f   :  { %v1382_v50 = vpop.xlane.xlu0 %1381 }
 0xaa0   :  { %v1383_v55 = vsub.f32 %v1379_v47, %v1382_v50  ;;  %v6829_v47 = vld [vmem:[%s7834_s10 + $0x90] ss:$8 sps:$4 sm:$0xff]  }
 0xaa2   :  { %v1384_v58 = vmul.f32 1.442695, %v1383_v55 }
 0xaa4   :  { %6077 = vpow2.f32 %v1384_v58 }
 0xaae   :  { %v6078_v60 = vpop.eup %6077 }
 0xaaf   :  { %v1386_v61 = vsel %vm859_vm7, %v6078_v60, 0.0 }
 0xab0   :  { %1387 = vadd.xlane.f32.xlu1 %v1386_v61 }
 0xac1   :  { %1507 = vrot.lane.b32.xlu1 %v6577_v30, %s6175_s22  ;;  %v6778_v30 = vld [vmem:[%s7834_s10 + $0x70] ss:$8 sps:$4 sm:$0xff]  }
 0xac2   :  { %1466 = vmatpush1.bf16.msra.mxu1 %v6778_v30 }
 0xac3   :  { %5464 = vmatprep.subr.bf16.mxu1 %v6169_v63 }
 0xada   :  { %v1324_v7 = vpop.f32.mrb[12].mxu0 }
 0xadb   :  { %v1331_v9 = vadd.f32 %v1324_v7, %v6708_v6  ;;  %v1326_v10 = vpop.f32.mrb[13].mxu0  ;;  %v6794_v6 = vpack.c.bf16 %v6601_v49, %v6601_v49 }
 0xadc   :  { %v1332_v13 = vadd.f32 %v1326_v10, %v6710_v8  ;;  %v1328_v53 = vpop.f32.mrb[14].mxu0 }
 0xadd   :  { %v1329_v14 = vpop.f32.mrb[15].mxu0 }
 0xb3d   :  { %v1388_v15 = vpop.xlane.xlu1 %1387 }
 0xb3e   :  { %6079 = vrcp.f32 %v1388_v15 }
 0xb41   :  { %v1508_v18 = vpop.permute.xlu1 %1507 }
 0xb42   :  { %v6786_v20 = vsel %vm810_vm6, %v1508_v18, 0 }
 0xb48   :  { %v6080_v16 = vpop.eup %6079 }
 0xb49   :  { %v1390_v17 = vmul.f32 %v6080_v16, %v6078_v60 }
 0xb4b   :  { %v1391_v19 = vpack.c.bf16 %v1390_v17, %v1390_v17 }
 0xb4d   :  { %5455 = vmatmul.mubr.msk.bf16.vlgmr.msra.gmra.mrb[16].mxu0 %vm859_vm7, %v1391_v19 }
 0xb4e   :  { %5459 = vmatpush3.bf16.xpose.msra.mxu0 %v6786_v20  ;;  %5460 = vmatprep.mubr.msk.bf16.mxu0 %vm6170_vm5, %v6169_v63 }
 0xb4f   :  { %1640 = vmatprep.subr.bf16.mxu0 %v6817_v45 }
 0xb55   :  { %5461 = vmatmul.mubr.msk.bf16.vlgmr.msra.gmra.mrb[20].mxu0 %vm810_vm6, %v6794_v6 }
 0xb56   :  { %1672 = vmatprep.mubr.bf16.mxu0 %v6173_v54  ;;  %1641 = vmatpush1.bf16.msra.mxu0 %v6812_v42 }
 0xb57   :  { %1642 = vmatprep.subr.bf16.mxu0 %v6822_v46 }
 0xb5a   :  { %1643 = vmatpush1.bf16.msra.mxu0 %v6829_v47 }
 0xb5b   :  { %5476 = vmatprep.subr.bf16.mxu0 %v6169_v63 }
 0xc20   :  { %v1429_v8 = vpop.f32.mrb[16].mxu0 }
 0xc21   :  { %v1435_v21 = vpack.c.bf16 %v1429_v8, %v1429_v8  ;;  %v5456_v22 = vpop.f32.mrb[17].mxu0 }
 0xc22   :  { %v1432_v23 = vpop.f32.mrb[18].mxu0 }
 0xc23   :  { %v5457_v27 = vpop.f32.mrb[19].mxu0  ;;  %5071 = vmatmul.mubr.msk.bf16.vlgmr.msra.gmra.mrb[36].mxu1 %vm810_vm6, %v1435_v21 }
 0xc24   :  { %5465 = vmatpush3.bf16.msra.mxu1 %v6173_v54  ;;  %5466 = vmatprep.mubr.msk.bf16.mxu1 %vm6170_vm5, %v6169_v63 }
 0xc25   :  { %5470 = vmatprep.subr.bf16.mxu1 %v6169_v63 }
 0xc28   :  { %v1549_v49 = vpop.f32.mrb[20].mxu0 }
 0xc29   :  { %v1555_v28 = vmul.f32 0.17677669, %v1549_v49  ;;  %v5462_v31 = vpop.f32.mrb[21].mxu0 }
 0xc2a   :  { %v1552_v32 = vpop.f32.mrb[22].mxu0 }
 0xc2b   :  { %v5463_v33 = vpop.f32.mrb[23].mxu0  ;;  %v1556_v0 = vadd.f32 %v1555_v28, %v6621_v59 }
 0xc2d   :  { %v1557_v1 = vsel %vm859_vm7, %v1556_v0, -inf }
 0xc2e   :  { %1558 = vmax.xlane.f32.xlu1 %v1557_v1  ;;  %v6853_v1 = vld [vmem:[%s7834_s10 + $0xa0] ss:$8 sps:$4 sm:$0xff]  }
 0xcbb   :  { %v1559_v2 = vpop.xlane.xlu1 %1558 }
 0xcbc   :  { %v1560_v38 = vsub.f32 %v1556_v0, %v1559_v2  ;;  %v6858_v2 = vld [vmem:[%s7834_s10 + $0xa4] ss:$8 sps:$4 sm:$0xff]  }
 0xcbe   :  { %v1561_v39 = vmul.f32 1.442695, %v1560_v38  ;;  %v6863_v38 = vld [vmem:[%s7834_s10 + $0xb4] ss:$8 sps:$4 sm:$0xff]  }
 0xcc0   :  { %6081 = vpow2.f32 %v1561_v39  ;;  %v6870_v39 = vld [vmem:[%s7834_s10 + $0xb0] ss:$8 sps:$4 sm:$0xff]  }
 0xcca   :  { %v6082_v56 = vpop.eup %6081 }
 0xccb   :  { %v1563_v40 = vsel %vm859_vm7, %v6082_v56, 0.0 }
 0xccc   :  { %1564 = vadd.xlane.f32.xlu0 %v1563_v40 }
 0xce2   :  { %1684 = vrot.lane.b32.xlu0 %v6794_v6, %s6174_s2 }
 0xcf6   :  { %v1497_v48 = vpop.f32.mrb[36].mxu1 }
 0xcf7   :  { %v1504_v50 = vadd.f32 %v1497_v48, %v1331_v9  ;;  %v1499_v55 = vpop.f32.mrb[37].mxu1 }
 0xcf8   :  { %v1505_v58 = vadd.f32 %v1499_v55, %v1332_v13  ;;  %v1501_v60 = vpop.f32.mrb[38].mxu1 }
 0xcf9   :  { %v1502_v61 = vpop.f32.mrb[39].mxu1 }
 0xd59   :  { %v1565_v7 = vpop.xlane.xlu0 %1564 }
 0xd5a   :  { %6083 = vrcp.f32 %v1565_v7 }
 0xd5d   :  { %v1685_v9 = vpop.permute.xlu0 %1684 }
 0xd64   :  { %v6084_v10 = vpop.eup %6083 }
 0xd65   :  { %v1567_v53 = vmul.f32 %v6084_v10, %v6082_v56 }
 0xd67   :  { %v1568_v14 = vpack.c.bf16 %v1567_v53, %v1567_v53 }
 0xd69   :  { %5467 = vmatmul.mubr.msk.bf16.vlgmr.msra.gmra.mrb[40].mxu1 %vm859_vm7, %v1568_v14 }
 0xd6a   :  { %5471 = vmatpush3.bf16.xpose.msra.mxu1 %v6786_v20  ;;  %5472 = vmatprep.mubr.msk.bf16.mxu1 %vm6170_vm5, %v6169_v63 }
 0xd6b   :  { %1814 = vmatprep.subr.bf16.mxu1 %v6858_v2 }
 0xd71   :  { %5473 = vmatmul.mubr.msk.bf16.vlgmr.msra.gmra.mrb[44].mxu1 %vm810_vm6, %v1685_v9 }
 0xd72   :  { %1846 = vmatprep.mubr.bf16.mxu1 %v6173_v54  ;;  %1815 = vmatpush1.bf16.msra.mxu1 %v6853_v1 }
 0xd73   :  { %1816 = vmatprep.subr.bf16.mxu1 %v6863_v38 }
 0xd76   :  { %1817 = vmatpush1.bf16.msra.mxu1 %v6870_v39 }
 0xd77   :  { %5488 = vmatprep.subr.bf16.mxu1 %v6169_v63 }
 0xe3c   :  { %v1606_v13 = vpop.f32.mrb[40].mxu1 }
 0xe3d   :  { %v1612_v15 = vpack.c.bf16 %v1606_v13, %v1606_v13  ;;  %v5468_v16 = vpop.f32.mrb[41].mxu1 }
 0xe3e   :  { %v1609_v17 = vpop.f32.mrb[42].mxu1 }
 0xe3f   :  { %v5469_v18 = vpop.f32.mrb[43].mxu1  ;;  %5078 = vmatmul.mubr.msk.bf16.vlgmr.msra.gmra.mrb[24].mxu0 %vm810_vm6, %v1612_v15 }
 0xe40   :  { %5477 = vmatpush3.bf16.msra.mxu0 %v6173_v54  ;;  %5478 = vmatprep.mubr.msk.bf16.mxu0 %vm6170_vm5, %v6169_v63 }
 0xe41   :  { %5482 = vmatprep.subr.bf16.mxu0 %v6169_v63 }
 0xe44   :  { %v1723_v19 = vpop.f32.mrb[44].mxu1 }
 0xe45   :  { %v1729_v8 = vmul.f32 0.17677669, %v1723_v19  ;;  %v5474_v21 = vpop.f32.mrb[45].mxu1 }
 0xe46   :  { %v1726_v22 = vpop.f32.mrb[46].mxu1 }
 0xe47   :  { %v5475_v23 = vpop.f32.mrb[47].mxu1  ;;  %v1730_v27 = vadd.f32 %v1729_v8, %v6621_v59 }
 0xe49   :  { %v1731_v49 = vsel %vm859_vm7, %v1730_v27, -inf }
 0xe4a   :  { %1732 = vmax.xlane.f32.xlu0 %v1731_v49 }
 0xed7   :  { %v1733_v28 = vpop.xlane.xlu0 %1732 }
 0xed8   :  { %v1734_v31 = vsub.f32 %v1730_v27, %v1733_v28 }
 0xeda   :  { %v1735_v32 = vmul.f32 1.442695, %v1734_v31 }
 0xedc   :  { %6085 = vpow2.f32 %v1735_v32 }
 0xee6   :  { %v6086_v33 = vpop.eup %6085 }
 0xee7   :  { %v1737_v0 = vsel %vm859_vm7, %v6086_v33, 0.0 }
 0xee8   :  { %1738 = vadd.xlane.f32.xlu1 %v1737_v0  ;;  %v6899_v0 = vld [vmem:[%s7834_s10 + $0xc4] ss:$8 sps:$4 sm:$0xff]  }
 0xef9   :  { %1857 = vrot.lane.b32.xlu1 %v6794_v6, %s6171_s9 }
 0xf12   :  { %v1674_v56 = vpop.f32.mrb[24].mxu0 }
 0xf13   :  { %v1681_v40 = vadd.f32 %v1674_v56, %v1504_v50  ;;  %v1676_v48 = vpop.f32.mrb[25].mxu0  ;;  %v6904_v56 = vld [vmem:[%s7834_s10 + $0xd4] ss:$8 sps:$4 sm:$0xff]  }
 0xf14   :  { %v1682_v55 = vadd.f32 %v1676_v48, %v1505_v58  ;;  %v1678_v60 = vpop.f32.mrb[26].mxu0 }
 0xf15   :  { %v1679_v61 = vpop.f32.mrb[27].mxu0 }
 0xf75   :  { %v1739_v7 = vpop.xlane.xlu1 %1738 }
 0xf76   :  { %6087 = vrcp.f32 %v1739_v7 }
 0xf79   :  { %v1858_v50 = vpop.permute.xlu1 %1857 }
 0xf80   :  { %v6088_v10 = vpop.eup %6087 }
 0xf81   :  { %v1741_v53 = vmul.f32 %v6088_v10, %v6086_v33  ;;  %v6894_v33 = vld [vmem:[%s7834_s10 + $0xc0] ss:$8 sps:$4 sm:$0xff]  }
 0xf83   :  { %v1742_v14 = vpack.c.bf16 %v1741_v53, %v1741_v53 }
 0xf85   :  { %5479 = vmatmul.mubr.msk.bf16.vlgmr.msra.gmra.mrb[28].mxu0 %vm859_vm7, %v1742_v14 }
 0xf86   :  { %5483 = vmatpush3.bf16.xpose.msra.mxu0 %v6786_v20  ;;  %5484 = vmatprep.mubr.msk.bf16.mxu0 %vm6170_vm5, %v6169_v63 }
 0xf87   :  { %1987 = vmatprep.subr.bf16.mxu0 %v6899_v0 }
 0xf8d   :  { %5485 = vmatmul.mubr.msk.bf16.vlgmr.msra.gmra.mrb[32].mxu0 %vm810_vm6, %v1858_v50 }
 0xf8e   :  { %2019 = vmatprep.mubr.bf16.mxu0 %v6173_v54  ;;  %1988 = vmatpush1.bf16.msra.mxu0 %v6894_v33 }
 0xf8f   :  { %1989 = vmatprep.subr.bf16.mxu0 %v6904_v56 }
0x1058   :  { %v1780_v58 = vpop.f32.mrb[28].mxu0 }
0x1059   :  { %v1786_v9 = vpack.c.bf16 %v1780_v58, %v1780_v58  ;;  %v5480_v13 = vpop.f32.mrb[29].mxu0 }
0x105a   :  { %v1783_v15 = vpop.f32.mrb[30].mxu0 }
0x105b   :  { %v5481_v16 = vpop.f32.mrb[31].mxu0  ;;  %5085 = vmatmul.mubr.msk.bf16.vlgmr.msra.gmra.mrb[48].mxu1 %vm810_vm6, %v1786_v9 }
0x105c   :  { %5489 = vmatpush3.bf16.msra.mxu1 %v6173_v54  ;;  %5490 = vmatprep.mubr.msk.bf16.mxu1 %vm6170_vm5, %v6169_v63 }
0x105d   :  { %5494 = vmatprep.subr.bf16.mxu1 %v6169_v63 }
0x1060   :  { %v1896_v17 = vpop.f32.mrb[32].mxu0 }
0x1061   :  { %v1902_v18 = vmul.f32 0.17677669, %v1896_v17  ;;  %v5486_v19 = vpop.f32.mrb[33].mxu0 }
0x1062   :  { %v1899_v8 = vpop.f32.mrb[34].mxu0 }
0x1063   :  { %v5487_v21 = vpop.f32.mrb[35].mxu0  ;;  %v1903_v22 = vadd.f32 %v1902_v18, %v6621_v59 }
0x1065   :  { %v1904_v23 = vsel %vm859_vm7, %v1903_v22, -inf }
0x1066   :  { %1905 = vmax.xlane.f32.xlu1 %v1904_v23 }
0x10f3   :  { %v1906_v27 = vpop.xlane.xlu1 %1905 }
0x10f4   :  { %v1907_v49 = vsub.f32 %v1903_v22, %v1906_v27 }
0x10f6   :  { %v1908_v28 = vmul.f32 1.442695, %v1907_v49 }
0x10f8   :  { %6089 = vpow2.f32 %v1908_v28 }
0x1102   :  { %v6090_v31 = vpop.eup %6089 }
0x1103   :  { %v1910_v32 = vsel %vm859_vm7, %v6090_v31, 0.0 }
0x1104   :  { %1911 = vadd.xlane.f32.xlu0 %v1910_v32 }
0x111a   :  { %2030 = vrot.lane.b32.xlu0 %v6794_v6, %s6175_s22  ;;  %v6911_v6 = vld [vmem:[%s7834_s10 + $0xd0] ss:$8 sps:$4 sm:$0xff]  }
0x111b   :  { %1990 = vmatpush1.bf16.msra.mxu0 %v6911_v6 }
0x111c   :  { %5500 = vmatprep.subr.bf16.mxu0 %v6169_v63 }
0x112e   :  { %v1848_v48 = vpop.f32.mrb[48].mxu1 }
0x112f   :  { %v1855_v60 = vadd.f32 %v1848_v48, %v1681_v40  ;;  %v1850_v61 = vpop.f32.mrb[49].mxu1  ;;  %v6932_v48 = vpack.c.bf16 %v6575_v29, %v6575_v29  ;;  %v6949_v29 = vld [vmem:[%s7834_s10 + $0xe0] ss:$8 sps:$4 sm:$0xff]  }
0x1130   :  { %v1856_v7 = vadd.f32 %v1850_v61, %v1682_v55  ;;  %v1852_v10 = vpop.f32.mrb[50].mxu1  ;;  %v6938_v61 = vpack.c.bf16 %v6603_v51, %v6603_v51  ;;  %v6954_v51 = vld [vmem:[%s7834_s10 + $0xe4] ss:$8 sps:$4 sm:$0xff]  }
0x1131   :  { %v1853_v53 = vpop.f32.mrb[51].mxu1 }
0x1191   :  { %v1912_v14 = vpop.xlane.xlu0 %1911 }
0x1192   :  { %6091 = vrcp.f32 %v1912_v14 }
0x1195   :  { %v2031_v40 = vpop.permute.xlu0 %2030 }
0x119c   :  { %v6092_v50 = vpop.eup %6091 }
0x119d   :  { %v1914_v58 = vmul.f32 %v6092_v50, %v6090_v31 }
0x119f   :  { %v1915_v9 = vpack.c.bf16 %v1914_v58, %v1914_v58 }
0x11a1   :  { %5491 = vmatmul.mubr.msk.bf16.vlgmr.msra.gmra.mrb[52].mxu1 %vm859_vm7, %v1915_v9 }
0x11a2   :  { %5495 = vmatpush3.bf16.xpose.msra.mxu1 %v6786_v20  ;;  %5496 = vmatprep.mubr.msk.bf16.mxu1 %vm6170_vm5, %v6169_v63 }
0x11a3   :  { %2160 = vmatprep.subr.bf16.mxu1 %v6954_v51 }
0x11a9   :  { %5497 = vmatmul.mubr.msk.bf16.vlgmr.msra.gmra.mrb[56].mxu1 %vm810_vm6, %v2031_v40 }
0x11aa   :  { %2192 = vmatprep.mubr.bf16.mxu1 %v6173_v54  ;;  %2161 = vmatpush1.bf16.msra.mxu1 %v6949_v29 }
0x1274   :  { %v1953_v55 = vpop.f32.mrb[52].mxu1 }
0x1275   :  { %v1959_v13 = vpack.c.bf16 %v1953_v55, %v1953_v55  ;;  %v5492_v15 = vpop.f32.mrb[53].mxu1 }
0x1276   :  { %v1956_v16 = vpop.f32.mrb[54].mxu1 }
0x1277   :  { %v5493_v17 = vpop.f32.mrb[55].mxu1  ;;  %5092 = vmatmul.mubr.msk.bf16.vlgmr.msra.gmra.mrb[36].mxu0 %vm810_vm6, %v1959_v13 }
0x1278   :  { %5501 = vmatpush3.bf16.msra.mxu0 %v6173_v54  ;;  %5502 = vmatprep.mubr.msk.bf16.mxu0 %vm6170_vm5, %v6169_v63 }
0x1279   :  { %5506 = vmatprep.subr.bf16.mxu0 %v6169_v63 }
0x127c   :  { %v2069_v20 = vpop.f32.mrb[56].mxu1 }
0x127d   :  { %v2075_v18 = vmul.f32 0.17677669, %v2069_v20  ;;  %v5498_v19 = vpop.f32.mrb[57].mxu1 }
0x127e   :  { %v2072_v8 = vpop.f32.mrb[58].mxu1 }
0x127f   :  { %v5499_v21 = vpop.f32.mrb[59].mxu1  ;;  %v2076_v22 = vadd.f32 %v2075_v18, %v6621_v59 }
0x1281   :  { %v2077_v23 = vsel %vm859_vm7, %v2076_v22, -inf }
0x1282   :  { %2078 = vmax.xlane.f32.xlu0 %v2077_v23 }
0x130f   :  { %v2079_v27 = vpop.xlane.xlu0 %2078 }
0x1310   :  { %v2080_v49 = vsub.f32 %v2076_v22, %v2079_v27 }
0x1312   :  { %v2081_v28 = vmul.f32 1.442695, %v2080_v49 }
0x1314   :  { %6093 = vpow2.f32 %v2081_v28 }
0x131e   :  { %v6094_v31 = vpop.eup %6093 }
0x131f   :  { %v2083_v32 = vsel %vm859_vm7, %v6094_v31, 0.0 }
0x1320   :  { %2084 = vadd.xlane.f32.xlu1 %v2083_v32 }
0x1331   :  { %2206 = vrot.lane.b32.xlu1 %v6932_v48, %s6171_s9 }
0x1335   :  { %2313 = vrot.lane.b32.xlu1 %v6938_v61, %s6174_s2 }
0x134a   :  { %v2021_v10 = vpop.f32.mrb[36].mxu0 }
0x134b   :  { %v6942_v53 = vadd.f32 %v2021_v10, %v1855_v60  ;;  %v2023_v14 = vpop.f32.mrb[37].mxu0  ;;  %v6959_v60 = vld [vmem:[%s7834_s10 + $0xf4] ss:$8 sps:$4 sm:$0xff]  }
0x134c   :  { %v6944_v50 = vadd.f32 %v2023_v14, %v1856_v7  ;;  %v2025_v58 = vpop.f32.mrb[38].mxu0  ;;  %v6966_v7 = vld [vmem:[%s7834_s10 + $0xf0] ss:$8 sps:$4 sm:$0xff]   ;;  %2162 = vmatprep.subr.bf16.mxu1 %v6959_v60 }
0x134d   :  { %v2026_v9 = vpop.f32.mrb[39].mxu0  ;;  %2163 = vmatpush1.bf16.msra.mxu1 %v6966_v7 }
0x134e   :  { %5512 = vmatprep.subr.bf16.mxu1 %v6169_v63 }
0x13ad   :  { %v2085_v40 = vpop.xlane.xlu1 %2084 }
0x13ae   :  { %6095 = vrcp.f32 %v2085_v40 }
0x13b1   :  { %v2207_v15 = vpop.permute.xlu1 %2206 }
0x13b2   :  { %v6972_v17 = vsel %vm810_vm6, %v2207_v15, 0 }
0x13b5   :  { %v2314_v20 = vpop.permute.xlu1 %2313 }
0x13b8   :  { %v6096_v55 = vpop.eup %6095 }
0x13b9   :  { %v2087_v13 = vmul.f32 %v6096_v55, %v6094_v31 }
0x13bb   :  { %v2088_v16 = vpack.c.bf16 %v2087_v13, %v2087_v13 }
0x13bd   :  { %5503 = vmatmul.mubr.msk.bf16.vlgmr.msra.gmra.mrb[40].mxu0 %vm859_vm7, %v2088_v16 }
0x13be   :  { %5507 = vmatpush3.bf16.xpose.msra.mxu0 %v6972_v17  ;;  %5508 = vmatprep.mubr.msk.bf16.mxu0 %vm6170_vm5, %v6169_v63 }
0x13bf   :  { %5518 = vmatprep.subr.bf16.mxu0 %v6169_v63 }
0x13c5   :  { %5509 = vmatmul.mubr.msk.bf16.vlgmr.msra.gmra.mrb[44].mxu0 %vm810_vm6, %v6938_v61 }
0x13c6   :  { %5519 = vmatpush3.bf16.xpose.msra.mxu0 %v6972_v17  ;;  %5520 = vmatprep.mubr.msk.bf16.mxu0 %vm6170_vm5, %v6169_v63 }
0x13c7   :  { %2419 = vmatprep.subr.bf16.mxu0 %v6659_v35 }
0x13cd   :  { %5521 = vmatmul.mubr.msk.bf16.vlgmr.msra.gmra.mrb[48].mxu0 %vm810_vm6, %v2314_v20 }
0x13ce   :  { %2420 = vmatpush1.bf16.msra.mxu0 %v6654_v34  ;;  %2451 = vmatprep.mubr.bf16.mxu0 %v6173_v54 }
0x13cf   :  { %2421 = vmatprep.subr.bf16.mxu0 %v6669_v37 }
0x13d2   :  { %2422 = vmatpush1.bf16.msra.mxu0 %v6664_v36 }
0x13d3   :  { %5530 = vmatprep.subr.bf16.mxu0 %v6169_v63 }
0x1490   :  { %v2126_v18 = vpop.f32.mrb[40].mxu0 }
0x1491   :  { %v2132_v19 = vpack.c.bf16 %v2126_v18, %v2126_v18  ;;  %v5504_v8 = vpop.f32.mrb[41].mxu0 }
0x1492   :  { %v2129_v21 = vpop.f32.mrb[42].mxu0 }
0x1493   :  { %v5505_v22 = vpop.f32.mrb[43].mxu0  ;;  %5099 = vmatmul.mubr.msk.bf16.vlgmr.msra.gmra.mrb[60].mxu1 %vm810_vm6, %v2132_v19 }
0x1494   :  { %5513 = vmatpush3.bf16.msra.mxu1 %v6173_v54  ;;  %5514 = vmatprep.mubr.msk.bf16.mxu1 %vm6170_vm5, %v6169_v63 }
0x1495   :  { %5524 = vmatprep.subr.bf16.mxu1 %v6169_v63 }
0x1498   :  { %v2248_v34 = vpop.f32.mrb[44].mxu0 }
0x1499   :  { %v2254_v35 = vmul.f32 0.17677669, %v2248_v34  ;;  %v5510_v37 = vpop.f32.mrb[45].mxu0 }
0x149a   :  { %v2251_v36 = vpop.f32.mrb[46].mxu0 }
0x149b   :  { %v5511_v23 = vpop.f32.mrb[47].mxu0  ;;  %v2255_v27 = vadd.f32 %v2254_v35, %v6621_v59 }
0x149d   :  { %v2256_v49 = vsel %vm859_vm7, %v2255_v27, -inf }
0x149e   :  { %2257 = vmax.xlane.f32.xlu0 %v2256_v49 }
0x14a0   :  { %v2352_v28 = vpop.f32.mrb[48].mxu0 }
0x14a1   :  { %v2358_v31 = vmul.f32 0.17677669, %v2352_v28  ;;  %v5522_v32 = vpop.f32.mrb[49].mxu0 }
0x14a2   :  { %v2355_v10 = vpop.f32.mrb[50].mxu0 }
0x14a3   :  { %v5523_v14 = vpop.f32.mrb[51].mxu0  ;;  %v2359_v58 = vadd.f32 %v2358_v31, %v6621_v59 }
0x14a5   :  { %v2360_v9 = vsel %vm859_vm7, %v2359_v58, -inf }
0x14a6   :  { %2361 = vmax.xlane.f32.xlu1 %v2360_v9 }
0x152b   :  { %v2258_v40 = vpop.xlane.xlu0 %2257 }
0x152c   :  { %v2259_v55 = vsub.f32 %v2255_v27, %v2258_v40 }
0x152e   :  { %v2260_v13 = vmul.f32 1.442695, %v2259_v55 }
0x1530   :  { %6097 = vpow2.f32 %v2260_v13 }
0x1533   :  { %v2362_v15 = vpop.xlane.xlu1 %2361 }
0x1534   :  { %v2363_v16 = vsub.f32 %v2359_v58, %v2362_v15 }
0x1536   :  { %v2364_v20 = vmul.f32 1.442695, %v2363_v16 }
0x1538   :  { %6099 = vpow2.f32 %v2364_v20 }
0x153a   :  { %v6098_v18 = vpop.eup %6097 }
0x153b   :  { %v2262_v19 = vsel %vm859_vm7, %v6098_v18, 0.0 }
0x153c   :  { %2263 = vadd.xlane.f32.xlu0 %v2262_v19 }
0x1542   :  { %v6100_v8 = vpop.eup %6099 }
0x1543   :  { %v2366_v21 = vsel %vm859_vm7, %v6100_v8, 0.0 }
0x1544   :  { %2367 = vadd.xlane.f32.xlu0 %v2366_v21 }
0x155a   :  { %2504 = vrot.lane.b32.xlu0 %v6938_v61, %s6171_s9 }
0x1566   :  { %v2194_v22 = vpop.f32.mrb[60].mxu1 }
0x1567   :  { %v7005_v34 = vadd.f32 %v2194_v22, %v6942_v53  ;;  %v2196_v35 = vpop.f32.mrb[61].mxu1 }
0x1568   :  { %v7008_v37 = vadd.f32 %v2196_v35, %v6944_v50  ;;  %v2198_v36 = vpop.f32.mrb[62].mxu1 }
0x1569   :  { %v2199_v23 = vpop.f32.mrb[63].mxu1 }
0x15c9   :  { %v2264_v27 = vpop.xlane.xlu0 %2263 }
0x15ca   :  { %6101 = vrcp.f32 %v2264_v27 }
0x15d1   :  { %v2368_v49 = vpop.xlane.xlu0 %2367 }
0x15d2   :  { %6103 = vrcp.f32 %v2368_v49 }
0x15d4   :  { %v6102_v28 = vpop.eup %6101 }
0x15d5   :  { %v2266_v31 = vmul.f32 %v6102_v28, %v6098_v18  ;;  %v2505_v15 = vpop.permute.xlu0 %2504 }
0x15d7   :  { %v2267_v32 = vpack.c.bf16 %v2266_v31, %v2266_v31 }
0x15d9   :  { %5515 = vmatmul.mubr.msk.bf16.vlgmr.msra.gmra.mrb[64].mxu1 %vm859_vm7, %v2267_v32 }
0x15da   :  { %5525 = vmatpush3.bf16.msra.mxu1 %v6173_v54  ;;  %5526 = vmatprep.mubr.msk.bf16.mxu1 %vm6170_vm5, %v6169_v63 }
0x15db   :  { %2463 = vmatprep.subr.bf16.mxu1 %v6648_v5 }
0x15dc   :  { %v6104_v53 = vpop.eup %6103 }
0x15dd   :  { %v2370_v50 = vmul.f32 %v6104_v53, %v6100_v8 }
0x15df   :  { %v2371_v10 = vpack.c.bf16 %v2370_v50, %v2370_v50 }
0x15e1   :  { %5527 = vmatmul.mubr.msk.bf16.vlgmr.msra.gmra.mrb[68].mxu1 %vm859_vm7, %v2371_v10 }
0x15e2   :  { %2464 = vmatpush1.bf16.msra.mxu1 %v6679_v41  ;;  %2495 = vmatprep.mubr.bf16.mxu1 %v6173_v54 }
0x15e3   :  { %2465 = vmatprep.subr.bf16.mxu1 %v6684_v43 }
0x15e6   :  { %2466 = vmatpush1.bf16.msra.mxu1 %v6691_v44 }
0x15e7   :  { %5536 = vmatprep.subr.bf16.mxu1 %v6169_v63 }
0x16ac   :  { %v2305_v14 = vpop.f32.mrb[64].mxu1 }
0x16ad   :  { %v2311_v58 = vpack.c.bf16 %v2305_v14, %v2305_v14  ;;  %v5516_v9 = vpop.f32.mrb[65].mxu1 }
0x16ae   :  { %v2308_v40 = vpop.f32.mrb[66].mxu1 }
0x16af   :  { %v5517_v5 = vpop.f32.mrb[67].mxu1  ;;  %5105 = vmatmul.mubr.msk.bf16.vlgmr.msra.gmra.mrb[72].mxu1 %vm810_vm6, %v2311_v58 }
0x16b0   :  { %5537 = vmatpush3.bf16.msra.mxu1 %v6173_v54  ;;  %5538 = vmatprep.mubr.msk.bf16.mxu1 %vm6170_vm5, %v6169_v63 }
0x16b1   :  { %5542 = vmatprep.subr.bf16.mxu1 %v6169_v63 }
0x16b4   :  { %v2409_v41 = vpop.f32.mrb[68].mxu1 }
0x16b5   :  { %v2415_v43 = vpack.c.bf16 %v2409_v41, %v2409_v41  ;;  %v5528_v55 = vpop.f32.mrb[69].mxu1 }
0x16b6   :  { %v2412_v44 = vpop.f32.mrb[70].mxu1 }
0x16b7   :  { %v5529_v13 = vpop.f32.mrb[71].mxu1  ;;  %5104 = vmatmul.mubr.msk.bf16.vlgmr.msra.gmra.mrb[52].mxu0 %vm810_vm6, %v2415_v43 }
0x16b8   :  { %5531 = vmatpush3.bf16.xpose.msra.mxu0 %v6972_v17  ;;  %5532 = vmatprep.mubr.msk.bf16.mxu0 %vm6170_vm5, %v6169_v63 }
0x16b9   :  { %2610 = vmatprep.subr.bf16.mxu0 %v6725_v25 }
0x16bf   :  { %5533 = vmatmul.mubr.msk.bf16.vlgmr.msra.gmra.mrb[56].mxu0 %vm810_vm6, %v2505_v15 }
0x16c0   :  { %2611 = vmatpush1.bf16.msra.mxu0 %v6720_v24  ;;  %2642 = vmatprep.mubr.bf16.mxu0 %v6173_v54 }
0x16c1   :  { %2612 = vmatprep.subr.bf16.mxu0 %v6730_v26 }
0x16c4   :  { %2613 = vmatpush1.bf16.msra.mxu0 %v6737_v57 }
0x16c5   :  { %5548 = vmatprep.subr.bf16.mxu0 %v6169_v63 }
0x1782   :  { %v2497_v16 = vpop.f32.mrb[72].mxu1 }
0x1783   :  { %v2499_v20 = vpop.f32.mrb[73].mxu1 }
0x1784   :  { %v2501_v18 = vpop.f32.mrb[74].mxu1 }
0x1785   :  { %v2502_v19 = vpop.f32.mrb[75].mxu1 }
0x178a   :  { %v2453_v8 = vpop.f32.mrb[52].mxu0 }
0x178b   :  { %v7037_v21 = vadd.f32 %v2497_v16, %v2453_v8  ;;  %v2455_v25 = vpop.f32.mrb[53].mxu0 }
0x178c   :  { %v7039_v22 = vadd.f32 %v2499_v20, %v2455_v25  ;;  %v2457_v35 = vpop.f32.mrb[54].mxu0 }
0x178d   :  { %v2458_v24 = vpop.f32.mrb[55].mxu0 }
0x1792   :  { %v2543_v36 = vpop.f32.mrb[56].mxu0 }
0x1793   :  { %v2549_v23 = vmul.f32 0.17677669, %v2543_v36  ;;  %v5534_v27 = vpop.f32.mrb[57].mxu0 }
0x1794   :  { %v2546_v26 = vpop.f32.mrb[58].mxu0 }
0x1795   :  { %v5535_v49 = vpop.f32.mrb[59].mxu0  ;;  %v2550_v57 = vadd.f32 %v2549_v23, %v6621_v59 }
0x1797   :  { %v2551_v28 = vsel %vm859_vm7, %v2550_v57, -inf }
0x1798   :  { %2552 = vmax.xlane.f32.xlu0 %v2551_v28 }
0x1825   :  { %v2553_v31 = vpop.xlane.xlu0 %2552 }
0x1826   :  { %v2554_v32 = vsub.f32 %v2550_v57, %v2553_v31 }
0x1828   :  { %v2555_v53 = vmul.f32 1.442695, %v2554_v32 }
0x182a   :  { %6105 = vpow2.f32 %v2555_v53 }
0x1834   :  { %v6106_v50 = vpop.eup %6105 }
0x1835   :  { %v2557_v10 = vsel %vm859_vm7, %v6106_v50, 0.0 }
0x1836   :  { %2558 = vadd.xlane.f32.xlu1 %v2557_v10 }
0x1847   :  { %2653 = vrot.lane.b32.xlu1 %v6938_v61, %s6175_s22 }
0x18c3   :  { %v2559_v14 = vpop.xlane.xlu1 %2558 }
0x18c4   :  { %6107 = vrcp.f32 %v2559_v14 }
0x18c7   :  { %v2654_v5 = vpop.permute.xlu1 %2653 }
0x18ce   :  { %v6108_v58 = vpop.eup %6107 }
0x18cf   :  { %v2561_v9 = vmul.f32 %v6108_v58, %v6106_v50 }
0x18d1   :  { %v2562_v40 = vpack.c.bf16 %v2561_v9, %v2561_v9 }
0x18d3   :  { %5539 = vmatmul.mubr.msk.bf16.vlgmr.msra.gmra.mrb[76].mxu1 %vm859_vm7, %v2562_v40 }
0x18d4   :  { %5543 = vmatpush3.bf16.xpose.msra.mxu1 %v6972_v17  ;;  %5544 = vmatprep.mubr.msk.bf16.mxu1 %vm6170_vm5, %v6169_v63 }
0x18d5   :  { %2759 = vmatprep.subr.bf16.mxu1 %v6766_v3 }
0x18db   :  { %5545 = vmatmul.mubr.msk.bf16.vlgmr.msra.gmra.mrb[80].mxu1 %vm810_vm6, %v2654_v5 }
0x18dc   :  { %2760 = vmatpush1.bf16.msra.mxu1 %v6761_v62  ;;  %2791 = vmatprep.mubr.bf16.mxu1 %v6173_v54 }
0x18dd   :  { %2761 = vmatprep.subr.bf16.mxu1 %v6771_v4 }
0x18e0   :  { %2762 = vmatpush1.bf16.msra.mxu1 %v6778_v30 }
0x18e1   :  { %5560 = vmatprep.subr.bf16.mxu1 %v6169_v63 }
0x19a6   :  { %v2600_v61 = vpop.f32.mrb[76].mxu1 }
0x19a7   :  { %v2606_v17 = vpack.c.bf16 %v2600_v61, %v2600_v61  ;;  %v5540_v41 = vpop.f32.mrb[77].mxu1 }
0x19a8   :  { %v2603_v43 = vpop.f32.mrb[78].mxu1 }
0x19a9   :  { %v5541_v55 = vpop.f32.mrb[79].mxu1  ;;  %5108 = vmatmul.mubr.msk.bf16.vlgmr.msra.gmra.mrb[60].mxu0 %vm810_vm6, %v2606_v17 }
0x19aa   :  { %5549 = vmatpush3.bf16.msra.mxu0 %v6173_v54  ;;  %5550 = vmatprep.mubr.msk.bf16.mxu0 %vm6170_vm5, %v6169_v63 }
0x19ab   :  { %5554 = vmatprep.subr.bf16.mxu0 %v6169_v63 }
0x19ae   :  { %v2692_v62 = vpop.f32.mrb[80].mxu1 }
0x19af   :  { %v2698_v3 = vmul.f32 0.17677669, %v2692_v62  ;;  %v5546_v4 = vpop.f32.mrb[81].mxu1 }
0x19b0   :  { %v2695_v30 = vpop.f32.mrb[82].mxu1 }
0x19b1   :  { %v5547_v44 = vpop.f32.mrb[83].mxu1  ;;  %v2699_v13 = vadd.f32 %v2698_v3, %v6621_v59 }
0x19b3   :  { %v2700_v15 = vsel %vm859_vm7, %v2699_v13, -inf }
0x19b4   :  { %2701 = vmax.xlane.f32.xlu1 %v2700_v15 }
0x1a41   :  { %v2702_v16 = vpop.xlane.xlu1 %2701 }
0x1a42   :  { %v2703_v20 = vsub.f32 %v2699_v13, %v2702_v16 }
0x1a44   :  { %v2704_v18 = vmul.f32 1.442695, %v2703_v20 }
0x1a46   :  { %6109 = vpow2.f32 %v2704_v18 }
0x1a50   :  { %v6110_v19 = vpop.eup %6109 }
0x1a51   :  { %v2706_v8 = vsel %vm859_vm7, %v6110_v19, 0.0 }
0x1a52   :  { %2707 = vadd.xlane.f32.xlu0 %v2706_v8 }
0x1a68   :  { %2803 = vrot.lane.b32.xlu0 %v6932_v48, %s6175_s22  ;;  %v7079_v48 = vpack.c.bf16 %v6605_v52, %v6605_v52 }
0x1a7c   :  { %v2644_v25 = vpop.f32.mrb[60].mxu0 }
0x1a7d   :  { %v2651_v35 = vadd.f32 %v2644_v25, %v7037_v21  ;;  %v2646_v24 = vpop.f32.mrb[61].mxu0 }
0x1a7e   :  { %v2652_v36 = vadd.f32 %v2646_v24, %v7039_v22  ;;  %v2648_v23 = vpop.f32.mrb[62].mxu0 }
0x1a7f   :  { %v2649_v27 = vpop.f32.mrb[63].mxu0 }
0x1adf   :  { %v2708_v26 = vpop.xlane.xlu0 %2707 }
0x1ae0   :  { %6111 = vrcp.f32 %v2708_v26 }
0x1ae3   :  { %v2804_v28 = vpop.permute.xlu0 %2803 }
0x1ae4   :  { %v7070_v32 = vsel %vm810_vm6, %v2804_v28, 0 }
0x1aea   :  { %v6112_v49 = vpop.eup %6111 }
0x1aeb   :  { %v2710_v57 = vmul.f32 %v6112_v49, %v6110_v19 }
0x1aed   :  { %v2711_v31 = vpack.c.bf16 %v2710_v57, %v2710_v57 }
0x1aef   :  { %5551 = vmatmul.mubr.msk.bf16.vlgmr.msra.gmra.mrb[64].mxu0 %vm859_vm7, %v2711_v31 }
0x1af0   :  { %5555 = vmatpush3.bf16.xpose.msra.mxu0 %v7070_v32  ;;  %5556 = vmatprep.mubr.msk.bf16.mxu0 %vm6170_vm5, %v6169_v63 }
0x1af1   :  { %2912 = vmatprep.subr.bf16.mxu0 %v6817_v45 }
0x1af7   :  { %5557 = vmatmul.mubr.msk.bf16.vlgmr.msra.gmra.mrb[68].mxu0 %vm810_vm6, %v7079_v48 }
0x1af8   :  { %2913 = vmatpush1.bf16.msra.mxu0 %v6812_v42  ;;  %2944 = vmatprep.mubr.bf16.mxu0 %v6173_v54 }
0x1af9   :  { %2914 = vmatprep.subr.bf16.mxu0 %v6822_v46 }
0x1afc   :  { %2915 = vmatpush1.bf16.msra.mxu0 %v6829_v47 }
0x1afd   :  { %5572 = vmatprep.subr.bf16.mxu0 %v6169_v63 }
0x1bc2   :  { %v2749_v21 = vpop.f32.mrb[64].mxu0 }
0x1bc3   :  { %v2755_v22 = vpack.c.bf16 %v2749_v21, %v2749_v21  ;;  %v5552_v45 = vpop.f32.mrb[65].mxu0 }
0x1bc4   :  { %v2752_v53 = vpop.f32.mrb[66].mxu0 }
0x1bc5   :  { %v5553_v50 = vpop.f32.mrb[67].mxu0  ;;  %5111 = vmatmul.mubr.msk.bf16.vlgmr.msra.gmra.mrb[84].mxu1 %vm810_vm6, %v2755_v22 }
0x1bc6   :  { %5561 = vmatpush3.bf16.msra.mxu1 %v6173_v54  ;;  %5562 = vmatprep.mubr.msk.bf16.mxu1 %vm6170_vm5, %v6169_v63 }
0x1bc7   :  { %5566 = vmatprep.subr.bf16.mxu1 %v6169_v63 }
0x1bca   :  { %v2845_v52 = vpop.f32.mrb[68].mxu0 }
0x1bcb   :  { %v2851_v42 = vmul.f32 0.17677669, %v2845_v52  ;;  %v5558_v46 = vpop.f32.mrb[69].mxu0 }
0x1bcc   :  { %v2848_v47 = vpop.f32.mrb[70].mxu0 }
0x1bcd   :  { %v5559_v10 = vpop.f32.mrb[71].mxu0  ;;  %v2852_v14 = vadd.f32 %v2851_v42, %v6621_v59 }
0x1bcf   :  { %v2853_v58 = vsel %vm859_vm7, %v2852_v14, -inf }
0x1bd0   :  { %2854 = vmax.xlane.f32.xlu0 %v2853_v58 }
0x1c5d   :  { %v2855_v9 = vpop.xlane.xlu0 %2854 }
0x1c5e   :  { %v2856_v40 = vsub.f32 %v2852_v14, %v2855_v9 }
0x1c60   :  { %v2857_v5 = vmul.f32 1.442695, %v2856_v40 }
0x1c62   :  { %6113 = vpow2.f32 %v2857_v5 }
0x1c6c   :  { %v6114_v61 = vpop.eup %6113 }
0x1c6d   :  { %v2859_v17 = vsel %vm859_vm7, %v6114_v61, 0.0 }
0x1c6e   :  { %2860 = vadd.xlane.f32.xlu1 %v2859_v17 }
0x1c7f   :  { %2956 = vrot.lane.b32.xlu1 %v7079_v48, %s6174_s2 }
0x1c98   :  { %v2793_v41 = vpop.f32.mrb[84].mxu1 }
0x1c99   :  { %v2800_v43 = vadd.f32 %v2793_v41, %v2651_v35  ;;  %v2795_v55 = vpop.f32.mrb[85].mxu1 }
0x1c9a   :  { %v2801_v62 = vadd.f32 %v2795_v55, %v2652_v36  ;;  %v2797_v3 = vpop.f32.mrb[86].mxu1 }
0x1c9b   :  { %v2798_v4 = vpop.f32.mrb[87].mxu1 }
0x1cfb   :  { %v2861_v30 = vpop.xlane.xlu1 %2860 }
0x1cfc   :  { %6115 = vrcp.f32 %v2861_v30 }
0x1cff   :  { %v2957_v16 = vpop.permute.xlu1 %2956 }
0x1d06   :  { %v6116_v44 = vpop.eup %6115 }
0x1d07   :  { %v2863_v13 = vmul.f32 %v6116_v44, %v6114_v61 }
0x1d09   :  { %v2864_v15 = vpack.c.bf16 %v2863_v13, %v2863_v13 }
0x1d0b   :  { %5563 = vmatmul.mubr.msk.bf16.vlgmr.msra.gmra.mrb[88].mxu1 %vm859_vm7, %v2864_v15 }
0x1d0c   :  { %5567 = vmatpush3.bf16.xpose.msra.mxu1 %v7070_v32  ;;  %5568 = vmatprep.mubr.msk.bf16.mxu1 %vm6170_vm5, %v6169_v63 }
0x1d0d   :  { %3062 = vmatprep.subr.bf16.mxu1 %v6858_v2 }
0x1d13   :  { %5569 = vmatmul.mubr.msk.bf16.vlgmr.msra.gmra.mrb[92].mxu1 %vm810_vm6, %v2957_v16 }
0x1d14   :  { %3063 = vmatpush1.bf16.msra.mxu1 %v6853_v1  ;;  %3094 = vmatprep.mubr.bf16.mxu1 %v6173_v54 }
0x1d15   :  { %3064 = vmatprep.subr.bf16.mxu1 %v6863_v38 }
0x1d18   :  { %3065 = vmatpush1.bf16.msra.mxu1 %v6870_v39 }
0x1d19   :  { %5584 = vmatprep.subr.bf16.mxu1 %v6169_v63 }
0x1dde   :  { %v2902_v20 = vpop.f32.mrb[88].mxu1 }
0x1ddf   :  { %v2908_v18 = vpack.c.bf16 %v2902_v20, %v2902_v20  ;;  %v5564_v19 = vpop.f32.mrb[89].mxu1 }
0x1de0   :  { %v2905_v8 = vpop.f32.mrb[90].mxu1 }
0x1de1   :  { %v5565_v25 = vpop.f32.mrb[91].mxu1  ;;  %5114 = vmatmul.mubr.msk.bf16.vlgmr.msra.gmra.mrb[72].mxu0 %vm810_vm6, %v2908_v18 }
0x1de2   :  { %5573 = vmatpush3.bf16.msra.mxu0 %v6173_v54  ;;  %5574 = vmatprep.mubr.msk.bf16.mxu0 %vm6170_vm5, %v6169_v63 }
0x1de3   :  { %5578 = vmatprep.subr.bf16.mxu0 %v6169_v63 }
0x1de6   :  { %v2995_v1 = vpop.f32.mrb[92].mxu1 }
0x1de7   :  { %v3001_v2 = vmul.f32 0.17677669, %v2995_v1  ;;  %v5570_v38 = vpop.f32.mrb[93].mxu1 }
0x1de8   :  { %v2998_v39 = vpop.f32.mrb[94].mxu1 }
0x1de9   :  { %v5571_v35 = vpop.f32.mrb[95].mxu1  ;;  %v3002_v24 = vadd.f32 %v3001_v2, %v6621_v59 }
0x1deb   :  { %v3003_v36 = vsel %vm859_vm7, %v3002_v24, -inf }
0x1dec   :  { %3004 = vmax.xlane.f32.xlu1 %v3003_v36  ;;  %v3403_v36 = vld [vmem:[%s7835_s11] sm:$0x3] }
0x1e79   :  { %v3005_v23 = vpop.xlane.xlu1 %3004 }
0x1e7a   :  { %v3006_v27 = vsub.f32 %v3002_v24, %v3005_v23 }
0x1e7c   :  { %v3007_v26 = vmul.f32 1.442695, %v3006_v27 }
0x1e7e   :  { %6117 = vpow2.f32 %v3007_v26 }
0x1e88   :  { %v6118_v49 = vpop.eup %6117 }
0x1e89   :  { %v3009_v57 = vsel %vm859_vm7, %v6118_v49, 0.0 }
0x1e8a   :  { %3010 = vadd.xlane.f32.xlu0 %v3009_v57  ;;  %v6165_v57 = vld [vmem:[%s7843_s23] sm:$0xff] }
0x1ea0   :  { %3105 = vrot.lane.b32.xlu0 %v7079_v48, %s6171_s9 }
0x1eb4   :  { %v2946_v28 = vpop.f32.mrb[72].mxu0 }
0x1eb5   :  { %v2953_v31 = vadd.f32 %v2946_v28, %v2800_v43  ;;  %v2948_v21 = vpop.f32.mrb[73].mxu0 }
0x1eb6   :  { %v2954_v22 = vadd.f32 %v2948_v21, %v2801_v62  ;;  %v2950_v45 = vpop.f32.mrb[74].mxu0 }
0x1eb7   :  { %v2951_v53 = vpop.f32.mrb[75].mxu0 }
0x1f17   :  { %v3011_v50 = vpop.xlane.xlu0 %3010 }
0x1f18   :  { %6119 = vrcp.f32 %v3011_v50 }
0x1f1b   :  { %v3106_v47 = vpop.permute.xlu0 %3105 }
0x1f22   :  { %v6120_v52 = vpop.eup %6119 }
0x1f23   :  { %v3013_v42 = vmul.f32 %v6120_v52, %v6118_v49 }
0x1f25   :  { %v3014_v46 = vpack.c.bf16 %v3013_v42, %v3013_v42 }
0x1f27   :  { %5575 = vmatmul.mubr.msk.bf16.vlgmr.msra.gmra.mrb[76].mxu0 %vm859_vm7, %v3014_v46 }
0x1f28   :  { %5579 = vmatpush3.bf16.xpose.msra.mxu0 %v7070_v32  ;;  %5580 = vmatprep.mubr.msk.bf16.mxu0 %vm6170_vm5, %v6169_v63 }
0x1f29   :  { %3211 = vmatprep.subr.bf16.mxu0 %v6899_v0 }
0x1f2f   :  { %5581 = vmatmul.mubr.msk.bf16.vlgmr.msra.gmra.mrb[80].mxu0 %vm810_vm6, %v3106_v47 }
0x1f30   :  { %3212 = vmatpush1.bf16.msra.mxu0 %v6894_v33  ;;  %3243 = vmatprep.mubr.bf16.mxu0 %v6173_v54 }
0x1f31   :  { %3213 = vmatprep.subr.bf16.mxu0 %v6904_v56 }
0x1f34   :  { %3214 = vmatpush1.bf16.msra.mxu0 %v6911_v6 }
0x1f35   :  { %5596 = vmatprep.subr.bf16.mxu0 %v6169_v63 }
0x1ffa   :  { %v3052_v10 = vpop.f32.mrb[76].mxu0 }
0x1ffb   :  { %v3058_v14 = vpack.c.bf16 %v3052_v10, %v3052_v10  ;;  %v5576_v58 = vpop.f32.mrb[77].mxu0 }
0x1ffc   :  { %v3055_v9 = vpop.f32.mrb[78].mxu0 }
0x1ffd   :  { %v5577_v40 = vpop.f32.mrb[79].mxu0  ;;  %5117 = vmatmul.mubr.msk.bf16.vlgmr.msra.gmra.mrb[96].mxu1 %vm810_vm6, %v3058_v14 }
0x1ffe   :  { %5585 = vmatpush3.bf16.msra.mxu1 %v6173_v54  ;;  %5586 = vmatprep.mubr.msk.bf16.mxu1 %vm6170_vm5, %v6169_v63 }
0x1fff   :  { %5590 = vmatprep.subr.bf16.mxu1 %v6169_v63 }
0x2002   :  { %v3144_v33 = vpop.f32.mrb[80].mxu0 }
0x2003   :  { %v3150_v0 = vmul.f32 0.17677669, %v3144_v33  ;;  %v5582_v56 = vpop.f32.mrb[81].mxu0 }
0x2004   :  { %v3147_v6 = vpop.f32.mrb[82].mxu0 }
0x2005   :  { %v5583_v5 = vpop.f32.mrb[83].mxu0  ;;  %v3151_v61 = vadd.f32 %v3150_v0, %v6621_v59 }
0x2007   :  { %v3152_v17 = vsel %vm859_vm7, %v3151_v61, -inf }
0x2008   :  { %3153 = vmax.xlane.f32.xlu0 %v3152_v17  ;;  %v5775_v17 = vld [vmem:[%s7836_s13 + $0x4] ss:$16 sps:$4 sm:$0xff]  }
0x2095   :  { %v3154_v41 = vpop.xlane.xlu0 %3153 }
0x2096   :  { %v3155_v43 = vsub.f32 %v3151_v61, %v3154_v41  ;;  %v5773_v61 = vld [vmem:[%s7836_s13] ss:$16 sps:$4 sm:$0xff]   ;;  %v5776_v41 = vld [vmem:[%s7836_s13 + $0x8] ss:$16 sps:$4 sm:$0xff]  }
0x2098   :  { %v3156_v55 = vmul.f32 1.442695, %v3155_v43  ;;  %v5778_v43 = vld [vmem:[%s7836_s13 + $0xc] ss:$16 sps:$4 sm:$0xff]  }
0x209a   :  { %6121 = vpow2.f32 %v3156_v55  ;;  %v5779_v55 = vld [vmem:[%s7836_s13 + $0x20] ss:$16 sps:$4 sm:$0xff]  }
0x20a4   :  { %v6122_v62 = vpop.eup %6121 }
0x20a5   :  { %v3158_v3 = vsel %vm859_vm7, %v6122_v62, 0.0 }
0x20a6   :  { %3159 = vadd.xlane.f32.xlu1 %v3158_v3  ;;  %v5782_v3 = vld [vmem:[%s7836_s13 + $0x28] ss:$16 sps:$4 sm:$0xff]  }
0x20b7   :  { %3254 = vrot.lane.b32.xlu1 %v7079_v48, %s6175_s22 }
0x20d0   :  { %v3096_v4 = vpop.f32.mrb[96].mxu1 }
0x20d1   :  { %v3103_v30 = vadd.f32 %v3096_v4, %v2953_v31  ;;  %v3098_v44 = vpop.f32.mrb[97].mxu1  ;;  %v6166_v31 = vld [vmem:[%s7843_s23 + $0x8] sm:$0xff] }
0x20d2   :  { %v3104_v13 = vadd.f32 %v3098_v44, %v2954_v22  ;;  %v3100_v15 = vpop.f32.mrb[98].mxu1  ;;  %v5784_v4 = vld [vmem:[%s7836_s13 + $0x2c] ss:$16 sps:$4 sm:$0xff]   ;;  %v5785_v44 = vld [vmem:[%s7836_s13 + $0x40] ss:$16 sps:$4 sm:$0xff]  }
0x20d3   :  { %v3101_v16 = vpop.f32.mrb[99].mxu1  ;;  %v5788_v15 = vld [vmem:[%s7836_s13 + $0x48] ss:$16 sps:$4 sm:$0xff]  }
0x20d4   :  { %v5793_v16 = vld [vmem:[%s7836_s13 + $0x64] ss:$16 sps:$4 sm:$0xff]  }
0x2133   :  { %v3160_v20 = vpop.xlane.xlu1 %3159 }
0x2134   :  { %6123 = vrcp.f32 %v3160_v20  ;;  %v5796_v20 = vld [vmem:[%s7836_s13 + $0x6c] ss:$16 sps:$4 sm:$0xff]  }
0x2137   :  { %v3255_v48 = vpop.permute.xlu1 %3254 }
0x213e   :  { %v6124_v18 = vpop.eup %6123 }
0x213f   :  { %v3162_v19 = vmul.f32 %v6124_v18, %v6122_v62  ;;  %v5781_v62 = vld [vmem:[%s7836_s13 + $0x24] ss:$16 sps:$4 sm:$0xff]   ;;  %v5791_v18 = vld [vmem:[%s7836_s13 + $0x60] ss:$16 sps:$4 sm:$0xff]  }
0x2141   :  { %v3163_v8 = vpack.c.bf16 %v3162_v19, %v3162_v19  ;;  %v5794_v19 = vld [vmem:[%s7836_s13 + $0x68] ss:$16 sps:$4 sm:$0xff]  }
0x2143   :  { %5587 = vmatmul.mubr.msk.bf16.vlgmr.msra.gmra.mrb[100].mxu1 %vm859_vm7, %v3163_v8  ;;  %v5799_v8 = vld [vmem:[%s7836_s13 + $0x84] ss:$16 sps:$4 sm:$0xff]  }
0x2144   :  { %5591 = vmatpush3.bf16.xpose.msra.mxu1 %v7070_v32  ;;  %5592 = vmatprep.mubr.msk.bf16.mxu1 %vm6170_vm5, %v6169_v63 }
0x2145   :  { %3360 = vmatprep.subr.bf16.mxu1 %v6954_v51 }
0x214b   :  { %5593 = vmatmul.mubr.msk.bf16.vlgmr.msra.gmra.mrb[104].mxu1 %vm810_vm6, %v3255_v48  ;;  %v5802_v48 = vld [vmem:[%s7836_s13 + $0x8c] ss:$16 sps:$4 sm:$0xff]  }
0x214c   :  { %3361 = vmatpush1.bf16.msra.mxu1 %v6949_v29  ;;  %3392 = vmatprep.mubr.bf16.mxu1 %v6173_v54 }
0x214d   :  { %3362 = vmatprep.subr.bf16.mxu1 %v6959_v60 }
0x2150   :  { %3363 = vmatpush1.bf16.msra.mxu1 %v6966_v7 }
0x2151   :  { %3900 = vmatprep.subr.bf16.mxu1 %v5778_v43  ;;  %v5847_v43 = vld [vmem:[%s7836_s13 + $0x184] ss:$16 sps:$4 sm:$0xff]  }
0x2216   :  { %v3201_v25 = vpop.f32.mrb[100].mxu1 }
0x2217   :  { %v3207_v1 = vpack.c.bf16 %v3201_v25, %v3201_v25  ;;  %v5588_v2 = vpop.f32.mrb[101].mxu1  ;;  %v5797_v25 = vld [vmem:[%s7836_s13 + $0x80] ss:$16 sps:$4 sm:$0xff]  }
0x2218   :  { %v3204_v32 = vpop.f32.mrb[102].mxu1  ;;  %v5805_v2 = vld [vmem:[%s7836_s13 + $0xa4] ss:$16 sps:$4 sm:$0xff]  }
0x2219   :  { %v5589_v38 = vpop.f32.mrb[103].mxu1  ;;  %5120 = vmatmul.mubr.msk.bf16.vlgmr.msra.gmra.mrb[84].mxu0 %vm810_vm6, %v3207_v1  ;;  %v5800_v1 = vld [vmem:[%s7836_s13 + $0x88] ss:$16 sps:$4 sm:$0xff]   ;;  %v5808_v32 = vld [vmem:[%s7836_s13 + $0xac] ss:$16 sps:$4 sm:$0xff]  }
0x221a   :  { %5597 = vmatpush3.bf16.msra.mxu0 %v6173_v54  ;;  %5598 = vmatprep.mubr.msk.bf16.mxu0 %vm6170_vm5, %v6169_v63  ;;  %v7160_v54 = vrot.slane %v3403_v36, %v6446_v12  ;;  %v7163_v63 = vrot.slane %v3403_v36, %v6443_v11  ;;  %v5803_v38 = vld [vmem:[%s7836_s13 + $0xa0] ss:$16 sps:$4 sm:$0xff]   ;;  %v5820_v36 = vld [vmem:[%s7836_s13 + $0xec] ss:$16 sps:$4 sm:$0xff]  }
0x221b   :  { %3857 = vmatprep.subr.bf16.mxu0 %v5775_v17  ;;  %v5839_v17 = vld [vmem:[%s7836_s13 + $0x160] ss:$16 sps:$4 sm:$0xff]  }
0x221c   :  { %v3416_v49 = vadd.f32 %v7163_v63, %v7008_v37 }
0x221e   :  { %v3293_v51 = vpop.f32.mrb[104].mxu1  ;;  %v7177_v21 = vadd.f32 %v6166_v31, %v3416_v49  ;;  %v5824_v49 = vld [vmem:[%s7836_s13 + $0x108] ss:$16 sps:$4 sm:$0xff]   ;;  %v5832_v31 = vld [vmem:[%s7836_s13 + $0x12c] ss:$16 sps:$4 sm:$0xff]  }
0x221f   :  { %v3299_v29 = vmul.f32 0.17677669, %v3293_v51  ;;  %v5594_v39 = vpop.f32.mrb[105].mxu1  ;;  %v5806_v51 = vld [vmem:[%s7836_s13 + $0xa8] ss:$16 sps:$4 sm:$0xff]  }
0x2220   :  { %v3296_v35 = vpop.f32.mrb[106].mxu1  ;;  %v5814_v39 = vld [vmem:[%s7836_s13 + $0xcc] ss:$16 sps:$4 sm:$0xff]  }
0x2221   :  { %v5595_v24 = vpop.f32.mrb[107].mxu1  ;;  %v3300_v60 = vadd.f32 %v3299_v29, %v6621_v59  ;;  %v3415_v59 = vadd.f32 %v7160_v54, %v7005_v34  ;;  %v3425_v34 = vmul.f32 %v7177_v21, %v7177_v21  ;;  %v5811_v29 = vld [vmem:[%s7836_s13 + $0xc4] ss:$16 sps:$4 sm:$0xff]   ;;  %v5809_v35 = vld [vmem:[%s7836_s13 + $0xc0] ss:$16 sps:$4 sm:$0xff]  }
0x2222   :  { %v5812_v24 = vld [vmem:[%s7836_s13 + $0xc8] ss:$16 sps:$4 sm:$0xff]  }
0x2223   :  { %v3301_v7 = vsel %vm859_vm7, %v3300_v60, -inf  ;;  %v7172_v28 = vadd.f32 %v6165_v57, %v3415_v59  ;;  %v5821_v59 = vld [vmem:[%s7836_s13 + $0x100] ss:$16 sps:$4 sm:$0xff]   ;;  %v5829_v57 = vld [vmem:[%s7836_s13 + $0x124] ss:$16 sps:$4 sm:$0xff]  }
0x2224   :  { %3302 = vmax.xlane.f32.xlu1 %v3301_v7  ;;  %v5815_v7 = vld [vmem:[%s7836_s13 + $0xe0] ss:$16 sps:$4 sm:$0xff]  }
0x2225   :  { %v3424_v45 = vmul.f32 %v7172_v28, %v7172_v28 }
0x2227   :  { %v3428_v53 = vadd.f32 %v3425_v34, %v3424_v45  ;;  %v5830_v45 = vld [vmem:[%s7836_s13 + $0x128] ss:$16 sps:$4 sm:$0xff]  }
0x22b1   :  { %v3303_v23 = vpop.xlane.xlu1 %3302 }
0x22b2   :  { %v3304_v27 = vsub.f32 %v3300_v60, %v3303_v23  ;;  %v5817_v60 = vld [vmem:[%s7836_s13 + $0xe4] ss:$16 sps:$4 sm:$0xff]   ;;  %v5818_v23 = vld [vmem:[%s7836_s13 + $0xe8] ss:$16 sps:$4 sm:$0xff]  }
0x22b4   :  { %v3305_v26 = vmul.f32 1.442695, %v3304_v27  ;;  %v5823_v27 = vld [vmem:[%s7836_s13 + $0x104] ss:$16 sps:$4 sm:$0xff]  }
0x22b6   :  { %6125 = vpow2.f32 %v3305_v26  ;;  %v5826_v26 = vld [vmem:[%s7836_s13 + $0x10c] ss:$16 sps:$4 sm:$0xff]  }
0x22c0   :  { %v6126_v22 = vpop.eup %6125 }
0x22c1   :  { %v3307_v37 = vsel %vm859_vm7, %v6126_v22, 0.0 }
0x22c2   :  { %3308 = vadd.xlane.f32.xlu0 %v3307_v37 }
0x22c6   :  { %3429 = vadd.xlane.f32.xlu0 %v3428_v53 }
0x22ec   :  { %v3245_v50 = vpop.f32.mrb[84].mxu0 }
0x22ed   :  { %v7184_v52 = vadd.f32 %v3245_v50, %v3103_v30  ;;  %v3247_v42 = vpop.f32.mrb[85].mxu0  ;;  %v5787_v30 = vld [vmem:[%s7836_s13 + $0x44] ss:$16 sps:$4 sm:$0xff]  }
0x22ee   :  { %v7186_v46 = vadd.f32 %v3247_v42, %v3104_v13  ;;  %v3249_v47 = vpop.f32.mrb[86].mxu0  ;;  %v5790_v13 = vld [vmem:[%s7836_s13 + $0x4c] ss:$16 sps:$4 sm:$0xff]  }
0x22ef   :  { %v3250_v10 = vpop.f32.mrb[87].mxu0 }
0x234f   :  { %v3309_v14 = vpop.xlane.xlu0 %3308 }
0x2350   :  { %6127 = vrcp.f32 %v3309_v14 }
0x235a   :  { %v6128_v58 = vpop.eup %6127 }
0x235b   :  { %v3311_v9 = vmul.f32 %v6128_v58, %v6126_v22  ;;  %v5827_v22 = vld [vmem:[%s7836_s13 + $0x120] ss:$16 sps:$4 sm:$0xff]  }
0x235c   :  { %v6167_v58 = vld [vmem:[%s7843_s23 + $0x10] sm:$0xff] }
0x235d   :  { %v3312_v40 = vpack.c.bf16 %v3311_v9, %v3311_v9 }
0x235f   :  { %5599 = vmatmul.mubr.msk.bf16.vlgmr.msra.gmra.mrb[88].mxu0 %vm859_vm7, %v3312_v40  ;;  %v6168_v40 = vld [vmem:[%s7843_s23 + $0x18] sm:$0xff] }
0x2360   :  { %3858 = vmatpush1.bf16.msra.mxu0 %v5773_v61  ;;  %v5844_v61 = vld [vmem:[%s7836_s13 + $0x16c] ss:$16 sps:$4 sm:$0xff]  }
0x2361   :  { %3859 = vmatprep.subr.bf16.mxu0 %v5781_v62  ;;  %v5845_v62 = vld [vmem:[%s7836_s13 + $0x180] ss:$16 sps:$4 sm:$0xff]  }
0x2364   :  { %3860 = vmatpush1.bf16.msra.mxu0 %v5779_v55  ;;  %v5850_v55 = vld [vmem:[%s7836_s13 + $0x18c] ss:$16 sps:$4 sm:$0xff]  }
0x2365   :  { %3861 = vmatprep.subr.bf16.mxu0 %v5787_v30  ;;  %v5856_v30 = vld [vmem:[%s7836_s13 + $0x1ac] ss:$16 sps:$4 sm:$0xff]  }
0x2368   :  { %3862 = vmatpush1.bf16.msra.mxu0 %v5785_v44  ;;  %v5851_v44 = vld [vmem:[%s7836_s13 + $0x1a0] ss:$16 sps:$4 sm:$0xff]  }
0x2369   :  { %3863 = vmatprep.subr.bf16.mxu0 %v5793_v16  ;;  %v5859_v16 = vld [vmem:[%s7836_s13 + $0x1c4] ss:$16 sps:$4 sm:$0xff]  }
0x236c   :  { %3864 = vmatpush1.bf16.msra.mxu0 %v5791_v18  ;;  %v5862_v18 = vld [vmem:[%s7836_s13 + $0x1cc] ss:$16 sps:$4 sm:$0xff]  }
0x236d   :  { %3865 = vmatprep.subr.bf16.mxu0 %v5799_v8  ;;  %v5868_v8 = vld [vmem:[%s7836_s13 + $0x1ec] ss:$16 sps:$4 sm:$0xff]  }
0x2370   :  { %3866 = vmatpush1.bf16.msra.mxu0 %v5797_v25  ;;  %v5866_v25 = vld [vmem:[%s7836_s13 + $0x1e8] ss:$16 sps:$4 sm:$0xff]  }
0x2371   :  { %3867 = vmatprep.subr.bf16.mxu0 %v5805_v2  ;;  %v5874_v2 = vld [vmem:[%s7837_s14 + $0xc] ss:$16 sps:$4 sm:$0xff]  }
0x2374   :  { %3868 = vmatpush1.bf16.msra.mxu0 %v5803_v38 }
0x2375   :  { %3869 = vmatprep.subr.bf16.mxu0 %v5811_v29 }
0x2378   :  { %3870 = vmatpush1.bf16.msra.mxu0 %v5809_v35 }
0x2379   :  { %3871 = vmatprep.subr.bf16.mxu0 %v5817_v60 }
0x237c   :  { %3872 = vmatpush1.bf16.msra.mxu0 %v5815_v7 }
0x237d   :  { %3873 = vmatprep.subr.bf16.mxu0 %v5823_v27 }
0x2380   :  { %3874 = vmatpush1.bf16.msra.mxu0 %v5821_v59 }
0x2381   :  { %3875 = vmatprep.subr.bf16.mxu0 %v5829_v57 }
0x2384   :  { %3876 = vmatpush1.bf16.msra.mxu0 %v5827_v22 }
0x2432   :  { %v3350_v33 = vpop.f32.mrb[88].mxu0 }
0x2433   :  { %v3356_v0 = vpack.c.bf16 %v3350_v33, %v3350_v33  ;;  %v5600_v56 = vpop.f32.mrb[89].mxu0 }
0x2434   :  { %v3353_v6 = vpop.f32.mrb[90].mxu0  ;;  %v5833_v56 = vld [vmem:[%s7836_s13 + $0x140] ss:$16 sps:$4 sm:$0xff]  }
0x2435   :  { %v5601_v5 = vpop.f32.mrb[91].mxu0  ;;  %5123 = vmatmul.mubr.msk.bf16.vlgmr.msra.gmra.mrb[108].mxu1 %vm810_vm6, %v3356_v0  ;;  %v5838_v0 = vld [vmem:[%s7836_s13 + $0x14c] ss:$16 sps:$4 sm:$0xff]   ;;  %v5836_v6 = vld [vmem:[%s7836_s13 + $0x148] ss:$16 sps:$4 sm:$0xff]  }
0x2436   :  { %3901 = vmatpush1.bf16.msra.mxu1 %v5776_v41  ;;  %v5841_v5 = vld [vmem:[%s7836_s13 + $0x164] ss:$16 sps:$4 sm:$0xff]   ;;  %v5842_v41 = vld [vmem:[%s7836_s13 + $0x168] ss:$16 sps:$4 sm:$0xff]  }
0x2437   :  { %3902 = vmatprep.subr.bf16.mxu1 %v5784_v4  ;;  %v5853_v4 = vld [vmem:[%s7836_s13 + $0x1a4] ss:$16 sps:$4 sm:$0xff]  }
0x243a   :  { %3903 = vmatpush1.bf16.msra.mxu1 %v5782_v3  ;;  %v5848_v3 = vld [vmem:[%s7836_s13 + $0x188] ss:$16 sps:$4 sm:$0xff]  }
0x243b   :  { %3904 = vmatprep.subr.bf16.mxu1 %v5790_v13  ;;  %v5854_v13 = vld [vmem:[%s7836_s13 + $0x1a8] ss:$16 sps:$4 sm:$0xff]  }
0x243e   :  { %3905 = vmatpush1.bf16.msra.mxu1 %v5788_v15  ;;  %v5857_v15 = vld [vmem:[%s7836_s13 + $0x1c0] ss:$16 sps:$4 sm:$0xff]  }
0x243f   :  { %3906 = vmatprep.subr.bf16.mxu1 %v5796_v20  ;;  %v5860_v20 = vld [vmem:[%s7836_s13 + $0x1c8] ss:$16 sps:$4 sm:$0xff]  }
0x2442   :  { %3907 = vmatpush1.bf16.msra.mxu1 %v5794_v19  ;;  %v5865_v19 = vld [vmem:[%s7836_s13 + $0x1e4] ss:$16 sps:$4 sm:$0xff]  }
0x2443   :  { %3908 = vmatprep.subr.bf16.mxu1 %v5802_v48  ;;  %v5863_v48 = vld [vmem:[%s7836_s13 + $0x1e0] ss:$16 sps:$4 sm:$0xff]  }
0x2446   :  { %3909 = vmatpush1.bf16.msra.mxu1 %v5800_v1  ;;  %v5871_v1 = vld [vmem:[%s7837_s14 + $0x4] ss:$16 sps:$4 sm:$0xff]  }
0x2447   :  { %3910 = vmatprep.subr.bf16.mxu1 %v5808_v32  ;;  %v3430_v32 = vpop.xlane.xlu0 %3429 }
0x2448   :  { %v3434_v38 = vmul.f32 0.00390625, %v3430_v32  ;;  %v5922_v32 = vld [vmem:[%s7837_s14 + $0x10c] ss:$16 sps:$4 sm:$0xff]  }
0x244a   :  { %3911 = vmatpush1.bf16.msra.mxu1 %v5806_v51  ;;  %v3436_v51 = vadd.f32 1e-05, %v3434_v38  ;;  %v5917_v38 = vld [vmem:[%s7837_s14 + $0x100] ss:$16 sps:$4 sm:$0xff]  }
0x244b   :  { %3912 = vmatprep.subr.bf16.mxu1 %v5814_v39 }
0x244c   :  { %6129 = vrsqrt.f32 %v3436_v51  ;;  %vm3440_vm8 = vcmp.eq.f32.partialorder %v3436_v51, inf  ;;  %vm3442_vm9 = vcmp.eq.f32.partialorder %v3436_v51, 0.0 }
0x244e   :  { %3913 = vmatpush1.bf16.msra.mxu1 %v5812_v24 }
0x244f   :  { %3914 = vmatprep.subr.bf16.mxu1 %v5820_v36  ;;  %v3443_v36 = vand.u32 2147483648, %v3436_v51 }
0x2452   :  { %3915 = vmatpush1.bf16.msra.mxu1 %v5818_v23  ;;  %v3423_v23 = vld [vmem:[%s7838_s12] sm:$0x3] }
0x2453   :  { %3916 = vmatprep.subr.bf16.mxu1 %v5826_v26  ;;  %v3464_v57 = vrot.slane %v3423_v23, %v6443_v11  ;;  %v5869_v11 = vld [vmem:[%s7837_s14] ss:$16 sps:$4 sm:$0xff]  }
0x2456   :  { %3917 = vmatpush1.bf16.msra.mxu1 %v5824_v49  ;;  %v6130_v24 = vpop.eup %6129 }
0x2457   :  { %3918 = vmatprep.subr.bf16.mxu1 %v5832_v31  ;;  %v3439_v60 = vmul.f32 %v6130_v24, %v3436_v51  ;;  %v3460_v31 = vrot.slane %v3423_v23, %v6446_v12  ;;  %v5872_v12 = vld [vmem:[%s7837_s14 + $0x8] ss:$16 sps:$4 sm:$0xff]  }
0x2458   :  { %v5926_v24 = vld [vmem:[%s7837_s14 + $0x128] ss:$16 sps:$4 sm:$0xff]  }
0x2459   :  { %v3441_v7 = vsel %vm3440_vm8, %v3436_v51, %v3439_v60  ;;  %v5920_v51 = vld [vmem:[%s7837_s14 + $0x108] ss:$16 sps:$4 sm:$0xff]   ;;  %v5931_v60 = vld [vmem:[%s7837_s14 + $0x144] ss:$16 sps:$4 sm:$0xff]  }
0x245a   :  { %3919 = vmatpush1.bf16.msra.mxu1 %v5830_v45  ;;  %v3444_v26 = vsel %vm3442_vm9, %v3443_v36, %v3441_v7  ;;  %v5934_v7 = vld [vmem:[%s7837_s14 + $0x14c] ss:$16 sps:$4 sm:$0xff]   ;;  %v5929_v36 = vld [vmem:[%s7837_s14 + $0x140] ss:$16 sps:$4 sm:$0xff]   ;;  %v5932_v23 = vld [vmem:[%s7837_s14 + $0x148] ss:$16 sps:$4 sm:$0xff]  }
0x245b   :  { %3920 = vmatprep.subr.bf16.mxu1 %v5838_v0  ;;  %v3453_v45 = vmul.f32 %v3444_v26, %v7177_v21  ;;  %v5883_v0 = vld [vmem:[%s7837_s14 + $0x44] ss:$16 sps:$4 sm:$0xff]  }
0x245e   :  { %3921 = vmatpush1.bf16.msra.mxu1 %v5836_v6  ;;  %v5881_v6 = vld [vmem:[%s7837_s14 + $0x40] ss:$16 sps:$4 sm:$0xff]  }
0x245f   :  { %3922 = vmatprep.subr.bf16.mxu1 %v5844_v61  ;;  %v5889_v61 = vld [vmem:[%s7837_s14 + $0x64] ss:$16 sps:$4 sm:$0xff]  }
0x2462   :  { %3923 = vmatpush1.bf16.msra.mxu1 %v5842_v41  ;;  %v5887_v41 = vld [vmem:[%s7837_s14 + $0x60] ss:$16 sps:$4 sm:$0xff]  }
0x2463   :  { %3924 = vmatprep.subr.bf16.mxu1 %v5850_v55  ;;  %v5895_v55 = vld [vmem:[%s7837_s14 + $0x84] ss:$16 sps:$4 sm:$0xff]  }
0x2466   :  { %3925 = vmatpush1.bf16.msra.mxu1 %v5848_v3  ;;  %v5893_v3 = vld [vmem:[%s7837_s14 + $0x80] ss:$16 sps:$4 sm:$0xff]  }
0x2467   :  { %3926 = vmatprep.subr.bf16.mxu1 %v5856_v30  ;;  %v5901_v30 = vld [vmem:[%s7837_s14 + $0xa4] ss:$16 sps:$4 sm:$0xff]  }
0x246a   :  { %3927 = vmatpush1.bf16.msra.mxu1 %v5854_v13  ;;  %v5899_v13 = vld [vmem:[%s7837_s14 + $0xa0] ss:$16 sps:$4 sm:$0xff]  }
0x246b   :  { %3928 = vmatprep.subr.bf16.mxu1 %v5862_v18  ;;  %v5905_v18 = vld [vmem:[%s7837_s14 + $0xc0] ss:$16 sps:$4 sm:$0xff]  }
0x246e   :  { %3929 = vmatpush1.bf16.msra.mxu1 %v5860_v20  ;;  %v5910_v20 = vld [vmem:[%s7837_s14 + $0xcc] ss:$16 sps:$4 sm:$0xff]  }
0x246f   :  { %3930 = vmatprep.subr.bf16.mxu1 %v5868_v8  ;;  %v5913_v8 = vld [vmem:[%s7837_s14 + $0xe4] ss:$16 sps:$4 sm:$0xff]  }
0x2472   :  { %3931 = vmatpush1.bf16.msra.mxu1 %v5866_v25  ;;  %v5911_v25 = vld [vmem:[%s7837_s14 + $0xe0] ss:$16 sps:$4 sm:$0xff]  }
0x2473   :  { %4370 = vmatprep.subr.bf16.mxu1 %v5874_v2  ;;  %v5919_v2 = vld [vmem:[%s7837_s14 + $0x104] ss:$16 sps:$4 sm:$0xff]  }
0x2508   :  { %v3394_v34 = vpop.f32.mrb[108].mxu1 }
0x2509   :  { %v3401_v37 = vadd.f32 %v3394_v34, %v7184_v52  ;;  %v3396_v53 = vpop.f32.mrb[109].mxu1  ;;  %v3452_v34 = vmul.f32 %v3444_v26, %v7172_v28  ;;  %v5940_v26 = vld [vmem:[%s7837_s14 + $0x16c] ss:$16 sps:$4 sm:$0xff]  }
0x250a   :  { %v3402_v50 = vadd.f32 %v3396_v53, %v7186_v46  ;;  %v3398_v42 = vpop.f32.mrb[110].mxu1 }
0x250b   :  { %v3417_v47 = vadd.f32 %v7160_v54, %v3401_v37  ;;  %v3399_v10 = vpop.f32.mrb[111].mxu1  ;;  %v3468_v42 = vmul.f32 %v3464_v57, %v3453_v45  ;;  %v5944_v45 = vld [vmem:[%s7837_s14 + $0x188] ss:$16 sps:$4 sm:$0xff]  }
0x250c   :  { %v3418_v14 = vadd.f32 %v7163_v63, %v3402_v50  ;;  %v5835_v63 = vld [vmem:[%s7836_s13 + $0x144] ss:$16 sps:$4 sm:$0xff]   ;;  %v3467_v10 = vmul.f32 %v3460_v31, %v3452_v34 }
0x250d   :  { %v7317_v9 = vadd.f32 %v6167_v58, %v3417_v47  ;;  %3877 = vmatprep.subr.bf16.mxu0 %v5835_v63  ;;  %v5878_v63 = vld [vmem:[%s7837_s14 + $0x28] ss:$16 sps:$4 sm:$0xff]   ;;  %v5949_v34 = vld [vmem:[%s7837_s14 + $0x1a4] ss:$16 sps:$4 sm:$0xff]  }
0x250e   :  { %v7322_v52 = vadd.f32 %v6168_v40, %v3418_v14  ;;  %3878 = vmatpush1.bf16.msra.mxu0 %v5833_v56  ;;  %v5886_v56 = vld [vmem:[%s7837_s14 + $0x4c] ss:$16 sps:$4 sm:$0xff]  }
0x250f   :  { %v3426_v46 = vmul.f32 %v7317_v9, %v7317_v9  ;;  %3879 = vmatprep.subr.bf16.mxu0 %v5841_v5  ;;  %v5884_v5 = vld [vmem:[%s7837_s14 + $0x48] ss:$16 sps:$4 sm:$0xff]  }
0x2510   :  { %v3427_v54 = vmul.f32 %v7322_v52, %v7322_v52 }
0x2512   :  { %v3431_v33 = vadd.f32 %v3427_v54, %v3426_v46  ;;  %3880 = vmatpush1.bf16.msra.mxu0 %v5839_v17  ;;  %v5877_v46 = vld [vmem:[%s7837_s14 + $0x24] ss:$16 sps:$4 sm:$0xff]   ;;  %v5880_v54 = vld [vmem:[%s7837_s14 + $0x2c] ss:$16 sps:$4 sm:$0xff]  }
0x2513   :  { %3881 = vmatprep.subr.bf16.mxu0 %v5847_v43  ;;  %v5892_v17 = vld [vmem:[%s7837_s14 + $0x6c] ss:$16 sps:$4 sm:$0xff]   ;;  %v5890_v43 = vld [vmem:[%s7837_s14 + $0x68] ss:$16 sps:$4 sm:$0xff]  }
0x2514   :  { %3432 = vadd.xlane.f32.xlu0 %v3431_v33  ;;  %v5875_v33 = vld [vmem:[%s7837_s14 + $0x20] ss:$16 sps:$4 sm:$0xff]  }
0x2516   :  { %3882 = vmatpush1.bf16.msra.mxu0 %v5845_v62  ;;  %v5898_v62 = vld [vmem:[%s7837_s14 + $0x8c] ss:$16 sps:$4 sm:$0xff]  }
0x2517   :  { %3883 = vmatprep.subr.bf16.mxu0 %v5853_v4  ;;  %v5896_v4 = vld [vmem:[%s7837_s14 + $0x88] ss:$16 sps:$4 sm:$0xff]  }
0x251a   :  { %3884 = vmatpush1.bf16.msra.mxu0 %v5851_v44  ;;  %v5904_v44 = vld [vmem:[%s7837_s14 + $0xac] ss:$16 sps:$4 sm:$0xff]  }
0x251b   :  { %3885 = vmatprep.subr.bf16.mxu0 %v5859_v16  ;;  %v5907_v16 = vld [vmem:[%s7837_s14 + $0xc4] ss:$16 sps:$4 sm:$0xff]  }
0x251e   :  { %3886 = vmatpush1.bf16.msra.mxu0 %v5857_v15  ;;  %v5902_v15 = vld [vmem:[%s7837_s14 + $0xa8] ss:$16 sps:$4 sm:$0xff]  }
0x251f   :  { %3887 = vmatprep.subr.bf16.mxu0 %v5865_v19  ;;  %v5908_v19 = vld [vmem:[%s7837_s14 + $0xc8] ss:$16 sps:$4 sm:$0xff]  }
0x2522   :  { %3888 = vmatpush1.bf16.msra.mxu0 %v5863_v48  ;;  %v5916_v48 = vld [vmem:[%s7837_s14 + $0xec] ss:$16 sps:$4 sm:$0xff]  }
0x2523   :  { %4327 = vmatprep.subr.bf16.mxu0 %v5871_v1  ;;  %v5914_v1 = vld [vmem:[%s7837_s14 + $0xe8] ss:$16 sps:$4 sm:$0xff]  }
0x25a1   :  { %v3433_v29 = vpop.xlane.xlu0 %3432 }
0x25a2   :  { %v3435_v39 = vmul.f32 0.00390625, %v3433_v29  ;;  %v5925_v29 = vld [vmem:[%s7837_s14 + $0x124] ss:$16 sps:$4 sm:$0xff]  }
0x25a4   :  { %v3437_v35 = vadd.f32 1e-05, %v3435_v39  ;;  %v5928_v39 = vld [vmem:[%s7837_s14 + $0x12c] ss:$16 sps:$4 sm:$0xff]  }
0x25a6   :  { %6131 = vrsqrt.f32 %v3437_v35  ;;  %vm3447_vm10 = vcmp.eq.f32.partialorder %v3437_v35, inf  ;;  %v3450_v49 = vand.u32 2147483648, %v3437_v35  ;;  %vm3449_vm11 = vcmp.eq.f32.partialorder %v3437_v35, 0.0 }
0x25b0   :  { %v6132_v27 = vpop.eup %6131 }
0x25b1   :  { %v3446_v59 = vmul.f32 %v6132_v27, %v3437_v35  ;;  %v5937_v27 = vld [vmem:[%s7837_s14 + $0x164] ss:$16 sps:$4 sm:$0xff]  }
0x25b3   :  { %v3448_v22 = vsel %vm3447_vm10, %v3437_v35, %v3446_v59  ;;  %v5923_v35 = vld [vmem:[%s7837_s14 + $0x120] ss:$16 sps:$4 sm:$0xff]  }
0x25b4   :  { %v3451_v37 = vsel %vm3449_vm11, %v3450_v49, %v3448_v22  ;;  %v5935_v59 = vld [vmem:[%s7837_s14 + $0x160] ss:$16 sps:$4 sm:$0xff]   ;;  %v5938_v49 = vld [vmem:[%s7837_s14 + $0x168] ss:$16 sps:$4 sm:$0xff]  }
0x25b5   :  { %v3455_v53 = vmul.f32 %v3451_v37, %v7322_v52  ;;  %v3454_v50 = vmul.f32 %v3451_v37, %v7317_v9  ;;  %v5941_v22 = vld [vmem:[%s7837_s14 + $0x180] ss:$16 sps:$4 sm:$0xff]   ;;  %v5952_v37 = vld [vmem:[%s7837_s14 + $0x1ac] ss:$16 sps:$4 sm:$0xff]  }
0x25b7   :  { %v3470_v47 = vmul.f32 %v3464_v57, %v3455_v53  ;;  %v3469_v14 = vmul.f32 %v3460_v31, %v3454_v50  ;;  %v5943_v57 = vld [vmem:[%s7837_s14 + $0x184] ss:$16 sps:$4 sm:$0xff]   ;;  %v5946_v31 = vld [vmem:[%s7837_s14 + $0x18c] ss:$16 sps:$4 sm:$0xff]   ;;  %v5947_v53 = vld [vmem:[%s7837_s14 + $0x1a0] ss:$16 sps:$4 sm:$0xff]  }
0x25b8   :  { %v5950_v50 = vld [vmem:[%s7837_s14 + $0x1a8] ss:$16 sps:$4 sm:$0xff]  }
0x25b9   :  { %v3472_v58 = vpack.c.bf16 %v3470_v47, %v3468_v42  ;;  %v7421_v40 = vpack.c.bf16 %v3469_v14, %v3467_v10  ;;  %v5955_v42 = vld [vmem:[%s7837_s14 + $0x1c4] ss:$16 sps:$4 sm:$0xff]   ;;  %v5958_v47 = vld [vmem:[%s7837_s14 + $0x1cc] ss:$16 sps:$4 sm:$0xff]   ;;  %v5953_v10 = vld [vmem:[%s7837_s14 + $0x1c0] ss:$16 sps:$4 sm:$0xff]  }
0x25ba   :  { %v5956_v14 = vld [vmem:[%s7837_s14 + $0x1c8] ss:$16 sps:$4 sm:$0xff]  }
0x25bb   :  { %3889 = vmatprep.mubr.bf16.mxu0 %v3472_v58  ;;  %3932 = vmatprep.mubr.bf16.mxu1 %v3472_v58 }
0x25bc   :  { %3890 = vmatmul.mubr.bf16.vlgmr.msra.gmra.mrb[92].mxu0 %v7421_v40  ;;  %3933 = vmatmul.mubr.bf16.vlgmr.msra.gmra.mrb[112].mxu1 %v7421_v40 }
0x25bd   :  { %4328 = vmatpush1.bf16.msra.mxu0 %v5869_v11  ;;  %4371 = vmatpush1.bf16.msra.mxu1 %v5872_v12  ;;  %v5964_v11 = vld [vmem:[%s7837_s14 + $0x1ec] ss:$16 sps:$4 sm:$0xff]   ;;  %v5959_v12 = vld [vmem:[%s7837_s14 + $0x1e0] ss:$16 sps:$4 sm:$0xff]  }
0x25be   :  { %4359 = vmatprep.mubr.bf16.mxu0 %v3472_v58  ;;  %4402 = vmatprep.mubr.bf16.mxu1 %v3472_v58  ;;  %v5961_v58 = vld [vmem:[%s7837_s14 + $0x1e4] ss:$16 sps:$4 sm:$0xff]  }
0x25bf   :  { %4329 = vmatprep.subr.bf16.mxu0 %v5877_v46  ;;  %4372 = vmatprep.subr.bf16.mxu1 %v5880_v54  ;;  %v5962_v46 = vld [vmem:[%s7837_s14 + $0x1e8] ss:$16 sps:$4 sm:$0xff]   ;;  %v5967_v54 = vld [vmem:[%s7839_s15 + $0x4] ss:$8 sps:$4 sm:$0xff]  }
0x25c1   :  { %4330 = vmatpush1.bf16.msra.mxu0 %v5875_v33  ;;  %4373 = vmatpush1.bf16.msra.mxu1 %v5878_v63  ;;  %v5965_v33 = vld [vmem:[%s7839_s15] ss:$8 sps:$4 sm:$0xff]   ;;  %v5970_v63 = vld [vmem:[%s7839_s15 + $0x14] ss:$8 sps:$4 sm:$0xff]  }
0x25c2   :  { %4331 = vmatprep.subr.bf16.mxu0 %v5883_v0  ;;  %4374 = vmatprep.subr.bf16.mxu1 %v5886_v56  ;;  %v5968_v0 = vld [vmem:[%s7839_s15 + $0x10] ss:$8 sps:$4 sm:$0xff]   ;;  %v5971_v56 = vld [vmem:[%s7839_s15 + $0x20] ss:$8 sps:$4 sm:$0xff]  }
0x25c5   :  { %4332 = vmatpush1.bf16.msra.mxu0 %v5881_v6  ;;  %4375 = vmatpush1.bf16.msra.mxu1 %v5884_v5  ;;  %v5976_v6 = vld [vmem:[%s7839_s15 + $0x34] ss:$8 sps:$4 sm:$0xff]   ;;  %v5974_v5 = vld [vmem:[%s7839_s15 + $0x30] ss:$8 sps:$4 sm:$0xff]  }
0x25c6   :  { %4333 = vmatprep.subr.bf16.mxu0 %v5889_v61  ;;  %4376 = vmatprep.subr.bf16.mxu1 %v5892_v17  ;;  %v5979_v61 = vld [vmem:[%s7839_s15 + $0x44] ss:$8 sps:$4 sm:$0xff]   ;;  %v5977_v17 = vld [vmem:[%s7839_s15 + $0x40] ss:$8 sps:$4 sm:$0xff]  }
0x25c9   :  { %4334 = vmatpush1.bf16.msra.mxu0 %v5887_v41  ;;  %4377 = vmatpush1.bf16.msra.mxu1 %v5890_v43  ;;  %v5982_v41 = vld [vmem:[%s7839_s15 + $0x54] ss:$8 sps:$4 sm:$0xff]   ;;  %v5980_v43 = vld [vmem:[%s7839_s15 + $0x50] ss:$8 sps:$4 sm:$0xff]  }
0x25ca   :  { %4335 = vmatprep.subr.bf16.mxu0 %v5895_v55  ;;  %4378 = vmatprep.subr.bf16.mxu1 %v5898_v62  ;;  %v5985_v55 = vld [vmem:[%s7839_s15 + $0x64] ss:$8 sps:$4 sm:$0xff]   ;;  %v5983_v62 = vld [vmem:[%s7839_s15 + $0x60] ss:$8 sps:$4 sm:$0xff]  }
0x25cd   :  { %4336 = vmatpush1.bf16.msra.mxu0 %v5893_v3  ;;  %4379 = vmatpush1.bf16.msra.mxu1 %v5896_v4  ;;  %v5988_v3 = vld [vmem:[%s7839_s15 + $0x74] ss:$8 sps:$4 sm:$0xff]   ;;  %v5986_v4 = vld [vmem:[%s7839_s15 + $0x70] ss:$8 sps:$4 sm:$0xff]  }
0x25ce   :  { %4337 = vmatprep.subr.bf16.mxu0 %v5901_v30  ;;  %4380 = vmatprep.subr.bf16.mxu1 %v5904_v44  ;;  %v5991_v30 = vld [vmem:[%s7839_s15 + $0x84] ss:$8 sps:$4 sm:$0xff]   ;;  %v5989_v44 = vld [vmem:[%s7839_s15 + $0x80] ss:$8 sps:$4 sm:$0xff]  }
0x25d1   :  { %4338 = vmatpush1.bf16.msra.mxu0 %v5899_v13  ;;  %4381 = vmatpush1.bf16.msra.mxu1 %v5902_v15  ;;  %v5994_v13 = vld [vmem:[%s7839_s15 + $0x94] ss:$8 sps:$4 sm:$0xff]   ;;  %v5992_v15 = vld [vmem:[%s7839_s15 + $0x90] ss:$8 sps:$4 sm:$0xff]  }
0x25d2   :  { %4339 = vmatprep.subr.bf16.mxu0 %v5907_v16  ;;  %4382 = vmatprep.subr.bf16.mxu1 %v5910_v20  ;;  %v5997_v16 = vld [vmem:[%s7839_s15 + $0xa4] ss:$8 sps:$4 sm:$0xff]   ;;  %v5995_v20 = vld [vmem:[%s7839_s15 + $0xa0] ss:$8 sps:$4 sm:$0xff]  }
0x25d5   :  { %4340 = vmatpush1.bf16.msra.mxu0 %v5905_v18  ;;  %4383 = vmatpush1.bf16.msra.mxu1 %v5908_v19  ;;  %v6000_v18 = vld [vmem:[%s7839_s15 + $0xb4] ss:$8 sps:$4 sm:$0xff]   ;;  %v5998_v19 = vld [vmem:[%s7839_s15 + $0xb0] ss:$8 sps:$4 sm:$0xff]  }
0x25d6   :  { %4341 = vmatprep.subr.bf16.mxu0 %v5913_v8  ;;  %4384 = vmatprep.subr.bf16.mxu1 %v5916_v48  ;;  %v6003_v8 = vld [vmem:[%s7839_s15 + $0xc4] ss:$8 sps:$4 sm:$0xff]   ;;  %v6001_v48 = vld [vmem:[%s7839_s15 + $0xc0] ss:$8 sps:$4 sm:$0xff]  }
0x25d9   :  { %4342 = vmatpush1.bf16.msra.mxu0 %v5911_v25  ;;  %4385 = vmatpush1.bf16.msra.mxu1 %v5914_v1  ;;  %v6006_v25 = vld [vmem:[%s7839_s15 + $0xd4] ss:$8 sps:$4 sm:$0xff]   ;;  %v6004_v1 = vld [vmem:[%s7839_s15 + $0xd0] ss:$8 sps:$4 sm:$0xff]  }
0x25da   :  { %4343 = vmatprep.subr.bf16.mxu0 %v5919_v2  ;;  %4386 = vmatprep.subr.bf16.mxu1 %v5922_v32  ;;  %v6007_v2 = vld [vmem:[%s7839_s15 + $0xe0] ss:$8 sps:$4 sm:$0xff]   ;;  %v6009_v32 = vld [vmem:[%s7839_s15 + $0xe4] ss:$8 sps:$4 sm:$0xff]  }
0x25dd   :  { %4344 = vmatpush1.bf16.msra.mxu0 %v5917_v38  ;;  %4387 = vmatpush1.bf16.msra.mxu1 %v5920_v51  ;;  %v6012_v38 = vld [vmem:[%s7839_s15 + $0xf4] ss:$8 sps:$4 sm:$0xff]   ;;  %v6010_v51 = vld [vmem:[%s7839_s15 + $0xf0] ss:$8 sps:$4 sm:$0xff]  }
0x25de   :  { %4345 = vmatprep.subr.bf16.mxu0 %v5925_v29  ;;  %4388 = vmatprep.subr.bf16.mxu1 %v5928_v39  ;;  %v6015_v29 = vld [vmem:[%s7839_s15 + $0x104] ss:$8 sps:$4 sm:$0xff]  }
0x25e1   :  { %4346 = vmatpush1.bf16.msra.mxu0 %v5923_v35  ;;  %4389 = vmatpush1.bf16.msra.mxu1 %v5926_v24 }
0x25e2   :  { %4347 = vmatprep.subr.bf16.mxu0 %v5931_v60  ;;  %4390 = vmatprep.subr.bf16.mxu1 %v5934_v7 }
0x25e5   :  { %4348 = vmatpush1.bf16.msra.mxu0 %v5929_v36  ;;  %4391 = vmatpush1.bf16.msra.mxu1 %v5932_v23 }
0x25e6   :  { %4349 = vmatprep.subr.bf16.mxu0 %v5937_v27  ;;  %4392 = vmatprep.subr.bf16.mxu1 %v5940_v26 }
0x25e9   :  { %4350 = vmatpush1.bf16.msra.mxu0 %v5935_v59  ;;  %4393 = vmatpush1.bf16.msra.mxu1 %v5938_v49 }
0x25ea   :  { %4351 = vmatprep.subr.bf16.mxu0 %v5943_v57  ;;  %4394 = vmatprep.subr.bf16.mxu1 %v5946_v31 }
0x25ed   :  { %4352 = vmatpush1.bf16.msra.mxu0 %v5941_v22  ;;  %4395 = vmatpush1.bf16.msra.mxu1 %v5944_v45 }
0x25ee   :  { %4353 = vmatprep.subr.bf16.mxu0 %v5949_v34  ;;  %4396 = vmatprep.subr.bf16.mxu1 %v5952_v37 }
0x25f1   :  { %4354 = vmatpush1.bf16.msra.mxu0 %v5947_v53  ;;  %4397 = vmatpush1.bf16.msra.mxu1 %v5950_v50 }
0x25f2   :  { %4355 = vmatprep.subr.bf16.mxu0 %v5955_v42  ;;  %4398 = vmatprep.subr.bf16.mxu1 %v5958_v47 }
0x25f5   :  { %4356 = vmatpush1.bf16.msra.mxu0 %v5953_v10  ;;  %4399 = vmatpush1.bf16.msra.mxu1 %v5956_v14 }
0x25f6   :  { %4357 = vmatprep.subr.bf16.mxu0 %v5961_v58  ;;  %4400 = vmatprep.subr.bf16.mxu1 %v5964_v11 }
0x25f9   :  { %4358 = vmatpush1.bf16.msra.mxu0 %v5959_v12  ;;  %4401 = vmatpush1.bf16.msra.mxu1 %v5962_v46 }
0x25fa   :  { %4865 = vmatprep.subr.bf16.mxu0 %v5967_v54 }
0x25fc   :  { %4360 = vmatmul.mubr.bf16.vlgmr.msra.gmra.mrb[96].mxu0 %v7421_v40  ;;  %4403 = vmatmul.mubr.bf16.vlgmr.msra.gmra.mrb[116].mxu1 %v7421_v40  ;;  %v5973_v40 = vld [vmem:[%s7839_s15 + $0x24] ss:$8 sps:$4 sm:$0xff]  }
0x25fd   :  { %4866 = vmatpush1.bf16.msra.mxu0 %v5965_v33 }
0x25fe   :  { %4867 = vmatprep.subr.bf16.mxu0 %v5970_v63 }
0x2601   :  { %4868 = vmatpush1.bf16.msra.mxu0 %v5968_v0 }
0x2602   :  { %4869 = vmatprep.subr.bf16.mxu0 %v5973_v40 }
0x2605   :  { %4870 = vmatpush1.bf16.msra.mxu0 %v5971_v56 }
0x2606   :  { %4871 = vmatprep.subr.bf16.mxu0 %v5976_v6 }
0x2609   :  { %4872 = vmatpush1.bf16.msra.mxu0 %v5974_v5 }
0x260a   :  { %4873 = vmatprep.subr.bf16.mxu0 %v5979_v61 }
0x260d   :  { %4874 = vmatpush1.bf16.msra.mxu0 %v5977_v17 }
0x260e   :  { %4875 = vmatprep.subr.bf16.mxu0 %v5982_v41 }
0x2611   :  { %4876 = vmatpush1.bf16.msra.mxu0 %v5980_v43 }
0x2612   :  { %4877 = vmatprep.subr.bf16.mxu0 %v5985_v55 }
0x2615   :  { %4878 = vmatpush1.bf16.msra.mxu0 %v5983_v62 }
0x2616   :  { %4879 = vmatprep.subr.bf16.mxu0 %v5988_v3 }
0x2619   :  { %4880 = vmatpush1.bf16.msra.mxu0 %v5986_v4 }
0x261a   :  { %4881 = vmatprep.subr.bf16.mxu0 %v5991_v30 }
0x261d   :  { %4882 = vmatpush1.bf16.msra.mxu0 %v5989_v44 }
0x261e   :  { %4883 = vmatprep.subr.bf16.mxu0 %v5994_v13 }
0x2621   :  { %4884 = vmatpush1.bf16.msra.mxu0 %v5992_v15 }
0x2622   :  { %4885 = vmatprep.subr.bf16.mxu0 %v5997_v16 }
0x2625   :  { %4886 = vmatpush1.bf16.msra.mxu0 %v5995_v20 }
0x2626   :  { %4887 = vmatprep.subr.bf16.mxu0 %v6000_v18 }
0x2629   :  { %4888 = vmatpush1.bf16.msra.mxu0 %v5998_v19 }
0x262a   :  { %4889 = vmatprep.subr.bf16.mxu0 %v6003_v8 }
0x262d   :  { %4890 = vmatpush1.bf16.msra.mxu0 %v6001_v48 }
0x262e   :  { %4891 = vmatprep.subr.bf16.mxu0 %v6006_v25 }
0x2631   :  { %4892 = vmatpush1.bf16.msra.mxu0 %v6004_v1 }
0x2632   :  { %4893 = vmatprep.subr.bf16.mxu0 %v6009_v32 }
0x2635   :  { %4894 = vmatpush1.bf16.msra.mxu0 %v6007_v2 }
0x2636   :  { %4895 = vmatprep.subr.bf16.mxu0 %v6012_v38 }
0x2639   :  { %4896 = vmatpush1.bf16.msra.mxu0 %v6010_v51 }
0x263a   :  { %4908 = vmatprep.subr.bf16.mxu0 %v6015_v29 }
0x268f   :  { %v3891_v39 = vpop.f32.mrb[92].mxu0  ;;  %v3934_v35 = vpop.f32.mrb[112].mxu1 }
0x2690   :  { %v3893_v24 = vpop.f32.mrb[93].mxu0  ;;  %v3936_v60 = vpop.f32.mrb[113].mxu1  ;;  %v5252_v26 = vmul.f32 -1.442695, %v3891_v39  ;;  %v5254_v59 = vmul.f32 -1.442695, %v3934_v35 }
0x2691   :  { %v3895_v7 = vpop.f32.mrb[94].mxu0  ;;  %v3938_v36 = vpop.f32.mrb[114].mxu1  ;;  %v5253_v49 = vmul.f32 -1.442695, %v3893_v24  ;;  %v5255_v57 = vmul.f32 -1.442695, %v3936_v60 }
0x2692   :  { %v3897_v23 = vpop.f32.mrb[95].mxu0  ;;  %v3940_v27 = vpop.f32.mrb[115].mxu1  ;;  %6133 = vpow2.f32 %v5252_v26  ;;  %v5256_v31 = vmul.f32 -1.442695, %v3895_v7  ;;  %v5258_v22 = vmul.f32 -1.442695, %v3938_v36 }
0x2693   :  { %6135 = vpow2.f32 %v5254_v59  ;;  %v5257_v45 = vmul.f32 -1.442695, %v3897_v23  ;;  %v5259_v34 = vmul.f32 -1.442695, %v3940_v27 }
0x2694   :  { %6137 = vpow2.f32 %v5253_v49  ;;  %v6016_v49 = vld [vmem:[%s7839_s15 + $0x110] ss:$8 sps:$4 sm:$0xff]  }
0x2695   :  { %6139 = vpow2.f32 %v5255_v57  ;;  %v6021_v57 = vld [vmem:[%s7839_s15 + $0x124] ss:$8 sps:$4 sm:$0xff]  }
0x2696   :  { %6141 = vpow2.f32 %v5256_v31  ;;  %v6019_v31 = vld [vmem:[%s7839_s15 + $0x120] ss:$8 sps:$4 sm:$0xff]  }
0x2697   :  { %6143 = vpow2.f32 %v5258_v22  ;;  %v6024_v22 = vld [vmem:[%s7839_s15 + $0x134] ss:$8 sps:$4 sm:$0xff]  }
0x2698   :  { %6145 = vpow2.f32 %v5257_v45  ;;  %v6022_v45 = vld [vmem:[%s7839_s15 + $0x130] ss:$8 sps:$4 sm:$0xff]  }
0x2699   :  { %6147 = vpow2.f32 %v5259_v34  ;;  %v6027_v34 = vld [vmem:[%s7839_s15 + $0x144] ss:$8 sps:$4 sm:$0xff]  }
0x269c   :  { %v6134_v37 = vpop.eup %6133 }
0x269d   :  { %v6136_v53 = vpop.eup %6135  ;;  %v4437_v47 = vadd.f32 1.0, %v6134_v37  ;;  %v6025_v37 = vld [vmem:[%s7839_s15 + $0x140] ss:$8 sps:$4 sm:$0xff]  }
0x269e   :  { %v6138_v50 = vpop.eup %6137  ;;  %v4439_v14 = vadd.f32 1.0, %v6136_v53  ;;  %v6030_v53 = vld [vmem:[%s7839_s15 + $0x154] ss:$8 sps:$4 sm:$0xff]  }
0x269f   :  { %v6140_v42 = vpop.eup %6139  ;;  %v4438_v11 = vadd.f32 1.0, %v6138_v50  ;;  %6149 = vrcp.f32 %v4437_v47  ;;  %v6028_v50 = vld [vmem:[%s7839_s15 + $0x150] ss:$8 sps:$4 sm:$0xff]   ;;  %v6031_v47 = vld [vmem:[%s7839_s15 + $0x160] ss:$8 sps:$4 sm:$0xff]  }
0x26a0   :  { %v6142_v10 = vpop.eup %6141  ;;  %v4440_v46 = vadd.f32 1.0, %v6140_v42  ;;  %6151 = vrcp.f32 %v4439_v14  ;;  %v6033_v42 = vld [vmem:[%s7839_s15 + $0x164] ss:$8 sps:$4 sm:$0xff]   ;;  %v6034_v14 = vld [vmem:[%s7839_s15 + $0x170] ss:$8 sps:$4 sm:$0xff]  }
0x26a1   :  { %v6144_v58 = vpop.eup %6143  ;;  %v4441_v33 = vadd.f32 1.0, %v6142_v10  ;;  %6153 = vrcp.f32 %v4438_v11  ;;  %v6036_v10 = vld [vmem:[%s7839_s15 + $0x174] ss:$8 sps:$4 sm:$0xff]   ;;  %v6037_v11 = vld [vmem:[%s7839_s15 + $0x180] ss:$8 sps:$4 sm:$0xff]  }
0x26a2   :  { %v6146_v12 = vpop.eup %6145  ;;  %v4443_v63 = vadd.f32 1.0, %v6144_v58  ;;  %6155 = vrcp.f32 %v4440_v46  ;;  %v6039_v58 = vld [vmem:[%s7839_s15 + $0x184] ss:$8 sps:$4 sm:$0xff]   ;;  %v6040_v46 = vld [vmem:[%s7839_s15 + $0x190] ss:$8 sps:$4 sm:$0xff]  }
0x26a3   :  { %v6148_v54 = vpop.eup %6147  ;;  %v4442_v0 = vadd.f32 1.0, %v6146_v12  ;;  %6157 = vrcp.f32 %v4441_v33  ;;  %v6042_v12 = vld [vmem:[%s7839_s15 + $0x194] ss:$8 sps:$4 sm:$0xff]   ;;  %v6043_v33 = vld [vmem:[%s7839_s15 + $0x1a0] ss:$8 sps:$4 sm:$0xff]  }
0x26a4   :  { %v4444_v40 = vadd.f32 1.0, %v6148_v54  ;;  %6159 = vrcp.f32 %v4443_v63  ;;  %v6045_v54 = vld [vmem:[%s7839_s15 + $0x1a4] ss:$8 sps:$4 sm:$0xff]   ;;  %v6048_v63 = vld [vmem:[%s7839_s15 + $0x1b4] ss:$8 sps:$4 sm:$0xff]  }
0x26a5   :  { %6161 = vrcp.f32 %v4442_v0  ;;  %v6046_v0 = vld [vmem:[%s7839_s15 + $0x1b0] ss:$8 sps:$4 sm:$0xff]  }
0x26a6   :  { %6163 = vrcp.f32 %v4444_v40  ;;  %v6051_v40 = vld [vmem:[%s7839_s15 + $0x1c4] ss:$8 sps:$4 sm:$0xff]  }
0x26a9   :  { %v6150_v56 = vpop.eup %6149 }
0x26aa   :  { %v6152_v6 = vpop.eup %6151  ;;  %v4461_v62 = vmul.f32 %v6150_v56, %v3891_v39  ;;  %v6049_v56 = vld [vmem:[%s7839_s15 + $0x1c0] ss:$8 sps:$4 sm:$0xff]  }
0x26ab   :  { %v6154_v5 = vpop.eup %6153  ;;  %v4463_v3 = vmul.f32 %v6152_v6, %v3934_v35  ;;  %v6054_v6 = vld [vmem:[%s7839_s15 + $0x1d4] ss:$8 sps:$4 sm:$0xff]  }
0x26ac   :  { %v6156_v61 = vpop.eup %6155  ;;  %v4462_v4 = vmul.f32 %v6154_v5, %v3893_v24  ;;  %v6052_v5 = vld [vmem:[%s7839_s15 + $0x1d0] ss:$8 sps:$4 sm:$0xff]  }
0x26ad   :  { %v6158_v17 = vpop.eup %6157  ;;  %v4464_v30 = vmul.f32 %v6156_v61, %v3936_v60  ;;  %v6057_v61 = vld [vmem:[%s7839_s15 + $0x1e4] ss:$8 sps:$4 sm:$0xff]  }
0x26ae   :  { %v6160_v41 = vpop.eup %6159  ;;  %v4465_v15 = vmul.f32 %v6158_v17, %v3895_v7  ;;  %v6055_v17 = vld [vmem:[%s7839_s15 + $0x1e0] ss:$8 sps:$4 sm:$0xff]  }
0x26af   :  { %v6162_v43 = vpop.eup %6161  ;;  %v4467_v16 = vmul.f32 %v6160_v41, %v3938_v36  ;;  %v6060_v41 = vld [vmem:[%s7839_s15 + $0x1f4] ss:$8 sps:$4 sm:$0xff]  }
0x26b0   :  { %v6164_v55 = vpop.eup %6163  ;;  %v4466_v48 = vmul.f32 %v6162_v43, %v3897_v23  ;;  %v6013_v23 = vld [vmem:[%s7839_s15 + $0x100] ss:$8 sps:$4 sm:$0xff]   ;;  %v6058_v43 = vld [vmem:[%s7839_s15 + $0x1f0] ss:$8 sps:$4 sm:$0xff]  }
0x26b1   :  { %v4468_v25 = vmul.f32 %v6164_v55, %v3940_v27  ;;  %v6018_v27 = vld [vmem:[%s7839_s15 + $0x114] ss:$8 sps:$4 sm:$0xff]  }
0x26cf   :  { %v4361_v44 = vpop.f32.mrb[96].mxu0  ;;  %v4404_v13 = vpop.f32.mrb[116].mxu1 }
0x26d0   :  { %v4469_v20 = vmul.f32 %v4461_v62, %v4361_v44  ;;  %v7706_v18 = vmul.f32 %v4463_v3, %v4404_v13  ;;  %v4363_v19 = vpop.f32.mrb[97].mxu0  ;;  %v4406_v8 = vpop.f32.mrb[117].mxu1 }
0x26d1   :  { %v4470_v1 = vmul.f32 %v4462_v4, %v4363_v19  ;;  %v4472_v2 = vmul.f32 %v4464_v30, %v4406_v8  ;;  %v4365_v32 = vpop.f32.mrb[98].mxu0  ;;  %v4408_v38 = vpop.f32.mrb[118].mxu1 }
0x26d2   :  { %v4473_v51 = vmul.f32 %v4465_v15, %v4365_v32  ;;  %v7708_v29 = vmul.f32 %v4467_v16, %v4408_v38  ;;  %v4367_v39 = vpop.f32.mrb[99].mxu0  ;;  %v4410_v35 = vpop.f32.mrb[119].mxu1 }
0x26d3   :  { %v4474_v24 = vmul.f32 %v4466_v48, %v4367_v39  ;;  %v4476_v60 = vmul.f32 %v4468_v25, %v4410_v35 }
0x26d4   :  { %v4477_v7 = vpack.c.bf16 %v4473_v51, %v4469_v20  ;;  %v4479_v36 = vpack.c.bf16 %v7708_v29, %v7706_v18 }
0x26d5   :  { %v4478_v26 = vpack.c.bf16 %v4474_v24, %v4470_v1  ;;  %v4480_v59 = vpack.c.bf16 %v4476_v60, %v4472_v2 }
0x26d7   :  { %4897 = vmatprep.mubr.bf16.mxu0 %v4478_v26 }
0x26d8   :  { %4898 = vmatmul.mubr.bf16.vlgmr.msra.gmra.mrb[100].mxu0 %v4477_v7 }
0x26d9   :  { %4909 = vmatpush1.bf16.msra.mxu0 %v6013_v23  ;;  %4940 = vmatprep.mubr.bf16.mxu0 %v4480_v59 }
0x26da   :  { %4910 = vmatprep.subr.bf16.mxu0 %v6018_v27 }
0x26dd   :  { %4911 = vmatpush1.bf16.msra.mxu0 %v6016_v49 }
0x26de   :  { %4912 = vmatprep.subr.bf16.mxu0 %v6021_v57 }
0x26e1   :  { %4913 = vmatpush1.bf16.msra.mxu0 %v6019_v31 }
0x26e2   :  { %4914 = vmatprep.subr.bf16.mxu0 %v6024_v22 }
0x26e5   :  { %4915 = vmatpush1.bf16.msra.mxu0 %v6022_v45 }
0x26e6   :  { %4916 = vmatprep.subr.bf16.mxu0 %v6027_v34 }
0x26e9   :  { %4917 = vmatpush1.bf16.msra.mxu0 %v6025_v37 }
0x26ea   :  { %4918 = vmatprep.subr.bf16.mxu0 %v6030_v53 }
0x26ed   :  { %4919 = vmatpush1.bf16.msra.mxu0 %v6028_v50 }
0x26ee   :  { %4920 = vmatprep.subr.bf16.mxu0 %v6033_v42 }
0x26f1   :  { %4921 = vmatpush1.bf16.msra.mxu0 %v6031_v47 }
0x26f2   :  { %4922 = vmatprep.subr.bf16.mxu0 %v6036_v10 }
0x26f5   :  { %4923 = vmatpush1.bf16.msra.mxu0 %v6034_v14 }
0x26f6   :  { %4924 = vmatprep.subr.bf16.mxu0 %v6039_v58 }
0x26f9   :  { %4925 = vmatpush1.bf16.msra.mxu0 %v6037_v11 }
0x26fa   :  { %4926 = vmatprep.subr.bf16.mxu0 %v6042_v12 }
0x26fd   :  { %4927 = vmatpush1.bf16.msra.mxu0 %v6040_v46 }
0x26fe   :  { %4928 = vmatprep.subr.bf16.mxu0 %v6045_v54 }
0x2701   :  { %4929 = vmatpush1.bf16.msra.mxu0 %v6043_v33 }
0x2702   :  { %4930 = vmatprep.subr.bf16.mxu0 %v6048_v63 }
0x2705   :  { %4931 = vmatpush1.bf16.msra.mxu0 %v6046_v0 }
0x2706   :  { %4932 = vmatprep.subr.bf16.mxu0 %v6051_v40 }
0x2709   :  { %4933 = vmatpush1.bf16.msra.mxu0 %v6049_v56 }
0x270a   :  { %4934 = vmatprep.subr.bf16.mxu0 %v6054_v6 }
0x270d   :  { %4935 = vmatpush1.bf16.msra.mxu0 %v6052_v5 }
0x270e   :  { %4936 = vmatprep.subr.bf16.mxu0 %v6057_v61 }
0x2711   :  { %4937 = vmatpush1.bf16.msra.mxu0 %v6055_v17 }
0x2712   :  { %4938 = vmatprep.subr.bf16.mxu0 %v6060_v41 }
0x2715   :  { %4939 = vmatpush1.bf16.msra.mxu0 %v6058_v43 }
0x2718   :  { %4941 = vmatmul.mubr.bf16.vlgmr.msra.gmra.mrb[100].mxu0 %v4479_v36 }
0x27eb   :  { %v4942_v55 = vpop.f32.mrb[100].mxu0 }
0x27ec   :  { %v4951_v62 = vadd.f32 %v4942_v55, %v7172_v28  ;;  %v4944_v3 = vpop.f32.mrb[101].mxu0 }
0x27ed   :  { %v4952_v4 = vadd.f32 %v4944_v3, %v7177_v21  ;;  %v4946_v30 = vpop.f32.mrb[102].mxu0 }
0x27ee   :  { %4955 = vst [vmem:[%s7840_s16] sm:$0xff] %v4951_v62  ;;  %v4953_v44 = vadd.f32 %v4946_v30, %v7317_v9  ;;  %v4948_v13 = vpop.f32.mrb[103].mxu0 }
0x27ef   :  { %4956 = vst [vmem:[%s7840_s16 + $0x8] sm:$0xff] %v4952_v4  ;;  %v4954_v15 = vadd.f32 %v4948_v13, %v7322_v52 }
0x27f0   :  { %4957 = vst [vmem:[%s7840_s16 + $0x10] sm:$0xff] %v4953_v44 }
0x27f1   :  { %4958 = vst [vmem:[%s7840_s16 + $0x18] sm:$0xff] %v4954_v15 }

// kernel: transformer_forward.3
= control target key start
LH: loop header
LB: loop body
LE: loop exit
PB: predicated region body
PF: predicated region fallthrough
CT: control target
= control target key end

     0   :  { %s7720_s0 = inlined_call_operand.vmem [shape: f32[16,256], index: 0, kind: input, shape index: {}]   ;;  %s7721_s1 = inlined_call_operand.vmem [shape: f32[16,256], index: 1, kind: input, shape index: {}]   ;;  %s7722_s2 = inlined_call_operand.vmem [shape: f32[16,256], index: 2, kind: input, shape index: {}]   ;;  %s7723_s3 = inlined_call_operand.hbm [shape: f32[1,256], index: 3, kind: input, shape index: {}]   ;;  %s7724_s4 = inlined_call_operand.hbm [shape: bf16[256,256], index: 4, kind: input, shape index: {}]   ;;  %s7725_s5 = inlined_call_operand.vmem [shape: f32[1,256], index: 5, kind: input, shape index: {}]   ;;  %s7726_s6 = inlined_call_operand.hbm [shape: bf16[256,256], index: 6, kind: input, shape index: {}]   ;;  %s7727_s7 = inlined_call_operand.hbm [shape: f32[1,256], index: 7, kind: input, shape index: {}]   ;;  %s7728_s8 = inlined_call_operand.hbm [shape: bf16[256,128], index: 8, kind: input, shape index: {}]   ;;  %s7729_s9 = inlined_call_operand.vmem [shape: f32[1,128], index: 9, kind: input, shape index: {}]   ;;  %s7730_s10 = inlined_call_operand.hbm [shape: bf16[256,256], index: 10, kind: input, shape index: {}]   ;;  %s7731_s11 = inlined_call_operand.vmem [shape: f32[1,256], index: 11, kind: input, shape index: {}]   ;;  %s7732_s12 = inlined_call_operand.hbm [shape: f32[1,256], index: 12, kind: input, shape index: {}]   ;;  %s7733_s13 = inlined_call_operand.vmem [shape: bf16[256,512], index: 13, kind: input, shape index: {}]   ;;  %s7734_s14 = inlined_call_operand.vmem [shape: bf16[256,512], index: 14, kind: input, shape index: {}]   ;;  %s7735_s15 = inlined_call_operand.hbm [shape: bf16[512,256], index: 15, kind: input, shape index: {}]   ;;  %s7736_s16 = inlined_call_operand.vmem [shape: f32[16,256], index: 16, kind: output, shape index: {}]  }
   0x1   :  { %7739 = sst [smem:[#allocation20_spill]] %s7720_s0 }
   0x2   :  { %7740 = sst [smem:[#allocation21_spill]] %s7736_s16 }
   0x3   :  { %21 = vsyncpa [#allocation3], 0 }
   0x4   :  { %22 = vsyncpa [#allocation5], 0 }
   0x5   :  { %23 = vsyncpa [#allocation8], 0 }
   0x6   :  { %24 = vsyncpa [#allocation11], 0 }
   0x7   :  { %25 = vsyncpa [#allocation14], 0  ;;  %s6474_s21 = smov [#allocation4]   ;;  %s6288_s25 = scalar_lea.hbm %s7724_s4, 4096 }
   0x8   :  { %s47_s22 = sshll.u32 %s6474_s21, 4  ;;  %p6289_p0 = scmp.ne.s32.totalorder %s7724_s4, %s6288_s25  ;;  %s48_s22 = int_to_ptr.vmem [resolvable:$true] %s47_s22 }
   0x9   :  { %p6292_p1 = scmp.lt.u32.totalorder %s6288_s25, %s7724_s4 }
   0xb   :  { %p6294_p2 = pnand %p6292_p1, %p6289_p0 }
   0xd   :  { %6297 = shalt.err (!%p6294_p2)
}
   0xe   :  { %s6298_s30 = scalar_lea.vmem %s48_s22, 4096  ;;  %p6303_p4 = scmp.lt.s32.totalorder %s48_s22, %s48_s22 }
   0xf   :  { %p6299_p3 = scmp.ne.s32.totalorder %s48_s22, %s6298_s30  ;;  %p6304_p5 = scmp.lt.s32.totalorder %s6298_s30, %s6298_s30 }
  0x11   :  { %p6305_p6 = por %p6304_p5, %p6303_p4 }
  0x13   :  { %p6306_p7 = pnand %p6305_p6, %p6299_p3 }
  0x15   :  { %6309 = shalt.err (!%p6306_p7)
}
  0x16   :  { %s6475_s0 = smov 128   ;;  %s6476_s17 = smov 8  }
  0x17   :  { %53 = dma.hbm_to_vmem [thread:$0]  %s7724_s4, 4096, %s48_s22, [#allocation5], %s6475_s0, %s6475_s0, %s6476_s17  }
  0x18   :  { %s6477_s20 = smov [#allocation7]   ;;  %s6478_s23 = smov [#allocation10]  }
  0x19   :  { %s74_s21 = sshll.u32 %s6477_s20, 4  ;;  %s97_s24 = sshll.u32 %s6478_s23, 4  ;;  %s75_s21 = int_to_ptr.vmem [resolvable:$true] %s74_s21  ;;  %s98_s24 = int_to_ptr.vmem [resolvable:$true] %s97_s24 }
  0x1a   :  { %s6310_s27 = scalar_lea.hbm %s7727_s7, 32 }
  0x1b   :  { %p6311_p8 = scmp.ne.s32.totalorder %s7727_s7, %s6310_s27  ;;  %p6314_p9 = scmp.lt.u32.totalorder %s6310_s27, %s7727_s7 }
  0x1d   :  { %p6316_p10 = pnand %p6314_p9, %p6311_p8 }
  0x1f   :  { %6319 = shalt.err (!%p6316_p10)
}
  0x20   :  { %s6320_s4 = scalar_lea.vmem %s75_s21, 32  ;;  %p6325_p12 = scmp.lt.s32.totalorder %s75_s21, %s75_s21 }
  0x21   :  { %p6321_p11 = scmp.ne.s32.totalorder %s75_s21, %s6320_s4  ;;  %p6326_p13 = scmp.lt.s32.totalorder %s6320_s4, %s6320_s4 }
  0x23   :  { %p6327_p0 = por %p6326_p13, %p6325_p12 }
  0x25   :  { %p6328_p1 = pnand %p6327_p0, %p6321_p11 }
  0x27   :  { %6331 = shalt.err (!%p6328_p1)
}
  0x28   :  { %77 = dma.hbm_to_vmem [thread:$0]  %s7727_s7, 32, %s75_s21, [#allocation8]  }
  0x29   :  { %s6332_s23 = scalar_lea.hbm %s7730_s10, 4096 }
  0x2a   :  { %p6333_p2 = scmp.ne.s32.totalorder %s7730_s10, %s6332_s23  ;;  %p6336_p3 = scmp.lt.u32.totalorder %s6332_s23, %s7730_s10 }
  0x2c   :  { %p6338_p4 = pnand %p6336_p3, %p6333_p2 }
  0x2e   :  { %6341 = shalt.err (!%p6338_p4)
}
  0x2f   :  { %s6342_s28 = scalar_lea.vmem %s98_s24, 4096  ;;  %p6347_p6 = scmp.lt.s32.totalorder %s98_s24, %s98_s24 }
  0x30   :  { %p6343_p5 = scmp.ne.s32.totalorder %s98_s24, %s6342_s28  ;;  %p6348_p7 = scmp.lt.s32.totalorder %s6342_s28, %s6342_s28 }
  0x32   :  { %p6349_p8 = por %p6348_p7, %p6347_p6 }
  0x34   :  { %p6350_p9 = pnand %p6349_p8, %p6343_p5 }
  0x36   :  { %6353 = shalt.err (!%p6350_p9)
}
  0x37   :  { %103 = dma.hbm_to_vmem [thread:$0]  %s7730_s10, 4096, %s98_s24, [#allocation11], %s6475_s0, %s6475_s0, %s6476_s17  }
  0x38   :  { %s6479_s29 = smov [#allocation2]   ;;  %s6480_s4 = smov [#allocation6]  }
  0x39   :  { %s38_s30 = sshll.u32 %s6479_s29, 4  ;;  %s61_s22 = sshll.u32 %s6480_s4, 4  ;;  %s39_s30 = int_to_ptr.vmem [resolvable:$true] %s38_s30  ;;  %s62_s22 = int_to_ptr.vmem [resolvable:$true] %s61_s22 }
  0x3a   :  { %s6354_s20 = scalar_lea.hbm %s7723_s3, 32 }
  0x3b   :  { %p6355_p10 = scmp.ne.s32.totalorder %s7723_s3, %s6354_s20  ;;  %p6358_p11 = scmp.lt.u32.totalorder %s6354_s20, %s7723_s3 }
  0x3d   :  { %p6360_p12 = pnand %p6358_p11, %p6355_p10 }
  0x3f   :  { %6363 = shalt.err (!%p6360_p12)
}
  0x40   :  { %s6364_s10 = scalar_lea.vmem %s39_s30, 32  ;;  %p6369_p0 = scmp.lt.s32.totalorder %s39_s30, %s39_s30 }
  0x41   :  { %p6365_p13 = scmp.ne.s32.totalorder %s39_s30, %s6364_s10  ;;  %p6370_p1 = scmp.lt.s32.totalorder %s6364_s10, %s6364_s10 }
  0x43   :  { %p6371_p2 = por %p6370_p1, %p6369_p0 }
  0x45   :  { %p6372_p3 = pnand %p6371_p2, %p6365_p13 }
  0x47   :  { %6375 = shalt.err (!%p6372_p3)
}
  0x48   :  { %41 = dma.hbm_to_vmem [thread:$0]  %s7723_s3, 32, %s39_s30, [#allocation3]  }
  0x49   :  { %s6376_s21 = scalar_lea.hbm %s7726_s6, 4096 }
  0x4a   :  { %p6377_p4 = scmp.ne.s32.totalorder %s7726_s6, %s6376_s21  ;;  %p6380_p5 = scmp.lt.u32.totalorder %s6376_s21, %s7726_s6 }
  0x4c   :  { %p6382_p6 = pnand %p6380_p5, %p6377_p4 }
  0x4e   :  { %6385 = shalt.err (!%p6382_p6)
}
  0x4f   :  { %s6386_s20 = scalar_lea.vmem %s62_s22, 4096  ;;  %p6391_p8 = scmp.lt.s32.totalorder %s62_s22, %s62_s22 }
  0x50   :  { %p6387_p7 = scmp.ne.s32.totalorder %s62_s22, %s6386_s20  ;;  %p6392_p9 = scmp.lt.s32.totalorder %s6386_s20, %s6386_s20 }
  0x52   :  { %p6393_p10 = por %p6392_p9, %p6391_p8 }
  0x54   :  { %p6394_p11 = pnand %p6393_p10, %p6387_p7 }
  0x56   :  { %6397 = shalt.err (!%p6394_p11)
}
  0x57   :  { %67 = dma.hbm_to_vmem [thread:$0]  %s7726_s6, 4096, %s62_s22, [#allocation5], %s6475_s0, %s6475_s0, %s6476_s17  }
  0x58   :  { %s6481_s23 = smov [#allocation9]   ;;  %s6398_s10 = scalar_lea.hbm %s7728_s8, 2048 }
  0x59   :  { %s83_s16 = sshll.u32 %s6481_s23, 4  ;;  %p6399_p12 = scmp.ne.s32.totalorder %s7728_s8, %s6398_s10  ;;  %s84_s16 = int_to_ptr.vmem [resolvable:$true] %s83_s16 }
  0x5a   :  { %p6402_p13 = scmp.lt.u32.totalorder %s6398_s10, %s7728_s8 }
  0x5c   :  { %p6404_p0 = pnand %p6402_p13, %p6399_p12 }
  0x5e   :  { %6407 = shalt.err (!%p6404_p0)
}
  0x5f   :  { %s6408_s21 = scalar_lea.vmem %s84_s16, 2048  ;;  %p6413_p2 = scmp.lt.s32.totalorder %s84_s16, %s84_s16 }
  0x60   :  { %p6409_p1 = scmp.ne.s32.totalorder %s84_s16, %s6408_s21  ;;  %p6414_p3 = scmp.lt.s32.totalorder %s6408_s21, %s6408_s21 }
  0x62   :  { %p6415_p4 = por %p6414_p3, %p6413_p2 }
  0x64   :  { %p6416_p5 = pnand %p6415_p4, %p6409_p1 }
  0x66   :  { %6419 = shalt.err (!%p6416_p5)
}
  0x67   :  { %s6482_s6 = smov 64   ;;  %s6483_s22 = smov 4  }
  0x68   :  { %89 = dma.hbm_to_vmem [thread:$0]  %s7728_s8, 2048, %s84_s16, [#allocation8], %s6482_s6, %s6482_s6, %s6483_s22  }
  0x69   :  { %s6484_s18 = smov [#allocation12]   ;;  %s6485_s20 = smov [#allocation13]  }
  0x6a   :  { %s112_s19 = sshll.u32 %s6484_s18, 4  ;;  %s125_s3 = sshll.u32 %s6485_s20, 4  ;;  %s113_s19 = int_to_ptr.vmem [resolvable:$true] %s112_s19  ;;  %s6660_s3 = int_to_ptr.vmem [resolvable:$true] %s125_s3 }
  0x6b   :  { %s6420_s25 = scalar_lea.hbm %s7732_s12, 32 }
  0x6c   :  { %p6421_p6 = scmp.ne.s32.totalorder %s7732_s12, %s6420_s25  ;;  %p6424_p7 = scmp.lt.u32.totalorder %s6420_s25, %s7732_s12 }
  0x6e   :  { %p6426_p8 = pnand %p6424_p7, %p6421_p6 }
  0x70   :  { %6429 = shalt.err (!%p6426_p8)
}
  0x71   :  { %s6430_s8 = scalar_lea.vmem %s113_s19, 32  ;;  %p6435_p10 = scmp.lt.s32.totalorder %s113_s19, %s113_s19 }
  0x72   :  { %p6431_p9 = scmp.ne.s32.totalorder %s113_s19, %s6430_s8  ;;  %p6436_p11 = scmp.lt.s32.totalorder %s6430_s8, %s6430_s8 }
  0x74   :  { %p6437_p12 = por %p6436_p11, %p6435_p10 }
  0x76   :  { %p6438_p13 = pnand %p6437_p12, %p6431_p9 }
  0x78   :  { %6441 = shalt.err (!%p6438_p13)
}
  0x79   :  { %115 = dma.hbm_to_vmem [thread:$0]  %s7732_s12, 32, %s113_s19, [#allocation11]  }
  0x7a   :  { %s6442_s22 = scalar_lea.hbm %s7735_s15, 8192 }
  0x7b   :  { %p6443_p0 = scmp.ne.s32.totalorder %s7735_s15, %s6442_s22  ;;  %p6446_p1 = scmp.lt.u32.totalorder %s6442_s22, %s7735_s15 }
  0x7d   :  { %p6448_p2 = pnand %p6446_p1, %p6443_p0 }
  0x7f   :  { %6451 = shalt.err (!%p6448_p2)
}
  0x80   :  { %s6452_s30 = scalar_lea.vmem %s6660_s3, 8192  ;;  %p6457_p4 = scmp.lt.s32.totalorder %s6660_s3, %s6660_s3 }
  0x81   :  { %p6453_p3 = scmp.ne.s32.totalorder %s6660_s3, %s6452_s30  ;;  %p6458_p5 = scmp.lt.s32.totalorder %s6452_s30, %s6452_s30 }
  0x83   :  { %p6459_p6 = por %p6458_p5, %p6457_p4 }
  0x85   :  { %p6460_p7 = pnand %p6459_p6, %p6453_p3 }
  0x87   :  { %6463 = shalt.err (!%p6460_p7)
}
  0x88   :  { %131 = dma.hbm_to_vmem [thread:$0]  %s7735_s15, 8192, %s6660_s3, [#allocation14], %s6475_s0, %s6475_s0, %s6476_s17  }
  0x89   :  { %6464 = dma.done.wait [#allocation3], 32  }
  0x8a   :  { %6465 = vsyncadd [#allocation3], 4294967264 }
  0x8b   :  { %6466 = dma.done.wait [#allocation5], 8192  }
  0x8c   :  { %6467 = vsyncadd [#allocation5], 4294959104 }
  0x8d   :  { %6468 = dma.done.wait [#allocation8], 2080  }
  0x8e   :  { %6469 = vsyncadd [#allocation8], 4294965216 }
  0x8f   :  { %6470 = dma.done.wait [#allocation11], 4128  }
  0x90   :  { %6471 = vsyncadd [#allocation11], 4294963168 }
  0x91   :  { %6472 = dma.done.wait [#allocation14], 8192  }
  0x92   :  { %6473 = vsyncadd [#allocation14], 4294959104  ;;  %s7741_s26 = sld [smem:[#allocation20_spill]]  ;;  %v5732_v8 = vld [vmem:[#allocation4 + $0x4] ss:$8 sps:$4 sm:$0xff]   ;;  %v5769_v28 = vld [vmem:[#allocation9 + $0x50] sm:$0xff]   ;;  %v196_v51 = vlaneseq }
  0x93   :  { %v5734_v9 = vld [vmem:[#allocation4] ss:$8 sps:$4 sm:$0xff]   ;;  %v5735_v11 = vld [vmem:[#allocation4 + $0x14] ss:$8 sps:$4 sm:$0xff]   ;;  %416 = vmatprep.subr.bf16.mxu1 %v5732_v8  ;;  %v5737_v13 = vld [vmem:[#allocation4 + $0x10] ss:$8 sps:$4 sm:$0xff]  }
  0x94   :  { %417 = vmatpush1.bf16.msra.mxu1 %v5734_v9  ;;  %v5738_v14 = vld [vmem:[#allocation4 + $0x24] ss:$8 sps:$4 sm:$0xff]   ;;  %v5740_v15 = vld [vmem:[#allocation4 + $0x20] ss:$8 sps:$4 sm:$0xff]   ;;  %v5741_v16 = vld [vmem:[#allocation4 + $0x34] ss:$8 sps:$4 sm:$0xff]  }
  0x95   :  { %418 = vmatprep.subr.bf16.mxu1 %v5735_v11  ;;  %v5743_v17 = vld [vmem:[#allocation4 + $0x30] ss:$8 sps:$4 sm:$0xff]   ;;  %v5744_v18 = vld [vmem:[#allocation4 + $0x44] ss:$8 sps:$4 sm:$0xff]   ;;  %v5746_v20 = vld [vmem:[#allocation4 + $0x40] ss:$8 sps:$4 sm:$0xff]  }
  0x96   :  { %v5759_v19 = vld [vmem:[#allocation9 + $0x40] sm:$0xff]   ;;  %v5747_v22 = vld [vmem:[#allocation4 + $0x54] ss:$8 sps:$4 sm:$0xff]   ;;  %v5749_v23 = vld [vmem:[#allocation4 + $0x50] ss:$8 sps:$4 sm:$0xff]   ;;  %v6722_v53 = vshrl.u32 %v196_v51, 7 }
  0x97   :  { %v5760_v21 = vld [vmem:[#allocation9] sm:$0xff]   ;;  %5432 = vmatprep.subr.bf16.mxu0 %v5759_v19  ;;  %v5764_v24 = vld [vmem:[#allocation9 + $0x48] sm:$0xff]   ;;  %v5770_v29 = vld [vmem:[#allocation9 + $0x10] sm:$0xff]   ;;  %v6724_v54 = vand.u32 127, %v196_v51  ;;  %vm6487_vm5 = vmmov 0   ;;  %vm913_vm6 = vcmask 261120  }
  0x98   :  { %v6697_v0 = vld [vmem:[%s7741_s26] sm:$0xff]  ;;  %v6702_v1 = vld [vmem:[%s7741_s26 + $0x8] sm:$0xff]  ;;  %v6707_v2 = vld [vmem:[%s7741_s26 + $0x10] sm:$0xff]  ;;  %419 = vmatpush1.bf16.msra.mxu1 %v5737_v13  ;;  %5433 = vmatpush3.bf16.msra.mxu0 %v5760_v21  ;;  %v6729_v11 = vsub.s32 1, %v6722_v53  ;;  %vm962_vm7 = vcmask 64512  }
  0x99   :  { %v162_v3 = vmul.f32 %v6697_v0, %v6697_v0  ;;  %v163_v4 = vmul.f32 %v6702_v1, %v6702_v1  ;;  %v6716_v5 = vld [vmem:[%s7741_s26 + $0x18] sm:$0xff]  ;;  %v164_v6 = vmul.f32 %v6707_v2, %v6707_v2  ;;  %420 = vmatprep.subr.bf16.mxu1 %v5738_v14  ;;  %v5765_v25 = vld [vmem:[#allocation9 + $0x8] sm:$0xff]   ;;  %5434 = vmatprep.subr.bf16.mxu0 %v5764_v24  ;;  %v5779_v33 = vld [vmem:[#allocation9 + $0x60] sm:$0xff]  }
  0x9a   :  { %v165_v7 = vmul.f32 %v6716_v5, %v6716_v5  ;;  %v5750_v26 = vld [vmem:[#allocation4 + $0x64] ss:$8 sps:$4 sm:$0xff]   ;;  %v5752_v27 = vld [vmem:[#allocation4 + $0x60] ss:$8 sps:$4 sm:$0xff]   ;;  %v5753_v30 = vld [vmem:[#allocation4 + $0x74] ss:$8 sps:$4 sm:$0xff]   ;;  %vm906_vm0 = vcmp.le.s32.totalorder %v6724_v54, %v6722_v53 }
  0x9b   :  { %v166_v10 = vadd.f32 %v163_v4, %v162_v3  ;;  %v5774_v31 = vld [vmem:[#allocation9 + $0x58] sm:$0xff]   ;;  %v5756_v35 = vld [vmem:[#allocation4 + $0x84] ss:$8 sps:$4 sm:$0xff]   ;;  %v5789_v41 = vld [vmem:[#allocation9 + $0x70] sm:$0xff]   ;;  %v6489_v54 = vmov 0  }
  0x9c   :  { %v169_v12 = vadd.f32 %v165_v7, %v164_v6  ;;  %421 = vmatpush1.bf16.msra.mxu1 %v5740_v15  ;;  %5435 = vmatpush3.bf16.msra.mxu0 %v5765_v25  ;;  %v5775_v32 = vld [vmem:[#allocation9 + $0x18] sm:$0xff]   ;;  %v5780_v36 = vld [vmem:[#allocation9 + $0x20] sm:$0xff]   ;;  %v5784_v37 = vld [vmem:[#allocation9 + $0x68] sm:$0xff]  }
  0x9d   :  { %167 = vadd.xlane.f32.xlu0 %v166_v10  ;;  %422 = vmatprep.subr.bf16.mxu1 %v5741_v16  ;;  %v5755_v34 = vld [vmem:[#allocation4 + $0x70] ss:$8 sps:$4 sm:$0xff]   ;;  %v5758_v38 = vld [vmem:[#allocation4 + $0x80] ss:$8 sps:$4 sm:$0xff]   ;;  %v5761_v39 = vld [vmem:[#allocation4 + $0x94] ss:$8 sps:$4 sm:$0xff]  }
  0x9e   :  { %5436 = vmatprep.subr.bf16.mxu0 %v5769_v28  ;;  %v5785_v40 = vld [vmem:[#allocation9 + $0x28] sm:$0xff]   ;;  %v5790_v44 = vld [vmem:[#allocation9 + $0x30] sm:$0xff]   ;;  %v5794_v45 = vld [vmem:[#allocation9 + $0x78] sm:$0xff]  }
  0x9f   :  { %v5763_v42 = vld [vmem:[#allocation4 + $0x90] ss:$8 sps:$4 sm:$0xff]   ;;  %v5766_v43 = vld [vmem:[#allocation4 + $0xa4] ss:$8 sps:$4 sm:$0xff]   ;;  %v5768_v46 = vld [vmem:[#allocation4 + $0xa0] ss:$8 sps:$4 sm:$0xff]  }
  0xa0   :  { %423 = vmatpush1.bf16.msra.mxu1 %v5743_v17  ;;  %5437 = vmatpush3.bf16.msra.mxu0 %v5770_v29  ;;  %v5771_v47 = vld [vmem:[#allocation4 + $0xb4] ss:$8 sps:$4 sm:$0xff]   ;;  %v5773_v49 = vld [vmem:[#allocation4 + $0xb0] ss:$8 sps:$4 sm:$0xff]   ;;  %v5776_v50 = vld [vmem:[#allocation4 + $0xc4] ss:$8 sps:$4 sm:$0xff]  }
  0xa1   :  { %170 = vadd.xlane.f32.xlu0 %v169_v12  ;;  %424 = vmatprep.subr.bf16.mxu1 %v5744_v18  ;;  %v5795_v48 = vld [vmem:[#allocation9 + $0x38] sm:$0xff]   ;;  %v5786_v57 = vld [vmem:[#allocation4 + $0xe4] ss:$8 sps:$4 sm:$0xff]   ;;  %v6732_v12 = vsub.s32 0, %v6722_v53 }
  0xa2   :  { %5438 = vmatprep.subr.bf16.mxu0 %v5774_v31  ;;  %v5778_v52 = vld [vmem:[#allocation4 + $0xc0] ss:$8 sps:$4 sm:$0xff]   ;;  %v5781_v55 = vld [vmem:[#allocation4 + $0xd4] ss:$8 sps:$4 sm:$0xff]   ;;  %v5783_v56 = vld [vmem:[#allocation4 + $0xd0] ss:$8 sps:$4 sm:$0xff]  }
  0xa3   :  { %v5788_v58 = vld [vmem:[#allocation4 + $0xe0] ss:$8 sps:$4 sm:$0xff]   ;;  %v5791_v59 = vld [vmem:[#allocation4 + $0xf4] ss:$8 sps:$4 sm:$0xff]   ;;  %v5793_v60 = vld [vmem:[#allocation4 + $0xf0] ss:$8 sps:$4 sm:$0xff]  }
  0xa4   :  { %425 = vmatpush1.bf16.msra.mxu1 %v5746_v20  ;;  %5439 = vmatpush3.bf16.msra.mxu0 %v5775_v32  ;;  %v5798_v61 = vld [vmem:[#allocation6 + $0x4] ss:$8 sps:$4 sm:$0xff]   ;;  %v161_v13 = vld [vmem:[#allocation2] sm:$0x3]  ;;  %v5796_v32 = vld [vmem:[#allocation6] ss:$8 sps:$4 sm:$0xff]  }
  0xa5   :  { %426 = vmatprep.subr.bf16.mxu1 %v5747_v22  ;;  %5440 = vmatprep.subr.bf16.mxu0 %v5779_v33  ;;  %v203_v19 = vrot.slane %v161_v13, %v6729_v11  ;;  %v199_v20 = vrot.slane %v161_v13, %v6732_v12  ;;  %v5829_v51 = vld [vmem:[#allocation6 + $0xb0] ss:$8 sps:$4 sm:$0xff]  }
  0xa8   :  { %427 = vmatpush1.bf16.msra.mxu1 %v5749_v23  ;;  %5441 = vmatpush3.bf16.msra.mxu0 %v5780_v36  ;;  %v5810_v36 = vld [vmem:[#allocation6 + $0x44] ss:$8 sps:$4 sm:$0xff]  }
  0xa9   :  { %428 = vmatprep.subr.bf16.mxu1 %v5750_v26  ;;  %5442 = vmatprep.subr.bf16.mxu0 %v5784_v37  ;;  %v5808_v37 = vld [vmem:[#allocation6 + $0x40] ss:$8 sps:$4 sm:$0xff]  }
  0xac   :  { %429 = vmatpush1.bf16.msra.mxu1 %v5752_v27  ;;  %5443 = vmatpush3.bf16.msra.mxu0 %v5785_v40  ;;  %v5816_v40 = vld [vmem:[#allocation6 + $0x64] ss:$8 sps:$4 sm:$0xff]  }
  0xad   :  { %430 = vmatprep.subr.bf16.mxu1 %v5753_v30  ;;  %5444 = vmatprep.subr.bf16.mxu0 %v5789_v41  ;;  %v5814_v41 = vld [vmem:[#allocation6 + $0x60] ss:$8 sps:$4 sm:$0xff]  }
  0xb0   :  { %431 = vmatpush1.bf16.msra.mxu1 %v5755_v34  ;;  %5445 = vmatpush3.bf16.msra.mxu0 %v5790_v44  ;;  %v5801_v34 = vld [vmem:[#allocation6 + $0x14] ss:$8 sps:$4 sm:$0xff]   ;;  %v5822_v44 = vld [vmem:[#allocation6 + $0x84] ss:$8 sps:$4 sm:$0xff]  }
  0xb1   :  { %432 = vmatprep.subr.bf16.mxu1 %v5756_v35  ;;  %5446 = vmatprep.subr.bf16.mxu0 %v5794_v45  ;;  %v5805_v35 = vld [vmem:[#allocation6 + $0x30] ss:$8 sps:$4 sm:$0xff]   ;;  %v5820_v45 = vld [vmem:[#allocation6 + $0x80] ss:$8 sps:$4 sm:$0xff]  }
  0xb4   :  { %433 = vmatpush1.bf16.msra.mxu1 %v5758_v38  ;;  %5447 = vmatpush3.bf16.msra.mxu0 %v5795_v48  ;;  %v5813_v38 = vld [vmem:[#allocation6 + $0x54] ss:$8 sps:$4 sm:$0xff]   ;;  %v5828_v48 = vld [vmem:[#allocation6 + $0xa4] ss:$8 sps:$4 sm:$0xff]  }
  0xb5   :  { %434 = vmatprep.subr.bf16.mxu1 %v5761_v39  ;;  %v5811_v39 = vld [vmem:[#allocation6 + $0x50] ss:$8 sps:$4 sm:$0xff]  }
  0xb8   :  { %435 = vmatpush1.bf16.msra.mxu1 %v5763_v42  ;;  %v5819_v42 = vld [vmem:[#allocation6 + $0x74] ss:$8 sps:$4 sm:$0xff]  }
  0xb9   :  { %436 = vmatprep.subr.bf16.mxu1 %v5766_v43  ;;  %v5817_v43 = vld [vmem:[#allocation6 + $0x70] ss:$8 sps:$4 sm:$0xff]  }
  0xbc   :  { %437 = vmatpush1.bf16.msra.mxu1 %v5768_v46  ;;  %v5825_v46 = vld [vmem:[#allocation6 + $0x94] ss:$8 sps:$4 sm:$0xff]  }
  0xbd   :  { %438 = vmatprep.subr.bf16.mxu1 %v5771_v47  ;;  %v5823_v47 = vld [vmem:[#allocation6 + $0x90] ss:$8 sps:$4 sm:$0xff]  }
  0xc0   :  { %439 = vmatpush1.bf16.msra.mxu1 %v5773_v49  ;;  %v5826_v49 = vld [vmem:[#allocation6 + $0xa0] ss:$8 sps:$4 sm:$0xff]  }
  0xc1   :  { %440 = vmatprep.subr.bf16.mxu1 %v5776_v50  ;;  %v5831_v50 = vld [vmem:[#allocation6 + $0xb4] ss:$8 sps:$4 sm:$0xff]  }
  0xc4   :  { %441 = vmatpush1.bf16.msra.mxu1 %v5778_v52  ;;  %v5834_v52 = vld [vmem:[#allocation6 + $0xc4] ss:$8 sps:$4 sm:$0xff]  }
  0xc5   :  { %442 = vmatprep.subr.bf16.mxu1 %v5781_v55  ;;  %v5832_v55 = vld [vmem:[#allocation6 + $0xc0] ss:$8 sps:$4 sm:$0xff]  }
  0xc8   :  { %443 = vmatpush1.bf16.msra.mxu1 %v5783_v56  ;;  %v5837_v56 = vld [vmem:[#allocation6 + $0xd4] ss:$8 sps:$4 sm:$0xff]  }
  0xc9   :  { %444 = vmatprep.subr.bf16.mxu1 %v5786_v57  ;;  %v5835_v57 = vld [vmem:[#allocation6 + $0xd0] ss:$8 sps:$4 sm:$0xff]  }
  0xcc   :  { %445 = vmatpush1.bf16.msra.mxu1 %v5788_v58  ;;  %v5840_v58 = vld [vmem:[#allocation6 + $0xe4] ss:$8 sps:$4 sm:$0xff]  }
  0xcd   :  { %446 = vmatprep.subr.bf16.mxu1 %v5791_v59  ;;  %v5838_v59 = vld [vmem:[#allocation6 + $0xe0] ss:$8 sps:$4 sm:$0xff]  }
  0xd0   :  { %447 = vmatpush1.bf16.msra.mxu1 %v5793_v60  ;;  %v5843_v60 = vld [vmem:[#allocation6 + $0xf4] ss:$8 sps:$4 sm:$0xff]  }
  0xd1   :  { %663 = vmatprep.subr.bf16.mxu1 %v5798_v61  ;;  %v5841_v61 = vld [vmem:[#allocation6 + $0xf0] ss:$8 sps:$4 sm:$0xff]  }
 0x12a   :  { %v168_v62 = vpop.xlane.xlu0 %167 }
 0x12b   :  { %v173_v63 = vmul.f32 0.00390625, %v168_v62  ;;  %v6486_v62 = vmov 0.0  }
 0x12d   :  { %v175_v3 = vadd.f32 1e-05, %v173_v63  ;;  %v244_v63 = vld [vmem:[%s7725_s5] sm:$0x3] }
 0x12e   :  { %v171_v4 = vpop.xlane.xlu0 %170 }
 0x12f   :  { %6180 = vrsqrt.f32 %v175_v3  ;;  %v174_v6 = vmul.f32 0.00390625, %v171_v4  ;;  %vm179_vm1 = vcmp.eq.f32.partialorder %v175_v3, inf  ;;  %v182_v10 = vand.u32 2147483648, %v175_v3 }
 0x130   :  { %vm181_vm2 = vcmp.eq.f32.partialorder %v175_v3, 0.0 }
 0x131   :  { %v176_v7 = vadd.f32 1e-05, %v174_v6  ;;  %v249_v6 = vrot.slane %v244_v63, %v6732_v12 }
 0x133   :  { %6182 = vrsqrt.f32 %v176_v7  ;;  %vm186_vm3 = vcmp.eq.f32.partialorder %v176_v7, inf  ;;  %v189_v18 = vand.u32 2147483648, %v176_v7  ;;  %vm188_vm4 = vcmp.eq.f32.partialorder %v176_v7, 0.0 }
 0x139   :  { %v6181_v8 = vpop.eup %6180 }
 0x13a   :  { %v178_v9 = vmul.f32 %v6181_v8, %v175_v3 }
 0x13c   :  { %v180_v14 = vsel %vm179_vm1, %v175_v3, %v178_v9  ;;  %v5135_v9 = vld [vmem:[%s7729_s9] ss:$0 sm:$0xff] }
 0x13d   :  { %v6183_v15 = vpop.eup %6182  ;;  %v183_v16 = vsel %vm181_vm2, %v182_v10, %v180_v14  ;;  %v253_v10 = vrot.slane %v244_v63, %v6729_v11 }
 0x13e   :  { %v185_v17 = vmul.f32 %v6183_v15, %v176_v7  ;;  %v192_v22 = vmul.f32 %v183_v16, %v6702_v1  ;;  %v191_v23 = vmul.f32 %v183_v16, %v6697_v0  ;;  %v5799_v0 = vld [vmem:[#allocation6 + $0x10] ss:$8 sps:$4 sm:$0xff]   ;;  %v5804_v1 = vld [vmem:[#allocation6 + $0x24] ss:$8 sps:$4 sm:$0xff]  }
 0x140   :  { %v187_v21 = vsel %vm186_vm3, %v176_v7, %v185_v17  ;;  %v207_v27 = vmul.f32 %v203_v19, %v192_v22  ;;  %v206_v29 = vmul.f32 %v199_v20, %v191_v23 }
 0x141   :  { %v190_v24 = vsel %vm188_vm4, %v189_v18, %v187_v21 }
 0x142   :  { %v194_v25 = vmul.f32 %v190_v24, %v6716_v5  ;;  %v193_v26 = vmul.f32 %v190_v24, %v6707_v2  ;;  %v5802_v2 = vld [vmem:[#allocation6 + $0x20] ss:$8 sps:$4 sm:$0xff]   ;;  %v5807_v5 = vld [vmem:[#allocation6 + $0x34] ss:$8 sps:$4 sm:$0xff]  }
 0x143   :  { %v491_v24 = vld [vmem:[#allocation7] sm:$0x3] }
 0x144   :  { %v209_v28 = vmul.f32 %v203_v19, %v194_v25  ;;  %v208_v30 = vmul.f32 %v199_v20, %v193_v26  ;;  %v496_v25 = vrot.slane %v491_v24, %v6732_v12  ;;  %v500_v26 = vrot.slane %v491_v24, %v6729_v11 }
 0x146   :  { %v211_v31 = vpack.c.bf16 %v209_v28, %v207_v27  ;;  %v6740_v33 = vpack.c.bf16 %v208_v30, %v206_v29  ;;  %v706_v28 = vld [vmem:[%s7721_s1] sm:$0xff] }
 0x148   :  { %448 = vmatprep.mubr.bf16.mxu1 %v211_v31  ;;  %893 = vmatprep.mubr.bf16.mxu0 %v211_v31 }
 0x149   :  { %449 = vmatmul.mubr.bf16.vlgmr.msra.gmra.mrb[0].mxu1 %v6740_v33  ;;  %894 = vmatmul.mubr.bf16.vlgmr.msra.gmra.mrb[0].mxu0 %v6740_v33 }
 0x14a   :  { %664 = vmatpush1.bf16.msra.mxu1 %v5796_v32  ;;  %695 = vmatprep.mubr.bf16.mxu1 %v211_v31  ;;  %v714_v31 = vld [vmem:[%s7722_s2] sm:$0xff]  ;;  %v707_v32 = vld [vmem:[%s7721_s1 + $0x8] sm:$0xff] }
 0x14b   :  { %665 = vmatprep.subr.bf16.mxu1 %v5801_v34  ;;  %1190 = vmatprep.mubr.bf16.mxu0 %v6489_v54 }
 0x14e   :  { %666 = vmatpush1.bf16.msra.mxu1 %v5799_v0  ;;  %v715_v0 = vld [vmem:[%s7722_s2 + $0x8] sm:$0xff] }
 0x14f   :  { %667 = vmatprep.subr.bf16.mxu1 %v5804_v1  ;;  %v708_v1 = vld [vmem:[%s7721_s1 + $0x10] sm:$0xff] }
 0x152   :  { %668 = vmatpush1.bf16.msra.mxu1 %v5802_v2 }
 0x153   :  { %669 = vmatprep.subr.bf16.mxu1 %v5807_v5 }
 0x156   :  { %670 = vmatpush1.bf16.msra.mxu1 %v5805_v35  ;;  %v716_v35 = vld [vmem:[%s7722_s2 + $0x10] sm:$0xff] }
 0x157   :  { %671 = vmatprep.subr.bf16.mxu1 %v5810_v36 }
 0x15a   :  { %672 = vmatpush1.bf16.msra.mxu1 %v5808_v37  ;;  %v709_v37 = vld [vmem:[%s7721_s1 + $0x18] sm:$0xff]  ;;  %s6490_s1 = smov 96  }
 0x15b   :  { %673 = vmatprep.subr.bf16.mxu1 %v5813_v38 }
 0x15e   :  { %674 = vmatpush1.bf16.msra.mxu1 %v5811_v39 }
 0x15f   :  { %675 = vmatprep.subr.bf16.mxu1 %v5816_v40 }
 0x162   :  { %676 = vmatpush1.bf16.msra.mxu1 %v5814_v41  ;;  %v717_v41 = vld [vmem:[%s7722_s2 + $0x18] sm:$0xff]  ;;  %s6491_s2 = smov 32  }
 0x163   :  { %677 = vmatprep.subr.bf16.mxu1 %v5819_v42 }
 0x166   :  { %678 = vmatpush1.bf16.msra.mxu1 %v5817_v43 }
 0x167   :  { %679 = vmatprep.subr.bf16.mxu1 %v5822_v44 }
 0x16a   :  { %680 = vmatpush1.bf16.msra.mxu1 %v5820_v45 }
 0x16b   :  { %681 = vmatprep.subr.bf16.mxu1 %v5825_v46 }
 0x16e   :  { %682 = vmatpush1.bf16.msra.mxu1 %v5823_v47 }
 0x16f   :  { %683 = vmatprep.subr.bf16.mxu1 %v5828_v48 }
 0x172   :  { %684 = vmatpush1.bf16.msra.mxu1 %v5826_v49 }
 0x173   :  { %685 = vmatprep.subr.bf16.mxu1 %v5831_v50 }
 0x176   :  { %686 = vmatpush1.bf16.msra.mxu1 %v5829_v51 }
 0x177   :  { %687 = vmatprep.subr.bf16.mxu1 %v5834_v52 }
 0x17a   :  { %688 = vmatpush1.bf16.msra.mxu1 %v5832_v55 }
 0x17b   :  { %689 = vmatprep.subr.bf16.mxu1 %v5837_v56 }
 0x17e   :  { %690 = vmatpush1.bf16.msra.mxu1 %v5835_v57 }
 0x17f   :  { %691 = vmatprep.subr.bf16.mxu1 %v5840_v58  ;;  %v6488_v58 = vmov -inf  }
 0x182   :  { %692 = vmatpush1.bf16.msra.mxu1 %v5838_v59  ;;  %v6808_v59 = vsel %vm906_vm0, 0.0, %v6488_v58 }
 0x183   :  { %693 = vmatprep.subr.bf16.mxu1 %v5843_v60 }
 0x186   :  { %694 = vmatpush1.bf16.msra.mxu1 %v5841_v61 }
 0x187   :  { %5518 = vmatprep.subr.bf16.mxu1 %v6486_v62 }
 0x189   :  { %696 = vmatmul.mubr.bf16.vlgmr.msra.gmra.mrb[4].mxu1 %v6740_v33 }
 0x18a   :  { %5520 = vmatprep.mubr.msk.bf16.mxu1 %vm6487_vm5, %v6486_v62 }
 0x21c   :  { %v450_v3 = vpop.f32.mrb[0].mxu1  ;;  %v5448_v4 = vpop.f32.mrb[0].mxu0 }
 0x21d   :  { %v452_v7 = vpop.f32.mrb[1].mxu1  ;;  %v5449_v8 = vpop.f32.mrb[1].mxu0  ;;  %v451_v27 = vadd.f32 %v450_v3, %v249_v6 }
 0x21e   :  { %v5450_v13 = vadd.f32 %v5449_v8, %v5448_v4  ;;  %v454_v14 = vpop.f32.mrb[2].mxu1  ;;  %v5451_v15 = vpop.f32.mrb[2].mxu0  ;;  %v453_v29 = vadd.f32 %v452_v7, %v253_v10 }
 0x21f   :  { %v455_v16 = vadd.f32 %v454_v14, %v249_v6  ;;  %v456_v17 = vpop.f32.mrb[3].mxu1  ;;  %v5452_v18 = vpop.f32.mrb[3].mxu0  ;;  %v710_v36 = vmul.f32 %v706_v28, %v451_v27 }
 0x220   :  { %v457_v19 = vadd.f32 %v456_v17, %v253_v10  ;;  %v5453_v20 = vadd.f32 %v5452_v18, %v5451_v15  ;;  %v896_v21 = vadd.f32 %v5450_v13, %v5135_v9  ;;  %v711_v42 = vmul.f32 %v707_v32, %v453_v29 }
 0x221   :  { %v712_v45 = vmul.f32 %v708_v1, %v455_v16 }
 0x222   :  { %v6756_v22 = vpack.c.bf16 %v896_v21, %v896_v21  ;;  %v6758_v23 = vadd.f32 %v5453_v20, %v5135_v9  ;;  %v713_v48 = vmul.f32 %v709_v37, %v457_v19  ;;  %v6843_v37 = vld [vmem:[#allocation10 + $0x30] ss:$8 sps:$4 sm:$0xff]  }
 0x224   :  { %911 = vrot.lane.b32.xlu1 %v6756_v22, %s6482_s6 }
 0x25c   :  { %v697_v30 = vpop.f32.mrb[4].mxu1 }
 0x25d   :  { %v698_v33 = vadd.f32 %v697_v30, %v496_v25  ;;  %v699_v34 = vpop.f32.mrb[5].mxu1 }
 0x25e   :  { %v700_v2 = vadd.f32 %v699_v34, %v500_v26  ;;  %v701_v5 = vpop.f32.mrb[6].mxu1 }
 0x25f   :  { %v718_v38 = vmul.f32 %v714_v31, %v698_v33  ;;  %v702_v39 = vadd.f32 %v701_v5, %v496_v25  ;;  %v703_v40 = vpop.f32.mrb[7].mxu1  ;;  %v6835_v5 = vld [vmem:[#allocation10 + $0x20] ss:$8 sps:$4 sm:$0xff]  }
 0x260   :  { %v719_v43 = vmul.f32 %v715_v0, %v700_v2  ;;  %v704_v44 = vadd.f32 %v703_v40, %v500_v26  ;;  %v6832_v2 = vld [vmem:[#allocation10 + $0x4] ss:$8 sps:$4 sm:$0xff]  }
 0x261   :  { %v722_v46 = vadd.f32 %v718_v38, %v710_v36  ;;  %v720_v47 = vmul.f32 %v716_v35, %v702_v39  ;;  %v6837_v35 = vld [vmem:[#allocation10 + $0x24] ss:$8 sps:$4 sm:$0xff]   ;;  %v6839_v36 = vld [vmem:[#allocation10 + $0x34] ss:$8 sps:$4 sm:$0xff]  }
 0x262   :  { %v6788_v49 = vadd.f32 %v719_v43, %v711_v42  ;;  %v721_v50 = vmul.f32 %v717_v41, %v704_v44  ;;  %1158 = vmatprep.subr.bf16.mxu0 %v6837_v35  ;;  %v6848_v41 = vld [vmem:[#allocation10] ss:$8 sps:$4 sm:$0xff]   ;;  %v6850_v43 = vld [vmem:[#allocation10 + $0x14] ss:$8 sps:$4 sm:$0xff]   ;;  %v6854_v44 = vld [vmem:[#allocation10 + $0x10] ss:$8 sps:$4 sm:$0xff]  }
 0x263   :  { %v6790_v51 = vadd.f32 %v720_v47, %v712_v45  ;;  %v6799_v57 = vpack.c.bf16 %v722_v46, %v722_v46  ;;  %1159 = vmatpush1.bf16.msra.mxu0 %v6835_v5 }
 0x264   :  { %v6792_v52 = vadd.f32 %v721_v50, %v713_v48  ;;  %1160 = vmatprep.subr.bf16.mxu0 %v6839_v36 }
 0x267   :  { %1161 = vmatpush1.bf16.msra.mxu0 %v6843_v37 }
 0x268   :  { %5542 = vmatprep.subr.bf16.mxu0 %v6486_v62 }
 0x296   :  { %v912_v55 = vpop.permute.xlu1 %911 }
 0x297   :  { %v6795_v56 = vsel %vm913_vm6, %v912_v55, 0 }
 0x298   :  { %5519 = vmatpush3.bf16.xpose.msra.mxu1 %v6795_v56 }
 0x299   :  { %5524 = vmatprep.subr.bf16.mxu1 %v6486_v62 }
 0x29f   :  { %5521 = vmatmul.mubr.msk.bf16.vlgmr.msra.gmra.mrb[8].mxu1 %vm913_vm6, %v6799_v57 }
 0x2a0   :  { %5526 = vmatprep.mubr.msk.bf16.mxu1 %vm6487_vm5, %v6486_v62  ;;  %5525 = vmatpush3.bf16.msra.mxu1 %v6489_v54 }
 0x2a1   :  { %5530 = vmatprep.subr.bf16.mxu1 %v6486_v62 }
 0x372   :  { %v954_v60 = vpop.f32.mrb[8].mxu1 }
 0x373   :  { %v960_v61 = vmul.f32 0.17677669, %v954_v60  ;;  %v5522_v63 = vpop.f32.mrb[9].mxu1 }
 0x374   :  { %v957_v3 = vpop.f32.mrb[10].mxu1 }
 0x375   :  { %v5523_v4 = vpop.f32.mrb[11].mxu1  ;;  %v961_v6 = vadd.f32 %v960_v61, %v6808_v59 }
 0x377   :  { %v963_v7 = vsel %vm962_vm7, %v961_v6, -inf }
 0x378   :  { %964 = vmax.xlane.f32.xlu1 %v963_v7 }
 0x405   :  { %v965_v8 = vpop.xlane.xlu1 %964 }
 0x406   :  { %v966_v9 = vsub.f32 %v961_v6, %v965_v8 }
 0x408   :  { %v967_v10 = vmul.f32 1.442695, %v966_v9 }
 0x40a   :  { %6184 = vpow2.f32 %v967_v10 }
 0x414   :  { %v6185_v13 = vpop.eup %6184 }
 0x415   :  { %v969_v53 = vsel %vm962_vm7, %v6185_v13, 0.0 }
 0x416   :  { %970 = vadd.xlane.f32.xlu0 %v969_v53 }
 0x42c   :  { %1028 = vrot.lane.b32.xlu0 %v6799_v57, %s6490_s1 }
 0x4a3   :  { %v971_v14 = vpop.xlane.xlu0 %970 }
 0x4a4   :  { %6186 = vrcp.f32 %v971_v14 }
 0x4a7   :  { %v1029_v18 = vpop.permute.xlu0 %1028 }
 0x4ae   :  { %v6187_v15 = vpop.eup %6186 }
 0x4af   :  { %v973_v16 = vmul.f32 %v6187_v15, %v6185_v13 }
 0x4b1   :  { %v974_v17 = vpack.c.bf16 %v973_v16, %v973_v16 }
 0x4b3   :  { %5527 = vmatmul.mubr.msk.bf16.vlgmr.msra.gmra.mrb[12].mxu1 %vm962_vm7, %v974_v17 }
 0x4b4   :  { %5531 = vmatpush3.bf16.xpose.msra.mxu1 %v6795_v56  ;;  %5532 = vmatprep.mubr.msk.bf16.mxu1 %vm6487_vm5, %v6486_v62 }
 0x4b5   :  { %5536 = vmatprep.subr.bf16.mxu1 %v6486_v62 }
 0x4bb   :  { %5533 = vmatmul.mubr.msk.bf16.vlgmr.msra.gmra.mrb[16].mxu1 %vm913_vm6, %v1029_v18 }
 0x4bc   :  { %5537 = vmatpush3.bf16.msra.mxu1 %v6489_v54  ;;  %5538 = vmatprep.mubr.msk.bf16.mxu1 %vm6487_vm5, %v6486_v62 }
 0x4bd   :  { %1222 = vmatprep.subr.bf16.mxu1 %v6832_v2 }
 0x586   :  { %v1016_v19 = vpop.f32.mrb[12].mxu1 }
 0x587   :  { %v5528_v20 = vpop.f32.mrb[13].mxu1  ;;  %v1022_v45 = vpack.c.bf16 %v1016_v19, %v1016_v19 }
 0x588   :  { %v1019_v21 = vpop.f32.mrb[14].mxu1 }
 0x589   :  { %v5529_v24 = vpop.f32.mrb[15].mxu1 }
 0x58e   :  { %v1067_v25 = vpop.f32.mrb[16].mxu1 }
 0x58f   :  { %v1073_v26 = vmul.f32 0.17677669, %v1067_v25  ;;  %v5534_v27 = vpop.f32.mrb[17].mxu1 }
 0x590   :  { %v1070_v28 = vpop.f32.mrb[18].mxu1  ;;  %v6882_v27 = vld [vmem:[#allocation10 + $0x44] ss:$8 sps:$4 sm:$0xff]  }
 0x591   :  { %v5535_v29 = vpop.f32.mrb[19].mxu1  ;;  %v1074_v30 = vadd.f32 %v1073_v26, %v6808_v59  ;;  %v6880_v26 = vld [vmem:[#allocation10 + $0x40] ss:$8 sps:$4 sm:$0xff]   ;;  %v6884_v28 = vld [vmem:[#allocation10 + $0x54] ss:$8 sps:$4 sm:$0xff]  }
 0x592   :  { %v6888_v29 = vld [vmem:[#allocation10 + $0x50] ss:$8 sps:$4 sm:$0xff]  }
 0x593   :  { %v1075_v31 = vsel %vm962_vm7, %v1074_v30, -inf }
 0x594   :  { %1076 = vmax.xlane.f32.xlu0 %v1075_v31 }
 0x621   :  { %v1077_v32 = vpop.xlane.xlu0 %1076 }
 0x622   :  { %v1078_v33 = vsub.f32 %v1074_v30, %v1077_v32 }
 0x624   :  { %v1079_v34 = vmul.f32 1.442695, %v1078_v33 }
 0x626   :  { %6188 = vpow2.f32 %v1079_v34 }
 0x630   :  { %v6189_v0 = vpop.eup %6188 }
 0x631   :  { %v1081_v1 = vsel %vm962_vm7, %v6189_v0, 0.0 }
 0x632   :  { %1082 = vadd.xlane.f32.xlu1 %v1081_v1 }
 0x643   :  { %1263 = vrot.lane.b32.xlu1 %v6799_v57, %s6482_s6 }
 0x6bf   :  { %v1083_v38 = vpop.xlane.xlu1 %1082 }
 0x6c0   :  { %6190 = vrcp.f32 %v1083_v38 }
 0x6c3   :  { %v1264_v61 = vpop.permute.xlu1 %1263 }
 0x6ca   :  { %v6191_v39 = vpop.eup %6190 }
 0x6cb   :  { %v1085_v40 = vmul.f32 %v6191_v39, %v6189_v0 }
 0x6cd   :  { %v1086_v42 = vpack.c.bf16 %v1085_v40, %v1085_v40 }
 0x6cf   :  { %5539 = vmatmul.mubr.msk.bf16.vlgmr.msra.gmra.mrb[20].mxu1 %vm962_vm7, %v1086_v42 }
 0x6d0   :  { %1223 = vmatpush1.bf16.msra.mxu1 %v6848_v41  ;;  %1254 = vmatprep.mubr.bf16.mxu1 %v6489_v54 }
 0x6d1   :  { %1224 = vmatprep.subr.bf16.mxu1 %v6850_v43 }
 0x6d4   :  { %1225 = vmatpush1.bf16.msra.mxu1 %v6854_v44 }
 0x6d5   :  { %5548 = vmatprep.subr.bf16.mxu1 %v6486_v62 }
 0x6d7   :  { %5165 = vmatmul.mubr.msk.bf16.vlgmr.msra.gmra.mrb[24].mxu1 %vm913_vm6, %v1022_v45 }
 0x6d8   :  { %5549 = vmatpush3.bf16.msra.mxu1 %v6489_v54  ;;  %5550 = vmatprep.mubr.msk.bf16.mxu1 %vm6487_vm5, %v6486_v62 }
 0x6d9   :  { %5554 = vmatprep.subr.bf16.mxu1 %v6486_v62 }
 0x7a2   :  { %v1124_v46 = vpop.f32.mrb[20].mxu1 }
 0x7a3   :  { %v1130_v47 = vpack.c.bf16 %v1124_v46, %v1124_v46  ;;  %v5540_v48 = vpop.f32.mrb[21].mxu1 }
 0x7a4   :  { %v1127_v50 = vpop.f32.mrb[22].mxu1 }
 0x7a5   :  { %v5541_v55 = vpop.f32.mrb[23].mxu1  ;;  %5160 = vmatmul.mubr.msk.bf16.vlgmr.msra.gmra.mrb[4].mxu0 %vm913_vm6, %v1130_v47 }
 0x7a6   :  { %5543 = vmatpush3.bf16.xpose.msra.mxu0 %v6795_v56  ;;  %5544 = vmatprep.mubr.msk.bf16.mxu0 %vm6487_vm5, %v6486_v62 }
 0x7a7   :  { %1393 = vmatprep.subr.bf16.mxu0 %v6882_v27 }
 0x7aa   :  { %v1256_v58 = vpop.f32.mrb[24].mxu1 }
 0x7ab   :  { %v1258_v60 = vpop.f32.mrb[25].mxu1 }
 0x7ac   :  { %v1260_v63 = vpop.f32.mrb[26].mxu1 }
 0x7ad   :  { %v1261_v3 = vpop.f32.mrb[27].mxu1  ;;  %5545 = vmatmul.mubr.msk.bf16.vlgmr.msra.gmra.mrb[8].mxu0 %vm913_vm6, %v1264_v61  ;;  %v6909_v63 = vld [vmem:[#allocation10 + $0x60] ss:$8 sps:$4 sm:$0xff]  }
 0x7ae   :  { %1425 = vmatprep.mubr.bf16.mxu0 %v6489_v54  ;;  %1394 = vmatpush1.bf16.msra.mxu0 %v6880_v26  ;;  %v6911_v3 = vld [vmem:[#allocation10 + $0x64] ss:$8 sps:$4 sm:$0xff]  }
 0x7af   :  { %1395 = vmatprep.subr.bf16.mxu0 %v6884_v28 }
 0x7b2   :  { %1396 = vmatpush1.bf16.msra.mxu0 %v6888_v29 }
 0x7b3   :  { %5560 = vmatprep.subr.bf16.mxu0 %v6486_v62 }
 0x878   :  { %v1192_v4 = vpop.f32.mrb[4].mxu0 }
 0x879   :  { %v6871_v6 = vadd.f32 %v1256_v58, %v1192_v4  ;;  %v1194_v7 = vpop.f32.mrb[5].mxu0  ;;  %v6913_v4 = vld [vmem:[#allocation10 + $0x74] ss:$8 sps:$4 sm:$0xff]  }
 0x87a   :  { %v6873_v8 = vadd.f32 %v1258_v60, %v1194_v7  ;;  %v1196_v9 = vpop.f32.mrb[6].mxu0  ;;  %v6917_v7 = vld [vmem:[#allocation10 + $0x70] ss:$8 sps:$4 sm:$0xff]  }
 0x87b   :  { %v1197_v10 = vpop.f32.mrb[7].mxu0 }
 0x880   :  { %v1302_v13 = vpop.f32.mrb[8].mxu0 }
 0x881   :  { %v1308_v53 = vmul.f32 0.17677669, %v1302_v13  ;;  %v5546_v14 = vpop.f32.mrb[9].mxu0 }
 0x882   :  { %v1305_v15 = vpop.f32.mrb[10].mxu0 }
 0x883   :  { %v5547_v16 = vpop.f32.mrb[11].mxu0  ;;  %v1309_v17 = vadd.f32 %v1308_v53, %v6808_v59 }
 0x885   :  { %v1310_v18 = vsel %vm962_vm7, %v1309_v17, -inf }
 0x886   :  { %1311 = vmax.xlane.f32.xlu1 %v1310_v18 }
 0x913   :  { %v1312_v19 = vpop.xlane.xlu1 %1311 }
 0x914   :  { %v1313_v20 = vsub.f32 %v1309_v17, %v1312_v19 }
 0x916   :  { %v1314_v21 = vmul.f32 1.442695, %v1313_v20 }
 0x918   :  { %6192 = vpow2.f32 %v1314_v21 }
 0x922   :  { %v6193_v24 = vpop.eup %6192 }
 0x923   :  { %v1316_v25 = vsel %vm962_vm7, %v6193_v24, 0.0 }
 0x924   :  { %1317 = vadd.xlane.f32.xlu0 %v1316_v25 }
 0x93a   :  { %1436 = vrot.lane.b32.xlu0 %v6799_v57, %s6491_s2 }
 0x9b1   :  { %v1318_v30 = vpop.xlane.xlu0 %1317 }
 0x9b2   :  { %6194 = vrcp.f32 %v1318_v30 }
 0x9b5   :  { %v1437_v33 = vpop.permute.xlu0 %1436 }
 0x9bc   :  { %v6195_v57 = vpop.eup %6194 }
 0x9bd   :  { %v1320_v31 = vmul.f32 %v6195_v57, %v6193_v24 }
 0x9bf   :  { %v1321_v32 = vpack.c.bf16 %v1320_v31, %v1320_v31 }
 0x9c1   :  { %5551 = vmatmul.mubr.msk.bf16.vlgmr.msra.gmra.mrb[28].mxu1 %vm962_vm7, %v1321_v32 }
 0x9c2   :  { %5555 = vmatpush3.bf16.xpose.msra.mxu1 %v6795_v56  ;;  %5556 = vmatprep.mubr.msk.bf16.mxu1 %vm6487_vm5, %v6486_v62 }
 0x9c3   :  { %1566 = vmatprep.subr.bf16.mxu1 %v6911_v3 }
 0x9c9   :  { %5557 = vmatmul.mubr.msk.bf16.vlgmr.msra.gmra.mrb[32].mxu1 %vm913_vm6, %v1437_v33 }
 0x9ca   :  { %1598 = vmatprep.mubr.bf16.mxu1 %v6489_v54  ;;  %1567 = vmatpush1.bf16.msra.mxu1 %v6909_v63 }
 0x9cb   :  { %1568 = vmatprep.subr.bf16.mxu1 %v6913_v4 }
 0x9ce   :  { %1569 = vmatpush1.bf16.msra.mxu1 %v6917_v7 }
 0x9cf   :  { %5572 = vmatprep.subr.bf16.mxu1 %v6486_v62 }
 0xa94   :  { %v1359_v34 = vpop.f32.mrb[28].mxu1 }
 0xa95   :  { %v1365_v0 = vpack.c.bf16 %v1359_v34, %v1359_v34  ;;  %v5552_v1 = vpop.f32.mrb[29].mxu1 }
 0xa96   :  { %v1362_v38 = vpop.f32.mrb[30].mxu1 }
 0xa97   :  { %v5553_v39 = vpop.f32.mrb[31].mxu1  ;;  %5172 = vmatmul.mubr.msk.bf16.vlgmr.msra.gmra.mrb[12].mxu0 %vm913_vm6, %v1365_v0 }
 0xa98   :  { %5561 = vmatpush3.bf16.msra.mxu0 %v6489_v54  ;;  %5562 = vmatprep.mubr.msk.bf16.mxu0 %vm6487_vm5, %v6486_v62 }
 0xa99   :  { %5566 = vmatprep.subr.bf16.mxu0 %v6486_v62 }
 0xa9c   :  { %v1475_v56 = vpop.f32.mrb[32].mxu1 }
 0xa9d   :  { %v1481_v40 = vmul.f32 0.17677669, %v1475_v56  ;;  %v5558_v42 = vpop.f32.mrb[33].mxu1 }
 0xa9e   :  { %v1478_v45 = vpop.f32.mrb[34].mxu1  ;;  %v6948_v42 = vld [vmem:[#allocation10 + $0x80] ss:$8 sps:$4 sm:$0xff]  }
 0xa9f   :  { %v5559_v46 = vpop.f32.mrb[35].mxu1  ;;  %v1482_v47 = vadd.f32 %v1481_v40, %v6808_v59  ;;  %v6950_v45 = vld [vmem:[#allocation10 + $0x84] ss:$8 sps:$4 sm:$0xff]  }
 0xaa0   :  { %v6952_v46 = vld [vmem:[#allocation10 + $0x94] ss:$8 sps:$4 sm:$0xff]  }
 0xaa1   :  { %v1483_v48 = vsel %vm962_vm7, %v1482_v47, -inf }
 0xaa2   :  { %1484 = vmax.xlane.f32.xlu0 %v1483_v48 }
 0xb2f   :  { %v1485_v50 = vpop.xlane.xlu0 %1484 }
 0xb30   :  { %v1486_v55 = vsub.f32 %v1482_v47, %v1485_v50  ;;  %v6956_v47 = vld [vmem:[#allocation10 + $0x90] ss:$8 sps:$4 sm:$0xff]  }
 0xb32   :  { %v1487_v58 = vmul.f32 1.442695, %v1486_v55 }
 0xb34   :  { %6196 = vpow2.f32 %v1487_v58 }
 0xb3e   :  { %v6197_v60 = vpop.eup %6196 }
 0xb3f   :  { %v1489_v61 = vsel %vm962_vm7, %v6197_v60, 0.0 }
 0xb40   :  { %1490 = vadd.xlane.f32.xlu1 %v1489_v61 }
 0xb51   :  { %1610 = vrot.lane.b32.xlu1 %v6756_v22, %s6491_s2 }
 0xb6a   :  { %v1427_v9 = vpop.f32.mrb[12].mxu0 }
 0xb6b   :  { %v1434_v10 = vadd.f32 %v1427_v9, %v6871_v6  ;;  %v1429_v13 = vpop.f32.mrb[13].mxu0  ;;  %v6933_v6 = vpack.c.bf16 %v6788_v49, %v6788_v49 }
 0xb6c   :  { %v1435_v22 = vadd.f32 %v1429_v13, %v6873_v8  ;;  %v1431_v53 = vpop.f32.mrb[14].mxu0 }
 0xb6d   :  { %v1432_v14 = vpop.f32.mrb[15].mxu0 }
 0xbcd   :  { %v1491_v15 = vpop.xlane.xlu1 %1490 }
 0xbce   :  { %6198 = vrcp.f32 %v1491_v15 }
 0xbd1   :  { %v1611_v18 = vpop.permute.xlu1 %1610 }
 0xbd2   :  { %v6925_v20 = vsel %vm913_vm6, %v1611_v18, 0 }
 0xbd8   :  { %v6199_v16 = vpop.eup %6198 }
 0xbd9   :  { %v1493_v17 = vmul.f32 %v6199_v16, %v6197_v60 }
 0xbdb   :  { %v1494_v19 = vpack.c.bf16 %v1493_v17, %v1493_v17 }
 0xbdd   :  { %5563 = vmatmul.mubr.msk.bf16.vlgmr.msra.gmra.mrb[16].mxu0 %vm962_vm7, %v1494_v19 }
 0xbde   :  { %5567 = vmatpush3.bf16.xpose.msra.mxu0 %v6925_v20  ;;  %5568 = vmatprep.mubr.msk.bf16.mxu0 %vm6487_vm5, %v6486_v62 }
 0xbdf   :  { %1743 = vmatprep.subr.bf16.mxu0 %v6950_v45 }
 0xbe5   :  { %5569 = vmatmul.mubr.msk.bf16.vlgmr.msra.gmra.mrb[20].mxu0 %vm913_vm6, %v6933_v6 }
 0xbe6   :  { %1775 = vmatprep.mubr.bf16.mxu0 %v6489_v54  ;;  %1744 = vmatpush1.bf16.msra.mxu0 %v6948_v42 }
 0xbe7   :  { %1745 = vmatprep.subr.bf16.mxu0 %v6952_v46 }
 0xbea   :  { %1746 = vmatpush1.bf16.msra.mxu0 %v6956_v47 }
 0xbeb   :  { %5584 = vmatprep.subr.bf16.mxu0 %v6486_v62 }
 0xcb0   :  { %v1532_v8 = vpop.f32.mrb[16].mxu0 }
 0xcb1   :  { %v1538_v21 = vpack.c.bf16 %v1532_v8, %v1532_v8  ;;  %v5564_v24 = vpop.f32.mrb[17].mxu0 }
 0xcb2   :  { %v1535_v25 = vpop.f32.mrb[18].mxu0 }
 0xcb3   :  { %v5565_v30 = vpop.f32.mrb[19].mxu0  ;;  %5179 = vmatmul.mubr.msk.bf16.vlgmr.msra.gmra.mrb[36].mxu1 %vm913_vm6, %v1538_v21 }
 0xcb4   :  { %5573 = vmatpush3.bf16.msra.mxu1 %v6489_v54  ;;  %5574 = vmatprep.mubr.msk.bf16.mxu1 %vm6487_vm5, %v6486_v62 }
 0xcb5   :  { %5578 = vmatprep.subr.bf16.mxu1 %v6486_v62 }
 0xcb8   :  { %v1652_v49 = vpop.f32.mrb[20].mxu0 }
 0xcb9   :  { %v1658_v57 = vmul.f32 0.17677669, %v1652_v49  ;;  %v5570_v31 = vpop.f32.mrb[21].mxu0 }
 0xcba   :  { %v1655_v32 = vpop.f32.mrb[22].mxu0 }
 0xcbb   :  { %v5571_v33 = vpop.f32.mrb[23].mxu0  ;;  %v1659_v34 = vadd.f32 %v1658_v57, %v6808_v59 }
 0xcbd   :  { %v1660_v0 = vsel %vm962_vm7, %v1659_v34, -inf }
 0xcbe   :  { %1661 = vmax.xlane.f32.xlu1 %v1660_v0  ;;  %v6977_v0 = vld [vmem:[#allocation10 + $0xa0] ss:$8 sps:$4 sm:$0xff]  }
 0xd4b   :  { %v1662_v1 = vpop.xlane.xlu1 %1661 }
 0xd4c   :  { %v1663_v38 = vsub.f32 %v1659_v34, %v1662_v1  ;;  %v6979_v1 = vld [vmem:[#allocation10 + $0xa4] ss:$8 sps:$4 sm:$0xff]  }
 0xd4e   :  { %v1664_v39 = vmul.f32 1.442695, %v1663_v38  ;;  %v6981_v38 = vld [vmem:[#allocation10 + $0xb4] ss:$8 sps:$4 sm:$0xff]  }
 0xd50   :  { %6200 = vpow2.f32 %v1664_v39  ;;  %v6985_v39 = vld [vmem:[#allocation10 + $0xb0] ss:$8 sps:$4 sm:$0xff]  }
 0xd5a   :  { %v6201_v56 = vpop.eup %6200 }
 0xd5b   :  { %v1666_v40 = vsel %vm962_vm7, %v6201_v56, 0.0 }
 0xd5c   :  { %1667 = vadd.xlane.f32.xlu0 %v1666_v40 }
 0xd72   :  { %1787 = vrot.lane.b32.xlu0 %v6933_v6, %s6490_s1 }
 0xd86   :  { %v1600_v48 = vpop.f32.mrb[36].mxu1 }
 0xd87   :  { %v1607_v50 = vadd.f32 %v1600_v48, %v1434_v10  ;;  %v1602_v55 = vpop.f32.mrb[37].mxu1 }
 0xd88   :  { %v1608_v58 = vadd.f32 %v1602_v55, %v1435_v22  ;;  %v1604_v60 = vpop.f32.mrb[38].mxu1 }
 0xd89   :  { %v1605_v61 = vpop.f32.mrb[39].mxu1 }
 0xde9   :  { %v1668_v9 = vpop.xlane.xlu0 %1667 }
 0xdea   :  { %6202 = vrcp.f32 %v1668_v9 }
 0xded   :  { %v1788_v10 = vpop.permute.xlu0 %1787 }
 0xdf4   :  { %v6203_v13 = vpop.eup %6202 }
 0xdf5   :  { %v1670_v53 = vmul.f32 %v6203_v13, %v6201_v56 }
 0xdf7   :  { %v1671_v14 = vpack.c.bf16 %v1670_v53, %v1670_v53 }
 0xdf9   :  { %5575 = vmatmul.mubr.msk.bf16.vlgmr.msra.gmra.mrb[40].mxu1 %vm962_vm7, %v1671_v14 }
 0xdfa   :  { %5579 = vmatpush3.bf16.xpose.msra.mxu1 %v6925_v20  ;;  %5580 = vmatprep.mubr.msk.bf16.mxu1 %vm6487_vm5, %v6486_v62 }
 0xdfb   :  { %1917 = vmatprep.subr.bf16.mxu1 %v6979_v1 }
 0xe01   :  { %5581 = vmatmul.mubr.msk.bf16.vlgmr.msra.gmra.mrb[44].mxu1 %vm913_vm6, %v1788_v10 }
 0xe02   :  { %1949 = vmatprep.mubr.bf16.mxu1 %v6489_v54  ;;  %1918 = vmatpush1.bf16.msra.mxu1 %v6977_v0 }
 0xe03   :  { %1919 = vmatprep.subr.bf16.mxu1 %v6981_v38 }
 0xe06   :  { %1920 = vmatpush1.bf16.msra.mxu1 %v6985_v39 }
 0xe07   :  { %5596 = vmatprep.subr.bf16.mxu1 %v6486_v62 }
 0xecc   :  { %v1709_v22 = vpop.f32.mrb[40].mxu1 }
 0xecd   :  { %v1715_v15 = vpack.c.bf16 %v1709_v22, %v1709_v22  ;;  %v5576_v16 = vpop.f32.mrb[41].mxu1 }
 0xece   :  { %v1712_v17 = vpop.f32.mrb[42].mxu1 }
 0xecf   :  { %v5577_v18 = vpop.f32.mrb[43].mxu1  ;;  %5186 = vmatmul.mubr.msk.bf16.vlgmr.msra.gmra.mrb[24].mxu0 %vm913_vm6, %v1715_v15 }
 0xed0   :  { %5585 = vmatpush3.bf16.msra.mxu0 %v6489_v54  ;;  %5586 = vmatprep.mubr.msk.bf16.mxu0 %vm6487_vm5, %v6486_v62 }
 0xed1   :  { %5590 = vmatprep.subr.bf16.mxu0 %v6486_v62 }
 0xed4   :  { %v1826_v19 = vpop.f32.mrb[44].mxu1 }
 0xed5   :  { %v1832_v8 = vmul.f32 0.17677669, %v1826_v19  ;;  %v5582_v21 = vpop.f32.mrb[45].mxu1 }
 0xed6   :  { %v1829_v24 = vpop.f32.mrb[46].mxu1 }
 0xed7   :  { %v5583_v25 = vpop.f32.mrb[47].mxu1  ;;  %v1833_v30 = vadd.f32 %v1832_v8, %v6808_v59 }
 0xed9   :  { %v1834_v49 = vsel %vm962_vm7, %v1833_v30, -inf }
 0xeda   :  { %1835 = vmax.xlane.f32.xlu0 %v1834_v49 }
 0xf67   :  { %v1836_v57 = vpop.xlane.xlu0 %1835 }
 0xf68   :  { %v1837_v31 = vsub.f32 %v1833_v30, %v1836_v57 }
 0xf6a   :  { %v1838_v32 = vmul.f32 1.442695, %v1837_v31 }
 0xf6c   :  { %6204 = vpow2.f32 %v1838_v32 }
 0xf76   :  { %v6205_v33 = vpop.eup %6204 }
 0xf77   :  { %v1840_v34 = vsel %vm962_vm7, %v6205_v33, 0.0 }
 0xf78   :  { %1841 = vadd.xlane.f32.xlu1 %v1840_v34  ;;  %v7008_v34 = vld [vmem:[#allocation10 + $0xc4] ss:$8 sps:$4 sm:$0xff]  }
 0xf89   :  { %1960 = vrot.lane.b32.xlu1 %v6933_v6, %s6482_s6 }
 0xfa2   :  { %v1777_v56 = vpop.f32.mrb[24].mxu0 }
 0xfa3   :  { %v1784_v40 = vadd.f32 %v1777_v56, %v1607_v50  ;;  %v1779_v48 = vpop.f32.mrb[25].mxu0  ;;  %v7010_v56 = vld [vmem:[#allocation10 + $0xd4] ss:$8 sps:$4 sm:$0xff]  }
 0xfa4   :  { %v1785_v55 = vadd.f32 %v1779_v48, %v1608_v58  ;;  %v1781_v60 = vpop.f32.mrb[26].mxu0  ;;  %v7014_v48 = vld [vmem:[#allocation10 + $0xd0] ss:$8 sps:$4 sm:$0xff]  }
 0xfa5   :  { %v1782_v61 = vpop.f32.mrb[27].mxu0 }
0x1005   :  { %v1842_v9 = vpop.xlane.xlu1 %1841 }
0x1006   :  { %6206 = vrcp.f32 %v1842_v9 }
0x1009   :  { %v1961_v50 = vpop.permute.xlu1 %1960 }
0x1010   :  { %v6207_v13 = vpop.eup %6206 }
0x1011   :  { %v1844_v53 = vmul.f32 %v6207_v13, %v6205_v33  ;;  %v7006_v33 = vld [vmem:[#allocation10 + $0xc0] ss:$8 sps:$4 sm:$0xff]  }
0x1013   :  { %v1845_v14 = vpack.c.bf16 %v1844_v53, %v1844_v53 }
0x1015   :  { %5587 = vmatmul.mubr.msk.bf16.vlgmr.msra.gmra.mrb[28].mxu0 %vm962_vm7, %v1845_v14 }
0x1016   :  { %5591 = vmatpush3.bf16.xpose.msra.mxu0 %v6925_v20  ;;  %5592 = vmatprep.mubr.msk.bf16.mxu0 %vm6487_vm5, %v6486_v62 }
0x1017   :  { %2090 = vmatprep.subr.bf16.mxu0 %v7008_v34 }
0x101d   :  { %5593 = vmatmul.mubr.msk.bf16.vlgmr.msra.gmra.mrb[32].mxu0 %vm913_vm6, %v1961_v50 }
0x101e   :  { %2122 = vmatprep.mubr.bf16.mxu0 %v6489_v54  ;;  %2091 = vmatpush1.bf16.msra.mxu0 %v7006_v33 }
0x101f   :  { %2092 = vmatprep.subr.bf16.mxu0 %v7010_v56 }
0x1022   :  { %2093 = vmatpush1.bf16.msra.mxu0 %v7014_v48 }
0x1023   :  { %5608 = vmatprep.subr.bf16.mxu0 %v6486_v62 }
0x10e8   :  { %v1883_v58 = vpop.f32.mrb[28].mxu0 }
0x10e9   :  { %v1889_v10 = vpack.c.bf16 %v1883_v58, %v1883_v58  ;;  %v5588_v22 = vpop.f32.mrb[29].mxu0 }
0x10ea   :  { %v1886_v15 = vpop.f32.mrb[30].mxu0 }
0x10eb   :  { %v5589_v16 = vpop.f32.mrb[31].mxu0  ;;  %5193 = vmatmul.mubr.msk.bf16.vlgmr.msra.gmra.mrb[48].mxu1 %vm913_vm6, %v1889_v10 }
0x10ec   :  { %5597 = vmatpush3.bf16.msra.mxu1 %v6489_v54  ;;  %5598 = vmatprep.mubr.msk.bf16.mxu1 %vm6487_vm5, %v6486_v62 }
0x10ed   :  { %5602 = vmatprep.subr.bf16.mxu1 %v6486_v62 }
0x10f0   :  { %v1999_v17 = vpop.f32.mrb[32].mxu0 }
0x10f1   :  { %v2005_v18 = vmul.f32 0.17677669, %v1999_v17  ;;  %v5594_v19 = vpop.f32.mrb[33].mxu0 }
0x10f2   :  { %v2002_v8 = vpop.f32.mrb[34].mxu0 }
0x10f3   :  { %v5595_v21 = vpop.f32.mrb[35].mxu0  ;;  %v2006_v24 = vadd.f32 %v2005_v18, %v6808_v59 }
0x10f5   :  { %v2007_v25 = vsel %vm962_vm7, %v2006_v24, -inf }
0x10f6   :  { %2008 = vmax.xlane.f32.xlu1 %v2007_v25 }
0x1183   :  { %v2009_v30 = vpop.xlane.xlu1 %2008 }
0x1184   :  { %v2010_v49 = vsub.f32 %v2006_v24, %v2009_v30 }
0x1186   :  { %v2011_v57 = vmul.f32 1.442695, %v2010_v49 }
0x1188   :  { %6208 = vpow2.f32 %v2011_v57 }
0x1192   :  { %v6209_v31 = vpop.eup %6208 }
0x1193   :  { %v2013_v32 = vsel %vm962_vm7, %v6209_v31, 0.0 }
0x1194   :  { %2014 = vadd.xlane.f32.xlu0 %v2013_v32 }
0x11aa   :  { %2133 = vrot.lane.b32.xlu0 %v6933_v6, %s6491_s2 }
0x11be   :  { %v1951_v60 = vpop.f32.mrb[48].mxu1 }
0x11bf   :  { %v1958_v61 = vadd.f32 %v1951_v60, %v1784_v40  ;;  %v1953_v9 = vpop.f32.mrb[49].mxu1  ;;  %v7035_v60 = vpack.c.bf16 %v6758_v23, %v6758_v23  ;;  %v7049_v23 = vld [vmem:[#allocation10 + $0xe0] ss:$8 sps:$4 sm:$0xff]  }
0x11c0   :  { %v1959_v13 = vadd.f32 %v1953_v9, %v1785_v55  ;;  %v1955_v53 = vpop.f32.mrb[50].mxu1  ;;  %v7041_v9 = vpack.c.bf16 %v6790_v51, %v6790_v51  ;;  %v7057_v51 = vld [vmem:[#allocation10 + $0xf0] ss:$8 sps:$4 sm:$0xff]  }
0x11c1   :  { %v1956_v6 = vpop.f32.mrb[51].mxu1 }
0x1221   :  { %v2015_v14 = vpop.xlane.xlu0 %2014 }
0x1222   :  { %6210 = vrcp.f32 %v2015_v14 }
0x1225   :  { %v2134_v40 = vpop.permute.xlu0 %2133 }
0x122c   :  { %v6211_v50 = vpop.eup %6210 }
0x122d   :  { %v2017_v58 = vmul.f32 %v6211_v50, %v6209_v31 }
0x122f   :  { %v2018_v10 = vpack.c.bf16 %v2017_v58, %v2017_v58 }
0x1231   :  { %5599 = vmatmul.mubr.msk.bf16.vlgmr.msra.gmra.mrb[52].mxu1 %vm962_vm7, %v2018_v10 }
0x1232   :  { %5603 = vmatpush3.bf16.xpose.msra.mxu1 %v6925_v20  ;;  %5604 = vmatprep.mubr.msk.bf16.mxu1 %vm6487_vm5, %v6486_v62 }
0x1239   :  { %5605 = vmatmul.mubr.msk.bf16.vlgmr.msra.gmra.mrb[56].mxu1 %vm913_vm6, %v2134_v40  ;;  %v7051_v40 = vld [vmem:[#allocation10 + $0xe4] ss:$8 sps:$4 sm:$0xff]  }
0x123a   :  { %2295 = vmatprep.mubr.bf16.mxu1 %v6489_v54  ;;  %2263 = vmatprep.subr.bf16.mxu1 %v7051_v40 }
0x123b   :  { %2264 = vmatpush1.bf16.msra.mxu1 %v7049_v23 }
0x1304   :  { %v2056_v55 = vpop.f32.mrb[52].mxu1 }
0x1305   :  { %v2062_v22 = vpack.c.bf16 %v2056_v55, %v2056_v55  ;;  %v5600_v15 = vpop.f32.mrb[53].mxu1  ;;  %v7053_v55 = vld [vmem:[#allocation10 + $0xf4] ss:$8 sps:$4 sm:$0xff]  }
0x1306   :  { %v2059_v16 = vpop.f32.mrb[54].mxu1  ;;  %2265 = vmatprep.subr.bf16.mxu1 %v7053_v55 }
0x1307   :  { %v5601_v17 = vpop.f32.mrb[55].mxu1  ;;  %5200 = vmatmul.mubr.msk.bf16.vlgmr.msra.gmra.mrb[36].mxu0 %vm913_vm6, %v2062_v22  ;;  %2266 = vmatpush1.bf16.msra.mxu1 %v7057_v51 }
0x1308   :  { %5609 = vmatpush3.bf16.msra.mxu0 %v6489_v54  ;;  %5610 = vmatprep.mubr.msk.bf16.mxu0 %vm6487_vm5, %v6486_v62 }
0x1309   :  { %5614 = vmatprep.subr.bf16.mxu0 %v6486_v62  ;;  %5620 = vmatprep.subr.bf16.mxu1 %v6486_v62 }
0x130c   :  { %v2172_v20 = vpop.f32.mrb[56].mxu1 }
0x130d   :  { %v2178_v18 = vmul.f32 0.17677669, %v2172_v20  ;;  %v5606_v19 = vpop.f32.mrb[57].mxu1 }
0x130e   :  { %v2175_v8 = vpop.f32.mrb[58].mxu1 }
0x130f   :  { %v5607_v21 = vpop.f32.mrb[59].mxu1  ;;  %v2179_v24 = vadd.f32 %v2178_v18, %v6808_v59 }
0x1311   :  { %v2180_v25 = vsel %vm962_vm7, %v2179_v24, -inf }
0x1312   :  { %2181 = vmax.xlane.f32.xlu0 %v2180_v25 }
0x139f   :  { %v2182_v30 = vpop.xlane.xlu0 %2181 }
0x13a0   :  { %v2183_v49 = vsub.f32 %v2179_v24, %v2182_v30 }
0x13a2   :  { %v2184_v57 = vmul.f32 1.442695, %v2183_v49 }
0x13a4   :  { %6212 = vpow2.f32 %v2184_v57 }
0x13ae   :  { %v6213_v31 = vpop.eup %6212 }
0x13af   :  { %v2186_v32 = vsel %vm962_vm7, %v6213_v31, 0.0 }
0x13b0   :  { %2187 = vadd.xlane.f32.xlu1 %v2186_v32 }
0x13c1   :  { %2309 = vrot.lane.b32.xlu1 %v7035_v60, %s6482_s6 }
0x13c5   :  { %2416 = vrot.lane.b32.xlu1 %v7041_v9, %s6490_s1 }
0x13da   :  { %v2124_v53 = vpop.f32.mrb[36].mxu0 }
0x13db   :  { %v7045_v6 = vadd.f32 %v2124_v53, %v1958_v61  ;;  %v2126_v14 = vpop.f32.mrb[37].mxu0 }
0x13dc   :  { %v7047_v50 = vadd.f32 %v2126_v14, %v1959_v13  ;;  %v2128_v58 = vpop.f32.mrb[38].mxu0 }
0x13dd   :  { %v2129_v10 = vpop.f32.mrb[39].mxu0 }
0x143d   :  { %v2188_v61 = vpop.xlane.xlu1 %2187 }
0x143e   :  { %6214 = vrcp.f32 %v2188_v61 }
0x1441   :  { %v2310_v15 = vpop.permute.xlu1 %2309 }
0x1442   :  { %v7063_v17 = vsel %vm913_vm6, %v2310_v15, 0 }
0x1445   :  { %v2417_v20 = vpop.permute.xlu1 %2416 }
0x1448   :  { %v6215_v13 = vpop.eup %6214 }
0x1449   :  { %v2190_v22 = vmul.f32 %v6215_v13, %v6213_v31 }
0x144b   :  { %v2191_v16 = vpack.c.bf16 %v2190_v22, %v2190_v22 }
0x144d   :  { %5611 = vmatmul.mubr.msk.bf16.vlgmr.msra.gmra.mrb[40].mxu0 %vm962_vm7, %v2191_v16 }
0x144e   :  { %5615 = vmatpush3.bf16.xpose.msra.mxu0 %v7063_v17  ;;  %5616 = vmatprep.mubr.msk.bf16.mxu0 %vm6487_vm5, %v6486_v62 }
0x144f   :  { %5626 = vmatprep.subr.bf16.mxu0 %v6486_v62 }
0x1455   :  { %5617 = vmatmul.mubr.msk.bf16.vlgmr.msra.gmra.mrb[44].mxu0 %vm913_vm6, %v7041_v9 }
0x1456   :  { %5627 = vmatpush3.bf16.xpose.msra.mxu0 %v7063_v17  ;;  %5628 = vmatprep.mubr.msk.bf16.mxu0 %vm6487_vm5, %v6486_v62 }
0x1457   :  { %2522 = vmatprep.subr.bf16.mxu0 %v6837_v35 }
0x145d   :  { %5629 = vmatmul.mubr.msk.bf16.vlgmr.msra.gmra.mrb[48].mxu0 %vm913_vm6, %v2417_v20 }
0x145e   :  { %2523 = vmatpush1.bf16.msra.mxu0 %v6835_v5  ;;  %2554 = vmatprep.mubr.bf16.mxu0 %v6489_v54 }
0x145f   :  { %2524 = vmatprep.subr.bf16.mxu0 %v6839_v36 }
0x1462   :  { %2525 = vmatpush1.bf16.msra.mxu0 %v6843_v37 }
0x1463   :  { %5638 = vmatprep.subr.bf16.mxu0 %v6486_v62 }
0x1520   :  { %v2229_v18 = vpop.f32.mrb[40].mxu0 }
0x1521   :  { %v2235_v19 = vpack.c.bf16 %v2229_v18, %v2229_v18  ;;  %v5612_v8 = vpop.f32.mrb[41].mxu0 }
0x1522   :  { %v2232_v21 = vpop.f32.mrb[42].mxu0 }
0x1523   :  { %v5613_v24 = vpop.f32.mrb[43].mxu0  ;;  %5207 = vmatmul.mubr.msk.bf16.vlgmr.msra.gmra.mrb[60].mxu1 %vm913_vm6, %v2235_v19 }
0x1524   :  { %5621 = vmatpush3.bf16.msra.mxu1 %v6489_v54  ;;  %5622 = vmatprep.mubr.msk.bf16.mxu1 %vm6487_vm5, %v6486_v62 }
0x1525   :  { %5632 = vmatprep.subr.bf16.mxu1 %v6486_v62 }
0x1528   :  { %v2351_v5 = vpop.f32.mrb[44].mxu0 }
0x1529   :  { %v2357_v35 = vmul.f32 0.17677669, %v2351_v5  ;;  %v5618_v36 = vpop.f32.mrb[45].mxu0 }
0x152a   :  { %v2354_v37 = vpop.f32.mrb[46].mxu0 }
0x152b   :  { %v5619_v25 = vpop.f32.mrb[47].mxu0  ;;  %v2358_v30 = vadd.f32 %v2357_v35, %v6808_v59 }
0x152d   :  { %v2359_v49 = vsel %vm962_vm7, %v2358_v30, -inf }
0x152e   :  { %2360 = vmax.xlane.f32.xlu0 %v2359_v49 }
0x1530   :  { %v2455_v57 = vpop.f32.mrb[48].mxu0 }
0x1531   :  { %v2461_v31 = vmul.f32 0.17677669, %v2455_v57  ;;  %v5630_v32 = vpop.f32.mrb[49].mxu0 }
0x1532   :  { %v2458_v53 = vpop.f32.mrb[50].mxu0 }
0x1533   :  { %v5631_v14 = vpop.f32.mrb[51].mxu0  ;;  %v2462_v58 = vadd.f32 %v2461_v31, %v6808_v59 }
0x1535   :  { %v2463_v10 = vsel %vm962_vm7, %v2462_v58, -inf }
0x1536   :  { %2464 = vmax.xlane.f32.xlu1 %v2463_v10 }
0x15bb   :  { %v2361_v61 = vpop.xlane.xlu0 %2360 }
0x15bc   :  { %v2362_v13 = vsub.f32 %v2358_v30, %v2361_v61 }
0x15be   :  { %v2363_v22 = vmul.f32 1.442695, %v2362_v13 }
0x15c0   :  { %6216 = vpow2.f32 %v2363_v22 }
0x15c3   :  { %v2465_v15 = vpop.xlane.xlu1 %2464 }
0x15c4   :  { %v2466_v16 = vsub.f32 %v2462_v58, %v2465_v15 }
0x15c6   :  { %v2467_v20 = vmul.f32 1.442695, %v2466_v16 }
0x15c8   :  { %6218 = vpow2.f32 %v2467_v20 }
0x15ca   :  { %v6217_v18 = vpop.eup %6216 }
0x15cb   :  { %v2365_v19 = vsel %vm962_vm7, %v6217_v18, 0.0 }
0x15cc   :  { %2366 = vadd.xlane.f32.xlu0 %v2365_v19 }
0x15d2   :  { %v6219_v8 = vpop.eup %6218 }
0x15d3   :  { %v2469_v21 = vsel %vm962_vm7, %v6219_v8, 0.0 }
0x15d4   :  { %2470 = vadd.xlane.f32.xlu0 %v2469_v21 }
0x15ea   :  { %2607 = vrot.lane.b32.xlu0 %v7041_v9, %s6482_s6 }
0x15f6   :  { %v2297_v24 = vpop.f32.mrb[60].mxu1 }
0x15f7   :  { %v7096_v5 = vadd.f32 %v2297_v24, %v7045_v6  ;;  %v2299_v35 = vpop.f32.mrb[61].mxu1 }
0x15f8   :  { %v7099_v36 = vadd.f32 %v2299_v35, %v7047_v50  ;;  %v2301_v37 = vpop.f32.mrb[62].mxu1 }
0x15f9   :  { %v2302_v25 = vpop.f32.mrb[63].mxu1 }
0x1659   :  { %v2367_v30 = vpop.xlane.xlu0 %2366 }
0x165a   :  { %6220 = vrcp.f32 %v2367_v30 }
0x1661   :  { %v2471_v49 = vpop.xlane.xlu0 %2470 }
0x1662   :  { %6222 = vrcp.f32 %v2471_v49 }
0x1664   :  { %v6221_v57 = vpop.eup %6220 }
0x1665   :  { %v2369_v31 = vmul.f32 %v6221_v57, %v6217_v18  ;;  %v2608_v15 = vpop.permute.xlu0 %2607 }
0x1667   :  { %v2370_v32 = vpack.c.bf16 %v2369_v31, %v2369_v31 }
0x1669   :  { %5623 = vmatmul.mubr.msk.bf16.vlgmr.msra.gmra.mrb[64].mxu1 %vm962_vm7, %v2370_v32 }
0x166a   :  { %5633 = vmatpush3.bf16.msra.mxu1 %v6489_v54  ;;  %5634 = vmatprep.mubr.msk.bf16.mxu1 %vm6487_vm5, %v6486_v62 }
0x166b   :  { %2566 = vmatprep.subr.bf16.mxu1 %v6832_v2 }
0x166c   :  { %v6223_v6 = vpop.eup %6222 }
0x166d   :  { %v2473_v50 = vmul.f32 %v6223_v6, %v6219_v8 }
0x166f   :  { %v2474_v53 = vpack.c.bf16 %v2473_v50, %v2473_v50 }
0x1671   :  { %5635 = vmatmul.mubr.msk.bf16.vlgmr.msra.gmra.mrb[68].mxu1 %vm962_vm7, %v2474_v53 }
0x1672   :  { %2567 = vmatpush1.bf16.msra.mxu1 %v6848_v41  ;;  %2598 = vmatprep.mubr.bf16.mxu1 %v6489_v54 }
0x1673   :  { %2568 = vmatprep.subr.bf16.mxu1 %v6850_v43 }
0x1676   :  { %2569 = vmatpush1.bf16.msra.mxu1 %v6854_v44 }
0x1677   :  { %5644 = vmatprep.subr.bf16.mxu1 %v6486_v62 }
0x173c   :  { %v2408_v14 = vpop.f32.mrb[64].mxu1 }
0x173d   :  { %v2414_v58 = vpack.c.bf16 %v2408_v14, %v2408_v14  ;;  %v5624_v10 = vpop.f32.mrb[65].mxu1 }
0x173e   :  { %v2411_v61 = vpop.f32.mrb[66].mxu1 }
0x173f   :  { %v5625_v2 = vpop.f32.mrb[67].mxu1  ;;  %5213 = vmatmul.mubr.msk.bf16.vlgmr.msra.gmra.mrb[72].mxu1 %vm913_vm6, %v2414_v58 }
0x1740   :  { %5645 = vmatpush3.bf16.msra.mxu1 %v6489_v54  ;;  %5646 = vmatprep.mubr.msk.bf16.mxu1 %vm6487_vm5, %v6486_v62 }
0x1741   :  { %5650 = vmatprep.subr.bf16.mxu1 %v6486_v62 }
0x1744   :  { %v2512_v41 = vpop.f32.mrb[68].mxu1 }
0x1745   :  { %v2518_v43 = vpack.c.bf16 %v2512_v41, %v2512_v41  ;;  %v5636_v13 = vpop.f32.mrb[69].mxu1 }
0x1746   :  { %v2515_v44 = vpop.f32.mrb[70].mxu1 }
0x1747   :  { %v5637_v22 = vpop.f32.mrb[71].mxu1  ;;  %5212 = vmatmul.mubr.msk.bf16.vlgmr.msra.gmra.mrb[52].mxu0 %vm913_vm6, %v2518_v43 }
0x1748   :  { %5639 = vmatpush3.bf16.xpose.msra.mxu0 %v7063_v17  ;;  %5640 = vmatprep.mubr.msk.bf16.mxu0 %vm6487_vm5, %v6486_v62 }
0x1749   :  { %2713 = vmatprep.subr.bf16.mxu0 %v6882_v27 }
0x174f   :  { %5641 = vmatmul.mubr.msk.bf16.vlgmr.msra.gmra.mrb[56].mxu0 %vm913_vm6, %v2608_v15 }
0x1750   :  { %2714 = vmatpush1.bf16.msra.mxu0 %v6880_v26  ;;  %2745 = vmatprep.mubr.bf16.mxu0 %v6489_v54 }
0x1751   :  { %2715 = vmatprep.subr.bf16.mxu0 %v6884_v28 }
0x1754   :  { %2716 = vmatpush1.bf16.msra.mxu0 %v6888_v29 }
0x1755   :  { %5656 = vmatprep.subr.bf16.mxu0 %v6486_v62 }
0x1812   :  { %v2600_v16 = vpop.f32.mrb[72].mxu1 }
0x1813   :  { %v2602_v20 = vpop.f32.mrb[73].mxu1 }
0x1814   :  { %v2604_v18 = vpop.f32.mrb[74].mxu1 }
0x1815   :  { %v2605_v19 = vpop.f32.mrb[75].mxu1 }
0x181a   :  { %v2556_v8 = vpop.f32.mrb[52].mxu0 }
0x181b   :  { %v7128_v21 = vadd.f32 %v2600_v16, %v2556_v8  ;;  %v2558_v27 = vpop.f32.mrb[53].mxu0 }
0x181c   :  { %v7130_v24 = vadd.f32 %v2602_v20, %v2558_v27  ;;  %v2560_v35 = vpop.f32.mrb[54].mxu0 }
0x181d   :  { %v2561_v26 = vpop.f32.mrb[55].mxu0 }
0x1822   :  { %v2646_v37 = vpop.f32.mrb[56].mxu0 }
0x1823   :  { %v2652_v25 = vmul.f32 0.17677669, %v2646_v37  ;;  %v5642_v30 = vpop.f32.mrb[57].mxu0 }
0x1824   :  { %v2649_v28 = vpop.f32.mrb[58].mxu0 }
0x1825   :  { %v5643_v49 = vpop.f32.mrb[59].mxu0  ;;  %v2653_v29 = vadd.f32 %v2652_v25, %v6808_v59 }
0x1827   :  { %v2654_v57 = vsel %vm962_vm7, %v2653_v29, -inf }
0x1828   :  { %2655 = vmax.xlane.f32.xlu0 %v2654_v57 }
0x18b5   :  { %v2656_v31 = vpop.xlane.xlu0 %2655 }
0x18b6   :  { %v2657_v32 = vsub.f32 %v2653_v29, %v2656_v31 }
0x18b8   :  { %v2658_v6 = vmul.f32 1.442695, %v2657_v32 }
0x18ba   :  { %6224 = vpow2.f32 %v2658_v6 }
0x18c4   :  { %v6225_v50 = vpop.eup %6224 }
0x18c5   :  { %v2660_v53 = vsel %vm962_vm7, %v6225_v50, 0.0 }
0x18c6   :  { %2661 = vadd.xlane.f32.xlu1 %v2660_v53 }
0x18d7   :  { %2756 = vrot.lane.b32.xlu1 %v7041_v9, %s6491_s2 }
0x1953   :  { %v2662_v14 = vpop.xlane.xlu1 %2661 }
0x1954   :  { %6226 = vrcp.f32 %v2662_v14 }
0x1957   :  { %v2757_v2 = vpop.permute.xlu1 %2756 }
0x195e   :  { %v6227_v58 = vpop.eup %6226 }
0x195f   :  { %v2664_v10 = vmul.f32 %v6227_v58, %v6225_v50 }
0x1961   :  { %v2665_v61 = vpack.c.bf16 %v2664_v10, %v2664_v10 }
0x1963   :  { %5647 = vmatmul.mubr.msk.bf16.vlgmr.msra.gmra.mrb[76].mxu1 %vm962_vm7, %v2665_v61 }
0x1964   :  { %5651 = vmatpush3.bf16.xpose.msra.mxu1 %v7063_v17  ;;  %5652 = vmatprep.mubr.msk.bf16.mxu1 %vm6487_vm5, %v6486_v62 }
0x1965   :  { %2862 = vmatprep.subr.bf16.mxu1 %v6911_v3 }
0x196b   :  { %5653 = vmatmul.mubr.msk.bf16.vlgmr.msra.gmra.mrb[80].mxu1 %vm913_vm6, %v2757_v2 }
0x196c   :  { %2863 = vmatpush1.bf16.msra.mxu1 %v6909_v63  ;;  %2894 = vmatprep.mubr.bf16.mxu1 %v6489_v54 }
0x196d   :  { %2864 = vmatprep.subr.bf16.mxu1 %v6913_v4 }
0x1970   :  { %2865 = vmatpush1.bf16.msra.mxu1 %v6917_v7 }
0x1971   :  { %5668 = vmatprep.subr.bf16.mxu1 %v6486_v62 }
0x1a36   :  { %v2703_v9 = vpop.f32.mrb[76].mxu1 }
0x1a37   :  { %v2709_v17 = vpack.c.bf16 %v2703_v9, %v2703_v9  ;;  %v5648_v41 = vpop.f32.mrb[77].mxu1 }
0x1a38   :  { %v2706_v43 = vpop.f32.mrb[78].mxu1 }
0x1a39   :  { %v5649_v13 = vpop.f32.mrb[79].mxu1  ;;  %5216 = vmatmul.mubr.msk.bf16.vlgmr.msra.gmra.mrb[60].mxu0 %vm913_vm6, %v2709_v17 }
0x1a3a   :  { %5657 = vmatpush3.bf16.msra.mxu0 %v6489_v54  ;;  %5658 = vmatprep.mubr.msk.bf16.mxu0 %vm6487_vm5, %v6486_v62 }
0x1a3b   :  { %5662 = vmatprep.subr.bf16.mxu0 %v6486_v62 }
0x1a3e   :  { %v2795_v63 = vpop.f32.mrb[80].mxu1 }
0x1a3f   :  { %v2801_v3 = vmul.f32 0.17677669, %v2795_v63  ;;  %v5654_v4 = vpop.f32.mrb[81].mxu1 }
0x1a40   :  { %v2798_v7 = vpop.f32.mrb[82].mxu1 }
0x1a41   :  { %v5655_v44 = vpop.f32.mrb[83].mxu1  ;;  %v2802_v22 = vadd.f32 %v2801_v3, %v6808_v59 }
0x1a43   :  { %v2803_v15 = vsel %vm962_vm7, %v2802_v22, -inf }
0x1a44   :  { %2804 = vmax.xlane.f32.xlu1 %v2803_v15 }
0x1ad1   :  { %v2805_v16 = vpop.xlane.xlu1 %2804 }
0x1ad2   :  { %v2806_v20 = vsub.f32 %v2802_v22, %v2805_v16 }
0x1ad4   :  { %v2807_v18 = vmul.f32 1.442695, %v2806_v20 }
0x1ad6   :  { %6228 = vpow2.f32 %v2807_v18 }
0x1ae0   :  { %v6229_v19 = vpop.eup %6228 }
0x1ae1   :  { %v2809_v8 = vsel %vm962_vm7, %v6229_v19, 0.0 }
0x1ae2   :  { %2810 = vadd.xlane.f32.xlu0 %v2809_v8 }
0x1af8   :  { %2906 = vrot.lane.b32.xlu0 %v7035_v60, %s6491_s2  ;;  %v7170_v60 = vpack.c.bf16 %v6792_v52, %v6792_v52 }
0x1b0c   :  { %v2747_v27 = vpop.f32.mrb[60].mxu0 }
0x1b0d   :  { %v2754_v35 = vadd.f32 %v2747_v27, %v7128_v21  ;;  %v2749_v26 = vpop.f32.mrb[61].mxu0 }
0x1b0e   :  { %v2755_v37 = vadd.f32 %v2749_v26, %v7130_v24  ;;  %v2751_v25 = vpop.f32.mrb[62].mxu0 }
0x1b0f   :  { %v2752_v30 = vpop.f32.mrb[63].mxu0 }
0x1b6f   :  { %v2811_v28 = vpop.xlane.xlu0 %2810 }
0x1b70   :  { %6230 = vrcp.f32 %v2811_v28 }
0x1b73   :  { %v2907_v57 = vpop.permute.xlu0 %2906 }
0x1b74   :  { %v7161_v32 = vsel %vm913_vm6, %v2907_v57, 0 }
0x1b7a   :  { %v6231_v49 = vpop.eup %6230 }
0x1b7b   :  { %v2813_v29 = vmul.f32 %v6231_v49, %v6229_v19 }
0x1b7d   :  { %v2814_v31 = vpack.c.bf16 %v2813_v29, %v2813_v29 }
0x1b7f   :  { %5659 = vmatmul.mubr.msk.bf16.vlgmr.msra.gmra.mrb[64].mxu0 %vm962_vm7, %v2814_v31 }
0x1b80   :  { %5663 = vmatpush3.bf16.xpose.msra.mxu0 %v7161_v32  ;;  %5664 = vmatprep.mubr.msk.bf16.mxu0 %vm6487_vm5, %v6486_v62 }
0x1b81   :  { %3015 = vmatprep.subr.bf16.mxu0 %v6950_v45 }
0x1b87   :  { %5665 = vmatmul.mubr.msk.bf16.vlgmr.msra.gmra.mrb[68].mxu0 %vm913_vm6, %v7170_v60 }
0x1b88   :  { %3016 = vmatpush1.bf16.msra.mxu0 %v6948_v42  ;;  %3047 = vmatprep.mubr.bf16.mxu0 %v6489_v54 }
0x1b89   :  { %3017 = vmatprep.subr.bf16.mxu0 %v6952_v46 }
0x1b8c   :  { %3018 = vmatpush1.bf16.msra.mxu0 %v6956_v47 }
0x1b8d   :  { %5680 = vmatprep.subr.bf16.mxu0 %v6486_v62 }
0x1c52   :  { %v2852_v21 = vpop.f32.mrb[64].mxu0 }
0x1c53   :  { %v2858_v24 = vpack.c.bf16 %v2852_v21, %v2852_v21  ;;  %v5660_v45 = vpop.f32.mrb[65].mxu0 }
0x1c54   :  { %v2855_v6 = vpop.f32.mrb[66].mxu0 }
0x1c55   :  { %v5661_v50 = vpop.f32.mrb[67].mxu0  ;;  %5219 = vmatmul.mubr.msk.bf16.vlgmr.msra.gmra.mrb[84].mxu1 %vm913_vm6, %v2858_v24 }
0x1c56   :  { %5669 = vmatpush3.bf16.msra.mxu1 %v6489_v54  ;;  %5670 = vmatprep.mubr.msk.bf16.mxu1 %vm6487_vm5, %v6486_v62 }
0x1c57   :  { %5674 = vmatprep.subr.bf16.mxu1 %v6486_v62 }
0x1c5a   :  { %v2948_v52 = vpop.f32.mrb[68].mxu0 }
0x1c5b   :  { %v2954_v42 = vmul.f32 0.17677669, %v2948_v52  ;;  %v5666_v46 = vpop.f32.mrb[69].mxu0 }
0x1c5c   :  { %v2951_v47 = vpop.f32.mrb[70].mxu0 }
0x1c5d   :  { %v5667_v53 = vpop.f32.mrb[71].mxu0  ;;  %v2955_v14 = vadd.f32 %v2954_v42, %v6808_v59 }
0x1c5f   :  { %v2956_v58 = vsel %vm962_vm7, %v2955_v14, -inf }
0x1c60   :  { %2957 = vmax.xlane.f32.xlu0 %v2956_v58 }
0x1ced   :  { %v2958_v10 = vpop.xlane.xlu0 %2957 }
0x1cee   :  { %v2959_v61 = vsub.f32 %v2955_v14, %v2958_v10 }
0x1cf0   :  { %v2960_v2 = vmul.f32 1.442695, %v2959_v61 }
0x1cf2   :  { %6232 = vpow2.f32 %v2960_v2 }
0x1cfc   :  { %v6233_v9 = vpop.eup %6232 }
0x1cfd   :  { %v2962_v17 = vsel %vm962_vm7, %v6233_v9, 0.0 }
0x1cfe   :  { %2963 = vadd.xlane.f32.xlu1 %v2962_v17 }
0x1d0f   :  { %3059 = vrot.lane.b32.xlu1 %v7170_v60, %s6490_s1 }
0x1d28   :  { %v2896_v41 = vpop.f32.mrb[84].mxu1 }
0x1d29   :  { %v2903_v43 = vadd.f32 %v2896_v41, %v2754_v35  ;;  %v2898_v13 = vpop.f32.mrb[85].mxu1 }
0x1d2a   :  { %v2904_v63 = vadd.f32 %v2898_v13, %v2755_v37  ;;  %v2900_v3 = vpop.f32.mrb[86].mxu1 }
0x1d2b   :  { %v2901_v4 = vpop.f32.mrb[87].mxu1 }
0x1d8b   :  { %v2964_v7 = vpop.xlane.xlu1 %2963 }
0x1d8c   :  { %6234 = vrcp.f32 %v2964_v7 }
0x1d8f   :  { %v3060_v16 = vpop.permute.xlu1 %3059 }
0x1d96   :  { %v6235_v44 = vpop.eup %6234 }
0x1d97   :  { %v2966_v22 = vmul.f32 %v6235_v44, %v6233_v9 }
0x1d99   :  { %v2967_v15 = vpack.c.bf16 %v2966_v22, %v2966_v22 }
0x1d9b   :  { %5671 = vmatmul.mubr.msk.bf16.vlgmr.msra.gmra.mrb[88].mxu1 %vm962_vm7, %v2967_v15 }
0x1d9c   :  { %5675 = vmatpush3.bf16.xpose.msra.mxu1 %v7161_v32  ;;  %5676 = vmatprep.mubr.msk.bf16.mxu1 %vm6487_vm5, %v6486_v62 }
0x1d9d   :  { %3165 = vmatprep.subr.bf16.mxu1 %v6979_v1 }
0x1da3   :  { %5677 = vmatmul.mubr.msk.bf16.vlgmr.msra.gmra.mrb[92].mxu1 %vm913_vm6, %v3060_v16 }
0x1da4   :  { %3166 = vmatpush1.bf16.msra.mxu1 %v6977_v0  ;;  %3197 = vmatprep.mubr.bf16.mxu1 %v6489_v54 }
0x1da5   :  { %3167 = vmatprep.subr.bf16.mxu1 %v6981_v38 }
0x1da8   :  { %3168 = vmatpush1.bf16.msra.mxu1 %v6985_v39 }
0x1da9   :  { %5692 = vmatprep.subr.bf16.mxu1 %v6486_v62 }
0x1e6e   :  { %v3005_v20 = vpop.f32.mrb[88].mxu1 }
0x1e6f   :  { %v3011_v18 = vpack.c.bf16 %v3005_v20, %v3005_v20  ;;  %v5672_v19 = vpop.f32.mrb[89].mxu1 }
0x1e70   :  { %v3008_v8 = vpop.f32.mrb[90].mxu1 }
0x1e71   :  { %v5673_v27 = vpop.f32.mrb[91].mxu1  ;;  %5222 = vmatmul.mubr.msk.bf16.vlgmr.msra.gmra.mrb[72].mxu0 %vm913_vm6, %v3011_v18 }
0x1e72   :  { %5681 = vmatpush3.bf16.msra.mxu0 %v6489_v54  ;;  %5682 = vmatprep.mubr.msk.bf16.mxu0 %vm6487_vm5, %v6486_v62 }
0x1e73   :  { %5686 = vmatprep.subr.bf16.mxu0 %v6486_v62 }
0x1e76   :  { %v3098_v0 = vpop.f32.mrb[92].mxu1 }
0x1e77   :  { %v3104_v1 = vmul.f32 0.17677669, %v3098_v0  ;;  %v5678_v38 = vpop.f32.mrb[93].mxu1 }
0x1e78   :  { %v3101_v39 = vpop.f32.mrb[94].mxu1 }
0x1e79   :  { %v5679_v35 = vpop.f32.mrb[95].mxu1  ;;  %v3105_v26 = vadd.f32 %v3104_v1, %v6808_v59 }
0x1e7b   :  { %v3106_v37 = vsel %vm962_vm7, %v3105_v26, -inf }
0x1e7c   :  { %3107 = vmax.xlane.f32.xlu1 %v3106_v37  ;;  %v3506_v37 = vld [vmem:[%s7731_s11] sm:$0x3]  ;;  %s7742_s11 = sld [smem:[#allocation21_spill]] }
0x1f09   :  { %v3108_v25 = vpop.xlane.xlu1 %3107 }
0x1f0a   :  { %v3109_v30 = vsub.f32 %v3105_v26, %v3108_v25 }
0x1f0c   :  { %v3110_v28 = vmul.f32 1.442695, %v3109_v30 }
0x1f0e   :  { %6236 = vpow2.f32 %v3110_v28 }
0x1f18   :  { %v6237_v49 = vpop.eup %6236 }
0x1f19   :  { %v3112_v29 = vsel %vm962_vm7, %v6237_v49, 0.0 }
0x1f1a   :  { %3113 = vadd.xlane.f32.xlu0 %v3112_v29  ;;  %v6284_v29 = vld [vmem:[%s7741_s26] sm:$0xff] }
0x1f30   :  { %3208 = vrot.lane.b32.xlu0 %v7170_v60, %s6482_s6 }
0x1f44   :  { %v3049_v57 = vpop.f32.mrb[72].mxu0 }
0x1f45   :  { %v3056_v31 = vadd.f32 %v3049_v57, %v2903_v43  ;;  %v3051_v21 = vpop.f32.mrb[73].mxu0 }
0x1f46   :  { %v3057_v24 = vadd.f32 %v3051_v21, %v2904_v63  ;;  %v3053_v45 = vpop.f32.mrb[74].mxu0 }
0x1f47   :  { %v3054_v6 = vpop.f32.mrb[75].mxu0 }
0x1fa7   :  { %v3114_v50 = vpop.xlane.xlu0 %3113 }
0x1fa8   :  { %6238 = vrcp.f32 %v3114_v50 }
0x1fab   :  { %v3209_v47 = vpop.permute.xlu0 %3208 }
0x1fb2   :  { %v6239_v52 = vpop.eup %6238 }
0x1fb3   :  { %v3116_v42 = vmul.f32 %v6239_v52, %v6237_v49 }
0x1fb5   :  { %v3117_v46 = vpack.c.bf16 %v3116_v42, %v3116_v42 }
0x1fb7   :  { %5683 = vmatmul.mubr.msk.bf16.vlgmr.msra.gmra.mrb[76].mxu0 %vm962_vm7, %v3117_v46 }
0x1fb8   :  { %5687 = vmatpush3.bf16.xpose.msra.mxu0 %v7161_v32  ;;  %5688 = vmatprep.mubr.msk.bf16.mxu0 %vm6487_vm5, %v6486_v62 }
0x1fb9   :  { %3314 = vmatprep.subr.bf16.mxu0 %v7008_v34 }
0x1fbf   :  { %5689 = vmatmul.mubr.msk.bf16.vlgmr.msra.gmra.mrb[80].mxu0 %vm913_vm6, %v3209_v47 }
0x1fc0   :  { %3315 = vmatpush1.bf16.msra.mxu0 %v7006_v33  ;;  %3346 = vmatprep.mubr.bf16.mxu0 %v6489_v54 }
0x1fc1   :  { %3316 = vmatprep.subr.bf16.mxu0 %v7010_v56 }
0x1fc4   :  { %3317 = vmatpush1.bf16.msra.mxu0 %v7014_v48 }
0x1fc5   :  { %5704 = vmatprep.subr.bf16.mxu0 %v6486_v62 }
0x208a   :  { %v3155_v53 = vpop.f32.mrb[76].mxu0 }
0x208b   :  { %v3161_v14 = vpack.c.bf16 %v3155_v53, %v3155_v53  ;;  %v5684_v58 = vpop.f32.mrb[77].mxu0 }
0x208c   :  { %v3158_v10 = vpop.f32.mrb[78].mxu0 }
0x208d   :  { %v5685_v61 = vpop.f32.mrb[79].mxu0  ;;  %5225 = vmatmul.mubr.msk.bf16.vlgmr.msra.gmra.mrb[96].mxu1 %vm913_vm6, %v3161_v14 }
0x208e   :  { %5693 = vmatpush3.bf16.msra.mxu1 %v6489_v54  ;;  %5694 = vmatprep.mubr.msk.bf16.mxu1 %vm6487_vm5, %v6486_v62 }
0x208f   :  { %5698 = vmatprep.subr.bf16.mxu1 %v6486_v62 }
0x2092   :  { %v3247_v33 = vpop.f32.mrb[80].mxu0 }
0x2093   :  { %v3253_v34 = vmul.f32 0.17677669, %v3247_v33  ;;  %v5690_v56 = vpop.f32.mrb[81].mxu0 }
0x2094   :  { %v3250_v48 = vpop.f32.mrb[82].mxu0 }
0x2095   :  { %v5691_v2 = vpop.f32.mrb[83].mxu0  ;;  %v3254_v9 = vadd.f32 %v3253_v34, %v6808_v59 }
0x2097   :  { %v3255_v17 = vsel %vm962_vm7, %v3254_v9, -inf }
0x2098   :  { %3256 = vmax.xlane.f32.xlu0 %v3255_v17  ;;  %v5894_v17 = vld [vmem:[%s7733_s13 + $0x4] ss:$16 sps:$4 sm:$0xff]  }
0x2125   :  { %v3257_v41 = vpop.xlane.xlu0 %3256 }
0x2126   :  { %v3258_v43 = vsub.f32 %v3254_v9, %v3257_v41  ;;  %v5892_v9 = vld [vmem:[%s7733_s13] ss:$16 sps:$4 sm:$0xff]   ;;  %v5895_v41 = vld [vmem:[%s7733_s13 + $0x8] ss:$16 sps:$4 sm:$0xff]  }
0x2128   :  { %v3259_v13 = vmul.f32 1.442695, %v3258_v43  ;;  %v5897_v43 = vld [vmem:[%s7733_s13 + $0xc] ss:$16 sps:$4 sm:$0xff]  }
0x212a   :  { %6240 = vpow2.f32 %v3259_v13  ;;  %v5900_v13 = vld [vmem:[%s7733_s13 + $0x24] ss:$16 sps:$4 sm:$0xff]  }
0x2134   :  { %v6241_v63 = vpop.eup %6240 }
0x2135   :  { %v3261_v3 = vsel %vm962_vm7, %v6241_v63, 0.0 }
0x2136   :  { %3262 = vadd.xlane.f32.xlu1 %v3261_v3  ;;  %v5898_v3 = vld [vmem:[%s7733_s13 + $0x20] ss:$16 sps:$4 sm:$0xff]  }
0x2147   :  { %3357 = vrot.lane.b32.xlu1 %v7170_v60, %s6491_s2 }
0x2160   :  { %v3199_v4 = vpop.f32.mrb[96].mxu1 }
0x2161   :  { %v3206_v7 = vadd.f32 %v3199_v4, %v3056_v31  ;;  %v3201_v44 = vpop.f32.mrb[97].mxu1  ;;  %v6285_v31 = vld [vmem:[%s7741_s26 + $0x8] sm:$0xff] }
0x2162   :  { %v3207_v22 = vadd.f32 %v3201_v44, %v3057_v24  ;;  %v3203_v15 = vpop.f32.mrb[98].mxu1  ;;  %v5901_v4 = vld [vmem:[%s7733_s13 + $0x28] ss:$16 sps:$4 sm:$0xff]   ;;  %v5909_v44 = vld [vmem:[%s7733_s13 + $0x4c] ss:$16 sps:$4 sm:$0xff]  }
0x2163   :  { %v3204_v16 = vpop.f32.mrb[99].mxu1  ;;  %v5907_v15 = vld [vmem:[%s7733_s13 + $0x48] ss:$16 sps:$4 sm:$0xff]  }
0x2164   :  { %v5912_v16 = vld [vmem:[%s7733_s13 + $0x64] ss:$16 sps:$4 sm:$0xff]  }
0x21c3   :  { %v3263_v20 = vpop.xlane.xlu1 %3262 }
0x21c4   :  { %6242 = vrcp.f32 %v3263_v20  ;;  %v5915_v20 = vld [vmem:[%s7733_s13 + $0x6c] ss:$16 sps:$4 sm:$0xff]  }
0x21c7   :  { %v3358_v60 = vpop.permute.xlu1 %3357 }
0x21ce   :  { %v6243_v18 = vpop.eup %6242 }
0x21cf   :  { %v3265_v19 = vmul.f32 %v6243_v18, %v6241_v63  ;;  %v5903_v63 = vld [vmem:[%s7733_s13 + $0x2c] ss:$16 sps:$4 sm:$0xff]   ;;  %v5910_v18 = vld [vmem:[%s7733_s13 + $0x60] ss:$16 sps:$4 sm:$0xff]  }
0x21d1   :  { %v3266_v8 = vpack.c.bf16 %v3265_v19, %v3265_v19  ;;  %v5913_v19 = vld [vmem:[%s7733_s13 + $0x68] ss:$16 sps:$4 sm:$0xff]  }
0x21d3   :  { %5695 = vmatmul.mubr.msk.bf16.vlgmr.msra.gmra.mrb[100].mxu1 %vm962_vm7, %v3266_v8  ;;  %v5918_v8 = vld [vmem:[%s7733_s13 + $0x84] ss:$16 sps:$4 sm:$0xff]  }
0x21d4   :  { %5699 = vmatpush3.bf16.xpose.msra.mxu1 %v7161_v32  ;;  %5700 = vmatprep.mubr.msk.bf16.mxu1 %vm6487_vm5, %v6486_v62 }
0x21d5   :  { %3463 = vmatprep.subr.bf16.mxu1 %v7051_v40 }
0x21db   :  { %5701 = vmatmul.mubr.msk.bf16.vlgmr.msra.gmra.mrb[104].mxu1 %vm913_vm6, %v3358_v60  ;;  %v5921_v60 = vld [vmem:[%s7733_s13 + $0x8c] ss:$16 sps:$4 sm:$0xff]  }
0x21dc   :  { %3464 = vmatpush1.bf16.msra.mxu1 %v7049_v23  ;;  %3495 = vmatprep.mubr.bf16.mxu1 %v6489_v54 }
0x21dd   :  { %3465 = vmatprep.subr.bf16.mxu1 %v7053_v55 }
0x21e0   :  { %3466 = vmatpush1.bf16.msra.mxu1 %v7057_v51 }
0x21e1   :  { %4003 = vmatprep.subr.bf16.mxu1 %v5897_v43  ;;  %v5966_v43 = vld [vmem:[%s7733_s13 + $0x184] ss:$16 sps:$4 sm:$0xff]  }
0x22a6   :  { %v3304_v27 = vpop.f32.mrb[100].mxu1 }
0x22a7   :  { %v3310_v0 = vpack.c.bf16 %v3304_v27, %v3304_v27  ;;  %v5696_v1 = vpop.f32.mrb[101].mxu1  ;;  %v5916_v27 = vld [vmem:[%s7733_s13 + $0x80] ss:$16 sps:$4 sm:$0xff]  }
0x22a8   :  { %v3307_v32 = vpop.f32.mrb[102].mxu1  ;;  %v5924_v1 = vld [vmem:[%s7733_s13 + $0xa4] ss:$16 sps:$4 sm:$0xff]  }
0x22a9   :  { %v5697_v38 = vpop.f32.mrb[103].mxu1  ;;  %5228 = vmatmul.mubr.msk.bf16.vlgmr.msra.gmra.mrb[84].mxu0 %vm913_vm6, %v3310_v0  ;;  %v5919_v0 = vld [vmem:[%s7733_s13 + $0x88] ss:$16 sps:$4 sm:$0xff]   ;;  %v5927_v32 = vld [vmem:[%s7733_s13 + $0xac] ss:$16 sps:$4 sm:$0xff]  }
0x22aa   :  { %5705 = vmatpush3.bf16.msra.mxu0 %v6489_v54  ;;  %5706 = vmatprep.mubr.msk.bf16.mxu0 %vm6487_vm5, %v6486_v62  ;;  %v7251_v54 = vrot.slane %v3506_v37, %v6732_v12  ;;  %v7254_v62 = vrot.slane %v3506_v37, %v6729_v11  ;;  %v5922_v38 = vld [vmem:[%s7733_s13 + $0xa0] ss:$16 sps:$4 sm:$0xff]  }
0x22ab   :  { %3960 = vmatprep.subr.bf16.mxu0 %v5894_v17  ;;  %v5934_v37 = vld [vmem:[%s7733_s13 + $0xe0] ss:$16 sps:$4 sm:$0xff]  }
0x22ac   :  { %v3519_v49 = vadd.f32 %v7254_v62, %v7099_v36  ;;  %v5958_v17 = vld [vmem:[%s7733_s13 + $0x160] ss:$16 sps:$4 sm:$0xff]  }
0x22ae   :  { %v3396_v40 = vpop.f32.mrb[104].mxu1  ;;  %v7268_v21 = vadd.f32 %v6285_v31, %v3519_v49  ;;  %v5943_v49 = vld [vmem:[%s7733_s13 + $0x108] ss:$16 sps:$4 sm:$0xff]   ;;  %v5951_v31 = vld [vmem:[%s7733_s13 + $0x12c] ss:$16 sps:$4 sm:$0xff]  }
0x22af   :  { %v3402_v23 = vmul.f32 0.17677669, %v3396_v40  ;;  %v5702_v39 = vpop.f32.mrb[105].mxu1  ;;  %v5925_v40 = vld [vmem:[%s7733_s13 + $0xa8] ss:$16 sps:$4 sm:$0xff]  }
0x22b0   :  { %v3399_v35 = vpop.f32.mrb[106].mxu1  ;;  %v5933_v39 = vld [vmem:[%s7733_s13 + $0xcc] ss:$16 sps:$4 sm:$0xff]  }
0x22b1   :  { %v5703_v26 = vpop.f32.mrb[107].mxu1  ;;  %v3403_v55 = vadd.f32 %v3402_v23, %v6808_v59  ;;  %v3518_v59 = vadd.f32 %v7251_v54, %v7096_v5  ;;  %v3528_v5 = vmul.f32 %v7268_v21, %v7268_v21  ;;  %v5930_v23 = vld [vmem:[%s7733_s13 + $0xc4] ss:$16 sps:$4 sm:$0xff]   ;;  %v5928_v35 = vld [vmem:[%s7733_s13 + $0xc0] ss:$16 sps:$4 sm:$0xff]  }
0x22b2   :  { %v5931_v26 = vld [vmem:[%s7733_s13 + $0xc8] ss:$16 sps:$4 sm:$0xff]  }
0x22b3   :  { %v3404_v51 = vsel %vm962_vm7, %v3403_v55, -inf  ;;  %v7263_v57 = vadd.f32 %v6284_v29, %v3518_v59  ;;  %v5940_v59 = vld [vmem:[%s7733_s13 + $0x100] ss:$16 sps:$4 sm:$0xff]   ;;  %v5948_v29 = vld [vmem:[%s7733_s13 + $0x124] ss:$16 sps:$4 sm:$0xff]  }
0x22b4   :  { %3405 = vmax.xlane.f32.xlu1 %v3404_v51  ;;  %v5939_v51 = vld [vmem:[%s7733_s13 + $0xec] ss:$16 sps:$4 sm:$0xff]  }
0x22b5   :  { %v3527_v45 = vmul.f32 %v7263_v57, %v7263_v57 }
0x22b7   :  { %v3531_v6 = vadd.f32 %v3528_v5, %v3527_v45  ;;  %v5949_v45 = vld [vmem:[%s7733_s13 + $0x128] ss:$16 sps:$4 sm:$0xff]  }
0x2341   :  { %v3406_v25 = vpop.xlane.xlu1 %3405 }
0x2342   :  { %v3407_v30 = vsub.f32 %v3403_v55, %v3406_v25  ;;  %v5936_v55 = vld [vmem:[%s7733_s13 + $0xe4] ss:$16 sps:$4 sm:$0xff]   ;;  %v5937_v25 = vld [vmem:[%s7733_s13 + $0xe8] ss:$16 sps:$4 sm:$0xff]  }
0x2344   :  { %v3408_v28 = vmul.f32 1.442695, %v3407_v30  ;;  %v5942_v30 = vld [vmem:[%s7733_s13 + $0x104] ss:$16 sps:$4 sm:$0xff]  }
0x2346   :  { %6244 = vpow2.f32 %v3408_v28  ;;  %v5945_v28 = vld [vmem:[%s7733_s13 + $0x10c] ss:$16 sps:$4 sm:$0xff]  }
0x2350   :  { %v6245_v24 = vpop.eup %6244 }
0x2351   :  { %v3410_v36 = vsel %vm962_vm7, %v6245_v24, 0.0 }
0x2352   :  { %3411 = vadd.xlane.f32.xlu0 %v3410_v36 }
0x2356   :  { %3532 = vadd.xlane.f32.xlu0 %v3531_v6 }
0x237c   :  { %v3348_v50 = vpop.f32.mrb[84].mxu0 }
0x237d   :  { %v7275_v52 = vadd.f32 %v3348_v50, %v3206_v7  ;;  %v3350_v42 = vpop.f32.mrb[85].mxu0  ;;  %v5906_v7 = vld [vmem:[%s7733_s13 + $0x44] ss:$16 sps:$4 sm:$0xff]  }
0x237e   :  { %v7277_v46 = vadd.f32 %v3350_v42, %v3207_v22  ;;  %v3352_v47 = vpop.f32.mrb[86].mxu0  ;;  %v5904_v22 = vld [vmem:[%s7733_s13 + $0x40] ss:$16 sps:$4 sm:$0xff]  }
0x237f   :  { %v3353_v53 = vpop.f32.mrb[87].mxu0 }
0x23df   :  { %v3412_v14 = vpop.xlane.xlu0 %3411 }
0x23e0   :  { %6246 = vrcp.f32 %v3412_v14 }
0x23ea   :  { %v6247_v58 = vpop.eup %6246 }
0x23eb   :  { %v3414_v10 = vmul.f32 %v6247_v58, %v6245_v24  ;;  %v5946_v24 = vld [vmem:[%s7733_s13 + $0x120] ss:$16 sps:$4 sm:$0xff]  }
0x23ec   :  { %v6286_v58 = vld [vmem:[%s7741_s26 + $0x10] sm:$0xff] }
0x23ed   :  { %v3415_v61 = vpack.c.bf16 %v3414_v10, %v3414_v10 }
0x23ef   :  { %5707 = vmatmul.mubr.msk.bf16.vlgmr.msra.gmra.mrb[88].mxu0 %vm962_vm7, %v3415_v61  ;;  %v6287_v61 = vld [vmem:[%s7741_s26 + $0x18] sm:$0xff] }
0x23f0   :  { %3961 = vmatpush1.bf16.msra.mxu0 %v5892_v9  ;;  %v5963_v9 = vld [vmem:[%s7733_s13 + $0x16c] ss:$16 sps:$4 sm:$0xff]  }
0x23f1   :  { %3962 = vmatprep.subr.bf16.mxu0 %v5900_v13  ;;  %v5969_v13 = vld [vmem:[%s7733_s13 + $0x18c] ss:$16 sps:$4 sm:$0xff]  }
0x23f4   :  { %3963 = vmatpush1.bf16.msra.mxu0 %v5898_v3  ;;  %v5967_v3 = vld [vmem:[%s7733_s13 + $0x188] ss:$16 sps:$4 sm:$0xff]  }
0x23f5   :  { %3964 = vmatprep.subr.bf16.mxu0 %v5906_v7  ;;  %v5975_v7 = vld [vmem:[%s7733_s13 + $0x1ac] ss:$16 sps:$4 sm:$0xff]  }
0x23f8   :  { %3965 = vmatpush1.bf16.msra.mxu0 %v5904_v22  ;;  %v5973_v22 = vld [vmem:[%s7733_s13 + $0x1a8] ss:$16 sps:$4 sm:$0xff]  }
0x23f9   :  { %3966 = vmatprep.subr.bf16.mxu0 %v5912_v16  ;;  %v5978_v16 = vld [vmem:[%s7733_s13 + $0x1c4] ss:$16 sps:$4 sm:$0xff]  }
0x23fc   :  { %3967 = vmatpush1.bf16.msra.mxu0 %v5910_v18  ;;  %v5981_v18 = vld [vmem:[%s7733_s13 + $0x1cc] ss:$16 sps:$4 sm:$0xff]  }
0x23fd   :  { %3968 = vmatprep.subr.bf16.mxu0 %v5918_v8  ;;  %v5987_v8 = vld [vmem:[%s7733_s13 + $0x1ec] ss:$16 sps:$4 sm:$0xff]  }
0x2400   :  { %3969 = vmatpush1.bf16.msra.mxu0 %v5916_v27  ;;  %v5985_v27 = vld [vmem:[%s7733_s13 + $0x1e8] ss:$16 sps:$4 sm:$0xff]  }
0x2401   :  { %3970 = vmatprep.subr.bf16.mxu0 %v5924_v1  ;;  %v5993_v1 = vld [vmem:[%s7734_s14 + $0xc] ss:$16 sps:$4 sm:$0xff]  }
0x2404   :  { %3971 = vmatpush1.bf16.msra.mxu0 %v5922_v38 }
0x2405   :  { %3972 = vmatprep.subr.bf16.mxu0 %v5930_v23 }
0x2408   :  { %3973 = vmatpush1.bf16.msra.mxu0 %v5928_v35 }
0x2409   :  { %3974 = vmatprep.subr.bf16.mxu0 %v5936_v55 }
0x240c   :  { %3975 = vmatpush1.bf16.msra.mxu0 %v5934_v37 }
0x240d   :  { %3976 = vmatprep.subr.bf16.mxu0 %v5942_v30 }
0x2410   :  { %3977 = vmatpush1.bf16.msra.mxu0 %v5940_v59 }
0x2411   :  { %3978 = vmatprep.subr.bf16.mxu0 %v5948_v29 }
0x2414   :  { %3979 = vmatpush1.bf16.msra.mxu0 %v5946_v24 }
0x24c2   :  { %v3453_v33 = vpop.f32.mrb[88].mxu0 }
0x24c3   :  { %v3459_v34 = vpack.c.bf16 %v3453_v33, %v3453_v33  ;;  %v5708_v56 = vpop.f32.mrb[89].mxu0 }
0x24c4   :  { %v3456_v48 = vpop.f32.mrb[90].mxu0  ;;  %v5952_v56 = vld [vmem:[%s7733_s13 + $0x140] ss:$16 sps:$4 sm:$0xff]  }
0x24c5   :  { %v5709_v2 = vpop.f32.mrb[91].mxu0  ;;  %5231 = vmatmul.mubr.msk.bf16.vlgmr.msra.gmra.mrb[108].mxu1 %vm913_vm6, %v3459_v34  ;;  %v5957_v34 = vld [vmem:[%s7733_s13 + $0x14c] ss:$16 sps:$4 sm:$0xff]   ;;  %v5955_v48 = vld [vmem:[%s7733_s13 + $0x148] ss:$16 sps:$4 sm:$0xff]  }
0x24c6   :  { %4004 = vmatpush1.bf16.msra.mxu1 %v5895_v41  ;;  %v5960_v2 = vld [vmem:[%s7733_s13 + $0x164] ss:$16 sps:$4 sm:$0xff]   ;;  %v5961_v41 = vld [vmem:[%s7733_s13 + $0x168] ss:$16 sps:$4 sm:$0xff]  }
0x24c7   :  { %4005 = vmatprep.subr.bf16.mxu1 %v5903_v63  ;;  %v5964_v63 = vld [vmem:[%s7733_s13 + $0x180] ss:$16 sps:$4 sm:$0xff]  }
0x24ca   :  { %4006 = vmatpush1.bf16.msra.mxu1 %v5901_v4  ;;  %v5972_v4 = vld [vmem:[%s7733_s13 + $0x1a4] ss:$16 sps:$4 sm:$0xff]  }
0x24cb   :  { %4007 = vmatprep.subr.bf16.mxu1 %v5909_v44  ;;  %v5970_v44 = vld [vmem:[%s7733_s13 + $0x1a0] ss:$16 sps:$4 sm:$0xff]  }
0x24ce   :  { %4008 = vmatpush1.bf16.msra.mxu1 %v5907_v15  ;;  %v5976_v15 = vld [vmem:[%s7733_s13 + $0x1c0] ss:$16 sps:$4 sm:$0xff]  }
0x24cf   :  { %4009 = vmatprep.subr.bf16.mxu1 %v5915_v20  ;;  %v5979_v20 = vld [vmem:[%s7733_s13 + $0x1c8] ss:$16 sps:$4 sm:$0xff]  }
0x24d2   :  { %4010 = vmatpush1.bf16.msra.mxu1 %v5913_v19  ;;  %v5984_v19 = vld [vmem:[%s7733_s13 + $0x1e4] ss:$16 sps:$4 sm:$0xff]  }
0x24d3   :  { %4011 = vmatprep.subr.bf16.mxu1 %v5921_v60  ;;  %v5982_v60 = vld [vmem:[%s7733_s13 + $0x1e0] ss:$16 sps:$4 sm:$0xff]  }
0x24d6   :  { %4012 = vmatpush1.bf16.msra.mxu1 %v5919_v0  ;;  %v5990_v0 = vld [vmem:[%s7734_s14 + $0x4] ss:$16 sps:$4 sm:$0xff]  }
0x24d7   :  { %4013 = vmatprep.subr.bf16.mxu1 %v5927_v32  ;;  %v3533_v32 = vpop.xlane.xlu0 %3532 }
0x24d8   :  { %v3537_v38 = vmul.f32 0.00390625, %v3533_v32  ;;  %v6041_v32 = vld [vmem:[%s7734_s14 + $0x10c] ss:$16 sps:$4 sm:$0xff]  }
0x24da   :  { %4014 = vmatpush1.bf16.msra.mxu1 %v5925_v40  ;;  %v3539_v40 = vadd.f32 1e-05, %v3537_v38  ;;  %v6036_v38 = vld [vmem:[%s7734_s14 + $0x100] ss:$16 sps:$4 sm:$0xff]  }
0x24db   :  { %4015 = vmatprep.subr.bf16.mxu1 %v5933_v39 }
0x24dc   :  { %6248 = vrsqrt.f32 %v3539_v40  ;;  %vm3543_vm8 = vcmp.eq.f32.partialorder %v3539_v40, inf  ;;  %v3546_v37 = vand.u32 2147483648, %v3539_v40  ;;  %vm3545_vm9 = vcmp.eq.f32.partialorder %v3539_v40, 0.0 }
0x24de   :  { %4016 = vmatpush1.bf16.msra.mxu1 %v5931_v26 }
0x24df   :  { %4017 = vmatprep.subr.bf16.mxu1 %v5939_v51 }
0x24e2   :  { %4018 = vmatpush1.bf16.msra.mxu1 %v5937_v25  ;;  %v3526_v25 = vld [vmem:[#allocation12] sm:$0x3] }
0x24e3   :  { %4019 = vmatprep.subr.bf16.mxu1 %v5945_v28  ;;  %v3567_v29 = vrot.slane %v3526_v25, %v6729_v11  ;;  %v5988_v11 = vld [vmem:[%s7734_s14] ss:$16 sps:$4 sm:$0xff]  }
0x24e6   :  { %4020 = vmatpush1.bf16.msra.mxu1 %v5943_v49  ;;  %v6249_v26 = vpop.eup %6248 }
0x24e7   :  { %4021 = vmatprep.subr.bf16.mxu1 %v5951_v31  ;;  %v3542_v55 = vmul.f32 %v6249_v26, %v3539_v40  ;;  %v3563_v31 = vrot.slane %v3526_v25, %v6732_v12  ;;  %v5991_v12 = vld [vmem:[%s7734_s14 + $0x8] ss:$16 sps:$4 sm:$0xff]  }
0x24e8   :  { %v6045_v26 = vld [vmem:[%s7734_s14 + $0x128] ss:$16 sps:$4 sm:$0xff]  }
0x24e9   :  { %v3544_v51 = vsel %vm3543_vm8, %v3539_v40, %v3542_v55  ;;  %v6039_v40 = vld [vmem:[%s7734_s14 + $0x108] ss:$16 sps:$4 sm:$0xff]   ;;  %v6050_v55 = vld [vmem:[%s7734_s14 + $0x144] ss:$16 sps:$4 sm:$0xff]  }
0x24ea   :  { %4022 = vmatpush1.bf16.msra.mxu1 %v5949_v45  ;;  %v3547_v28 = vsel %vm3545_vm9, %v3546_v37, %v3544_v51  ;;  %v6053_v51 = vld [vmem:[%s7734_s14 + $0x14c] ss:$16 sps:$4 sm:$0xff]   ;;  %v6048_v37 = vld [vmem:[%s7734_s14 + $0x140] ss:$16 sps:$4 sm:$0xff]   ;;  %v6051_v25 = vld [vmem:[%s7734_s14 + $0x148] ss:$16 sps:$4 sm:$0xff]  }
0x24eb   :  { %4023 = vmatprep.subr.bf16.mxu1 %v5957_v34  ;;  %v3556_v45 = vmul.f32 %v3547_v28, %v7268_v21  ;;  %v6002_v34 = vld [vmem:[%s7734_s14 + $0x44] ss:$16 sps:$4 sm:$0xff]  }
0x24ee   :  { %4024 = vmatpush1.bf16.msra.mxu1 %v5955_v48  ;;  %v6000_v48 = vld [vmem:[%s7734_s14 + $0x40] ss:$16 sps:$4 sm:$0xff]  }
0x24ef   :  { %4025 = vmatprep.subr.bf16.mxu1 %v5963_v9  ;;  %v6008_v9 = vld [vmem:[%s7734_s14 + $0x64] ss:$16 sps:$4 sm:$0xff]  }
0x24f2   :  { %4026 = vmatpush1.bf16.msra.mxu1 %v5961_v41  ;;  %v6006_v41 = vld [vmem:[%s7734_s14 + $0x60] ss:$16 sps:$4 sm:$0xff]  }
0x24f3   :  { %4027 = vmatprep.subr.bf16.mxu1 %v5969_v13  ;;  %v6014_v13 = vld [vmem:[%s7734_s14 + $0x84] ss:$16 sps:$4 sm:$0xff]  }
0x24f6   :  { %4028 = vmatpush1.bf16.msra.mxu1 %v5967_v3  ;;  %v6012_v3 = vld [vmem:[%s7734_s14 + $0x80] ss:$16 sps:$4 sm:$0xff]  }
0x24f7   :  { %4029 = vmatprep.subr.bf16.mxu1 %v5975_v7  ;;  %v6020_v7 = vld [vmem:[%s7734_s14 + $0xa4] ss:$16 sps:$4 sm:$0xff]  }
0x24fa   :  { %4030 = vmatpush1.bf16.msra.mxu1 %v5973_v22  ;;  %v6018_v22 = vld [vmem:[%s7734_s14 + $0xa0] ss:$16 sps:$4 sm:$0xff]  }
0x24fb   :  { %4031 = vmatprep.subr.bf16.mxu1 %v5981_v18  ;;  %v6024_v18 = vld [vmem:[%s7734_s14 + $0xc0] ss:$16 sps:$4 sm:$0xff]  }
0x24fe   :  { %4032 = vmatpush1.bf16.msra.mxu1 %v5979_v20  ;;  %v6029_v20 = vld [vmem:[%s7734_s14 + $0xcc] ss:$16 sps:$4 sm:$0xff]  }
0x24ff   :  { %4033 = vmatprep.subr.bf16.mxu1 %v5987_v8  ;;  %v6032_v8 = vld [vmem:[%s7734_s14 + $0xe4] ss:$16 sps:$4 sm:$0xff]  }
0x2502   :  { %4034 = vmatpush1.bf16.msra.mxu1 %v5985_v27  ;;  %v6030_v27 = vld [vmem:[%s7734_s14 + $0xe0] ss:$16 sps:$4 sm:$0xff]  }
0x2503   :  { %4473 = vmatprep.subr.bf16.mxu1 %v5993_v1  ;;  %v6038_v1 = vld [vmem:[%s7734_s14 + $0x104] ss:$16 sps:$4 sm:$0xff]  }
0x2598   :  { %v3497_v5 = vpop.f32.mrb[108].mxu1 }
0x2599   :  { %v3504_v36 = vadd.f32 %v3497_v5, %v7275_v52  ;;  %v3499_v6 = vpop.f32.mrb[109].mxu1  ;;  %v3555_v5 = vmul.f32 %v3547_v28, %v7263_v57  ;;  %v6059_v28 = vld [vmem:[%s7734_s14 + $0x16c] ss:$16 sps:$4 sm:$0xff]  }
0x259a   :  { %v3505_v50 = vadd.f32 %v3499_v6, %v7277_v46  ;;  %v3501_v42 = vpop.f32.mrb[110].mxu1 }
0x259b   :  { %v3520_v47 = vadd.f32 %v7251_v54, %v3504_v36  ;;  %v3502_v53 = vpop.f32.mrb[111].mxu1  ;;  %v3571_v42 = vmul.f32 %v3567_v29, %v3556_v45  ;;  %v6063_v45 = vld [vmem:[%s7734_s14 + $0x188] ss:$16 sps:$4 sm:$0xff]  }
0x259c   :  { %v3521_v14 = vadd.f32 %v7254_v62, %v3505_v50  ;;  %v5954_v62 = vld [vmem:[%s7733_s13 + $0x144] ss:$16 sps:$4 sm:$0xff]   ;;  %v3570_v53 = vmul.f32 %v3563_v31, %v3555_v5 }
0x259d   :  { %v7408_v10 = vadd.f32 %v6286_v58, %v3520_v47  ;;  %3980 = vmatprep.subr.bf16.mxu0 %v5954_v62  ;;  %v5997_v62 = vld [vmem:[%s7734_s14 + $0x28] ss:$16 sps:$4 sm:$0xff]   ;;  %v6068_v5 = vld [vmem:[%s7734_s14 + $0x1a4] ss:$16 sps:$4 sm:$0xff]  }
0x259e   :  { %v7413_v52 = vadd.f32 %v6287_v61, %v3521_v14  ;;  %3981 = vmatpush1.bf16.msra.mxu0 %v5952_v56  ;;  %v6005_v56 = vld [vmem:[%s7734_s14 + $0x4c] ss:$16 sps:$4 sm:$0xff]  }
0x259f   :  { %v3529_v46 = vmul.f32 %v7408_v10, %v7408_v10  ;;  %3982 = vmatprep.subr.bf16.mxu0 %v5960_v2  ;;  %v6003_v2 = vld [vmem:[%s7734_s14 + $0x48] ss:$16 sps:$4 sm:$0xff]  }
0x25a0   :  { %v3530_v54 = vmul.f32 %v7413_v52, %v7413_v52 }
0x25a2   :  { %v3534_v33 = vadd.f32 %v3530_v54, %v3529_v46  ;;  %3983 = vmatpush1.bf16.msra.mxu0 %v5958_v17  ;;  %v5996_v46 = vld [vmem:[%s7734_s14 + $0x24] ss:$16 sps:$4 sm:$0xff]   ;;  %v5999_v54 = vld [vmem:[%s7734_s14 + $0x2c] ss:$16 sps:$4 sm:$0xff]  }
0x25a3   :  { %3984 = vmatprep.subr.bf16.mxu0 %v5966_v43  ;;  %v6011_v17 = vld [vmem:[%s7734_s14 + $0x6c] ss:$16 sps:$4 sm:$0xff]   ;;  %v6009_v43 = vld [vmem:[%s7734_s14 + $0x68] ss:$16 sps:$4 sm:$0xff]  }
0x25a4   :  { %3535 = vadd.xlane.f32.xlu0 %v3534_v33  ;;  %v5994_v33 = vld [vmem:[%s7734_s14 + $0x20] ss:$16 sps:$4 sm:$0xff]  }
0x25a6   :  { %3985 = vmatpush1.bf16.msra.mxu0 %v5964_v63  ;;  %v6017_v63 = vld [vmem:[%s7734_s14 + $0x8c] ss:$16 sps:$4 sm:$0xff]  }
0x25a7   :  { %3986 = vmatprep.subr.bf16.mxu0 %v5972_v4  ;;  %v6015_v4 = vld [vmem:[%s7734_s14 + $0x88] ss:$16 sps:$4 sm:$0xff]  }
0x25aa   :  { %3987 = vmatpush1.bf16.msra.mxu0 %v5970_v44  ;;  %v6023_v44 = vld [vmem:[%s7734_s14 + $0xac] ss:$16 sps:$4 sm:$0xff]  }
0x25ab   :  { %3988 = vmatprep.subr.bf16.mxu0 %v5978_v16  ;;  %v6026_v16 = vld [vmem:[%s7734_s14 + $0xc4] ss:$16 sps:$4 sm:$0xff]  }
0x25ae   :  { %3989 = vmatpush1.bf16.msra.mxu0 %v5976_v15  ;;  %v6021_v15 = vld [vmem:[%s7734_s14 + $0xa8] ss:$16 sps:$4 sm:$0xff]  }
0x25af   :  { %3990 = vmatprep.subr.bf16.mxu0 %v5984_v19  ;;  %v6027_v19 = vld [vmem:[%s7734_s14 + $0xc8] ss:$16 sps:$4 sm:$0xff]  }
0x25b2   :  { %3991 = vmatpush1.bf16.msra.mxu0 %v5982_v60  ;;  %v6035_v60 = vld [vmem:[%s7734_s14 + $0xec] ss:$16 sps:$4 sm:$0xff]  }
0x25b3   :  { %4430 = vmatprep.subr.bf16.mxu0 %v5990_v0  ;;  %v6033_v0 = vld [vmem:[%s7734_s14 + $0xe8] ss:$16 sps:$4 sm:$0xff]  }
0x2631   :  { %v3536_v23 = vpop.xlane.xlu0 %3535 }
0x2632   :  { %v3538_v39 = vmul.f32 0.00390625, %v3536_v23  ;;  %v6044_v23 = vld [vmem:[%s7734_s14 + $0x124] ss:$16 sps:$4 sm:$0xff]  }
0x2634   :  { %v3540_v35 = vadd.f32 1e-05, %v3538_v39  ;;  %v6047_v39 = vld [vmem:[%s7734_s14 + $0x12c] ss:$16 sps:$4 sm:$0xff]  }
0x2636   :  { %6250 = vrsqrt.f32 %v3540_v35  ;;  %vm3550_vm10 = vcmp.eq.f32.partialorder %v3540_v35, inf  ;;  %v3553_v49 = vand.u32 2147483648, %v3540_v35  ;;  %vm3552_vm11 = vcmp.eq.f32.partialorder %v3540_v35, 0.0 }
0x2640   :  { %v6251_v30 = vpop.eup %6250 }
0x2641   :  { %v3549_v59 = vmul.f32 %v6251_v30, %v3540_v35  ;;  %v6056_v30 = vld [vmem:[%s7734_s14 + $0x164] ss:$16 sps:$4 sm:$0xff]  }
0x2643   :  { %v3551_v24 = vsel %vm3550_vm10, %v3540_v35, %v3549_v59  ;;  %v6042_v35 = vld [vmem:[%s7734_s14 + $0x120] ss:$16 sps:$4 sm:$0xff]  }
0x2644   :  { %v3554_v36 = vsel %vm3552_vm11, %v3553_v49, %v3551_v24  ;;  %v6054_v59 = vld [vmem:[%s7734_s14 + $0x160] ss:$16 sps:$4 sm:$0xff]   ;;  %v6057_v49 = vld [vmem:[%s7734_s14 + $0x168] ss:$16 sps:$4 sm:$0xff]  }
0x2645   :  { %v3558_v6 = vmul.f32 %v3554_v36, %v7413_v52  ;;  %v3557_v50 = vmul.f32 %v3554_v36, %v7408_v10  ;;  %v6060_v24 = vld [vmem:[%s7734_s14 + $0x180] ss:$16 sps:$4 sm:$0xff]   ;;  %v6071_v36 = vld [vmem:[%s7734_s14 + $0x1ac] ss:$16 sps:$4 sm:$0xff]  }
0x2647   :  { %v3573_v47 = vmul.f32 %v3567_v29, %v3558_v6  ;;  %v3572_v14 = vmul.f32 %v3563_v31, %v3557_v50  ;;  %v6062_v29 = vld [vmem:[%s7734_s14 + $0x184] ss:$16 sps:$4 sm:$0xff]   ;;  %v6065_v31 = vld [vmem:[%s7734_s14 + $0x18c] ss:$16 sps:$4 sm:$0xff]   ;;  %v6066_v6 = vld [vmem:[%s7734_s14 + $0x1a0] ss:$16 sps:$4 sm:$0xff]  }
0x2648   :  { %v6069_v50 = vld [vmem:[%s7734_s14 + $0x1a8] ss:$16 sps:$4 sm:$0xff]  }
0x2649   :  { %v3575_v58 = vpack.c.bf16 %v3573_v47, %v3571_v42  ;;  %v7509_v61 = vpack.c.bf16 %v3572_v14, %v3570_v53  ;;  %v6074_v42 = vld [vmem:[%s7734_s14 + $0x1c4] ss:$16 sps:$4 sm:$0xff]   ;;  %v6077_v47 = vld [vmem:[%s7734_s14 + $0x1cc] ss:$16 sps:$4 sm:$0xff]   ;;  %v6072_v53 = vld [vmem:[%s7734_s14 + $0x1c0] ss:$16 sps:$4 sm:$0xff]  }
0x264a   :  { %v6075_v14 = vld [vmem:[%s7734_s14 + $0x1c8] ss:$16 sps:$4 sm:$0xff]  }
0x264b   :  { %3992 = vmatprep.mubr.bf16.mxu0 %v3575_v58  ;;  %4035 = vmatprep.mubr.bf16.mxu1 %v3575_v58 }
0x264c   :  { %3993 = vmatmul.mubr.bf16.vlgmr.msra.gmra.mrb[92].mxu0 %v7509_v61  ;;  %4036 = vmatmul.mubr.bf16.vlgmr.msra.gmra.mrb[112].mxu1 %v7509_v61 }
0x264d   :  { %4431 = vmatpush1.bf16.msra.mxu0 %v5988_v11  ;;  %4474 = vmatpush1.bf16.msra.mxu1 %v5991_v12  ;;  %v6083_v11 = vld [vmem:[%s7734_s14 + $0x1ec] ss:$16 sps:$4 sm:$0xff]   ;;  %v6078_v12 = vld [vmem:[%s7734_s14 + $0x1e0] ss:$16 sps:$4 sm:$0xff]  }
0x264e   :  { %4462 = vmatprep.mubr.bf16.mxu0 %v3575_v58  ;;  %4505 = vmatprep.mubr.bf16.mxu1 %v3575_v58  ;;  %v6080_v58 = vld [vmem:[%s7734_s14 + $0x1e4] ss:$16 sps:$4 sm:$0xff]  }
0x264f   :  { %4432 = vmatprep.subr.bf16.mxu0 %v5996_v46  ;;  %4475 = vmatprep.subr.bf16.mxu1 %v5999_v54  ;;  %v6081_v46 = vld [vmem:[%s7734_s14 + $0x1e8] ss:$16 sps:$4 sm:$0xff]  }
0x2650   :  { %v6086_v54 = vld [vmem:[#allocation13 + $0x4] ss:$8 sps:$4 sm:$0xff]  }
0x2651   :  { %4433 = vmatpush1.bf16.msra.mxu0 %v5994_v33  ;;  %4476 = vmatpush1.bf16.msra.mxu1 %v5997_v62  ;;  %v6084_v33 = vld [vmem:[#allocation13] ss:$8 sps:$4 sm:$0xff]   ;;  %v6089_v62 = vld [vmem:[#allocation13 + $0x14] ss:$8 sps:$4 sm:$0xff]  }
0x2652   :  { %4434 = vmatprep.subr.bf16.mxu0 %v6002_v34  ;;  %4477 = vmatprep.subr.bf16.mxu1 %v6005_v56  ;;  %v6087_v34 = vld [vmem:[#allocation13 + $0x10] ss:$8 sps:$4 sm:$0xff]   ;;  %v6092_v56 = vld [vmem:[#allocation13 + $0x24] ss:$8 sps:$4 sm:$0xff]  }
0x2655   :  { %4435 = vmatpush1.bf16.msra.mxu0 %v6000_v48  ;;  %4478 = vmatpush1.bf16.msra.mxu1 %v6003_v2  ;;  %v6090_v48 = vld [vmem:[#allocation13 + $0x20] ss:$8 sps:$4 sm:$0xff]   ;;  %v6095_v2 = vld [vmem:[#allocation13 + $0x34] ss:$8 sps:$4 sm:$0xff]  }
0x2656   :  { %4436 = vmatprep.subr.bf16.mxu0 %v6008_v9  ;;  %4479 = vmatprep.subr.bf16.mxu1 %v6011_v17  ;;  %v6093_v9 = vld [vmem:[#allocation13 + $0x30] ss:$8 sps:$4 sm:$0xff]   ;;  %v6098_v17 = vld [vmem:[#allocation13 + $0x44] ss:$8 sps:$4 sm:$0xff]  }
0x2659   :  { %4437 = vmatpush1.bf16.msra.mxu0 %v6006_v41  ;;  %4480 = vmatpush1.bf16.msra.mxu1 %v6009_v43  ;;  %v6096_v41 = vld [vmem:[#allocation13 + $0x40] ss:$8 sps:$4 sm:$0xff]   ;;  %v6099_v43 = vld [vmem:[#allocation13 + $0x50] ss:$8 sps:$4 sm:$0xff]  }
0x265a   :  { %4438 = vmatprep.subr.bf16.mxu0 %v6014_v13  ;;  %4481 = vmatprep.subr.bf16.mxu1 %v6017_v63  ;;  %v6104_v13 = vld [vmem:[#allocation13 + $0x64] ss:$8 sps:$4 sm:$0xff]   ;;  %v6102_v63 = vld [vmem:[#allocation13 + $0x60] ss:$8 sps:$4 sm:$0xff]  }
0x265d   :  { %4439 = vmatpush1.bf16.msra.mxu0 %v6012_v3  ;;  %4482 = vmatpush1.bf16.msra.mxu1 %v6015_v4  ;;  %v6107_v3 = vld [vmem:[#allocation13 + $0x74] ss:$8 sps:$4 sm:$0xff]   ;;  %v6105_v4 = vld [vmem:[#allocation13 + $0x70] ss:$8 sps:$4 sm:$0xff]  }
0x265e   :  { %4440 = vmatprep.subr.bf16.mxu0 %v6020_v7  ;;  %4483 = vmatprep.subr.bf16.mxu1 %v6023_v44  ;;  %v6110_v7 = vld [vmem:[#allocation13 + $0x84] ss:$8 sps:$4 sm:$0xff]   ;;  %v6108_v44 = vld [vmem:[#allocation13 + $0x80] ss:$8 sps:$4 sm:$0xff]  }
0x2661   :  { %4441 = vmatpush1.bf16.msra.mxu0 %v6018_v22  ;;  %4484 = vmatpush1.bf16.msra.mxu1 %v6021_v15  ;;  %v6113_v22 = vld [vmem:[#allocation13 + $0x94] ss:$8 sps:$4 sm:$0xff]   ;;  %v6111_v15 = vld [vmem:[#allocation13 + $0x90] ss:$8 sps:$4 sm:$0xff]  }
0x2662   :  { %4442 = vmatprep.subr.bf16.mxu0 %v6026_v16  ;;  %4485 = vmatprep.subr.bf16.mxu1 %v6029_v20  ;;  %v6116_v16 = vld [vmem:[#allocation13 + $0xa4] ss:$8 sps:$4 sm:$0xff]   ;;  %v6114_v20 = vld [vmem:[#allocation13 + $0xa0] ss:$8 sps:$4 sm:$0xff]  }
0x2665   :  { %4443 = vmatpush1.bf16.msra.mxu0 %v6024_v18  ;;  %4486 = vmatpush1.bf16.msra.mxu1 %v6027_v19  ;;  %v6119_v18 = vld [vmem:[#allocation13 + $0xb4] ss:$8 sps:$4 sm:$0xff]   ;;  %v6117_v19 = vld [vmem:[#allocation13 + $0xb0] ss:$8 sps:$4 sm:$0xff]  }
0x2666   :  { %4444 = vmatprep.subr.bf16.mxu0 %v6032_v8  ;;  %4487 = vmatprep.subr.bf16.mxu1 %v6035_v60  ;;  %v6122_v8 = vld [vmem:[#allocation13 + $0xc4] ss:$8 sps:$4 sm:$0xff]   ;;  %v6120_v60 = vld [vmem:[#allocation13 + $0xc0] ss:$8 sps:$4 sm:$0xff]  }
0x2669   :  { %4445 = vmatpush1.bf16.msra.mxu0 %v6030_v27  ;;  %4488 = vmatpush1.bf16.msra.mxu1 %v6033_v0  ;;  %v6125_v27 = vld [vmem:[#allocation13 + $0xd4] ss:$8 sps:$4 sm:$0xff]   ;;  %v6123_v0 = vld [vmem:[#allocation13 + $0xd0] ss:$8 sps:$4 sm:$0xff]  }
0x266a   :  { %4446 = vmatprep.subr.bf16.mxu0 %v6038_v1  ;;  %4489 = vmatprep.subr.bf16.mxu1 %v6041_v32  ;;  %v6126_v1 = vld [vmem:[#allocation13 + $0xe0] ss:$8 sps:$4 sm:$0xff]   ;;  %v6128_v32 = vld [vmem:[#allocation13 + $0xe4] ss:$8 sps:$4 sm:$0xff]  }
0x266d   :  { %4447 = vmatpush1.bf16.msra.mxu0 %v6036_v38  ;;  %4490 = vmatpush1.bf16.msra.mxu1 %v6039_v40  ;;  %v6131_v38 = vld [vmem:[#allocation13 + $0xf4] ss:$8 sps:$4 sm:$0xff]   ;;  %v6129_v40 = vld [vmem:[#allocation13 + $0xf0] ss:$8 sps:$4 sm:$0xff]  }
0x266e   :  { %4448 = vmatprep.subr.bf16.mxu0 %v6044_v23  ;;  %4491 = vmatprep.subr.bf16.mxu1 %v6047_v39  ;;  %v6134_v23 = vld [vmem:[#allocation13 + $0x104] ss:$8 sps:$4 sm:$0xff]  }
0x2671   :  { %4449 = vmatpush1.bf16.msra.mxu0 %v6042_v35  ;;  %4492 = vmatpush1.bf16.msra.mxu1 %v6045_v26 }
0x2672   :  { %4450 = vmatprep.subr.bf16.mxu0 %v6050_v55  ;;  %4493 = vmatprep.subr.bf16.mxu1 %v6053_v51 }
0x2675   :  { %4451 = vmatpush1.bf16.msra.mxu0 %v6048_v37  ;;  %4494 = vmatpush1.bf16.msra.mxu1 %v6051_v25 }
0x2676   :  { %4452 = vmatprep.subr.bf16.mxu0 %v6056_v30  ;;  %4495 = vmatprep.subr.bf16.mxu1 %v6059_v28 }
0x2679   :  { %4453 = vmatpush1.bf16.msra.mxu0 %v6054_v59  ;;  %4496 = vmatpush1.bf16.msra.mxu1 %v6057_v49 }
0x267a   :  { %4454 = vmatprep.subr.bf16.mxu0 %v6062_v29  ;;  %4497 = vmatprep.subr.bf16.mxu1 %v6065_v31 }
0x267d   :  { %4455 = vmatpush1.bf16.msra.mxu0 %v6060_v24  ;;  %4498 = vmatpush1.bf16.msra.mxu1 %v6063_v45 }
0x267e   :  { %4456 = vmatprep.subr.bf16.mxu0 %v6068_v5  ;;  %4499 = vmatprep.subr.bf16.mxu1 %v6071_v36 }
0x2681   :  { %4457 = vmatpush1.bf16.msra.mxu0 %v6066_v6  ;;  %4500 = vmatpush1.bf16.msra.mxu1 %v6069_v50 }
0x2682   :  { %4458 = vmatprep.subr.bf16.mxu0 %v6074_v42  ;;  %4501 = vmatprep.subr.bf16.mxu1 %v6077_v47 }
0x2685   :  { %4459 = vmatpush1.bf16.msra.mxu0 %v6072_v53  ;;  %4502 = vmatpush1.bf16.msra.mxu1 %v6075_v14 }
0x2686   :  { %4460 = vmatprep.subr.bf16.mxu0 %v6080_v58  ;;  %4503 = vmatprep.subr.bf16.mxu1 %v6083_v11 }
0x2689   :  { %4461 = vmatpush1.bf16.msra.mxu0 %v6078_v12  ;;  %4504 = vmatpush1.bf16.msra.mxu1 %v6081_v46 }
0x268a   :  { %4968 = vmatprep.subr.bf16.mxu0 %v6086_v54 }
0x268c   :  { %4463 = vmatmul.mubr.bf16.vlgmr.msra.gmra.mrb[96].mxu0 %v7509_v61  ;;  %4506 = vmatmul.mubr.bf16.vlgmr.msra.gmra.mrb[116].mxu1 %v7509_v61  ;;  %v6101_v61 = vld [vmem:[#allocation13 + $0x54] ss:$8 sps:$4 sm:$0xff]  }
0x268d   :  { %4969 = vmatpush1.bf16.msra.mxu0 %v6084_v33 }
0x268e   :  { %4970 = vmatprep.subr.bf16.mxu0 %v6089_v62 }
0x2691   :  { %4971 = vmatpush1.bf16.msra.mxu0 %v6087_v34 }
0x2692   :  { %4972 = vmatprep.subr.bf16.mxu0 %v6092_v56 }
0x2695   :  { %4973 = vmatpush1.bf16.msra.mxu0 %v6090_v48 }
0x2696   :  { %4974 = vmatprep.subr.bf16.mxu0 %v6095_v2 }
0x2699   :  { %4975 = vmatpush1.bf16.msra.mxu0 %v6093_v9 }
0x269a   :  { %4976 = vmatprep.subr.bf16.mxu0 %v6098_v17 }
0x269d   :  { %4977 = vmatpush1.bf16.msra.mxu0 %v6096_v41 }
0x269e   :  { %4978 = vmatprep.subr.bf16.mxu0 %v6101_v61 }
0x26a1   :  { %4979 = vmatpush1.bf16.msra.mxu0 %v6099_v43 }
0x26a2   :  { %4980 = vmatprep.subr.bf16.mxu0 %v6104_v13 }
0x26a5   :  { %4981 = vmatpush1.bf16.msra.mxu0 %v6102_v63 }
0x26a6   :  { %4982 = vmatprep.subr.bf16.mxu0 %v6107_v3 }
0x26a9   :  { %4983 = vmatpush1.bf16.msra.mxu0 %v6105_v4 }
0x26aa   :  { %4984 = vmatprep.subr.bf16.mxu0 %v6110_v7 }
0x26ad   :  { %4985 = vmatpush1.bf16.msra.mxu0 %v6108_v44 }
0x26ae   :  { %4986 = vmatprep.subr.bf16.mxu0 %v6113_v22 }
0x26b1   :  { %4987 = vmatpush1.bf16.msra.mxu0 %v6111_v15 }
0x26b2   :  { %4988 = vmatprep.subr.bf16.mxu0 %v6116_v16 }
0x26b5   :  { %4989 = vmatpush1.bf16.msra.mxu0 %v6114_v20 }
0x26b6   :  { %4990 = vmatprep.subr.bf16.mxu0 %v6119_v18 }
0x26b9   :  { %4991 = vmatpush1.bf16.msra.mxu0 %v6117_v19 }
0x26ba   :  { %4992 = vmatprep.subr.bf16.mxu0 %v6122_v8 }
0x26bd   :  { %4993 = vmatpush1.bf16.msra.mxu0 %v6120_v60 }
0x26be   :  { %4994 = vmatprep.subr.bf16.mxu0 %v6125_v27 }
0x26c1   :  { %4995 = vmatpush1.bf16.msra.mxu0 %v6123_v0 }
0x26c2   :  { %4996 = vmatprep.subr.bf16.mxu0 %v6128_v32 }
0x26c5   :  { %4997 = vmatpush1.bf16.msra.mxu0 %v6126_v1 }
0x26c6   :  { %4998 = vmatprep.subr.bf16.mxu0 %v6131_v38 }
0x26c9   :  { %4999 = vmatpush1.bf16.msra.mxu0 %v6129_v40 }
0x26ca   :  { %5011 = vmatprep.subr.bf16.mxu0 %v6134_v23 }
0x271f   :  { %v3994_v39 = vpop.f32.mrb[92].mxu0  ;;  %v4037_v35 = vpop.f32.mrb[112].mxu1 }
0x2720   :  { %v3996_v26 = vpop.f32.mrb[93].mxu0  ;;  %v4039_v55 = vpop.f32.mrb[113].mxu1  ;;  %v5360_v28 = vmul.f32 -1.442695, %v3994_v39  ;;  %v5362_v59 = vmul.f32 -1.442695, %v4037_v35 }
0x2721   :  { %v3998_v51 = vpop.f32.mrb[94].mxu0  ;;  %v4041_v37 = vpop.f32.mrb[114].mxu1  ;;  %v5361_v49 = vmul.f32 -1.442695, %v3996_v26  ;;  %v5363_v29 = vmul.f32 -1.442695, %v4039_v55 }
0x2722   :  { %v4000_v25 = vpop.f32.mrb[95].mxu0  ;;  %v4043_v30 = vpop.f32.mrb[115].mxu1  ;;  %6252 = vpow2.f32 %v5360_v28  ;;  %v5364_v31 = vmul.f32 -1.442695, %v3998_v51  ;;  %v5366_v24 = vmul.f32 -1.442695, %v4041_v37 }
0x2723   :  { %6254 = vpow2.f32 %v5362_v59  ;;  %v5365_v45 = vmul.f32 -1.442695, %v4000_v25  ;;  %v5367_v5 = vmul.f32 -1.442695, %v4043_v30 }
0x2724   :  { %6256 = vpow2.f32 %v5361_v49  ;;  %v6132_v49 = vld [vmem:[#allocation13 + $0x100] ss:$8 sps:$4 sm:$0xff]  }
0x2725   :  { %6258 = vpow2.f32 %v5363_v29  ;;  %v6140_v29 = vld [vmem:[#allocation13 + $0x124] ss:$8 sps:$4 sm:$0xff]  }
0x2726   :  { %6260 = vpow2.f32 %v5364_v31  ;;  %v6138_v31 = vld [vmem:[#allocation13 + $0x120] ss:$8 sps:$4 sm:$0xff]  }
0x2727   :  { %6262 = vpow2.f32 %v5366_v24  ;;  %v6143_v24 = vld [vmem:[#allocation13 + $0x134] ss:$8 sps:$4 sm:$0xff]  }
0x2728   :  { %6264 = vpow2.f32 %v5365_v45  ;;  %v6141_v45 = vld [vmem:[#allocation13 + $0x130] ss:$8 sps:$4 sm:$0xff]  }
0x2729   :  { %6266 = vpow2.f32 %v5367_v5  ;;  %v6146_v5 = vld [vmem:[#allocation13 + $0x144] ss:$8 sps:$4 sm:$0xff]  }
0x272c   :  { %v6253_v36 = vpop.eup %6252 }
0x272d   :  { %v6255_v6 = vpop.eup %6254  ;;  %v4540_v47 = vadd.f32 1.0, %v6253_v36  ;;  %v6144_v36 = vld [vmem:[#allocation13 + $0x140] ss:$8 sps:$4 sm:$0xff]  }
0x272e   :  { %v6257_v50 = vpop.eup %6256  ;;  %v4542_v14 = vadd.f32 1.0, %v6255_v6  ;;  %v6149_v6 = vld [vmem:[#allocation13 + $0x154] ss:$8 sps:$4 sm:$0xff]  }
0x272f   :  { %v6259_v42 = vpop.eup %6258  ;;  %v4541_v11 = vadd.f32 1.0, %v6257_v50  ;;  %6268 = vrcp.f32 %v4540_v47  ;;  %v6147_v50 = vld [vmem:[#allocation13 + $0x150] ss:$8 sps:$4 sm:$0xff]   ;;  %v6150_v47 = vld [vmem:[#allocation13 + $0x160] ss:$8 sps:$4 sm:$0xff]  }
0x2730   :  { %v6261_v53 = vpop.eup %6260  ;;  %v4543_v46 = vadd.f32 1.0, %v6259_v42  ;;  %6270 = vrcp.f32 %v4542_v14  ;;  %v6152_v42 = vld [vmem:[#allocation13 + $0x164] ss:$8 sps:$4 sm:$0xff]   ;;  %v6153_v14 = vld [vmem:[#allocation13 + $0x170] ss:$8 sps:$4 sm:$0xff]  }
0x2731   :  { %v6263_v58 = vpop.eup %6262  ;;  %v4544_v33 = vadd.f32 1.0, %v6261_v53  ;;  %6272 = vrcp.f32 %v4541_v11  ;;  %v6155_v53 = vld [vmem:[#allocation13 + $0x174] ss:$8 sps:$4 sm:$0xff]   ;;  %v6156_v11 = vld [vmem:[#allocation13 + $0x180] ss:$8 sps:$4 sm:$0xff]  }
0x2732   :  { %v6265_v12 = vpop.eup %6264  ;;  %v4546_v62 = vadd.f32 1.0, %v6263_v58  ;;  %6274 = vrcp.f32 %v4543_v46  ;;  %v6158_v58 = vld [vmem:[#allocation13 + $0x184] ss:$8 sps:$4 sm:$0xff]   ;;  %v6159_v46 = vld [vmem:[#allocation13 + $0x190] ss:$8 sps:$4 sm:$0xff]  }
0x2733   :  { %v6267_v54 = vpop.eup %6266  ;;  %v4545_v34 = vadd.f32 1.0, %v6265_v12  ;;  %6276 = vrcp.f32 %v4544_v33  ;;  %v6161_v12 = vld [vmem:[#allocation13 + $0x194] ss:$8 sps:$4 sm:$0xff]   ;;  %v6162_v33 = vld [vmem:[#allocation13 + $0x1a0] ss:$8 sps:$4 sm:$0xff]  }
0x2734   :  { %v4547_v56 = vadd.f32 1.0, %v6267_v54  ;;  %6278 = vrcp.f32 %v4546_v62  ;;  %v6164_v54 = vld [vmem:[#allocation13 + $0x1a4] ss:$8 sps:$4 sm:$0xff]   ;;  %v6167_v62 = vld [vmem:[#allocation13 + $0x1b4] ss:$8 sps:$4 sm:$0xff]  }
0x2735   :  { %6280 = vrcp.f32 %v4545_v34  ;;  %v6165_v34 = vld [vmem:[#allocation13 + $0x1b0] ss:$8 sps:$4 sm:$0xff]  }
0x2736   :  { %6282 = vrcp.f32 %v4547_v56  ;;  %v6170_v56 = vld [vmem:[#allocation13 + $0x1c4] ss:$8 sps:$4 sm:$0xff]  }
0x2739   :  { %v6269_v48 = vpop.eup %6268 }
0x273a   :  { %v6271_v2 = vpop.eup %6270  ;;  %v4564_v63 = vmul.f32 %v6269_v48, %v3994_v39  ;;  %v6168_v48 = vld [vmem:[#allocation13 + $0x1c0] ss:$8 sps:$4 sm:$0xff]  }
0x273b   :  { %v6273_v9 = vpop.eup %6272  ;;  %v4566_v3 = vmul.f32 %v6271_v2, %v4037_v35  ;;  %v6173_v2 = vld [vmem:[#allocation13 + $0x1d4] ss:$8 sps:$4 sm:$0xff]  }
0x273c   :  { %v6275_v17 = vpop.eup %6274  ;;  %v4565_v4 = vmul.f32 %v6273_v9, %v3996_v26  ;;  %v6171_v9 = vld [vmem:[#allocation13 + $0x1d0] ss:$8 sps:$4 sm:$0xff]  }
0x273d   :  { %v6277_v41 = vpop.eup %6276  ;;  %v4567_v7 = vmul.f32 %v6275_v17, %v4039_v55  ;;  %v6176_v17 = vld [vmem:[#allocation13 + $0x1e4] ss:$8 sps:$4 sm:$0xff]  }
0x273e   :  { %v6279_v61 = vpop.eup %6278  ;;  %v4568_v15 = vmul.f32 %v6277_v41, %v3998_v51  ;;  %v6174_v41 = vld [vmem:[#allocation13 + $0x1e0] ss:$8 sps:$4 sm:$0xff]  }
0x273f   :  { %v6281_v43 = vpop.eup %6280  ;;  %v4570_v16 = vmul.f32 %v6279_v61, %v4041_v37  ;;  %v6179_v61 = vld [vmem:[#allocation13 + $0x1f4] ss:$8 sps:$4 sm:$0xff]  }
0x2740   :  { %v6283_v13 = vpop.eup %6282  ;;  %v4569_v60 = vmul.f32 %v6281_v43, %v4000_v25  ;;  %v6137_v25 = vld [vmem:[#allocation13 + $0x114] ss:$8 sps:$4 sm:$0xff]   ;;  %v6177_v43 = vld [vmem:[#allocation13 + $0x1f0] ss:$8 sps:$4 sm:$0xff]  }
0x2741   :  { %v4571_v27 = vmul.f32 %v6283_v13, %v4043_v30  ;;  %v6135_v30 = vld [vmem:[#allocation13 + $0x110] ss:$8 sps:$4 sm:$0xff]  }
0x275f   :  { %v4464_v44 = vpop.f32.mrb[96].mxu0  ;;  %v4507_v22 = vpop.f32.mrb[116].mxu1 }
0x2760   :  { %v4572_v20 = vmul.f32 %v4564_v63, %v4464_v44  ;;  %v7695_v18 = vmul.f32 %v4566_v3, %v4507_v22  ;;  %v4466_v19 = vpop.f32.mrb[97].mxu0  ;;  %v4509_v8 = vpop.f32.mrb[117].mxu1 }
0x2761   :  { %v4573_v0 = vmul.f32 %v4565_v4, %v4466_v19  ;;  %v4575_v1 = vmul.f32 %v4567_v7, %v4509_v8  ;;  %v4468_v32 = vpop.f32.mrb[98].mxu0  ;;  %v4511_v38 = vpop.f32.mrb[118].mxu1 }
0x2762   :  { %v4576_v40 = vmul.f32 %v4568_v15, %v4468_v32  ;;  %v7697_v23 = vmul.f32 %v4570_v16, %v4511_v38  ;;  %v4470_v39 = vpop.f32.mrb[99].mxu0  ;;  %v4513_v35 = vpop.f32.mrb[119].mxu1 }
0x2763   :  { %v4577_v26 = vmul.f32 %v4569_v60, %v4470_v39  ;;  %v4579_v55 = vmul.f32 %v4571_v27, %v4513_v35 }
0x2764   :  { %v4580_v51 = vpack.c.bf16 %v4576_v40, %v4572_v20  ;;  %v4582_v37 = vpack.c.bf16 %v7697_v23, %v7695_v18 }
0x2765   :  { %v4581_v28 = vpack.c.bf16 %v4577_v26, %v4573_v0  ;;  %v4583_v59 = vpack.c.bf16 %v4579_v55, %v4575_v1 }
0x2767   :  { %5000 = vmatprep.mubr.bf16.mxu0 %v4581_v28 }
0x2768   :  { %5001 = vmatmul.mubr.bf16.vlgmr.msra.gmra.mrb[100].mxu0 %v4580_v51 }
0x2769   :  { %5012 = vmatpush1.bf16.msra.mxu0 %v6132_v49  ;;  %5043 = vmatprep.mubr.bf16.mxu0 %v4583_v59 }
0x276a   :  { %5013 = vmatprep.subr.bf16.mxu0 %v6137_v25 }
0x276d   :  { %5014 = vmatpush1.bf16.msra.mxu0 %v6135_v30 }
0x276e   :  { %5015 = vmatprep.subr.bf16.mxu0 %v6140_v29 }
0x2771   :  { %5016 = vmatpush1.bf16.msra.mxu0 %v6138_v31 }
0x2772   :  { %5017 = vmatprep.subr.bf16.mxu0 %v6143_v24 }
0x2775   :  { %5018 = vmatpush1.bf16.msra.mxu0 %v6141_v45 }
0x2776   :  { %5019 = vmatprep.subr.bf16.mxu0 %v6146_v5 }
0x2779   :  { %5020 = vmatpush1.bf16.msra.mxu0 %v6144_v36 }
0x277a   :  { %5021 = vmatprep.subr.bf16.mxu0 %v6149_v6 }
0x277d   :  { %5022 = vmatpush1.bf16.msra.mxu0 %v6147_v50 }
0x277e   :  { %5023 = vmatprep.subr.bf16.mxu0 %v6152_v42 }
0x2781   :  { %5024 = vmatpush1.bf16.msra.mxu0 %v6150_v47 }
0x2782   :  { %5025 = vmatprep.subr.bf16.mxu0 %v6155_v53 }
0x2785   :  { %5026 = vmatpush1.bf16.msra.mxu0 %v6153_v14 }
0x2786   :  { %5027 = vmatprep.subr.bf16.mxu0 %v6158_v58 }
0x2789   :  { %5028 = vmatpush1.bf16.msra.mxu0 %v6156_v11 }
0x278a   :  { %5029 = vmatprep.subr.bf16.mxu0 %v6161_v12 }
0x278d   :  { %5030 = vmatpush1.bf16.msra.mxu0 %v6159_v46 }
0x278e   :  { %5031 = vmatprep.subr.bf16.mxu0 %v6164_v54 }
0x2791   :  { %5032 = vmatpush1.bf16.msra.mxu0 %v6162_v33 }
0x2792   :  { %5033 = vmatprep.subr.bf16.mxu0 %v6167_v62 }
0x2795   :  { %5034 = vmatpush1.bf16.msra.mxu0 %v6165_v34 }
0x2796   :  { %5035 = vmatprep.subr.bf16.mxu0 %v6170_v56 }
0x2799   :  { %5036 = vmatpush1.bf16.msra.mxu0 %v6168_v48 }
0x279a   :  { %5037 = vmatprep.subr.bf16.mxu0 %v6173_v2 }
0x279d   :  { %5038 = vmatpush1.bf16.msra.mxu0 %v6171_v9 }
0x279e   :  { %5039 = vmatprep.subr.bf16.mxu0 %v6176_v17 }
0x27a1   :  { %5040 = vmatpush1.bf16.msra.mxu0 %v6174_v41 }
0x27a2   :  { %5041 = vmatprep.subr.bf16.mxu0 %v6179_v61 }
0x27a5   :  { %5042 = vmatpush1.bf16.msra.mxu0 %v6177_v43 }
0x27a8   :  { %5044 = vmatmul.mubr.bf16.vlgmr.msra.gmra.mrb[100].mxu0 %v4582_v37 }
0x287b   :  { %v5045_v13 = vpop.f32.mrb[100].mxu0 }
0x287c   :  { %v5054_v63 = vadd.f32 %v5045_v13, %v7263_v57  ;;  %v5047_v3 = vpop.f32.mrb[101].mxu0 }
0x287d   :  { %v5055_v4 = vadd.f32 %v5047_v3, %v7268_v21  ;;  %v5049_v7 = vpop.f32.mrb[102].mxu0 }
0x287e   :  { %5058 = vst [vmem:[%s7742_s11] sm:$0xff] %v5054_v63  ;;  %v5056_v44 = vadd.f32 %v5049_v7, %v7408_v10  ;;  %v5051_v22 = vpop.f32.mrb[103].mxu0 }
0x287f   :  { %5059 = vst [vmem:[%s7742_s11 + $0x8] sm:$0xff] %v5055_v4  ;;  %v5057_v15 = vadd.f32 %v5051_v22, %v7413_v52 }
0x2880   :  { %5060 = vst [vmem:[%s7742_s11 + $0x10] sm:$0xff] %v5056_v44 }
0x2881   :  { %5061 = vst [vmem:[%s7742_s11 + $0x18] sm:$0xff] %v5057_v15 }
0x2882   :  { %5066 = vsyncpa [#allocation3], 1 }
0x2883   :  { %5067 = vsyncpa [#allocation5], 1 }
0x2884   :  { %5068 = vsyncpa [#allocation8], 1 }
0x2885   :  { %5069 = vsyncpa [#allocation11], 1 }
0x2886   :  { %5070 = vsyncpa [#allocation14], 1 }

</bundles_post_ra>
